<compile_context>
chip_gen: v7x
topology: tpu7x:2x2x1
jax: 0.10.0
libtpu: 0.0.40
codegen_flags: <defaults>
</compile_context>

<pallas_src>
import functools

import jax
import jax.numpy as jnp
from jax import lax
from jax.experimental import pallas as pl
from jax.experimental.pallas import tpu as pltpu

C = 512                       # channels, fixed by the module (Conv1d(512, 512, ...))
TN = 256                      # output-channel half processed per inner iteration
HALO = 8                      # halo rows per side (>= max conv padding 3, 8-aligned DMA)
KTOT = 3 + 5 + 7              # total taps over the three convs
_CONVS = ((3, 1), (5, 2), (7, 3))   # (kernel_size, padding) per conv


def timeconv_kernel(x_hbm, w_ref, b_ref, o_ref, xbuf, xbf, sem, *, nt_chunk, nt_total):
    # x_hbm : (B, T_pad, C) f32 in HBM (pl.ANY) -- halo'd windows DMA'd manually
    # w_ref : (KTOT, C, C) bf16  -- resident for the whole grid (constant index_map)
    # b_ref : (3, 1, C)   f32    -- resident
    # o_ref : (1, TM, C)  f32 output tile
    # xbuf  : (2, TM + 2*HALO, C) f32 double-buffered halo'd x window
    # xbf   : (TM + 2*HALO, C) bf16 cast of the current window (MXU LHS)
    # sem   : (2, 3) DMA semaphores  (slot x {body, left-halo, right-halo})
    c_i = pl.program_id(0)
    b_i = pl.program_id(1)
    t_i = pl.program_id(2)
    gt = c_i * nt_chunk + t_i            # global time-tile index

    TM = o_ref.shape[1]
    TMH = xbuf.shape[1]
    CW = xbuf.shape[2]

    def copies(g, slot):
        row0 = pl.multiple_of(g * TM, 8)
        body = lambda: pltpu.make_async_copy(
            x_hbm.at[b_i, pl.ds(row0, TM), :],
            xbuf.at[slot, pl.ds(HALO, TM), :], sem.at[slot, 0])
        left = lambda: pltpu.make_async_copy(
            x_hbm.at[b_i, pl.ds(row0 - HALO, HALO), :],
            xbuf.at[slot, pl.ds(0, HALO), :], sem.at[slot, 1])
        right = lambda: pltpu.make_async_copy(
            x_hbm.at[b_i, pl.ds(row0 + TM, HALO), :],
            xbuf.at[slot, pl.ds(HALO + TM, HALO), :], sem.at[slot, 2])
        return body, left, right, g > 0, g < nt_total - 1

    def start_window(g, slot):
        body, left, right, has_l, has_r = copies(g, slot)
        body().start()

        @pl.when(has_l)                  # left halo exists only for g > 0
        def _():
            left().start()

        @pl.when(has_r)                  # right halo exists only before the last tile
        def _():
            right().start()

    def wait_window(g, slot):
        body, left, right, has_l, has_r = copies(g, slot)
        body().wait()

        @pl.when(has_l)
        def _():
            left().wait()

        @pl.when(has_r)
        def _():
            right().wait()

    slot = t_i % 2

    # NOTE: the prime keys on t_i == 0; correct because the time-tile axis is
    # "arbitrary" (sequential per core) and each chunk/batch restarts t at 0.
    @pl.when(t_i == 0)
    def _prime():
        start_window(gt, slot)

    wait_window(gt, slot)

    @pl.when(t_i + 1 < nt_chunk)
    def _prefetch():                     # overlap next window's DMA with this step
        start_window(gt + 1, 1 - slot)

    # Conv zero-padding: zero the halo rows that fall outside [0, T_pad).
    # gt == 0 implies t_i == 0 -> slot 0; the last global tile's slot is static too.
    @pl.when(gt == 0)
    def _zero_left():
        xbuf[0, pl.ds(0, HALO), :] = jnp.zeros((HALO, CW), jnp.float32)

    slot_last = (nt_chunk - 1) % 2

    @pl.when(gt == nt_total - 1)
    def _zero_right():
        xbuf[slot_last, pl.ds(HALO + TM, HALO), :] = jnp.zeros((HALO, CW), jnp.float32)

    # Single bf16 cast of the window for the MXU LHS (chunked to bound vreg pressure).
    step = 16 if TMH % 16 == 0 else 8
    for r0 in range(0, TMH, step):
        xbf[pl.ds(r0, step), :] = xbuf[slot, pl.ds(r0, step), :].astype(jnp.bfloat16)

    # Full 512-wide output block; loop over two 256-wide halves to cap live f32 state.
    for lo in range(0, C, TN):
        # identity + shifted-max branch in exact f32: max(x[t], x[t-1]), x[-1] = 0
        x_id = xbuf[slot, pl.ds(HALO, TM), lo:lo + TN]
        x_m1 = xbuf[slot, pl.ds(HALO - 1, TM), lo:lo + TN]
        out = jnp.maximum(x_id, x_m1)

        # Three Conv1d branches as shifted (TM,512)@(512,256) MXU matmuls, folded into
        # a running max so only `out` + one accumulator stay live.
        tap = 0
        for cv, (k, p) in enumerate(_CONVS):
            acc = None
            for j in range(k):           # static unroll over taps
                s = HALO - p + j         # shifted window start inside the halo'd tile
                contrib = jnp.dot(xbf[pl.ds(s, TM), :],
                                  w_ref[tap, :, lo:lo + TN],
                                  preferred_element_type=jnp.float32)
                acc = contrib if acc is None else acc + contrib
                tap += 1
            out = jnp.maximum(out, acc + b_ref[cv, :, lo:lo + TN])

        o_ref[0, :, lo:lo + TN] = out.astype(o_ref.dtype)


def _round_up(v, m):
    return (v + m - 1) // m * m


def prepare_params(w1, b1, w2, b2, w3, b3):
    """One-time prep: PyTorch Conv1d weights (Cout, Cin, k) -> taps-major (k, Cin, Cout),
    concatenated over the three convs, cast to bf16; biases stacked as (3, 1, C) f32."""
    wcat = jnp.concatenate(
        [jnp.transpose(w, (2, 1, 0)) for w in (w1, w2, w3)], axis=0
    ).astype(jnp.bfloat16)                                    # (KTOT, C, C)
    bcat = jnp.stack([b1, b2, b3], axis=0).reshape(3, 1, C).astype(jnp.float32)
    return wcat, bcat


@functools.partial(jax.jit, static_argnames=("tm_max",))
def timeconv_forward(x, wcat, bcat, *, tm_max=128):
    """x: (B, T, 512) f32. wcat: (15, 512, 512) bf16. bcat: (3, 1, 512) f32."""
    B, T, Cin = x.shape
    assert Cin == C
    x = x.astype(jnp.float32)

    TM = min(_round_up(tm_max, 8), _round_up(T, 8))      # time tile (multiple of 8)
    # When B == 1, split time into two parallel super-chunks so both v7x cores are fed.
    n_chunks = 2 if (B == 1 and _round_up(T, TM) >= 2 * TM) else 1
    T_pad = _round_up(T, TM * n_chunks)
    nt_total = T_pad // TM
    nt_chunk = nt_total // n_chunks
    TMH = TM + 2 * HALO

    # pad/cast pre-pass is fused into the kernel; only a tail pad remains, and only
    # when T is not already a multiple of the tile extent.
    if T_pad != T:
        x = jnp.pad(x, ((0, 0), (0, T_pad - T), (0, 0)))

    grid = (n_chunks, B, nt_chunk)

    vmem_need = (2 * KTOT * C * C * 2        # (double-buffered) bf16 weight block
                 + 2 * 3 * 8 * C * 4         # biases (sublane padded)
                 + 2 * TM * C * 4            # double-buffered f32 output tile
                 + 2 * TMH * C * 4           # manual f32 x double buffer
                 + TMH * C * 2)              # bf16 LHS window
    vmem_limit = int(min(48 << 20, vmem_need + (16 << 20)))   # 48 MiB cap: v7x headroom

    kernel = functools.partial(timeconv_kernel, nt_chunk=nt_chunk, nt_total=nt_total)

    out = pl.pallas_call(
        kernel,
        out_shape=jax.ShapeDtypeStruct((B, T_pad, C), jnp.float32),
        grid_spec=pltpu.PrefetchScalarGridSpec(
            num_scalar_prefetch=0,
            grid=grid,
            in_specs=[
                pl.BlockSpec(memory_space=pl.ANY),                      # x stays in HBM
                pl.BlockSpec((KTOT, C, C), lambda c, b, t: (0, 0, 0)),  # resident weights
                pl.BlockSpec((3, 1, C), lambda c, b, t: (0, 0, 0)),     # resident biases
            ],
            out_specs=pl.BlockSpec((1, TM, C),
                                   lambda c, b, t: (b, c * nt_chunk + t, 0)),
            scratch_shapes=[
                pltpu.VMEM((2, TMH, C), jnp.float32),
                pltpu.VMEM((TMH, C), jnp.bfloat16),
                pltpu.SemaphoreType.DMA((2, 3)),
            ]),
        compiler_params=pltpu.CompilerParams(
            dimension_semantics=("parallel", "parallel", "arbitrary"),
            vmem_limit_bytes=vmem_limit),
    )(x, wcat, bcat)
    return out[:, :T, :]


def ref_forward(x, w1, b1, w2, b2, w3, b3):
    """Pure-JAX reference mirroring the PyTorch module (NCW conv layout), f32."""
    xc = jnp.transpose(x, (0, 2, 1))  # (B, C, T)

    def conv1d(xc, w, b, pad):
        out = lax.conv_general_dilated(
            xc, w, window_strides=(1,), padding=[(pad, pad)],
            dimension_numbers=("NCH", "OIH", "NCH"))
        return out + b[None, :, None]

    x1 = conv1d(xc, w1, b1, 1)
    x2 = conv1d(xc, w2, b2, 2)
    x3 = conv1d(xc, w3, b3, 3)
    xl = jnp.pad(xc, ((0, 0), (0, 0), (1, 0)))
    x4 = jnp.maximum(xl[:, :, :-1], xl[:, :, 1:])
    y = jnp.maximum(jnp.maximum(xc, x1),
                    jnp.maximum(jnp.maximum(x2, x3), x4))
    return jnp.transpose(y, (0, 2, 1))


def init_conv_params(key, k):
    """Deterministic init matching PyTorch Conv1d default (uniform +-1/sqrt(fan_in))."""
    kw, kb = jax.random.split(key)
    fan_in = C * k
    bound = 1.0 / (fan_in ** 0.5)
    w = jax.random.uniform(kw, (C, C, k), jnp.float32, -bound, bound)
    b = jax.random.uniform(kb, (C,), jnp.float32, -bound, bound)
    return w, b


if __name__ == "__main__":
    root = jax.random.PRNGKey(0)
    kx, k1, k2, k3, kx2 = jax.random.split(root, 5)

    w1, b1 = init_conv_params(k1, 3)
    w2, b2 = init_conv_params(k2, 5)
    w3, b3 = init_conv_params(k3, 7)
    wcat, bcat = prepare_params(w1, b1, w2, b2, w3, b3)

    # Case 1: single time tile, B=2 (no wrapper padding at all).
    B, T = 2, 16
    x = jax.random.normal(kx, (B, T, C), jnp.float32)
    out = jax.block_until_ready(timeconv_forward(x, wcat, bcat))
    ref = ref_forward(x, w1, b1, w2, b2, w3, b3)
    assert out.shape == (B, T, C), out.shape
    err = float(jnp.max(jnp.abs(out - ref)))
    assert jnp.allclose(out, ref, rtol=2e-2, atol=2e-2), err

    # Case 2: multi-tile path (prefetch, boundary halos, B==1 chunk split, tail pad).
    B2, T2 = 1, 20
    x2 = jax.random.normal(kx2, (B2, T2, C), jnp.float32)
    out2 = jax.block_until_ready(timeconv_forward(x2, wcat, bcat, tm_max=8))
    ref2 = ref_forward(x2, w1, b1, w2, b2, w3, b3)
    assert out2.shape == (B2, T2, C), out2.shape
    err2 = float(jnp.max(jnp.abs(out2 - ref2)))
    assert jnp.allclose(out2, ref2, rtol=2e-2, atol=2e-2), err2

    print("KERNEL_OK")
</pallas_src>

<mosaic_0001>
module attributes {stable_mosaic.version = 11 : i64} {
  func.func @timeconv_kernel(%arg0: i32, %arg1: i32, %arg2: i32, %arg3: memref<2x16x512xf32, #tpu.memory_space<any>>, %arg4: memref<15x512x512xbf16, #tpu.memory_space<vmem>>, %arg5: memref<3x1x512xf32, #tpu.memory_space<vmem>>, %arg6: memref<1x16x512xf32, #tpu.memory_space<vmem>>, %arg7: memref<2x32x512xf32, #tpu.memory_space<vmem>>, %arg8: memref<32x512xbf16, #tpu.memory_space<vmem>>, %arg9: memref<2x3x!tpu.dma_semaphore, #tpu.memory_space<semaphore_mem>>) attributes {dimension_semantics = [#tpu.dimension_semantics<parallel>, #tpu.dimension_semantics<parallel>, #tpu.dimension_semantics<arbitrary>], iteration_bounds = array<i64: 1, 2, 1>, scalar_prefetch = 0 : i64, scratch_operands = 3 : i64, tpu.core_type = #tpu.core_type<tc>, window_params = [{}, {pipeline_mode = #tpu.pipeline_mode<synchronous>, transform_indices = @transform_1, window_bounds = array<i64: 15, 512, 512>}, {pipeline_mode = #tpu.pipeline_mode<synchronous>, transform_indices = @transform_2, window_bounds = array<i64: 3, 1, 512>}, {transform_indices = @transform_3, window_bounds = array<i64: 1, 16, 512>}]} {
    %c1_i32 = arith.constant 1 : i32
    %0 = arith.muli %arg0, %c1_i32 : i32
    %1 = arith.addi %0, %arg2 : i32
    %c2_i32 = arith.constant 2 : i32
    %c0_i32 = arith.constant 0 : i32
    %2 = arith.cmpi eq, %c2_i32, %c0_i32 : i32
    %c1_i32_0 = arith.constant 1 : i32
    %3 = arith.select %2, %c1_i32_0, %c2_i32 : i32
    %4 = arith.remsi %arg2, %3 : i32
    %c0_i32_1 = arith.constant 0 : i32
    %5 = arith.cmpi ne, %4, %c0_i32_1 : i32
    %c0_i32_2 = arith.constant 0 : i32
    %6 = arith.cmpi slt, %4, %c0_i32_2 : i32
    %c0_i32_3 = arith.constant 0 : i32
    %7 = arith.cmpi slt, %3, %c0_i32_3 : i32
    %8 = arith.xori %6, %7 : i1
    %9 = arith.andi %8, %5 : i1
    %10 = arith.addi %4, %3 : i32
    %11 = arith.select %9, %10, %4 : i32
    %c0_i32_4 = arith.constant 0 : i32
    %12 = arith.cmpi eq, %arg2, %c0_i32_4 : i32
    %13 = arith.extui %12 : i1 to i32
    %c0_i32_5 = arith.constant 0 : i32
    %14 = arith.cmpi ne, %13, %c0_i32_5 : i32
    scf.if %14 {
      %c16_i32_222 = arith.constant 16 : i32
      %243 = arith.muli %1, %c16_i32_222 : i32
      %244 = tpu.assume_multiple %243, 8 : i32
      %c0_i32_223 = arith.constant 0 : i32
      %245 = arith.cmpi sgt, %1, %c0_i32_223 : i32
      %c0_i32_224 = arith.constant 0 : i32
      %246 = arith.cmpi slt, %1, %c0_i32_224 : i32
      %c0_i32_225 = arith.constant 0 : i32
      %c0_i32_226 = arith.constant 0 : i32
      %247 = tpu.memref_slice %arg3[%arg1, %244, %c0_i32_226] : memref<2x16x512xf32, #tpu.memory_space<any>> -> memref<1x16x512xf32, #tpu.memory_space<any>>
      %248 = tpu.memref_squeeze %247 : memref<1x16x512xf32, #tpu.memory_space<any>> -> memref<16x512xf32, #tpu.memory_space<any>>
      %c8_i32_227 = arith.constant 8 : i32
      %c0_i32_228 = arith.constant 0 : i32
      %249 = tpu.memref_slice %arg7[%11, %c8_i32_227, %c0_i32_228] : memref<2x32x512xf32, #tpu.memory_space<vmem>> -> memref<1x16x512xf32, #tpu.memory_space<vmem>>
      %250 = tpu.memref_squeeze %249 : memref<1x16x512xf32, #tpu.memory_space<vmem>> -> memref<16x512xf32, #tpu.memory_space<vmem>>
      %251 = tpu.memref_slice %arg9[%11, %c0_i32_225] : memref<2x3x!tpu.dma_semaphore, #tpu.memory_space<semaphore_mem>> -> memref<1x1x!tpu.dma_semaphore, #tpu.memory_space<semaphore_mem>>
      %252 = tpu.memref_squeeze %251 : memref<1x1x!tpu.dma_semaphore, #tpu.memory_space<semaphore_mem>> -> memref<!tpu.dma_semaphore, #tpu.memory_space<semaphore_mem>>
      tpu.enqueue_dma source(%248 : memref<16x512xf32, #tpu.memory_space<any>>) target(%250 : memref<16x512xf32, #tpu.memory_space<vmem>>) target_semaphore(%252 : memref<!tpu.dma_semaphore, #tpu.memory_space<semaphore_mem>>)
      %253 = arith.extui %245 : i1 to i32
      %c0_i32_229 = arith.constant 0 : i32
      %254 = arith.cmpi ne, %253, %c0_i32_229 : i32
      scf.if %254 {
        %c8_i32_231 = arith.constant 8 : i32
        %257 = arith.subi %244, %c8_i32_231 : i32
        %c1_i32_232 = arith.constant 1 : i32
        %c0_i32_233 = arith.constant 0 : i32
        %258 = tpu.memref_slice %arg3[%arg1, %257, %c0_i32_233] : memref<2x16x512xf32, #tpu.memory_space<any>> -> memref<1x8x512xf32, #tpu.memory_space<any>>
        %259 = tpu.memref_squeeze %258 : memref<1x8x512xf32, #tpu.memory_space<any>> -> memref<8x512xf32, #tpu.memory_space<any>>
        %c0_i32_234 = arith.constant 0 : i32
        %c0_i32_235 = arith.constant 0 : i32
        %260 = tpu.memref_slice %arg7[%11, %c0_i32_234, %c0_i32_235] : memref<2x32x512xf32, #tpu.memory_space<vmem>> -> memref<1x8x512xf32, #tpu.memory_space<vmem>>
        %261 = tpu.memref_squeeze %260 : memref<1x8x512xf32, #tpu.memory_space<vmem>> -> memref<8x512xf32, #tpu.memory_space<vmem>>
        %262 = tpu.memref_slice %arg9[%11, %c1_i32_232] : memref<2x3x!tpu.dma_semaphore, #tpu.memory_space<semaphore_mem>> -> memref<1x1x!tpu.dma_semaphore, #tpu.memory_space<semaphore_mem>>
        %263 = tpu.memref_squeeze %262 : memref<1x1x!tpu.dma_semaphore, #tpu.memory_space<semaphore_mem>> -> memref<!tpu.dma_semaphore, #tpu.memory_space<semaphore_mem>>
        tpu.enqueue_dma source(%259 : memref<8x512xf32, #tpu.memory_space<any>>) target(%261 : memref<8x512xf32, #tpu.memory_space<vmem>>) target_semaphore(%263 : memref<!tpu.dma_semaphore, #tpu.memory_space<semaphore_mem>>)
      } else {
      }
      %255 = arith.extui %246 : i1 to i32
      %c0_i32_230 = arith.constant 0 : i32
      %256 = arith.cmpi ne, %255, %c0_i32_230 : i32
      scf.if %256 {
        %c16_i32_231 = arith.constant 16 : i32
        %257 = arith.addi %244, %c16_i32_231 : i32
        %c2_i32_232 = arith.constant 2 : i32
        %c0_i32_233 = arith.constant 0 : i32
        %258 = tpu.memref_slice %arg3[%arg1, %257, %c0_i32_233] : memref<2x16x512xf32, #tpu.memory_space<any>> -> memref<1x8x512xf32, #tpu.memory_space<any>>
        %259 = tpu.memref_squeeze %258 : memref<1x8x512xf32, #tpu.memory_space<any>> -> memref<8x512xf32, #tpu.memory_space<any>>
        %c24_i32 = arith.constant 24 : i32
        %c0_i32_234 = arith.constant 0 : i32
        %260 = tpu.memref_slice %arg7[%11, %c24_i32, %c0_i32_234] : memref<2x32x512xf32, #tpu.memory_space<vmem>> -> memref<1x8x512xf32, #tpu.memory_space<vmem>>
        %261 = tpu.memref_squeeze %260 : memref<1x8x512xf32, #tpu.memory_space<vmem>> -> memref<8x512xf32, #tpu.memory_space<vmem>>
        %262 = tpu.memref_slice %arg9[%11, %c2_i32_232] : memref<2x3x!tpu.dma_semaphore, #tpu.memory_space<semaphore_mem>> -> memref<1x1x!tpu.dma_semaphore, #tpu.memory_space<semaphore_mem>>
        %263 = tpu.memref_squeeze %262 : memref<1x1x!tpu.dma_semaphore, #tpu.memory_space<semaphore_mem>> -> memref<!tpu.dma_semaphore, #tpu.memory_space<semaphore_mem>>
        tpu.enqueue_dma source(%259 : memref<8x512xf32, #tpu.memory_space<any>>) target(%261 : memref<8x512xf32, #tpu.memory_space<vmem>>) target_semaphore(%263 : memref<!tpu.dma_semaphore, #tpu.memory_space<semaphore_mem>>)
      } else {
      }
    } else {
    }
    %c16_i32 = arith.constant 16 : i32
    %15 = arith.muli %1, %c16_i32 : i32
    %16 = tpu.assume_multiple %15, 8 : i32
    %c0_i32_6 = arith.constant 0 : i32
    %17 = arith.cmpi sgt, %1, %c0_i32_6 : i32
    %c0_i32_7 = arith.constant 0 : i32
    %18 = arith.cmpi slt, %1, %c0_i32_7 : i32
    %c0_i32_8 = arith.constant 0 : i32
    %c0_i32_9 = arith.constant 0 : i32
    %19 = tpu.memref_slice %arg3[%arg1, %16, %c0_i32_9] : memref<2x16x512xf32, #tpu.memory_space<any>> -> memref<1x16x512xf32, #tpu.memory_space<any>>
    %20 = tpu.memref_squeeze %19 : memref<1x16x512xf32, #tpu.memory_space<any>> -> memref<16x512xf32, #tpu.memory_space<any>>
    %c8_i32 = arith.constant 8 : i32
    %c0_i32_10 = arith.constant 0 : i32
    %21 = tpu.memref_slice %arg7[%11, %c8_i32, %c0_i32_10] : memref<2x32x512xf32, #tpu.memory_space<vmem>> -> memref<1x16x512xf32, #tpu.memory_space<vmem>>
    %22 = tpu.memref_squeeze %21 : memref<1x16x512xf32, #tpu.memory_space<vmem>> -> memref<16x512xf32, #tpu.memory_space<vmem>>
    %23 = tpu.memref_slice %arg9[%11, %c0_i32_8] : memref<2x3x!tpu.dma_semaphore, #tpu.memory_space<semaphore_mem>> -> memref<1x1x!tpu.dma_semaphore, #tpu.memory_space<semaphore_mem>>
    %24 = tpu.memref_squeeze %23 : memref<1x1x!tpu.dma_semaphore, #tpu.memory_space<semaphore_mem>> -> memref<!tpu.dma_semaphore, #tpu.memory_space<semaphore_mem>>
    tpu.wait_dma2 semaphore(%24 : memref<!tpu.dma_semaphore, #tpu.memory_space<semaphore_mem>>) src(%20 : memref<16x512xf32, #tpu.memory_space<any>>) dst(%22 : memref<16x512xf32, #tpu.memory_space<vmem>>)
    %25 = arith.extui %17 : i1 to i32
    %c0_i32_11 = arith.constant 0 : i32
    %26 = arith.cmpi ne, %25, %c0_i32_11 : i32
    scf.if %26 {
      %c8_i32_222 = arith.constant 8 : i32
      %243 = arith.subi %16, %c8_i32_222 : i32
      %c1_i32_223 = arith.constant 1 : i32
      %c0_i32_224 = arith.constant 0 : i32
      %244 = tpu.memref_slice %arg3[%arg1, %243, %c0_i32_224] : memref<2x16x512xf32, #tpu.memory_space<any>> -> memref<1x8x512xf32, #tpu.memory_space<any>>
      %245 = tpu.memref_squeeze %244 : memref<1x8x512xf32, #tpu.memory_space<any>> -> memref<8x512xf32, #tpu.memory_space<any>>
      %c0_i32_225 = arith.constant 0 : i32
      %c0_i32_226 = arith.constant 0 : i32
      %246 = tpu.memref_slice %arg7[%11, %c0_i32_225, %c0_i32_226] : memref<2x32x512xf32, #tpu.memory_space<vmem>> -> memref<1x8x512xf32, #tpu.memory_space<vmem>>
      %247 = tpu.memref_squeeze %246 : memref<1x8x512xf32, #tpu.memory_space<vmem>> -> memref<8x512xf32, #tpu.memory_space<vmem>>
      %248 = tpu.memref_slice %arg9[%11, %c1_i32_223] : memref<2x3x!tpu.dma_semaphore, #tpu.memory_space<semaphore_mem>> -> memref<1x1x!tpu.dma_semaphore, #tpu.memory_space<semaphore_mem>>
      %249 = tpu.memref_squeeze %248 : memref<1x1x!tpu.dma_semaphore, #tpu.memory_space<semaphore_mem>> -> memref<!tpu.dma_semaphore, #tpu.memory_space<semaphore_mem>>
      tpu.wait_dma2 semaphore(%249 : memref<!tpu.dma_semaphore, #tpu.memory_space<semaphore_mem>>) src(%245 : memref<8x512xf32, #tpu.memory_space<any>>) dst(%247 : memref<8x512xf32, #tpu.memory_space<vmem>>)
    } else {
    }
    %27 = arith.extui %18 : i1 to i32
    %c0_i32_12 = arith.constant 0 : i32
    %28 = arith.cmpi ne, %27, %c0_i32_12 : i32
    scf.if %28 {
      %c16_i32_222 = arith.constant 16 : i32
      %243 = arith.addi %16, %c16_i32_222 : i32
      %c2_i32_223 = arith.constant 2 : i32
      %c0_i32_224 = arith.constant 0 : i32
      %244 = tpu.memref_slice %arg3[%arg1, %243, %c0_i32_224] : memref<2x16x512xf32, #tpu.memory_space<any>> -> memref<1x8x512xf32, #tpu.memory_space<any>>
      %245 = tpu.memref_squeeze %244 : memref<1x8x512xf32, #tpu.memory_space<any>> -> memref<8x512xf32, #tpu.memory_space<any>>
      %c24_i32 = arith.constant 24 : i32
      %c0_i32_225 = arith.constant 0 : i32
      %246 = tpu.memref_slice %arg7[%11, %c24_i32, %c0_i32_225] : memref<2x32x512xf32, #tpu.memory_space<vmem>> -> memref<1x8x512xf32, #tpu.memory_space<vmem>>
      %247 = tpu.memref_squeeze %246 : memref<1x8x512xf32, #tpu.memory_space<vmem>> -> memref<8x512xf32, #tpu.memory_space<vmem>>
      %248 = tpu.memref_slice %arg9[%11, %c2_i32_223] : memref<2x3x!tpu.dma_semaphore, #tpu.memory_space<semaphore_mem>> -> memref<1x1x!tpu.dma_semaphore, #tpu.memory_space<semaphore_mem>>
      %249 = tpu.memref_squeeze %248 : memref<1x1x!tpu.dma_semaphore, #tpu.memory_space<semaphore_mem>> -> memref<!tpu.dma_semaphore, #tpu.memory_space<semaphore_mem>>
      tpu.wait_dma2 semaphore(%249 : memref<!tpu.dma_semaphore, #tpu.memory_space<semaphore_mem>>) src(%245 : memref<8x512xf32, #tpu.memory_space<any>>) dst(%247 : memref<8x512xf32, #tpu.memory_space<vmem>>)
    } else {
    }
    %c1_i32_13 = arith.constant 1 : i32
    %29 = arith.addi %arg2, %c1_i32_13 : i32
    %c1_i32_14 = arith.constant 1 : i32
    %30 = arith.cmpi slt, %29, %c1_i32_14 : i32
    %31 = arith.extui %30 : i1 to i32
    %c0_i32_15 = arith.constant 0 : i32
    %32 = arith.cmpi ne, %31, %c0_i32_15 : i32
    scf.if %32 {
      %c1_i32_222 = arith.constant 1 : i32
      %243 = arith.addi %1, %c1_i32_222 : i32
      %c1_i32_223 = arith.constant 1 : i32
      %244 = arith.subi %c1_i32_223, %11 : i32
      %c16_i32_224 = arith.constant 16 : i32
      %245 = arith.muli %243, %c16_i32_224 : i32
      %246 = tpu.assume_multiple %245, 8 : i32
      %c0_i32_225 = arith.constant 0 : i32
      %247 = arith.cmpi sgt, %243, %c0_i32_225 : i32
      %c0_i32_226 = arith.constant 0 : i32
      %248 = arith.cmpi slt, %243, %c0_i32_226 : i32
      %c0_i32_227 = arith.constant 0 : i32
      %c0_i32_228 = arith.constant 0 : i32
      %249 = tpu.memref_slice %arg3[%arg1, %246, %c0_i32_228] : memref<2x16x512xf32, #tpu.memory_space<any>> -> memref<1x16x512xf32, #tpu.memory_space<any>>
      %250 = tpu.memref_squeeze %249 : memref<1x16x512xf32, #tpu.memory_space<any>> -> memref<16x512xf32, #tpu.memory_space<any>>
      %c8_i32_229 = arith.constant 8 : i32
      %c0_i32_230 = arith.constant 0 : i32
      %251 = tpu.memref_slice %arg7[%244, %c8_i32_229, %c0_i32_230] : memref<2x32x512xf32, #tpu.memory_space<vmem>> -> memref<1x16x512xf32, #tpu.memory_space<vmem>>
      %252 = tpu.memref_squeeze %251 : memref<1x16x512xf32, #tpu.memory_space<vmem>> -> memref<16x512xf32, #tpu.memory_space<vmem>>
      %253 = tpu.memref_slice %arg9[%244, %c0_i32_227] : memref<2x3x!tpu.dma_semaphore, #tpu.memory_space<semaphore_mem>> -> memref<1x1x!tpu.dma_semaphore, #tpu.memory_space<semaphore_mem>>
      %254 = tpu.memref_squeeze %253 : memref<1x1x!tpu.dma_semaphore, #tpu.memory_space<semaphore_mem>> -> memref<!tpu.dma_semaphore, #tpu.memory_space<semaphore_mem>>
      tpu.enqueue_dma source(%250 : memref<16x512xf32, #tpu.memory_space<any>>) target(%252 : memref<16x512xf32, #tpu.memory_space<vmem>>) target_semaphore(%254 : memref<!tpu.dma_semaphore, #tpu.memory_space<semaphore_mem>>)
      %255 = arith.extui %247 : i1 to i32
      %c0_i32_231 = arith.constant 0 : i32
      %256 = arith.cmpi ne, %255, %c0_i32_231 : i32
      scf.if %256 {
        %c8_i32_233 = arith.constant 8 : i32
        %259 = arith.subi %246, %c8_i32_233 : i32
        %c1_i32_234 = arith.constant 1 : i32
        %c0_i32_235 = arith.constant 0 : i32
        %260 = tpu.memref_slice %arg3[%arg1, %259, %c0_i32_235] : memref<2x16x512xf32, #tpu.memory_space<any>> -> memref<1x8x512xf32, #tpu.memory_space<any>>
        %261 = tpu.memref_squeeze %260 : memref<1x8x512xf32, #tpu.memory_space<any>> -> memref<8x512xf32, #tpu.memory_space<any>>
        %c0_i32_236 = arith.constant 0 : i32
        %c0_i32_237 = arith.constant 0 : i32
        %262 = tpu.memref_slice %arg7[%244, %c0_i32_236, %c0_i32_237] : memref<2x32x512xf32, #tpu.memory_space<vmem>> -> memref<1x8x512xf32, #tpu.memory_space<vmem>>
        %263 = tpu.memref_squeeze %262 : memref<1x8x512xf32, #tpu.memory_space<vmem>> -> memref<8x512xf32, #tpu.memory_space<vmem>>
        %264 = tpu.memref_slice %arg9[%244, %c1_i32_234] : memref<2x3x!tpu.dma_semaphore, #tpu.memory_space<semaphore_mem>> -> memref<1x1x!tpu.dma_semaphore, #tpu.memory_space<semaphore_mem>>
        %265 = tpu.memref_squeeze %264 : memref<1x1x!tpu.dma_semaphore, #tpu.memory_space<semaphore_mem>> -> memref<!tpu.dma_semaphore, #tpu.memory_space<semaphore_mem>>
        tpu.enqueue_dma source(%261 : memref<8x512xf32, #tpu.memory_space<any>>) target(%263 : memref<8x512xf32, #tpu.memory_space<vmem>>) target_semaphore(%265 : memref<!tpu.dma_semaphore, #tpu.memory_space<semaphore_mem>>)
      } else {
      }
      %257 = arith.extui %248 : i1 to i32
      %c0_i32_232 = arith.constant 0 : i32
      %258 = arith.cmpi ne, %257, %c0_i32_232 : i32
      scf.if %258 {
        %c16_i32_233 = arith.constant 16 : i32
        %259 = arith.addi %246, %c16_i32_233 : i32
        %c2_i32_234 = arith.constant 2 : i32
        %c0_i32_235 = arith.constant 0 : i32
        %260 = tpu.memref_slice %arg3[%arg1, %259, %c0_i32_235] : memref<2x16x512xf32, #tpu.memory_space<any>> -> memref<1x8x512xf32, #tpu.memory_space<any>>
        %261 = tpu.memref_squeeze %260 : memref<1x8x512xf32, #tpu.memory_space<any>> -> memref<8x512xf32, #tpu.memory_space<any>>
        %c24_i32 = arith.constant 24 : i32
        %c0_i32_236 = arith.constant 0 : i32
        %262 = tpu.memref_slice %arg7[%244, %c24_i32, %c0_i32_236] : memref<2x32x512xf32, #tpu.memory_space<vmem>> -> memref<1x8x512xf32, #tpu.memory_space<vmem>>
        %263 = tpu.memref_squeeze %262 : memref<1x8x512xf32, #tpu.memory_space<vmem>> -> memref<8x512xf32, #tpu.memory_space<vmem>>
        %264 = tpu.memref_slice %arg9[%244, %c2_i32_234] : memref<2x3x!tpu.dma_semaphore, #tpu.memory_space<semaphore_mem>> -> memref<1x1x!tpu.dma_semaphore, #tpu.memory_space<semaphore_mem>>
        %265 = tpu.memref_squeeze %264 : memref<1x1x!tpu.dma_semaphore, #tpu.memory_space<semaphore_mem>> -> memref<!tpu.dma_semaphore, #tpu.memory_space<semaphore_mem>>
        tpu.enqueue_dma source(%261 : memref<8x512xf32, #tpu.memory_space<any>>) target(%263 : memref<8x512xf32, #tpu.memory_space<vmem>>) target_semaphore(%265 : memref<!tpu.dma_semaphore, #tpu.memory_space<semaphore_mem>>)
      } else {
      }
    } else {
    }
    %c0_i32_16 = arith.constant 0 : i32
    %33 = arith.cmpi eq, %1, %c0_i32_16 : i32
    %34 = arith.extui %33 : i1 to i32
    %c0_i32_17 = arith.constant 0 : i32
    %35 = arith.cmpi ne, %34, %c0_i32_17 : i32
    scf.if %35 {
      %cst_222 = arith.constant 0.000000e+00 : f32
      %243 = vector.broadcast %cst_222 : f32 to vector<8x512xf32>
      %c0_223 = arith.constant 0 : index
      %c0_224 = arith.constant 0 : index
      %c0_225 = arith.constant 0 : index
      %244 = vector.load %arg7[%c0_223, %c0_224, %c0_225] : memref<2x32x512xf32, #tpu.memory_space<vmem>>, vector<1x8x512xf32>
      %245 = vector.shape_cast %244 : vector<1x8x512xf32> to vector<8x512xf32>
      %246 = vector.shape_cast %243 : vector<8x512xf32> to vector<1x8x512xf32>
      tpu.vector_store %arg7[%c0_223, %c0_224, %c0_225], %246 {strides = array<i32>} : memref<2x32x512xf32, #tpu.memory_space<vmem>>, vector<1x8x512xf32>,
    } else {
    }
    %c0_i32_18 = arith.constant 0 : i32
    %36 = arith.cmpi eq, %1, %c0_i32_18 : i32
    %37 = arith.extui %36 : i1 to i32
    %c0_i32_19 = arith.constant 0 : i32
    %38 = arith.cmpi ne, %37, %c0_i32_19 : i32
    scf.if %38 {
      %cst_222 = arith.constant 0.000000e+00 : f32
      %243 = vector.broadcast %cst_222 : f32 to vector<8x512xf32>
      %c0_223 = arith.constant 0 : index
      %c24 = arith.constant 24 : index
      %c0_224 = arith.constant 0 : index
      %244 = vector.load %arg7[%c0_223, %c24, %c0_224] : memref<2x32x512xf32, #tpu.memory_space<vmem>>, vector<1x8x512xf32>
      %245 = vector.shape_cast %244 : vector<1x8x512xf32> to vector<8x512xf32>
      %246 = vector.shape_cast %243 : vector<8x512xf32> to vector<1x8x512xf32>
      tpu.vector_store %arg7[%c0_223, %c24, %c0_224], %246 {strides = array<i32>} : memref<2x32x512xf32, #tpu.memory_space<vmem>>, vector<1x8x512xf32>,
    } else {
    }
    %39 = arith.index_cast %11 : i32 to index
    %c0 = arith.constant 0 : index
    %c0_20 = arith.constant 0 : index
    %40 = vector.load %arg7[%39, %c0, %c0_20] : memref<2x32x512xf32, #tpu.memory_space<vmem>>, vector<1x16x512xf32>
    %41 = vector.shape_cast %40 : vector<1x16x512xf32> to vector<16x512xf32>
    %42 = arith.truncf %41 : vector<16x512xf32> to vector<16x512xbf16>
    %c0_21 = arith.constant 0 : index
    %c0_22 = arith.constant 0 : index
    %43 = vector.load %arg8[%c0_21, %c0_22] : memref<32x512xbf16, #tpu.memory_space<vmem>>, vector<16x512xbf16>
    tpu.vector_store %arg8[%c0_21, %c0_22], %42 {strides = array<i32>} : memref<32x512xbf16, #tpu.memory_space<vmem>>, vector<16x512xbf16>,
    %44 = arith.index_cast %11 : i32 to index
    %c16 = arith.constant 16 : index
    %c0_23 = arith.constant 0 : index
    %45 = vector.load %arg7[%44, %c16, %c0_23] : memref<2x32x512xf32, #tpu.memory_space<vmem>>, vector<1x16x512xf32>
    %46 = vector.shape_cast %45 : vector<1x16x512xf32> to vector<16x512xf32>
    %47 = arith.truncf %46 : vector<16x512xf32> to vector<16x512xbf16>
    %c16_24 = arith.constant 16 : index
    %c0_25 = arith.constant 0 : index
    %48 = vector.load %arg8[%c16_24, %c0_25] : memref<32x512xbf16, #tpu.memory_space<vmem>>, vector<16x512xbf16>
    tpu.vector_store %arg8[%c16_24, %c0_25], %47 {strides = array<i32>} : memref<32x512xbf16, #tpu.memory_space<vmem>>, vector<16x512xbf16>,
    %49 = arith.index_cast %11 : i32 to index
    %c8 = arith.constant 8 : index
    %c0_26 = arith.constant 0 : index
    %50 = vector.load %arg7[%49, %c8, %c0_26] : memref<2x32x512xf32, #tpu.memory_space<vmem>>, vector<1x16x256xf32>
    %51 = vector.shape_cast %50 : vector<1x16x256xf32> to vector<16x256xf32>
    %52 = arith.index_cast %11 : i32 to index
    %c7 = arith.constant 7 : index
    %c0_27 = arith.constant 0 : index
    %53 = vector.load %arg7[%52, %c7, %c0_27] : memref<2x32x512xf32, #tpu.memory_space<vmem>>, vector<1x16x256xf32>
    %54 = vector.shape_cast %53 : vector<1x16x256xf32> to vector<16x256xf32>
    %55 = arith.maximumf %51, %54 : vector<16x256xf32>
    %c7_28 = arith.constant 7 : index
    %c0_29 = arith.constant 0 : index
    %56 = vector.load %arg8[%c7_28, %c0_29] : memref<32x512xbf16, #tpu.memory_space<vmem>>, vector<16x512xbf16>
    %c0_30 = arith.constant 0 : index
    %c0_31 = arith.constant 0 : index
    %c0_32 = arith.constant 0 : index
    %57 = vector.load %arg4[%c0_30, %c0_31, %c0_32] : memref<15x512x512xbf16, #tpu.memory_space<vmem>>, vector<1x512x256xbf16>
    %58 = vector.shape_cast %57 : vector<1x512x256xbf16> to vector<512x256xbf16>
    %cst = arith.constant dense<0.000000e+00> : vector<16x256xf32>
    %59 = tpu.matmul %56, %58, %cst {dimension_numbers = #tpu.dot_dimension_numbers<[1], [0], [0], [1], [0, 0, 1, 1], [], []>} : vector<16x512xbf16>, vector<512x256xbf16>, vector<16x256xf32> -> vector<16x256xf32>
    %c8_33 = arith.constant 8 : index
    %c0_34 = arith.constant 0 : index
    %60 = vector.load %arg8[%c8_33, %c0_34] : memref<32x512xbf16, #tpu.memory_space<vmem>>, vector<16x512xbf16>
    %c1 = arith.constant 1 : index
    %c0_35 = arith.constant 0 : index
    %c0_36 = arith.constant 0 : index
    %61 = vector.load %arg4[%c1, %c0_35, %c0_36] : memref<15x512x512xbf16, #tpu.memory_space<vmem>>, vector<1x512x256xbf16>
    %62 = vector.shape_cast %61 : vector<1x512x256xbf16> to vector<512x256xbf16>
    %cst_37 = arith.constant dense<0.000000e+00> : vector<16x256xf32>
    %63 = tpu.matmul %60, %62, %cst_37 {dimension_numbers = #tpu.dot_dimension_numbers<[1], [0], [0], [1], [0, 0, 1, 1], [], []>} : vector<16x512xbf16>, vector<512x256xbf16>, vector<16x256xf32> -> vector<16x256xf32>
    %64 = arith.addf %59, %63 : vector<16x256xf32>
    %c9 = arith.constant 9 : index
    %c0_38 = arith.constant 0 : index
    %65 = vector.load %arg8[%c9, %c0_38] : memref<32x512xbf16, #tpu.memory_space<vmem>>, vector<16x512xbf16>
    %c2 = arith.constant 2 : index
    %c0_39 = arith.constant 0 : index
    %c0_40 = arith.constant 0 : index
    %66 = vector.load %arg4[%c2, %c0_39, %c0_40] : memref<15x512x512xbf16, #tpu.memory_space<vmem>>, vector<1x512x256xbf16>
    %67 = vector.shape_cast %66 : vector<1x512x256xbf16> to vector<512x256xbf16>
    %cst_41 = arith.constant dense<0.000000e+00> : vector<16x256xf32>
    %68 = tpu.matmul %65, %67, %cst_41 {dimension_numbers = #tpu.dot_dimension_numbers<[1], [0], [0], [1], [0, 0, 1, 1], [], []>} : vector<16x512xbf16>, vector<512x256xbf16>, vector<16x256xf32> -> vector<16x256xf32>
    %69 = arith.addf %64, %68 : vector<16x256xf32>
    %c0_42 = arith.constant 0 : index
    %c0_43 = arith.constant 0 : index
    %c0_44 = arith.constant 0 : index
    %70 = vector.load %arg5[%c0_42, %c0_43, %c0_44] : memref<3x1x512xf32, #tpu.memory_space<vmem>>, vector<1x1x256xf32>
    %71 = vector.shape_cast %70 : vector<1x1x256xf32> to vector<1x256xf32>
    %72 = vector.broadcast %71 : vector<1x256xf32> to vector<16x256xf32>
    %73 = arith.addf %69, %72 : vector<16x256xf32>
    %74 = arith.maximumf %55, %73 : vector<16x256xf32>
    %c6 = arith.constant 6 : index
    %c0_45 = arith.constant 0 : index
    %75 = vector.load %arg8[%c6, %c0_45] : memref<32x512xbf16, #tpu.memory_space<vmem>>, vector<16x512xbf16>
    %c3 = arith.constant 3 : index
    %c0_46 = arith.constant 0 : index
    %c0_47 = arith.constant 0 : index
    %76 = vector.load %arg4[%c3, %c0_46, %c0_47] : memref<15x512x512xbf16, #tpu.memory_space<vmem>>, vector<1x512x256xbf16>
    %77 = vector.shape_cast %76 : vector<1x512x256xbf16> to vector<512x256xbf16>
    %cst_48 = arith.constant dense<0.000000e+00> : vector<16x256xf32>
    %78 = tpu.matmul %75, %77, %cst_48 {dimension_numbers = #tpu.dot_dimension_numbers<[1], [0], [0], [1], [0, 0, 1, 1], [], []>} : vector<16x512xbf16>, vector<512x256xbf16>, vector<16x256xf32> -> vector<16x256xf32>
    %c7_49 = arith.constant 7 : index
    %c0_50 = arith.constant 0 : index
    %79 = vector.load %arg8[%c7_49, %c0_50] : memref<32x512xbf16, #tpu.memory_space<vmem>>, vector<16x512xbf16>
    %c4 = arith.constant 4 : index
    %c0_51 = arith.constant 0 : index
    %c0_52 = arith.constant 0 : index
    %80 = vector.load %arg4[%c4, %c0_51, %c0_52] : memref<15x512x512xbf16, #tpu.memory_space<vmem>>, vector<1x512x256xbf16>
    %81 = vector.shape_cast %80 : vector<1x512x256xbf16> to vector<512x256xbf16>
    %cst_53 = arith.constant dense<0.000000e+00> : vector<16x256xf32>
    %82 = tpu.matmul %79, %81, %cst_53 {dimension_numbers = #tpu.dot_dimension_numbers<[1], [0], [0], [1], [0, 0, 1, 1], [], []>} : vector<16x512xbf16>, vector<512x256xbf16>, vector<16x256xf32> -> vector<16x256xf32>
    %83 = arith.addf %78, %82 : vector<16x256xf32>
    %c8_54 = arith.constant 8 : index
    %c0_55 = arith.constant 0 : index
    %84 = vector.load %arg8[%c8_54, %c0_55] : memref<32x512xbf16, #tpu.memory_space<vmem>>, vector<16x512xbf16>
    %c5 = arith.constant 5 : index
    %c0_56 = arith.constant 0 : index
    %c0_57 = arith.constant 0 : index
    %85 = vector.load %arg4[%c5, %c0_56, %c0_57] : memref<15x512x512xbf16, #tpu.memory_space<vmem>>, vector<1x512x256xbf16>
    %86 = vector.shape_cast %85 : vector<1x512x256xbf16> to vector<512x256xbf16>
    %cst_58 = arith.constant dense<0.000000e+00> : vector<16x256xf32>
    %87 = tpu.matmul %84, %86, %cst_58 {dimension_numbers = #tpu.dot_dimension_numbers<[1], [0], [0], [1], [0, 0, 1, 1], [], []>} : vector<16x512xbf16>, vector<512x256xbf16>, vector<16x256xf32> -> vector<16x256xf32>
    %88 = arith.addf %83, %87 : vector<16x256xf32>
    %c9_59 = arith.constant 9 : index
    %c0_60 = arith.constant 0 : index
    %89 = vector.load %arg8[%c9_59, %c0_60] : memref<32x512xbf16, #tpu.memory_space<vmem>>, vector<16x512xbf16>
    %c6_61 = arith.constant 6 : index
    %c0_62 = arith.constant 0 : index
    %c0_63 = arith.constant 0 : index
    %90 = vector.load %arg4[%c6_61, %c0_62, %c0_63] : memref<15x512x512xbf16, #tpu.memory_space<vmem>>, vector<1x512x256xbf16>
    %91 = vector.shape_cast %90 : vector<1x512x256xbf16> to vector<512x256xbf16>
    %cst_64 = arith.constant dense<0.000000e+00> : vector<16x256xf32>
    %92 = tpu.matmul %89, %91, %cst_64 {dimension_numbers = #tpu.dot_dimension_numbers<[1], [0], [0], [1], [0, 0, 1, 1], [], []>} : vector<16x512xbf16>, vector<512x256xbf16>, vector<16x256xf32> -> vector<16x256xf32>
    %93 = arith.addf %88, %92 : vector<16x256xf32>
    %c10 = arith.constant 10 : index
    %c0_65 = arith.constant 0 : index
    %94 = vector.load %arg8[%c10, %c0_65] : memref<32x512xbf16, #tpu.memory_space<vmem>>, vector<16x512xbf16>
    %c7_66 = arith.constant 7 : index
    %c0_67 = arith.constant 0 : index
    %c0_68 = arith.constant 0 : index
    %95 = vector.load %arg4[%c7_66, %c0_67, %c0_68] : memref<15x512x512xbf16, #tpu.memory_space<vmem>>, vector<1x512x256xbf16>
    %96 = vector.shape_cast %95 : vector<1x512x256xbf16> to vector<512x256xbf16>
    %cst_69 = arith.constant dense<0.000000e+00> : vector<16x256xf32>
    %97 = tpu.matmul %94, %96, %cst_69 {dimension_numbers = #tpu.dot_dimension_numbers<[1], [0], [0], [1], [0, 0, 1, 1], [], []>} : vector<16x512xbf16>, vector<512x256xbf16>, vector<16x256xf32> -> vector<16x256xf32>
    %98 = arith.addf %93, %97 : vector<16x256xf32>
    %c1_70 = arith.constant 1 : index
    %c0_71 = arith.constant 0 : index
    %c0_72 = arith.constant 0 : index
    %99 = vector.load %arg5[%c1_70, %c0_71, %c0_72] : memref<3x1x512xf32, #tpu.memory_space<vmem>>, vector<1x1x256xf32>
    %100 = vector.shape_cast %99 : vector<1x1x256xf32> to vector<1x256xf32>
    %101 = vector.broadcast %100 : vector<1x256xf32> to vector<16x256xf32>
    %102 = arith.addf %98, %101 : vector<16x256xf32>
    %103 = arith.maximumf %74, %102 : vector<16x256xf32>
    %c5_73 = arith.constant 5 : index
    %c0_74 = arith.constant 0 : index
    %104 = vector.load %arg8[%c5_73, %c0_74] : memref<32x512xbf16, #tpu.memory_space<vmem>>, vector<16x512xbf16>
    %c8_75 = arith.constant 8 : index
    %c0_76 = arith.constant 0 : index
    %c0_77 = arith.constant 0 : index
    %105 = vector.load %arg4[%c8_75, %c0_76, %c0_77] : memref<15x512x512xbf16, #tpu.memory_space<vmem>>, vector<1x512x256xbf16>
    %106 = vector.shape_cast %105 : vector<1x512x256xbf16> to vector<512x256xbf16>
    %cst_78 = arith.constant dense<0.000000e+00> : vector<16x256xf32>
    %107 = tpu.matmul %104, %106, %cst_78 {dimension_numbers = #tpu.dot_dimension_numbers<[1], [0], [0], [1], [0, 0, 1, 1], [], []>} : vector<16x512xbf16>, vector<512x256xbf16>, vector<16x256xf32> -> vector<16x256xf32>
    %c6_79 = arith.constant 6 : index
    %c0_80 = arith.constant 0 : index
    %108 = vector.load %arg8[%c6_79, %c0_80] : memref<32x512xbf16, #tpu.memory_space<vmem>>, vector<16x512xbf16>
    %c9_81 = arith.constant 9 : index
    %c0_82 = arith.constant 0 : index
    %c0_83 = arith.constant 0 : index
    %109 = vector.load %arg4[%c9_81, %c0_82, %c0_83] : memref<15x512x512xbf16, #tpu.memory_space<vmem>>, vector<1x512x256xbf16>
    %110 = vector.shape_cast %109 : vector<1x512x256xbf16> to vector<512x256xbf16>
    %cst_84 = arith.constant dense<0.000000e+00> : vector<16x256xf32>
    %111 = tpu.matmul %108, %110, %cst_84 {dimension_numbers = #tpu.dot_dimension_numbers<[1], [0], [0], [1], [0, 0, 1, 1], [], []>} : vector<16x512xbf16>, vector<512x256xbf16>, vector<16x256xf32> -> vector<16x256xf32>
    %112 = arith.addf %107, %111 : vector<16x256xf32>
    %c7_85 = arith.constant 7 : index
    %c0_86 = arith.constant 0 : index
    %113 = vector.load %arg8[%c7_85, %c0_86] : memref<32x512xbf16, #tpu.memory_space<vmem>>, vector<16x512xbf16>
    %c10_87 = arith.constant 10 : index
    %c0_88 = arith.constant 0 : index
    %c0_89 = arith.constant 0 : index
    %114 = vector.load %arg4[%c10_87, %c0_88, %c0_89] : memref<15x512x512xbf16, #tpu.memory_space<vmem>>, vector<1x512x256xbf16>
    %115 = vector.shape_cast %114 : vector<1x512x256xbf16> to vector<512x256xbf16>
    %cst_90 = arith.constant dense<0.000000e+00> : vector<16x256xf32>
    %116 = tpu.matmul %113, %115, %cst_90 {dimension_numbers = #tpu.dot_dimension_numbers<[1], [0], [0], [1], [0, 0, 1, 1], [], []>} : vector<16x512xbf16>, vector<512x256xbf16>, vector<16x256xf32> -> vector<16x256xf32>
    %117 = arith.addf %112, %116 : vector<16x256xf32>
    %c8_91 = arith.constant 8 : index
    %c0_92 = arith.constant 0 : index
    %118 = vector.load %arg8[%c8_91, %c0_92] : memref<32x512xbf16, #tpu.memory_space<vmem>>, vector<16x512xbf16>
    %c11 = arith.constant 11 : index
    %c0_93 = arith.constant 0 : index
    %c0_94 = arith.constant 0 : index
    %119 = vector.load %arg4[%c11, %c0_93, %c0_94] : memref<15x512x512xbf16, #tpu.memory_space<vmem>>, vector<1x512x256xbf16>
    %120 = vector.shape_cast %119 : vector<1x512x256xbf16> to vector<512x256xbf16>
    %cst_95 = arith.constant dense<0.000000e+00> : vector<16x256xf32>
    %121 = tpu.matmul %118, %120, %cst_95 {dimension_numbers = #tpu.dot_dimension_numbers<[1], [0], [0], [1], [0, 0, 1, 1], [], []>} : vector<16x512xbf16>, vector<512x256xbf16>, vector<16x256xf32> -> vector<16x256xf32>
    %122 = arith.addf %117, %121 : vector<16x256xf32>
    %c9_96 = arith.constant 9 : index
    %c0_97 = arith.constant 0 : index
    %123 = vector.load %arg8[%c9_96, %c0_97] : memref<32x512xbf16, #tpu.memory_space<vmem>>, vector<16x512xbf16>
    %c12 = arith.constant 12 : index
    %c0_98 = arith.constant 0 : index
    %c0_99 = arith.constant 0 : index
    %124 = vector.load %arg4[%c12, %c0_98, %c0_99] : memref<15x512x512xbf16, #tpu.memory_space<vmem>>, vector<1x512x256xbf16>
    %125 = vector.shape_cast %124 : vector<1x512x256xbf16> to vector<512x256xbf16>
    %cst_100 = arith.constant dense<0.000000e+00> : vector<16x256xf32>
    %126 = tpu.matmul %123, %125, %cst_100 {dimension_numbers = #tpu.dot_dimension_numbers<[1], [0], [0], [1], [0, 0, 1, 1], [], []>} : vector<16x512xbf16>, vector<512x256xbf16>, vector<16x256xf32> -> vector<16x256xf32>
    %127 = arith.addf %122, %126 : vector<16x256xf32>
    %c10_101 = arith.constant 10 : index
    %c0_102 = arith.constant 0 : index
    %128 = vector.load %arg8[%c10_101, %c0_102] : memref<32x512xbf16, #tpu.memory_space<vmem>>, vector<16x512xbf16>
    %c13 = arith.constant 13 : index
    %c0_103 = arith.constant 0 : index
    %c0_104 = arith.constant 0 : index
    %129 = vector.load %arg4[%c13, %c0_103, %c0_104] : memref<15x512x512xbf16, #tpu.memory_space<vmem>>, vector<1x512x256xbf16>
    %130 = vector.shape_cast %129 : vector<1x512x256xbf16> to vector<512x256xbf16>
    %cst_105 = arith.constant dense<0.000000e+00> : vector<16x256xf32>
    %131 = tpu.matmul %128, %130, %cst_105 {dimension_numbers = #tpu.dot_dimension_numbers<[1], [0], [0], [1], [0, 0, 1, 1], [], []>} : vector<16x512xbf16>, vector<512x256xbf16>, vector<16x256xf32> -> vector<16x256xf32>
    %132 = arith.addf %127, %131 : vector<16x256xf32>
    %c11_106 = arith.constant 11 : index
    %c0_107 = arith.constant 0 : index
    %133 = vector.load %arg8[%c11_106, %c0_107] : memref<32x512xbf16, #tpu.memory_space<vmem>>, vector<16x512xbf16>
    %c14 = arith.constant 14 : index
    %c0_108 = arith.constant 0 : index
    %c0_109 = arith.constant 0 : index
    %134 = vector.load %arg4[%c14, %c0_108, %c0_109] : memref<15x512x512xbf16, #tpu.memory_space<vmem>>, vector<1x512x256xbf16>
    %135 = vector.shape_cast %134 : vector<1x512x256xbf16> to vector<512x256xbf16>
    %cst_110 = arith.constant dense<0.000000e+00> : vector<16x256xf32>
    %136 = tpu.matmul %133, %135, %cst_110 {dimension_numbers = #tpu.dot_dimension_numbers<[1], [0], [0], [1], [0, 0, 1, 1], [], []>} : vector<16x512xbf16>, vector<512x256xbf16>, vector<16x256xf32> -> vector<16x256xf32>
    %137 = arith.addf %132, %136 : vector<16x256xf32>
    %c2_111 = arith.constant 2 : index
    %c0_112 = arith.constant 0 : index
    %c0_113 = arith.constant 0 : index
    %138 = vector.load %arg5[%c2_111, %c0_112, %c0_113] : memref<3x1x512xf32, #tpu.memory_space<vmem>>, vector<1x1x256xf32>
    %139 = vector.shape_cast %138 : vector<1x1x256xf32> to vector<1x256xf32>
    %140 = vector.broadcast %139 : vector<1x256xf32> to vector<16x256xf32>
    %141 = arith.addf %137, %140 : vector<16x256xf32>
    %142 = arith.maximumf %103, %141 : vector<16x256xf32>
    %c0_114 = arith.constant 0 : index
    %c0_115 = arith.constant 0 : index
    %c0_116 = arith.constant 0 : index
    %143 = vector.load %arg6[%c0_114, %c0_115, %c0_116] : memref<1x16x512xf32, #tpu.memory_space<vmem>>, vector<1x16x256xf32>
    %144 = vector.shape_cast %143 : vector<1x16x256xf32> to vector<16x256xf32>
    %145 = vector.shape_cast %142 : vector<16x256xf32> to vector<1x16x256xf32>
    tpu.vector_store %arg6[%c0_114, %c0_115, %c0_116], %145 {strides = array<i32>} : memref<1x16x512xf32, #tpu.memory_space<vmem>>, vector<1x16x256xf32>,
    %146 = arith.index_cast %11 : i32 to index
    %c8_117 = arith.constant 8 : index
    %c256 = arith.constant 256 : index
    %147 = vector.load %arg7[%146, %c8_117, %c256] : memref<2x32x512xf32, #tpu.memory_space<vmem>>, vector<1x16x256xf32>
    %148 = vector.shape_cast %147 : vector<1x16x256xf32> to vector<16x256xf32>
    %149 = arith.index_cast %11 : i32 to index
    %c7_118 = arith.constant 7 : index
    %c256_119 = arith.constant 256 : index
    %150 = vector.load %arg7[%149, %c7_118, %c256_119] : memref<2x32x512xf32, #tpu.memory_space<vmem>>, vector<1x16x256xf32>
    %151 = vector.shape_cast %150 : vector<1x16x256xf32> to vector<16x256xf32>
    %152 = arith.maximumf %148, %151 : vector<16x256xf32>
    %c7_120 = arith.constant 7 : index
    %c0_121 = arith.constant 0 : index
    %153 = vector.load %arg8[%c7_120, %c0_121] : memref<32x512xbf16, #tpu.memory_space<vmem>>, vector<16x512xbf16>
    %c0_122 = arith.constant 0 : index
    %c0_123 = arith.constant 0 : index
    %c256_124 = arith.constant 256 : index
    %154 = vector.load %arg4[%c0_122, %c0_123, %c256_124] : memref<15x512x512xbf16, #tpu.memory_space<vmem>>, vector<1x512x256xbf16>
    %155 = vector.shape_cast %154 : vector<1x512x256xbf16> to vector<512x256xbf16>
    %cst_125 = arith.constant dense<0.000000e+00> : vector<16x256xf32>
    %156 = tpu.matmul %153, %155, %cst_125 {dimension_numbers = #tpu.dot_dimension_numbers<[1], [0], [0], [1], [0, 0, 1, 1], [], []>} : vector<16x512xbf16>, vector<512x256xbf16>, vector<16x256xf32> -> vector<16x256xf32>
    %c8_126 = arith.constant 8 : index
    %c0_127 = arith.constant 0 : index
    %157 = vector.load %arg8[%c8_126, %c0_127] : memref<32x512xbf16, #tpu.memory_space<vmem>>, vector<16x512xbf16>
    %c1_128 = arith.constant 1 : index
    %c0_129 = arith.constant 0 : index
    %c256_130 = arith.constant 256 : index
    %158 = vector.load %arg4[%c1_128, %c0_129, %c256_130] : memref<15x512x512xbf16, #tpu.memory_space<vmem>>, vector<1x512x256xbf16>
    %159 = vector.shape_cast %158 : vector<1x512x256xbf16> to vector<512x256xbf16>
    %cst_131 = arith.constant dense<0.000000e+00> : vector<16x256xf32>
    %160 = tpu.matmul %157, %159, %cst_131 {dimension_numbers = #tpu.dot_dimension_numbers<[1], [0], [0], [1], [0, 0, 1, 1], [], []>} : vector<16x512xbf16>, vector<512x256xbf16>, vector<16x256xf32> -> vector<16x256xf32>
    %161 = arith.addf %156, %160 : vector<16x256xf32>
    %c9_132 = arith.constant 9 : index
    %c0_133 = arith.constant 0 : index
    %162 = vector.load %arg8[%c9_132, %c0_133] : memref<32x512xbf16, #tpu.memory_space<vmem>>, vector<16x512xbf16>
    %c2_134 = arith.constant 2 : index
    %c0_135 = arith.constant 0 : index
    %c256_136 = arith.constant 256 : index
    %163 = vector.load %arg4[%c2_134, %c0_135, %c256_136] : memref<15x512x512xbf16, #tpu.memory_space<vmem>>, vector<1x512x256xbf16>
    %164 = vector.shape_cast %163 : vector<1x512x256xbf16> to vector<512x256xbf16>
    %cst_137 = arith.constant dense<0.000000e+00> : vector<16x256xf32>
    %165 = tpu.matmul %162, %164, %cst_137 {dimension_numbers = #tpu.dot_dimension_numbers<[1], [0], [0], [1], [0, 0, 1, 1], [], []>} : vector<16x512xbf16>, vector<512x256xbf16>, vector<16x256xf32> -> vector<16x256xf32>
    %166 = arith.addf %161, %165 : vector<16x256xf32>
    %c0_138 = arith.constant 0 : index
    %c0_139 = arith.constant 0 : index
    %c256_140 = arith.constant 256 : index
    %167 = vector.load %arg5[%c0_138, %c0_139, %c256_140] : memref<3x1x512xf32, #tpu.memory_space<vmem>>, vector<1x1x256xf32>
    %168 = vector.shape_cast %167 : vector<1x1x256xf32> to vector<1x256xf32>
    %169 = vector.broadcast %168 : vector<1x256xf32> to vector<16x256xf32>
    %170 = arith.addf %166, %169 : vector<16x256xf32>
    %171 = arith.maximumf %152, %170 : vector<16x256xf32>
    %c6_141 = arith.constant 6 : index
    %c0_142 = arith.constant 0 : index
    %172 = vector.load %arg8[%c6_141, %c0_142] : memref<32x512xbf16, #tpu.memory_space<vmem>>, vector<16x512xbf16>
    %c3_143 = arith.constant 3 : index
    %c0_144 = arith.constant 0 : index
    %c256_145 = arith.constant 256 : index
    %173 = vector.load %arg4[%c3_143, %c0_144, %c256_145] : memref<15x512x512xbf16, #tpu.memory_space<vmem>>, vector<1x512x256xbf16>
    %174 = vector.shape_cast %173 : vector<1x512x256xbf16> to vector<512x256xbf16>
    %cst_146 = arith.constant dense<0.000000e+00> : vector<16x256xf32>
    %175 = tpu.matmul %172, %174, %cst_146 {dimension_numbers = #tpu.dot_dimension_numbers<[1], [0], [0], [1], [0, 0, 1, 1], [], []>} : vector<16x512xbf16>, vector<512x256xbf16>, vector<16x256xf32> -> vector<16x256xf32>
    %c7_147 = arith.constant 7 : index
    %c0_148 = arith.constant 0 : index
    %176 = vector.load %arg8[%c7_147, %c0_148] : memref<32x512xbf16, #tpu.memory_space<vmem>>, vector<16x512xbf16>
    %c4_149 = arith.constant 4 : index
    %c0_150 = arith.constant 0 : index
    %c256_151 = arith.constant 256 : index
    %177 = vector.load %arg4[%c4_149, %c0_150, %c256_151] : memref<15x512x512xbf16, #tpu.memory_space<vmem>>, vector<1x512x256xbf16>
    %178 = vector.shape_cast %177 : vector<1x512x256xbf16> to vector<512x256xbf16>
    %cst_152 = arith.constant dense<0.000000e+00> : vector<16x256xf32>
    %179 = tpu.matmul %176, %178, %cst_152 {dimension_numbers = #tpu.dot_dimension_numbers<[1], [0], [0], [1], [0, 0, 1, 1], [], []>} : vector<16x512xbf16>, vector<512x256xbf16>, vector<16x256xf32> -> vector<16x256xf32>
    %180 = arith.addf %175, %179 : vector<16x256xf32>
    %c8_153 = arith.constant 8 : index
    %c0_154 = arith.constant 0 : index
    %181 = vector.load %arg8[%c8_153, %c0_154] : memref<32x512xbf16, #tpu.memory_space<vmem>>, vector<16x512xbf16>
    %c5_155 = arith.constant 5 : index
    %c0_156 = arith.constant 0 : index
    %c256_157 = arith.constant 256 : index
    %182 = vector.load %arg4[%c5_155, %c0_156, %c256_157] : memref<15x512x512xbf16, #tpu.memory_space<vmem>>, vector<1x512x256xbf16>
    %183 = vector.shape_cast %182 : vector<1x512x256xbf16> to vector<512x256xbf16>
    %cst_158 = arith.constant dense<0.000000e+00> : vector<16x256xf32>
    %184 = tpu.matmul %181, %183, %cst_158 {dimension_numbers = #tpu.dot_dimension_numbers<[1], [0], [0], [1], [0, 0, 1, 1], [], []>} : vector<16x512xbf16>, vector<512x256xbf16>, vector<16x256xf32> -> vector<16x256xf32>
    %185 = arith.addf %180, %184 : vector<16x256xf32>
    %c9_159 = arith.constant 9 : index
    %c0_160 = arith.constant 0 : index
    %186 = vector.load %arg8[%c9_159, %c0_160] : memref<32x512xbf16, #tpu.memory_space<vmem>>, vector<16x512xbf16>
    %c6_161 = arith.constant 6 : index
    %c0_162 = arith.constant 0 : index
    %c256_163 = arith.constant 256 : index
    %187 = vector.load %arg4[%c6_161, %c0_162, %c256_163] : memref<15x512x512xbf16, #tpu.memory_space<vmem>>, vector<1x512x256xbf16>
    %188 = vector.shape_cast %187 : vector<1x512x256xbf16> to vector<512x256xbf16>
    %cst_164 = arith.constant dense<0.000000e+00> : vector<16x256xf32>
    %189 = tpu.matmul %186, %188, %cst_164 {dimension_numbers = #tpu.dot_dimension_numbers<[1], [0], [0], [1], [0, 0, 1, 1], [], []>} : vector<16x512xbf16>, vector<512x256xbf16>, vector<16x256xf32> -> vector<16x256xf32>
    %190 = arith.addf %185, %189 : vector<16x256xf32>
    %c10_165 = arith.constant 10 : index
    %c0_166 = arith.constant 0 : index
    %191 = vector.load %arg8[%c10_165, %c0_166] : memref<32x512xbf16, #tpu.memory_space<vmem>>, vector<16x512xbf16>
    %c7_167 = arith.constant 7 : index
    %c0_168 = arith.constant 0 : index
    %c256_169 = arith.constant 256 : index
    %192 = vector.load %arg4[%c7_167, %c0_168, %c256_169] : memref<15x512x512xbf16, #tpu.memory_space<vmem>>, vector<1x512x256xbf16>
    %193 = vector.shape_cast %192 : vector<1x512x256xbf16> to vector<512x256xbf16>
    %cst_170 = arith.constant dense<0.000000e+00> : vector<16x256xf32>
    %194 = tpu.matmul %191, %193, %cst_170 {dimension_numbers = #tpu.dot_dimension_numbers<[1], [0], [0], [1], [0, 0, 1, 1], [], []>} : vector<16x512xbf16>, vector<512x256xbf16>, vector<16x256xf32> -> vector<16x256xf32>
    %195 = arith.addf %190, %194 : vector<16x256xf32>
    %c1_171 = arith.constant 1 : index
    %c0_172 = arith.constant 0 : index
    %c256_173 = arith.constant 256 : index
    %196 = vector.load %arg5[%c1_171, %c0_172, %c256_173] : memref<3x1x512xf32, #tpu.memory_space<vmem>>, vector<1x1x256xf32>
    %197 = vector.shape_cast %196 : vector<1x1x256xf32> to vector<1x256xf32>
    %198 = vector.broadcast %197 : vector<1x256xf32> to vector<16x256xf32>
    %199 = arith.addf %195, %198 : vector<16x256xf32>
    %200 = arith.maximumf %171, %199 : vector<16x256xf32>
    %c5_174 = arith.constant 5 : index
    %c0_175 = arith.constant 0 : index
    %201 = vector.load %arg8[%c5_174, %c0_175] : memref<32x512xbf16, #tpu.memory_space<vmem>>, vector<16x512xbf16>
    %c8_176 = arith.constant 8 : index
    %c0_177 = arith.constant 0 : index
    %c256_178 = arith.constant 256 : index
    %202 = vector.load %arg4[%c8_176, %c0_177, %c256_178] : memref<15x512x512xbf16, #tpu.memory_space<vmem>>, vector<1x512x256xbf16>
    %203 = vector.shape_cast %202 : vector<1x512x256xbf16> to vector<512x256xbf16>
    %cst_179 = arith.constant dense<0.000000e+00> : vector<16x256xf32>
    %204 = tpu.matmul %201, %203, %cst_179 {dimension_numbers = #tpu.dot_dimension_numbers<[1], [0], [0], [1], [0, 0, 1, 1], [], []>} : vector<16x512xbf16>, vector<512x256xbf16>, vector<16x256xf32> -> vector<16x256xf32>
    %c6_180 = arith.constant 6 : index
    %c0_181 = arith.constant 0 : index
    %205 = vector.load %arg8[%c6_180, %c0_181] : memref<32x512xbf16, #tpu.memory_space<vmem>>, vector<16x512xbf16>
    %c9_182 = arith.constant 9 : index
    %c0_183 = arith.constant 0 : index
    %c256_184 = arith.constant 256 : index
    %206 = vector.load %arg4[%c9_182, %c0_183, %c256_184] : memref<15x512x512xbf16, #tpu.memory_space<vmem>>, vector<1x512x256xbf16>
    %207 = vector.shape_cast %206 : vector<1x512x256xbf16> to vector<512x256xbf16>
    %cst_185 = arith.constant dense<0.000000e+00> : vector<16x256xf32>
    %208 = tpu.matmul %205, %207, %cst_185 {dimension_numbers = #tpu.dot_dimension_numbers<[1], [0], [0], [1], [0, 0, 1, 1], [], []>} : vector<16x512xbf16>, vector<512x256xbf16>, vector<16x256xf32> -> vector<16x256xf32>
    %209 = arith.addf %204, %208 : vector<16x256xf32>
    %c7_186 = arith.constant 7 : index
    %c0_187 = arith.constant 0 : index
    %210 = vector.load %arg8[%c7_186, %c0_187] : memref<32x512xbf16, #tpu.memory_space<vmem>>, vector<16x512xbf16>
    %c10_188 = arith.constant 10 : index
    %c0_189 = arith.constant 0 : index
    %c256_190 = arith.constant 256 : index
    %211 = vector.load %arg4[%c10_188, %c0_189, %c256_190] : memref<15x512x512xbf16, #tpu.memory_space<vmem>>, vector<1x512x256xbf16>
    %212 = vector.shape_cast %211 : vector<1x512x256xbf16> to vector<512x256xbf16>
    %cst_191 = arith.constant dense<0.000000e+00> : vector<16x256xf32>
    %213 = tpu.matmul %210, %212, %cst_191 {dimension_numbers = #tpu.dot_dimension_numbers<[1], [0], [0], [1], [0, 0, 1, 1], [], []>} : vector<16x512xbf16>, vector<512x256xbf16>, vector<16x256xf32> -> vector<16x256xf32>
    %214 = arith.addf %209, %213 : vector<16x256xf32>
    %c8_192 = arith.constant 8 : index
    %c0_193 = arith.constant 0 : index
    %215 = vector.load %arg8[%c8_192, %c0_193] : memref<32x512xbf16, #tpu.memory_space<vmem>>, vector<16x512xbf16>
    %c11_194 = arith.constant 11 : index
    %c0_195 = arith.constant 0 : index
    %c256_196 = arith.constant 256 : index
    %216 = vector.load %arg4[%c11_194, %c0_195, %c256_196] : memref<15x512x512xbf16, #tpu.memory_space<vmem>>, vector<1x512x256xbf16>
    %217 = vector.shape_cast %216 : vector<1x512x256xbf16> to vector<512x256xbf16>
    %cst_197 = arith.constant dense<0.000000e+00> : vector<16x256xf32>
    %218 = tpu.matmul %215, %217, %cst_197 {dimension_numbers = #tpu.dot_dimension_numbers<[1], [0], [0], [1], [0, 0, 1, 1], [], []>} : vector<16x512xbf16>, vector<512x256xbf16>, vector<16x256xf32> -> vector<16x256xf32>
    %219 = arith.addf %214, %218 : vector<16x256xf32>
    %c9_198 = arith.constant 9 : index
    %c0_199 = arith.constant 0 : index
    %220 = vector.load %arg8[%c9_198, %c0_199] : memref<32x512xbf16, #tpu.memory_space<vmem>>, vector<16x512xbf16>
    %c12_200 = arith.constant 12 : index
    %c0_201 = arith.constant 0 : index
    %c256_202 = arith.constant 256 : index
    %221 = vector.load %arg4[%c12_200, %c0_201, %c256_202] : memref<15x512x512xbf16, #tpu.memory_space<vmem>>, vector<1x512x256xbf16>
    %222 = vector.shape_cast %221 : vector<1x512x256xbf16> to vector<512x256xbf16>
    %cst_203 = arith.constant dense<0.000000e+00> : vector<16x256xf32>
    %223 = tpu.matmul %220, %222, %cst_203 {dimension_numbers = #tpu.dot_dimension_numbers<[1], [0], [0], [1], [0, 0, 1, 1], [], []>} : vector<16x512xbf16>, vector<512x256xbf16>, vector<16x256xf32> -> vector<16x256xf32>
    %224 = arith.addf %219, %223 : vector<16x256xf32>
    %c10_204 = arith.constant 10 : index
    %c0_205 = arith.constant 0 : index
    %225 = vector.load %arg8[%c10_204, %c0_205] : memref<32x512xbf16, #tpu.memory_space<vmem>>, vector<16x512xbf16>
    %c13_206 = arith.constant 13 : index
    %c0_207 = arith.constant 0 : index
    %c256_208 = arith.constant 256 : index
    %226 = vector.load %arg4[%c13_206, %c0_207, %c256_208] : memref<15x512x512xbf16, #tpu.memory_space<vmem>>, vector<1x512x256xbf16>
    %227 = vector.shape_cast %226 : vector<1x512x256xbf16> to vector<512x256xbf16>
    %cst_209 = arith.constant dense<0.000000e+00> : vector<16x256xf32>
    %228 = tpu.matmul %225, %227, %cst_209 {dimension_numbers = #tpu.dot_dimension_numbers<[1], [0], [0], [1], [0, 0, 1, 1], [], []>} : vector<16x512xbf16>, vector<512x256xbf16>, vector<16x256xf32> -> vector<16x256xf32>
    %229 = arith.addf %224, %228 : vector<16x256xf32>
    %c11_210 = arith.constant 11 : index
    %c0_211 = arith.constant 0 : index
    %230 = vector.load %arg8[%c11_210, %c0_211] : memref<32x512xbf16, #tpu.memory_space<vmem>>, vector<16x512xbf16>
    %c14_212 = arith.constant 14 : index
    %c0_213 = arith.constant 0 : index
    %c256_214 = arith.constant 256 : index
    %231 = vector.load %arg4[%c14_212, %c0_213, %c256_214] : memref<15x512x512xbf16, #tpu.memory_space<vmem>>, vector<1x512x256xbf16>
    %232 = vector.shape_cast %231 : vector<1x512x256xbf16> to vector<512x256xbf16>
    %cst_215 = arith.constant dense<0.000000e+00> : vector<16x256xf32>
    %233 = tpu.matmul %230, %232, %cst_215 {dimension_numbers = #tpu.dot_dimension_numbers<[1], [0], [0], [1], [0, 0, 1, 1], [], []>} : vector<16x512xbf16>, vector<512x256xbf16>, vector<16x256xf32> -> vector<16x256xf32>
    %234 = arith.addf %229, %233 : vector<16x256xf32>
    %c2_216 = arith.constant 2 : index
    %c0_217 = arith.constant 0 : index
    %c256_218 = arith.constant 256 : index
    %235 = vector.load %arg5[%c2_216, %c0_217, %c256_218] : memref<3x1x512xf32, #tpu.memory_space<vmem>>, vector<1x1x256xf32>
    %236 = vector.shape_cast %235 : vector<1x1x256xf32> to vector<1x256xf32>
    %237 = vector.broadcast %236 : vector<1x256xf32> to vector<16x256xf32>
    %238 = arith.addf %234, %237 : vector<16x256xf32>
    %239 = arith.maximumf %200, %238 : vector<16x256xf32>
    %c0_219 = arith.constant 0 : index
    %c0_220 = arith.constant 0 : index
    %c256_221 = arith.constant 256 : index
    %240 = vector.load %arg6[%c0_219, %c0_220, %c256_221] : memref<1x16x512xf32, #tpu.memory_space<vmem>>, vector<1x16x256xf32>
    %241 = vector.shape_cast %240 : vector<1x16x256xf32> to vector<16x256xf32>
    %242 = vector.shape_cast %239 : vector<16x256xf32> to vector<1x16x256xf32>
    tpu.vector_store %arg6[%c0_219, %c0_220, %c256_221], %242 {strides = array<i32>} : memref<1x16x512xf32, #tpu.memory_space<vmem>>, vector<1x16x256xf32>,
    return
  }
  func.func @transform_1(%arg0: i32, %arg1: i32, %arg2: i32) -> (i32, i32, i32) {
    %c0_i32 = arith.constant 0 : i32
    %c0_i32_0 = arith.constant 0 : i32
    %c0_i32_1 = arith.constant 0 : i32
    %c0_i32_2 = arith.constant 0 : i32
    return %c0_i32, %c0_i32_0, %c0_i32_1 : i32, i32, i32
  }
  func.func @transform_2(%arg0: i32, %arg1: i32, %arg2: i32) -> (i32, i32, i32) {
    %c0_i32 = arith.constant 0 : i32
    %c0_i32_0 = arith.constant 0 : i32
    %c0_i32_1 = arith.constant 0 : i32
    %c0_i32_2 = arith.constant 0 : i32
    return %c0_i32, %c0_i32_0, %c0_i32_1 : i32, i32, i32
  }
  func.func @transform_3(%arg0: i32, %arg1: i32, %arg2: i32) -> (i32, i32, i32) {
    %c1_i32 = arith.constant 1 : i32
    %0 = arith.muli %arg0, %c1_i32 : i32
    %1 = arith.addi %0, %arg2 : i32
    %c0_i32 = arith.constant 0 : i32
    %c0_i32_0 = arith.constant 0 : i32
    return %arg1, %1, %c0_i32 : i32, i32, i32
  }
}

</mosaic_0001>

<bundles_post_ra>
// kernel: timeconv_forward.1
= control target key start
LH: loop header
LB: loop body
LE: loop exit
PB: predicated region body
PF: predicated region fallthrough
CT: control target
= control target key end

     0   :  { %8 = vsyncpa [#allocation6], 0  ;;  %s21844_s0 = inlined_call_operand.hbm [shape: f32[2,16,512], index: 0, kind: input, shape index: {}]   ;;  %s21845_s1 = inlined_call_operand.hbm [shape: bf16[15,512,512], index: 1, kind: input, shape index: {}]   ;;  %s21846_s2 = inlined_call_operand.hbm [shape: f32[3,1,512], index: 2, kind: input, shape index: {}]   ;;  %s21847_s3 = inlined_call_operand.hbm [shape: f32[2,16,512], index: 3, kind: output, shape index: {}]  }
   0x1   :  { %9 = vsyncpa [#allocation9], 0 }
   0x2   :  { %10 = vsyncpa [#allocation7], 0 }
   0x3   :  { %12 = vsyncpa [#allocation7 + $0x1], 0  ;;  %s21185_s12 = smov 0   ;;  %s21187_s13 = smov 0  }
   0x4   :  { %s21189_s14 = smov 0   ;;  %s21191_s15 = smov 0  }
   0x5   :  { %s21193_s16 = smov 0   ;;  %s21195_s17 = smov 0  }
   0x6 LB: > { %s15826_s18 = sadd.s32 4294967295, %s21152_s17   ;;  %s15827_s19 = sadd.s32 4294967294, %s21152_s17   ;;  %s21152_s17 = sphi %s21195_s17, %s18_s17   ;;  %s21148_s16 = sphi %s21193_s16, %s21866_s16   ;;  %s21144_s15 = sphi %s21191_s15, %s21865_s15   ;;  %s21140_s14 = sphi %s21189_s14, %s21864_s14   ;;  %s21136_s13 = sphi %s21187_s13, %s21863_s13   ;;  %s21132_s12 = sphi %s21185_s12, %s21862_s12  }
   0x7   : > { %s33_s20 = sadd.s32 1, %s21148_s16  ;;  %s90_s21 = sadd.s32 1, %s21140_s14 }
   0x8   : > { %p35_p0 = scmp.ge.s32.totalorder %s33_s20, 2  ;;  %p100_p1 = scmp.ne.s32.totalorder %s21140_s14, %s21136_s13 }
   0x9   : > { %p101_p2 = scmp.eq.s32.totalorder %s15826_s18, 1  ;;  %p106_p3 = scmp.ne.s32.totalorder %s21136_s13, %s21132_s12 }
   0xa   : > { %s21868_s20 = smov (%p35_p0, %s33_s20), 0  ;;  %p107_p5 = scmp.eq.s32.totalorder %s15827_s19, 1 }
   0xb   : > { %p21225_p4 = por %p101_p2, %p100_p1  ;;  %s85_s23 = ssub.s32 %s21148_s16, %s21868_s20 }
   0xc   : > { %p15828_p6 = scmp.ge.s32.totalorder %s21152_s17, 1  ;;  %p88_p7 = scmp.eq.s32.totalorder %s85_s23, 0 }
   0xd   : > { %s21852_s22 = scalar_select %p21225_p4, 1, 0 }
   0xe   : > { %p21232_p8 = por %p107_p5, %p106_p3  ;;  %p114_p9 = scmp.lt.s32.totalorder %s21152_s17, 3 }
   0xf   : > { %s21238_s25 = scalar_select %p88_p7, %s21140_s14, %s90_s21  }
  0x10   : > { %s21853_s24 = scalar_select %p21232_p8, 1, 0 }
  0x11   : > { %p21240_p10 = pnand %p15828_p6, %p114_p9  ;;  %p21244_p11 = scmp.eq.s32.totalorder %s15826_s18, 0 }
  0x12   : > { %s21154_s28 = smov [#allocation5]   ;;  %s21155_s4 = smov [#allocation8]  }
  0x13   : > { %s21854_s26 = scalar_select %p21240_p10, 1, 0 }
  0x14   : > { %s21855_s27 = scalar_select %p21244_p11, 1, 0 }
  0x15   : > { %p18014_p12 = pneg %p21240_p10  ;;  %s126_s29 = sshll.u32 %s21154_s28, 4  ;;  %s127_s29 = int_to_ptr.vmem [resolvable:$true] %s126_s29 }
  0x16   : > { %s139_s5 = sshll.u32 %s21155_s4, 4  ;;  %s20984_s8 = scalar_lea.hbm %s21845_s1, 245760  ;;  %s21256_s5 = int_to_ptr.vmem [resolvable:$true] %s139_s5 }
  0x17   : > { %p21252_p13 = pnand %p21244_p11, %p18014_p12  ;;  %p20985_p0 = scmp.ne.s32.totalorder %s21845_s1, %s20984_s8 }
  0x18   : > { %p20991_p5 = scmp.lt.u32.totalorder %s20984_s8, %s21845_s1 }
  0x19   : > { %p20986_p1 = pneg %p21252_p13 }
  0x1b   : > { %p20987_p2 = pnand %p20986_p1, %p20985_p0 }
  0x1d   : > { %p20988_p3 = pneg %p20987_p2 }
  0x1f   : > { %p20993_p6 = pnand %p20991_p5, %p20988_p3 }
  0x21   : > { %20996 = shalt.err (!%p20993_p6)
}
  0x22   : > { %s20997_s19 = scalar_lea.vmem %s127_s29, 245760  ;;  %p21005_p8 = scmp.lt.s32.totalorder %s127_s29, %s127_s29 }
  0x23   : > { %p20998_p7 = scmp.ne.s32.totalorder %s127_s29, %s20997_s19  ;;  %p21006_p4 = scmp.lt.s32.totalorder %s20997_s19, %s20997_s19 }
  0x25   : > { %p21000_p9 = pnand %p20998_p7, %p20986_p1  ;;  %p21007_p11 = por %p21006_p4, %p21005_p8 }
  0x27   : > { %p21001_p12 = pneg %p21000_p9 }
  0x29   : > { %p21008_p10 = pnand %p21007_p11, %p21001_p12 }
  0x2b   : > { %21011 = shalt.err (!%p21008_p10)
}
  0x2c   : > { %s21156_s21 = smov 256   ;;  %s21157_s23 = smov 16  }
  0x2d   : > { %18017 = dma.hbm_to_vmem [thread:$0]  (!%p21252_p13), %s21845_s1, 245760, %s127_s29, [#allocation6], %s21156_s21, %s21156_s21, %s21157_s23  }
  0x2e   : > { %s21012_s8 = scalar_lea.hbm %s21846_s2, 192 }
  0x2f   : > { %p21013_p0 = scmp.ne.s32.totalorder %s21846_s2, %s21012_s8  ;;  %p21019_p10 = scmp.lt.u32.totalorder %s21012_s8, %s21846_s2 }
  0x31   : > { %p21015_p4 = pnand %p21013_p0, %p20986_p1 }
  0x33   : > { %p21016_p8 = pneg %p21015_p4 }
  0x35   : > { %p21021_p11 = pnand %p21019_p10, %p21016_p8 }
  0x37   : > { %21024 = shalt.err (!%p21021_p11)
}
  0x38   : > { %s21025_s29 = scalar_lea.vmem %s21256_s5, 192  ;;  %p21033_p6 = scmp.lt.s32.totalorder %s21256_s5, %s21256_s5 }
  0x39   : > { %p21026_p2 = scmp.ne.s32.totalorder %s21256_s5, %s21025_s29  ;;  %p21034_p7 = scmp.lt.s32.totalorder %s21025_s29, %s21025_s29 }
  0x3b   : > { %p21028_p3 = pnand %p21026_p2, %p20986_p1  ;;  %p21035_p9 = por %p21034_p7, %p21033_p6 }
  0x3d   : > { %p21029_p5 = pneg %p21028_p3 }
  0x3f   : > { %p21036_p12 = pnand %p21035_p9, %p21029_p5 }
  0x41   : > { %21039 = shalt.err (!%p21036_p12)
}
  0x42   : > { %s21158_s19 = smov 64   ;;  %s21159_s21 = smov 4  }
  0x43   : > { %18020 = dma.hbm_to_vmem [thread:$0]  (!%p21252_p13), %s21846_s2, 192, %s21256_s5, [#allocation9], %s21158_s19, %s21158_s19, %s21159_s21  }
  0x44   : > { %p21857_p0 = scmp.ne.s32.totalorder %s21854_s26, 0 }
  0x45   : > { %p21858_p1 = scmp.ne.s32.totalorder (!%p21857_p0), %s21855_s27, 0 }
  0x46   : > { %155 = sbr.rel (%p21857_p0) target bundleno = 2263 (0x8d7), region = 28 }
  0x4d   : > { %21117 = dma.done.wait (%p21858_p1), [#allocation6], 245760  }
  0x4e   : > { %21119 = vsyncadd (%p21858_p1), [#allocation6], 4294721536 }
  0x4f   : > { %21121 = dma.done.wait (%p21858_p1), [#allocation9], 192  }
  0x50   : > { %21123 = vsyncadd (%p21858_p1), [#allocation9], 4294967104  ;;  %s173_s30 = sand.u32 1, %s21136_s13   ;;  %s17778_s5 = sshll.u32 %s21144_s15, 10 }
  0x51   : > { %s15834_s26 = sshll.u32 %s173_s30, 6  ;;  %s204_s7 = scalar_lea.hbm %s21844_s0, %s17778_s5 }
  0x52   : > { %s21160_s8 = smov [#allocation2]   ;;  %s21040_s11 = scalar_lea.hbm %s204_s7, 1024 }
  0x53   : > { %s15702_s9 = scalar_lea.vmem %s21160_s8, 32  ;;  %p21041_p13 = scmp.ne.s32.totalorder %s204_s7, %s21040_s11 }
  0x54   : > { %s218_s10 = sshll.u32 %s15702_s9, 4  ;;  %s21042_s29 = scalar_lea.hbm %s21844_s0, 2048  ;;  %s219_s10 = int_to_ptr.vmem [resolvable:$true] %s218_s10 }
  0x55   : > { %p21043_p4 = scmp.lt.u32.totalorder %s204_s7, %s21844_s0  ;;  %p21044_p8 = scmp.lt.u32.totalorder %s21042_s29, %s21040_s11 }
  0x56   : > { %p21046_p11 = scmp.lt.u32.totalorder %s21040_s11, %s204_s7 }
  0x57   : > { %p21045_p10 = por %p21044_p8, %p21043_p4 }
  0x59   : > { %p21047_p2 = por %p21046_p11, %p21045_p10 }
  0x5b   : > { %p21048_p3 = pnand %p21047_p2, %p21041_p13 }
  0x5d   : > { %21051 = shalt.err (!%p21048_p3)  }
  0x5e   : > { %s21052_s23 = scalar_lea.vmem %s219_s10, 1024  ;;  %s21054_s28 = sshll.u32 %s21160_s8, 4  ;;  %s21055_s28 = int_to_ptr.vmem [resolvable:$false] %s21054_s28 }
  0x5f   : > { %p21053_p5 = scmp.ne.s32.totalorder %s219_s10, %s21052_s23  ;;  %s21056_s4 = scalar_lea.vmem %s21055_s28, 4096 }
  0x60   : > { %p21057_p6 = scmp.lt.s32.totalorder %s219_s10, %s21055_s28  ;;  %p21058_p7 = scmp.lt.s32.totalorder %s21056_s4, %s21052_s23 }
  0x62   : > { %p21059_p9 = por %p21058_p7, %p21057_p6 }
  0x64   : > { %p21060_p12 = pnand %p21059_p9, %p21053_p5 }
  0x66   : > { %21063 = shalt.err (!%p21060_p12)  }
  0x67   : > { %221 = dma.hbm_to_vmem [thread:$0]  %s204_s7, 1024, %s219_s10, [#allocation4] }
  0x68   : > { %s21330_s6 = scalar_lea.vmem [#allocation10], %s15834_s26 }
  0x69   : > { %21124 = dma.done.wait [#allocation4], 1024 }
  0x6a   : > { %21125 = vsyncadd [#allocation4], 4294966272  ;;  %v21161_v0 = vmov 0.0   ;;  %v18088_v1 = vld [vmem:[#allocation5 + $0x404] ss:$16 sps:$4 sm:$0xff]   ;;  %v405_v47 = vld [vmem:[#allocation2 + $0x28] sm:$0xff]  ;;  %s21789_s9 = scalar_lea.hbm %s21847_s3, %s17778_s5 }
  0x6b   : > { %390 = vst [vmem:[#allocation2 + $0x8] sm:$0xff] %v21161_v0  ;;  %389 = vst [vmem:[#allocation2] sm:$0xff] %v21161_v0  ;;  %v18090_v2 = vld [vmem:[#allocation5 + $0x804] ss:$16 sps:$4 sm:$0xff]   ;;  %951 = vmatprep.subr.bf16.mxu1 %v18088_v1  ;;  %v18092_v3 = vld [vmem:[#allocation5 + $0x400] ss:$16 sps:$4 sm:$0xff]   ;;  %v409_v48 = vpack.c.bf16 %v405_v47, %v21161_v0 }
  0x6c   : > { %391 = vst [vmem:[#allocation2 + $0x10] sm:$0xff] %v21161_v0  ;;  %392 = vst [vmem:[#allocation2 + $0x18] sm:$0xff] %v21161_v0  ;;  %v18093_v4 = vld [vmem:[#allocation5 + $0x800] ss:$16 sps:$4 sm:$0xff]   ;;  %1978 = vmatprep.subr.bf16.mxu0 %v18090_v2  ;;  %v18094_v5 = vld [vmem:[#allocation5 + $0x424] ss:$16 sps:$4 sm:$0xff]   ;;  %952 = vmatpush1.bf16.msra.mxu1 %v18092_v3 }
  0x6d   : > { %1979 = vmatpush1.bf16.msra.mxu0 %v18093_v4  ;;  %v18096_v6 = vld [vmem:[#allocation5 + $0x824] ss:$16 sps:$4 sm:$0xff]   ;;  %v18098_v7 = vld [vmem:[#allocation5 + $0x420] ss:$16 sps:$4 sm:$0xff]   ;;  %953 = vmatprep.subr.bf16.mxu1 %v18094_v5  ;;  %v417_v49 = vld [vmem:[#allocation2 + $0x48] sm:$0xff]  ;;  %413 = vst [vmem:[#allocation3 + $0x8] sm:$0xff] %v409_v48 }
  0x6e   : > { %v18099_v8 = vld [vmem:[#allocation5 + $0x820] ss:$16 sps:$4 sm:$0xff]   ;;  %1980 = vmatprep.subr.bf16.mxu0 %v18096_v6  ;;  %v18100_v9 = vld [vmem:[#allocation5 + $0x444] ss:$16 sps:$4 sm:$0xff]   ;;  %v425_v52 = vpack.c.bf16 %v21161_v0, %v417_v49  ;;  %vm614_vm0 = vcmask 1043456   ;;  %vm2636_vm2 = vcmask 1044480  }
  0x6f   : > { %v18102_v10 = vld [vmem:[#allocation5 + $0x844] ss:$16 sps:$4 sm:$0xff]   ;;  %v18104_v11 = vld [vmem:[#allocation5 + $0x440] ss:$16 sps:$4 sm:$0xff]   ;;  %vm1585_vm1 = vsmask.f32 3328 }
  0x70   : > { %v18105_v12 = vld [vmem:[#allocation5 + $0x840] ss:$16 sps:$4 sm:$0xff]   ;;  %954 = vmatpush1.bf16.msra.mxu1 %v18098_v7  ;;  %v18106_v13 = vld [vmem:[#allocation5 + $0x464] ss:$16 sps:$4 sm:$0xff]   ;;  %429 = vst [vmem:[#allocation3 + $0x28] sm:$0xff] %v425_v52  ;;  %vm4086_vm5 = vcmask 1042432  }
  0x71   : > { %1981 = vmatpush1.bf16.msra.mxu0 %v18099_v8  ;;  %955 = vmatprep.subr.bf16.mxu1 %v18100_v9  ;;  %v18108_v14 = vld [vmem:[#allocation5 + $0x864] ss:$16 sps:$4 sm:$0xff]   ;;  %v18110_v15 = vld [vmem:[#allocation5 + $0x460] ss:$16 sps:$4 sm:$0xff]   ;;  %vm1037_vm3 = vsmask.f32 4352 }
  0x72   : > { %1982 = vmatprep.subr.bf16.mxu0 %v18102_v10  ;;  %v18111_v16 = vld [vmem:[#allocation5 + $0x860] ss:$16 sps:$4 sm:$0xff]   ;;  %v18112_v17 = vld [vmem:[#allocation5 + $0x484] ss:$16 sps:$4 sm:$0xff]   ;;  %vm5074_vm4 = vsmask.f32 5376 }
  0x73   : > { %v18114_v18 = vld [vmem:[#allocation5 + $0x884] ss:$16 sps:$4 sm:$0xff]   ;;  %v18116_v19 = vld [vmem:[#allocation5 + $0x480] ss:$16 sps:$4 sm:$0xff]   ;;  %vm7522_vm6 = vsmask.f32 2304 }
  0x74   : > { %956 = vmatpush1.bf16.msra.mxu1 %v18104_v11  ;;  %v18117_v20 = vld [vmem:[#allocation5 + $0x880] ss:$16 sps:$4 sm:$0xff]   ;;  %v18118_v21 = vld [vmem:[#allocation5 + $0x4a4] ss:$16 sps:$4 sm:$0xff]   ;;  %v538_v4 = vld [vmem:[#allocation3 + $0x8] sm:$0xf0] }
  0x75   : > { %1983 = vmatpush1.bf16.msra.mxu0 %v18105_v12  ;;  %957 = vmatprep.subr.bf16.mxu1 %v18106_v13  ;;  %v18120_v22 = vld [vmem:[#allocation5 + $0x8a4] ss:$16 sps:$4 sm:$0xff]   ;;  %v18122_v23 = vld [vmem:[#allocation5 + $0x4a0] ss:$16 sps:$4 sm:$0xff]   ;;  %v618_v6 = vrot.slane %v538_v4, 4  ;;  %v1604_v8 = vshrl.u32 %v538_v4, 16 }
  0x76   : > { %1984 = vmatprep.subr.bf16.mxu0 %v18108_v14  ;;  %v18123_v24 = vld [vmem:[#allocation5 + $0x8a0] ss:$16 sps:$4 sm:$0xff]   ;;  %v18124_v25 = vld [vmem:[#allocation5 + $0x4c4] ss:$16 sps:$4 sm:$0xff]   ;;  %v1607_v12 = vshll.u32 %v538_v4, 16  ;;  %vm446_vm7 = vcmask 1040384  }
  0x77   : > { %v18126_v26 = vld [vmem:[#allocation5 + $0x8c4] ss:$16 sps:$4 sm:$0xff]   ;;  %v18128_v27 = vld [vmem:[#allocation5 + $0x4c0] ss:$16 sps:$4 sm:$0xff]   ;;  %v21340_v5 = vld [vmem:[#allocation3 + $0x28] sm:$0xf] }
  0x78   : > { %958 = vmatpush1.bf16.msra.mxu1 %v18110_v15  ;;  %v18129_v28 = vld [vmem:[#allocation5 + $0x8c0] ss:$16 sps:$4 sm:$0xff]   ;;  %v18130_v29 = vld [vmem:[#allocation5 + $0x4e4] ss:$16 sps:$4 sm:$0xff]   ;;  %v1517_v7 = vld [vmem:[#allocation3 + $0x28] sm:$0x1f] }
  0x79   : > { %1985 = vmatpush1.bf16.msra.mxu0 %v18111_v16  ;;  %959 = vmatprep.subr.bf16.mxu1 %v18112_v17  ;;  %v18132_v30 = vld [vmem:[#allocation5 + $0x8e4] ss:$16 sps:$4 sm:$0xff]   ;;  %v18134_v31 = vld [vmem:[#allocation5 + $0x4e0] ss:$16 sps:$4 sm:$0xff]   ;;  %v619_v11 = vrot.slane %v21340_v5, 4  ;;  %v1612_v13 = vshrl.u32 %v1517_v7, 16 }
  0x7a   : > { %1986 = vmatprep.subr.bf16.mxu0 %v18114_v18  ;;  %v18135_v32 = vld [vmem:[#allocation5 + $0x8e0] ss:$16 sps:$4 sm:$0xff]   ;;  %v18136_v33 = vld [vmem:[#allocation5 + $0x504] ss:$16 sps:$4 sm:$0xff]   ;;  %v1615_v14 = vshll.u32 %v1517_v7, 16  ;;  %v1606_v17 = vrot.slane %v1604_v8, 4 }
  0x7b   : > { %v18138_v34 = vld [vmem:[#allocation5 + $0x904] ss:$16 sps:$4 sm:$0xff]   ;;  %v18140_v35 = vld [vmem:[#allocation5 + $0x500] ss:$16 sps:$4 sm:$0xff]   ;;  %v21344_v18 = vsel %vm614_vm0, %v618_v6, %v619_v11  ;;  %s15622_s26 = sshll.u32 %s21330_s6, 4  ;;  %s21798_s10 = scalar_lea.sflag [#allocation7], %s173_s30  ;;  %s21792_s26 = int_to_ptr.vmem [resolvable:$true] %s15622_s26 }
  0x7c   : > { %960 = vmatpush1.bf16.msra.mxu1 %v18116_v19  ;;  %v18141_v36 = vld [vmem:[#allocation5 + $0x900] ss:$16 sps:$4 sm:$0xff]   ;;  %v18142_v37 = vld [vmem:[#allocation5 + $0x524] ss:$16 sps:$4 sm:$0xff]   ;;  %v1609_v19 = vrot.slane %v1607_v12, 5  ;;  %983 = vmatprep.mubr.bf16.mxu1 %v21344_v18  ;;  %s21064_s11 = scalar_lea.vmem %s21792_s26, 1024 }
  0x7d   : > { %1987 = vmatpush1.bf16.msra.mxu0 %v18117_v20  ;;  %961 = vmatprep.subr.bf16.mxu1 %v18118_v21  ;;  %v18144_v38 = vld [vmem:[#allocation5 + $0x924] ss:$16 sps:$4 sm:$0xff]   ;;  %v18146_v39 = vld [vmem:[#allocation5 + $0x520] ss:$16 sps:$4 sm:$0xff]   ;;  %v1614_v20 = vrot.slane %v1612_v13, 4  ;;  %v1617_v21 = vrot.slane %v1615_v14, 5  ;;  %p21065_p0 = scmp.ne.s32.totalorder %s21792_s26, %s21064_s11 }
  0x7e   : > { %1988 = vmatprep.subr.bf16.mxu0 %v18120_v22  ;;  %v18147_v40 = vld [vmem:[#allocation5 + $0x920] ss:$16 sps:$4 sm:$0xff]   ;;  %v18148_v41 = vld [vmem:[#allocation5 + $0x544] ss:$16 sps:$4 sm:$0xff]   ;;  %v407_v14 = vld [vmem:[#allocation2 + $0x38] sm:$0xff]  ;;  %p21860_p1 = scmp.ne.s32.totalorder %s21852_s22, 0 }
  0x7f   : > { %v18150_v42 = vld [vmem:[#allocation5 + $0x944] ss:$16 sps:$4 sm:$0xff]   ;;  %v18152_v43 = vld [vmem:[#allocation5 + $0x540] ss:$16 sps:$4 sm:$0xff]   ;;  %s21162_s15 = smov [#allocation10]  }
  0x80   : > { %962 = vmatpush1.bf16.msra.mxu1 %v18122_v23  ;;  %v18153_v44 = vld [vmem:[#allocation5 + $0x940] ss:$16 sps:$4 sm:$0xff]   ;;  %v18154_v45 = vld [vmem:[#allocation5 + $0x564] ss:$16 sps:$4 sm:$0xff]   ;;  %p21066_p13 = pnand %p21065_p0, %p21860_p1  ;;  %s21068_s5 = sshll.u32 %s21162_s15, 4  ;;  %s21069_s5 = int_to_ptr.vmem [resolvable:$false] %s21068_s5 }
  0x81   : > { %1989 = vmatpush1.bf16.msra.mxu0 %v18123_v24  ;;  %963 = vmatprep.subr.bf16.mxu1 %v18124_v25  ;;  %v18156_v46 = vld [vmem:[#allocation5 + $0x964] ss:$16 sps:$4 sm:$0xff]   ;;  %v18158_v50 = vld [vmem:[#allocation5 + $0x560] ss:$16 sps:$4 sm:$0xff]   ;;  %s21070_s27 = scalar_lea.vmem %s21069_s5, 2048  ;;  %p21071_p8 = scmp.lt.s32.totalorder %s21792_s26, %s21069_s5 }
  0x82   : > { %1990 = vmatprep.subr.bf16.mxu0 %v18126_v26  ;;  %v18159_v51 = vld [vmem:[#allocation5 + $0x960] ss:$16 sps:$4 sm:$0xff]   ;;  %v18160_v53 = vld [vmem:[#allocation5 + $0x584] ss:$16 sps:$4 sm:$0xff]   ;;  %v1610_v26 = vor.u32 %v1609_v19, %v1606_v17  ;;  %v411_v19 = vpack.c.bf16 %v407_v14, %v21161_v0  ;;  %p21067_p4 = pneg %p21066_p13  ;;  %p21072_p10 = scmp.lt.s32.totalorder %s21070_s27, %s21064_s11 }
  0x83   : > { %v18162_v54 = vld [vmem:[#allocation5 + $0x984] ss:$16 sps:$4 sm:$0xff]   ;;  %v18164_v57 = vld [vmem:[#allocation5 + $0x580] ss:$16 sps:$4 sm:$0xff]  }
  0x84   : > { %964 = vmatpush1.bf16.msra.mxu1 %v18128_v27  ;;  %v404_v55 = vld [vmem:[#allocation2 + $0x20] sm:$0xff]  ;;  %v1618_v27 = vor.u32 %v1617_v21, %v1614_v20  ;;  %v406_v21 = vld [vmem:[#allocation2 + $0x30] sm:$0xff]  ;;  %415 = vst [vmem:[#allocation3 + $0x18] sm:$0xff] %v411_v19  ;;  %p21073_p11 = por %p21072_p10, %p21071_p8 }
  0x85   : > { %1991 = vmatpush1.bf16.msra.mxu0 %v18129_v28  ;;  %965 = vmatprep.subr.bf16.mxu1 %v18130_v29  ;;  %v416_v56 = vld [vmem:[#allocation2 + $0x40] sm:$0xff]  ;;  %v408_v59 = vpack.c.bf16 %v404_v55, %v21161_v0 }
  0x86   : > { %1992 = vmatprep.subr.bf16.mxu0 %v18132_v30  ;;  %v18165_v58 = vld [vmem:[#allocation5 + $0x980] ss:$16 sps:$4 sm:$0xff]   ;;  %v424_v60 = vpack.c.bf16 %v21161_v0, %v416_v56  ;;  %v18166_v61 = vld [vmem:[#allocation5 + $0x5a4] ss:$16 sps:$4 sm:$0xff]   ;;  %p21074_p2 = pnand %p21073_p11, %p21067_p4 }
  0x87   : > { %v18168_v62 = vld [vmem:[#allocation5 + $0x9a4] ss:$16 sps:$4 sm:$0xff]   ;;  %412 = vst [vmem:[#allocation3] sm:$0xff] %v408_v59  ;;  %v18170_v63 = vld [vmem:[#allocation5 + $0x5a0] ss:$16 sps:$4 sm:$0xff]  }
  0x88   : > { %966 = vmatpush1.bf16.msra.mxu1 %v18134_v31  ;;  %428 = vst [vmem:[#allocation3 + $0x20] sm:$0xff] %v424_v60  ;;  %v18171_v1 = vld [vmem:[#allocation5 + $0x9a0] ss:$16 sps:$4 sm:$0xff]   ;;  %v18172_v2 = vld [vmem:[#allocation5 + $0x5c4] ss:$16 sps:$4 sm:$0xff]  }
  0x89   : > { %1993 = vmatpush1.bf16.msra.mxu0 %v18135_v32  ;;  %967 = vmatprep.subr.bf16.mxu1 %v18136_v33  ;;  %v18174_v3 = vld [vmem:[#allocation5 + $0x9c4] ss:$16 sps:$4 sm:$0xff]   ;;  %v18176_v9 = vld [vmem:[#allocation5 + $0x5c0] ss:$16 sps:$4 sm:$0xff]  }
  0x8a   : > { %1994 = vmatprep.subr.bf16.mxu0 %v18138_v34  ;;  %v18177_v10 = vld [vmem:[#allocation5 + $0x9c0] ss:$16 sps:$4 sm:$0xff]   ;;  %v18178_v15 = vld [vmem:[#allocation5 + $0x5e4] ss:$16 sps:$4 sm:$0xff]   ;;  %v21350_v34 = vsel %vm1585_vm1, %v1610_v26, %v1618_v27 }
  0x8b   : > { %v18180_v16 = vld [vmem:[#allocation5 + $0x9e4] ss:$16 sps:$4 sm:$0xff]   ;;  %v18182_v25 = vld [vmem:[#allocation5 + $0x5e0] ss:$16 sps:$4 sm:$0xff]   ;;  %2010 = vmatprep.mubr.bf16.mxu0 %v21350_v34 }
  0x8c   : > { %968 = vmatpush1.bf16.msra.mxu1 %v18140_v35  ;;  %v18183_v29 = vld [vmem:[#allocation5 + $0x9e0] ss:$16 sps:$4 sm:$0xff]   ;;  %v18186_v33 = vld [vmem:[#allocation5 + $0x604] ss:$16 sps:$4 sm:$0xff]  }
  0x8d   : > { %1995 = vmatpush1.bf16.msra.mxu0 %v18141_v36  ;;  %969 = vmatprep.subr.bf16.mxu1 %v18142_v37  ;;  %v18192_v48 = vld [vmem:[#allocation5 + $0x624] ss:$16 sps:$4 sm:$0xff]   ;;  %v18199_v55 = vld [vmem:[#allocation5 + $0xa40] ss:$16 sps:$4 sm:$0xff]  }
  0x8e   : > { %1996 = vmatprep.subr.bf16.mxu0 %v18144_v38  ;;  %v537_v23 = vld [vmem:[#allocation3] sm:$0xf0]  ;;  %v18205_v59 = vld [vmem:[#allocation5 + $0xa60] ss:$16 sps:$4 sm:$0xff]  }
  0x8f   : > { %v21346_v22 = vld [vmem:[#allocation3 + $0x20] sm:$0xf]  ;;  %v1587_v28 = vshrl.u32 %v537_v23, 16  ;;  %v1590_v30 = vshll.u32 %v537_v23, 16  ;;  %v615_v35 = vrot.slane %v537_v23, 4  ;;  %v418_v23 = vld [vmem:[#allocation2 + $0x50] sm:$0xff] }
  0x90   : > { %970 = vmatpush1.bf16.msra.mxu1 %v18146_v39  ;;  %v1516_v24 = vld [vmem:[#allocation3 + $0x20] sm:$0x1f]  ;;  %v616_v36 = vrot.slane %v21346_v22, 4 }
  0x91   : > { %1997 = vmatpush1.bf16.msra.mxu0 %v18147_v40  ;;  %971 = vmatprep.subr.bf16.mxu1 %v18148_v41  ;;  %v1595_v31 = vshrl.u32 %v1516_v24, 16  ;;  %v1598_v32 = vshll.u32 %v1516_v24, 16  ;;  %v1589_v37 = vrot.slane %v1587_v28, 4  ;;  %v18189_v38 = vld [vmem:[#allocation5 + $0xa04] ss:$16 sps:$4 sm:$0xff]   ;;  %v1592_v39 = vrot.slane %v1590_v30, 5 }
  0x92   : > { %1998 = vmatprep.subr.bf16.mxu0 %v18150_v42  ;;  %v18184_v42 = vld [vmem:[#allocation5 + $0x600] ss:$16 sps:$4 sm:$0xff]   ;;  %v18195_v49 = vld [vmem:[#allocation5 + $0xa24] ss:$16 sps:$4 sm:$0xff]   ;;  %v410_v24 = vpack.c.bf16 %v406_v21, %v21161_v0 }
  0x93   : > { %v1597_v40 = vrot.slane %v1595_v31, 4  ;;  %v1600_v41 = vrot.slane %v1598_v32, 5  ;;  %v18198_v52 = vld [vmem:[#allocation5 + $0x644] ss:$16 sps:$4 sm:$0xff]   ;;  %v18217_v4 = vld [vmem:[#allocation5 + $0xaa0] ss:$16 sps:$4 sm:$0xff]  }
  0x94   : > { %972 = vmatpush1.bf16.msra.mxu1 %v18152_v43  ;;  %v1593_v43 = vor.u32 %v1592_v39, %v1589_v37  ;;  %v18204_v56 = vld [vmem:[#allocation5 + $0x664] ss:$16 sps:$4 sm:$0xff]   ;;  %v18220_v8 = vld [vmem:[#allocation5 + $0x6c0] ss:$16 sps:$4 sm:$0xff]   ;;  %414 = vst [vmem:[#allocation3 + $0x10] sm:$0xff] %v410_v24 }
  0x95   : > { %1999 = vmatpush1.bf16.msra.mxu0 %v18153_v44  ;;  %973 = vmatprep.subr.bf16.mxu1 %v18154_v45  ;;  %v1601_v44 = vor.u32 %v1600_v41, %v1597_v40  ;;  %v18187_v45 = vld [vmem:[#allocation5 + $0xa00] ss:$16 sps:$4 sm:$0xff]   ;;  %v18210_v60 = vld [vmem:[#allocation5 + $0x684] ss:$16 sps:$4 sm:$0xff]  }
  0x96   : > { %2000 = vmatprep.subr.bf16.mxu0 %v18156_v46  ;;  %v21355_v46 = vsel %vm614_vm0, %v615_v35, %v616_v36  ;;  %v18222_v6 = vld [vmem:[#allocation5 + $0x6c4] ss:$16 sps:$4 sm:$0xff]   ;;  %v18226_v12 = vld [vmem:[#allocation5 + $0x6e0] ss:$16 sps:$4 sm:$0xff]   ;;  %v540_v35 = vld [vmem:[#allocation3 + $0x18] sm:$0xf0] }
  0x97   : > { %v21358_v47 = vsel %vm1585_vm1, %v1593_v43, %v1601_v44  ;;  %v18225_v7 = vld [vmem:[#allocation5 + $0xac4] ss:$16 sps:$4 sm:$0xff]   ;;  %v18229_v13 = vld [vmem:[#allocation5 + $0xae0] ss:$16 sps:$4 sm:$0xff]   ;;  %v1638_v37 = vshrl.u32 %v540_v35, 16 }
  0x98   : > { %974 = vmatpush1.bf16.msra.mxu1 %v18158_v50  ;;  %v18190_v50 = vld [vmem:[#allocation5 + $0x620] ss:$16 sps:$4 sm:$0xff]   ;;  %v18231_v11 = vld [vmem:[#allocation5 + $0xae4] ss:$16 sps:$4 sm:$0xff]  }
  0x99   : > { %2001 = vmatpush1.bf16.msra.mxu0 %v18159_v51  ;;  %975 = vmatprep.subr.bf16.mxu1 %v18160_v53  ;;  %v18193_v51 = vld [vmem:[#allocation5 + $0xa20] ss:$16 sps:$4 sm:$0xff]   ;;  %v18201_v53 = vld [vmem:[#allocation5 + $0xa44] ss:$16 sps:$4 sm:$0xff]  }
  0x9a   : > { %2002 = vmatprep.subr.bf16.mxu0 %v18162_v54  ;;  %v18196_v54 = vld [vmem:[#allocation5 + $0x640] ss:$16 sps:$4 sm:$0xff]   ;;  %v18237_v17 = vld [vmem:[#allocation5 + $0xb04] ss:$16 sps:$4 sm:$0xff]  }
  0x9b   : > { %v18232_v26 = vld [vmem:[#allocation5 + $0x700] ss:$16 sps:$4 sm:$0xff]   ;;  %v18240_v28 = vld [vmem:[#allocation5 + $0x724] ss:$16 sps:$4 sm:$0xff]  }
  0x9c   : > { %976 = vmatpush1.bf16.msra.mxu1 %v18164_v57  ;;  %v18207_v57 = vld [vmem:[#allocation5 + $0xa64] ss:$16 sps:$4 sm:$0xff]   ;;  %v18235_v27 = vld [vmem:[#allocation5 + $0xb00] ss:$16 sps:$4 sm:$0xff]  }
  0x9d   : > { %2003 = vmatpush1.bf16.msra.mxu0 %v18165_v58  ;;  %977 = vmatprep.subr.bf16.mxu1 %v18166_v61  ;;  %v18202_v58 = vld [vmem:[#allocation5 + $0x660] ss:$16 sps:$4 sm:$0xff]   ;;  %v18213_v61 = vld [vmem:[#allocation5 + $0xa84] ss:$16 sps:$4 sm:$0xff]  }
  0x9e   : > { %2004 = vmatprep.subr.bf16.mxu0 %v18168_v62  ;;  %v18208_v62 = vld [vmem:[#allocation5 + $0x680] ss:$16 sps:$4 sm:$0xff]   ;;  %v18246_v32 = vld [vmem:[#allocation5 + $0x744] ss:$16 sps:$4 sm:$0xff]  }
  0x9f   : > { %v18238_v30 = vld [vmem:[#allocation5 + $0x720] ss:$16 sps:$4 sm:$0xff]  }
  0xa0   : > { %978 = vmatpush1.bf16.msra.mxu1 %v18170_v63  ;;  %v18211_v63 = vld [vmem:[#allocation5 + $0xa80] ss:$16 sps:$4 sm:$0xff]  }
  0xa1   : > { %2005 = vmatpush1.bf16.msra.mxu0 %v18171_v1  ;;  %979 = vmatprep.subr.bf16.mxu1 %v18172_v2  ;;  %v18216_v1 = vld [vmem:[#allocation5 + $0x6a4] ss:$16 sps:$4 sm:$0xff]   ;;  %v18241_v31 = vld [vmem:[#allocation5 + $0xb20] ss:$16 sps:$4 sm:$0xff]  }
  0xa2   : > { %2006 = vmatprep.subr.bf16.mxu0 %v18174_v3  ;;  %v18219_v2 = vld [vmem:[#allocation5 + $0xaa4] ss:$16 sps:$4 sm:$0xff]   ;;  %v18214_v3 = vld [vmem:[#allocation5 + $0x6a0] ss:$16 sps:$4 sm:$0xff]  }
  0xa3   : > { %v18244_v41 = vld [vmem:[#allocation5 + $0x740] ss:$16 sps:$4 sm:$0xff]  }
  0xa4   : > { %980 = vmatpush1.bf16.msra.mxu1 %v18176_v9  ;;  %v18223_v9 = vld [vmem:[#allocation5 + $0xac0] ss:$16 sps:$4 sm:$0xff]  }
  0xa5   : > { %2007 = vmatpush1.bf16.msra.mxu0 %v18177_v10  ;;  %981 = vmatprep.subr.bf16.mxu1 %v18178_v15  ;;  %v18228_v10 = vld [vmem:[#allocation5 + $0x6e4] ss:$16 sps:$4 sm:$0xff]   ;;  %v419_v15 = vld [vmem:[#allocation2 + $0x58] sm:$0xff]  ;;  %v18247_v44 = vld [vmem:[#allocation5 + $0xb40] ss:$16 sps:$4 sm:$0xff]  }
  0xa6   : > { %2008 = vmatprep.subr.bf16.mxu0 %v18180_v16  ;;  %v18234_v16 = vld [vmem:[#allocation5 + $0x704] ss:$16 sps:$4 sm:$0xff]   ;;  %v427_v20 = vpack.c.bf16 %v21161_v0, %v419_v15  ;;  %v18271_v14 = vld [vmem:[#allocation5 + $0xbc0] ss:$16 sps:$4 sm:$0xff]  }
  0xa7   : > { %v18276_v15 = vld [vmem:[#allocation5 + $0x7e4] ss:$16 sps:$4 sm:$0xff]   ;;  %v18274_v24 = vld [vmem:[#allocation5 + $0x7e0] ss:$16 sps:$4 sm:$0xff]  }
  0xa8   : > { %982 = vmatpush1.bf16.msra.mxu1 %v18182_v25  ;;  %431 = vst [vmem:[#allocation3 + $0x38] sm:$0xff] %v427_v20  ;;  %v426_v25 = vpack.c.bf16 %v21161_v0, %v418_v23 }
  0xa9   : > { %2009 = vmatpush1.bf16.msra.mxu0 %v18183_v29  ;;  %994 = vmatprep.subr.bf16.mxu1 %v18186_v33  ;;  %v18243_v29 = vld [vmem:[#allocation5 + $0xb24] ss:$16 sps:$4 sm:$0xff]  }
  0xaa   : > { %2021 = vmatprep.subr.bf16.mxu0 %v18189_v38  ;;  %430 = vst [vmem:[#allocation3 + $0x30] sm:$0xff] %v426_v25  ;;  %v18249_v33 = vld [vmem:[#allocation5 + $0xb44] ss:$16 sps:$4 sm:$0xff]   ;;  %v1641_v38 = vshll.u32 %v540_v35, 16  ;;  %v18277_v25 = vld [vmem:[#allocation5 + $0xbe0] ss:$16 sps:$4 sm:$0xff]  }
  0xab   : > { %984 = vmatmul.mubr.bf16.vlgmr.msra.gmra.mrb[0].mxu1 %v21355_v46 }
  0xac   : > { %2011 = vmatmul.mubr.bf16.vlgmr.msra.gmra.mrb[0].mxu0 %v21358_v47  ;;  %995 = vmatpush1.bf16.msra.mxu1 %v18184_v42  ;;  %v624_v42 = vrot.slane %v540_v35, 4  ;;  %v18283_v35 = vld [vmem:[#allocation5 + $0x2400] ss:$16 sps:$4 sm:$0xff]  }
  0xad   : > { %2022 = vmatpush1.bf16.msra.mxu0 %v18187_v45  ;;  %996 = vmatprep.subr.bf16.mxu1 %v18192_v48  ;;  %v1640_v45 = vrot.slane %v1638_v37, 4  ;;  %v1643_v48 = vrot.slane %v1641_v38, 5  ;;  %v18288_v37 = vld [vmem:[#allocation5 + $0x24] ss:$16 sps:$4 sm:$0xff]  }
  0xae   : > { %2023 = vmatprep.subr.bf16.mxu0 %v18195_v49  ;;  %v18291_v38 = vld [vmem:[#allocation5 + $0x2424] ss:$16 sps:$4 sm:$0xff]  }
  0xaf   : > { %v1519_v0 = vld [vmem:[#allocation3 + $0x38] sm:$0x1f] }
  0xb0   : > { %997 = vmatpush1.bf16.msra.mxu1 %v18190_v50  ;;  %v21366_v36 = vld [vmem:[#allocation3 + $0x38] sm:$0xf]  ;;  %v1646_v39 = vshrl.u32 %v1519_v0, 16  ;;  %v1649_v40 = vshll.u32 %v1519_v0, 16 }
  0xb1   : > { %2024 = vmatpush1.bf16.msra.mxu0 %v18193_v51  ;;  %998 = vmatprep.subr.bf16.mxu1 %v18198_v52  ;;  %v625_v43 = vrot.slane %v21366_v36, 4  ;;  %v18252_v51 = vld [vmem:[#allocation5 + $0x764] ss:$16 sps:$4 sm:$0xff]   ;;  %v21377_v23 = vld [vmem:[#allocation3 + $0x30] sm:$0xf] }
  0xb2   : > { %2025 = vmatprep.subr.bf16.mxu0 %v18201_v53  ;;  %v1648_v49 = vrot.slane %v1646_v39, 4  ;;  %v1651_v50 = vrot.slane %v1649_v40, 5  ;;  %v18255_v52 = vld [vmem:[#allocation5 + $0xb64] ss:$16 sps:$4 sm:$0xff]   ;;  %v18286_v39 = vld [vmem:[#allocation5 + $0x20] ss:$16 sps:$4 sm:$0xff]  }
  0xb3   : > { %v21370_v53 = vsel %vm614_vm0, %v624_v42, %v625_v43  ;;  %v18289_v40 = vld [vmem:[#allocation5 + $0x2420] ss:$16 sps:$4 sm:$0xff]   ;;  %v18297_v42 = vld [vmem:[#allocation5 + $0x2444] ss:$16 sps:$4 sm:$0xff]   ;;  %v1064_v43 = vshrl.u32 %v21340_v5, 16 }
  0xb4   : > { %999 = vmatpush1.bf16.msra.mxu1 %v18196_v54  ;;  %v1644_v54 = vor.u32 %v1643_v48, %v1640_v45  ;;  %1026 = vmatprep.mubr.bf16.mxu1 %v21370_v53  ;;  %v18292_v45 = vld [vmem:[#allocation5 + $0x40] ss:$16 sps:$4 sm:$0xff]  }
  0xb5   : > { %2026 = vmatpush1.bf16.msra.mxu0 %v18199_v55  ;;  %1000 = vmatprep.subr.bf16.mxu1 %v18204_v56  ;;  %v1652_v55 = vor.u32 %v1651_v50, %v1648_v49  ;;  %v18250_v56 = vld [vmem:[#allocation5 + $0x760] ss:$16 sps:$4 sm:$0xff]   ;;  %v18300_v49 = vld [vmem:[#allocation5 + $0x64] ss:$16 sps:$4 sm:$0xff]  }
  0xb6   : > { %2027 = vmatprep.subr.bf16.mxu0 %v18207_v57  ;;  %v18253_v57 = vld [vmem:[#allocation5 + $0xb60] ss:$16 sps:$4 sm:$0xff]   ;;  %v18303_v50 = vld [vmem:[#allocation5 + $0x2464] ss:$16 sps:$4 sm:$0xff]  }
  0xb7   : > { %v18295_v48 = vld [vmem:[#allocation5 + $0x2440] ss:$16 sps:$4 sm:$0xff]  }
  0xb8   : > { %1001 = vmatpush1.bf16.msra.mxu1 %v18202_v58  ;;  %v18258_v58 = vld [vmem:[#allocation5 + $0x784] ss:$16 sps:$4 sm:$0xff]  }
  0xb9   : > { %2028 = vmatpush1.bf16.msra.mxu0 %v18205_v59  ;;  %1002 = vmatprep.subr.bf16.mxu1 %v18210_v60  ;;  %v21374_v59 = vsel %vm1585_vm1, %v1644_v54, %v1652_v55  ;;  %v18261_v60 = vld [vmem:[#allocation5 + $0xb84] ss:$16 sps:$4 sm:$0xff]   ;;  %v18298_v54 = vld [vmem:[#allocation5 + $0x60] ss:$16 sps:$4 sm:$0xff]  }
  0xba   : > { %2029 = vmatprep.subr.bf16.mxu0 %v18213_v61  ;;  %v18256_v61 = vld [vmem:[#allocation5 + $0x780] ss:$16 sps:$4 sm:$0xff]   ;;  %2053 = vmatprep.mubr.bf16.mxu0 %v21374_v59 }
  0xbb   : > { %v18301_v55 = vld [vmem:[#allocation5 + $0x2460] ss:$16 sps:$4 sm:$0xff]  }
  0xbc   : > { %1003 = vmatpush1.bf16.msra.mxu1 %v18208_v62  ;;  %v18259_v62 = vld [vmem:[#allocation5 + $0xb80] ss:$16 sps:$4 sm:$0xff]  }
  0xbd   : > { %2030 = vmatpush1.bf16.msra.mxu0 %v18211_v63  ;;  %1004 = vmatprep.subr.bf16.mxu1 %v18216_v1  ;;  %v18264_v63 = vld [vmem:[#allocation5 + $0x7a4] ss:$16 sps:$4 sm:$0xff]  }
  0xbe   : > { %2031 = vmatprep.subr.bf16.mxu0 %v18219_v2  ;;  %v18267_v1 = vld [vmem:[#allocation5 + $0xba4] ss:$16 sps:$4 sm:$0xff]  }
  0xbf   : > { %v539_v2 = vld [vmem:[#allocation3 + $0x10] sm:$0xf0] }
  0xc0   : > { %1005 = vmatpush1.bf16.msra.mxu1 %v18214_v3  ;;  %v1518_v3 = vld [vmem:[#allocation3 + $0x30] sm:$0x1f] }
  0xc1   : > { %2032 = vmatpush1.bf16.msra.mxu0 %v18217_v4  ;;  %1006 = vmatprep.subr.bf16.mxu1 %v18222_v6  ;;  %v18262_v4 = vld [vmem:[#allocation5 + $0x7a0] ss:$16 sps:$4 sm:$0xff]  }
  0xc2   : > { %2033 = vmatprep.subr.bf16.mxu0 %v18225_v7  ;;  %v18265_v6 = vld [vmem:[#allocation5 + $0xba0] ss:$16 sps:$4 sm:$0xff]   ;;  %v18270_v7 = vld [vmem:[#allocation5 + $0x7c4] ss:$16 sps:$4 sm:$0xff]  }
  0xc4   : > { %1007 = vmatpush1.bf16.msra.mxu1 %v18220_v8  ;;  %v1621_v8 = vshrl.u32 %v539_v2, 16 }
  0xc5   : > { %2034 = vmatpush1.bf16.msra.mxu0 %v18223_v9  ;;  %1008 = vmatprep.subr.bf16.mxu1 %v18228_v10  ;;  %v1624_v9 = vshll.u32 %v539_v2, 16  ;;  %v1629_v10 = vshrl.u32 %v1518_v3, 16 }
  0xc6   : > { %2035 = vmatprep.subr.bf16.mxu0 %v18231_v11  ;;  %v1632_v11 = vshll.u32 %v1518_v3, 16 }
  0xc7   : > { %v1626_v19 = vrot.slane %v1624_v9, 5  ;;  %v1631_v20 = vrot.slane %v1629_v10, 4  ;;  %v18315_v10 = vld [vmem:[#allocation5 + $0x24a4] ss:$16 sps:$4 sm:$0xff]  }
  0xc8   : > { %1009 = vmatpush1.bf16.msra.mxu1 %v18226_v12  ;;  %v18273_v12 = vld [vmem:[#allocation5 + $0xbc4] ss:$16 sps:$4 sm:$0xff]   ;;  %v1634_v21 = vrot.slane %v1632_v11, 5 }
  0xc9   : > { %2036 = vmatpush1.bf16.msra.mxu0 %v18229_v13  ;;  %1010 = vmatprep.subr.bf16.mxu1 %v18234_v16  ;;  %v18268_v13 = vld [vmem:[#allocation5 + $0x7c0] ss:$16 sps:$4 sm:$0xff]   ;;  %v18279_v16 = vld [vmem:[#allocation5 + $0xbe4] ss:$16 sps:$4 sm:$0xff]  }
  0xca   : > { %2037 = vmatprep.subr.bf16.mxu0 %v18237_v17  ;;  %v1623_v17 = vrot.slane %v1621_v8, 4 }
  0xcc   : > { %1011 = vmatpush1.bf16.msra.mxu1 %v18232_v26  ;;  %v18282_v26 = vld [vmem:[#allocation5 + $0x4] ss:$16 sps:$4 sm:$0xff]  }
  0xcd   : > { %2038 = vmatpush1.bf16.msra.mxu0 %v18235_v27  ;;  %1012 = vmatprep.subr.bf16.mxu1 %v18240_v28  ;;  %v1627_v27 = vor.u32 %v1626_v19, %v1623_v17  ;;  %v1635_v28 = vor.u32 %v1634_v21, %v1631_v20  ;;  %v18319_v17 = vld [vmem:[#allocation5 + $0x24c0] ss:$16 sps:$4 sm:$0xff]   ;;  %v18324_v19 = vld [vmem:[#allocation5 + $0xe4] ss:$16 sps:$4 sm:$0xff]  }
  0xce   : > { %2039 = vmatprep.subr.bf16.mxu0 %v18243_v29  ;;  %v621_v29 = vrot.slane %v539_v2, 4  ;;  %v18327_v20 = vld [vmem:[#allocation5 + $0x24e4] ss:$16 sps:$4 sm:$0xff]   ;;  %v18322_v21 = vld [vmem:[#allocation5 + $0xe0] ss:$16 sps:$4 sm:$0xff]  }
  0xd0   : > { %1013 = vmatpush1.bf16.msra.mxu1 %v18238_v30  ;;  %v622_v30 = vrot.slane %v21377_v23, 4 }
  0xd1   : > { %2040 = vmatpush1.bf16.msra.mxu0 %v18241_v31  ;;  %1014 = vmatprep.subr.bf16.mxu1 %v18246_v32  ;;  %v18285_v31 = vld [vmem:[#allocation5 + $0x2404] ss:$16 sps:$4 sm:$0xff]   ;;  %v18280_v32 = vld [vmem:[#allocation5] ss:$16 sps:$4 sm:$0xff]  }
  0xd2   : > { %2041 = vmatprep.subr.bf16.mxu0 %v18249_v33  ;;  %v21381_v33 = vsel %vm1585_vm1, %v1627_v27, %v1635_v28  ;;  %v21384_v0 = vsel %vm614_vm0, %v621_v29, %v622_v30  ;;  %v18328_v27 = vld [vmem:[#allocation5 + $0x100] ss:$16 sps:$4 sm:$0xff]   ;;  %v18336_v29 = vld [vmem:[#allocation5 + $0x124] ss:$16 sps:$4 sm:$0xff]  }
  0xd3   : > { %v18331_v28 = vld [vmem:[#allocation5 + $0x2500] ss:$16 sps:$4 sm:$0xff]   ;;  %v18339_v30 = vld [vmem:[#allocation5 + $0x2524] ss:$16 sps:$4 sm:$0xff]  }
  0xd4   : > { %1015 = vmatpush1.bf16.msra.mxu1 %v18244_v41  ;;  %v18294_v41 = vld [vmem:[#allocation5 + $0x44] ss:$16 sps:$4 sm:$0xff]  }
  0xd5   : > { %2042 = vmatpush1.bf16.msra.mxu0 %v18247_v44  ;;  %1016 = vmatprep.subr.bf16.mxu1 %v18252_v51  ;;  %v1067_v44 = vshll.u32 %v21340_v5, 16  ;;  %v1066_v51 = vrot.slane %v1064_v43, 3  ;;  %v18309_v5 = vld [vmem:[#allocation5 + $0x2484] ss:$16 sps:$4 sm:$0xff]   ;;  %v18349_v43 = vld [vmem:[#allocation5 + $0x2560] ss:$16 sps:$4 sm:$0xff]  }
  0xd6   : > { %2043 = vmatprep.subr.bf16.mxu0 %v18255_v52 }
  0xd7   : > { %v1069_v52 = vrot.slane %v1067_v44, 4  ;;  %v18354_v44 = vld [vmem:[#allocation5 + $0x184] ss:$16 sps:$4 sm:$0xff]  }
  0xd8   : > { %1017 = vmatpush1.bf16.msra.mxu1 %v18250_v56  ;;  %v466_v56 = vld [vmem:[#allocation3 + $0x8] sm:$0xf8] }
  0xd9   : > { %2044 = vmatpush1.bf16.msra.mxu0 %v18253_v57  ;;  %1018 = vmatprep.subr.bf16.mxu1 %v18258_v58  ;;  %v18306_v57 = vld [vmem:[#allocation5 + $0x84] ss:$16 sps:$4 sm:$0xff]   ;;  %v1056_v58 = vshrl.u32 %v466_v56, 16  ;;  %v1070_v2 = vor.u32 %v1069_v52, %v1066_v51 }
  0xda   : > { %2045 = vmatprep.subr.bf16.mxu0 %v18261_v60  ;;  %v1059_v60 = vshll.u32 %v466_v56, 16  ;;  %v18363_v51 = vld [vmem:[#allocation5 + $0x25a4] ss:$16 sps:$4 sm:$0xff]  }
  0xdb   : > { %v465_v52 = vld [vmem:[#allocation3] sm:$0xf8] }
  0xdc   : > { %1019 = vmatpush1.bf16.msra.mxu1 %v18256_v61  ;;  %v21390_v61 = vld [vmem:[#allocation3 + $0x28] sm:$0x7] }
  0xdd   : > { %2046 = vmatpush1.bf16.msra.mxu0 %v18259_v62  ;;  %1020 = vmatprep.subr.bf16.mxu1 %v18264_v63  ;;  %v2640_v62 = vrot.slane %v466_v56, 3  ;;  %v1058_v63 = vrot.slane %v1056_v58, 3  ;;  %v2641_v3 = vrot.slane %v21390_v61, 3  ;;  %v1050_v56 = vshll.u32 %v21346_v22, 16 }
  0xde   : > { %2047 = vmatprep.subr.bf16.mxu0 %v18267_v1  ;;  %v1061_v1 = vrot.slane %v1059_v60, 4  ;;  %v1039_v58 = vshrl.u32 %v465_v52, 16  ;;  %v1042_v60 = vshll.u32 %v465_v52, 16 }
  0xdf   : > { %v21394_v9 = vsel %vm2636_vm2, %v2640_v62, %v2641_v3  ;;  %v18369_v62 = vld [vmem:[#allocation5 + $0x25c4] ss:$16 sps:$4 sm:$0xff]   ;;  %v1101_v3 = vshll.u32 %v21366_v36, 16 }
  0xe0   : > { %1021 = vmatpush1.bf16.msra.mxu1 %v18262_v4  ;;  %v18304_v4 = vld [vmem:[#allocation5 + $0x80] ss:$16 sps:$4 sm:$0xff]   ;;  %v1062_v8 = vor.u32 %v1061_v1, %v1058_v63  ;;  %v1098_v63 = vshrl.u32 %v21366_v36, 16 }
  0xe1   : > { %2048 = vmatpush1.bf16.msra.mxu0 %v18265_v6  ;;  %1022 = vmatprep.subr.bf16.mxu1 %v18270_v7  ;;  %v18307_v6 = vld [vmem:[#allocation5 + $0x2480] ss:$16 sps:$4 sm:$0xff]   ;;  %v18312_v7 = vld [vmem:[#allocation5 + $0xa4] ss:$16 sps:$4 sm:$0xff]  }
  0xe2   : > { %2049 = vmatprep.subr.bf16.mxu0 %v18273_v12  ;;  %v21397_v11 = vsel %vm1037_vm3, %v1062_v8, %v1070_v2  ;;  %v18310_v12 = vld [vmem:[#allocation5 + $0xa0] ss:$16 sps:$4 sm:$0xff]   ;;  %v1041_v8 = vrot.slane %v1039_v58, 3 }
  0xe3   : > { %v18364_v1 = vld [vmem:[#allocation5 + $0x1c0] ss:$16 sps:$4 sm:$0xff]  }
  0xe4   : > { %1023 = vmatpush1.bf16.msra.mxu1 %v18268_v13  ;;  %v18313_v13 = vld [vmem:[#allocation5 + $0x24a0] ss:$16 sps:$4 sm:$0xff]  }
  0xe5   : > { %2050 = vmatpush1.bf16.msra.mxu0 %v18271_v14  ;;  %1024 = vmatprep.subr.bf16.mxu1 %v18276_v15  ;;  %v18318_v14 = vld [vmem:[#allocation5 + $0xc4] ss:$16 sps:$4 sm:$0xff]   ;;  %v18367_v2 = vld [vmem:[#allocation5 + $0x25c0] ss:$16 sps:$4 sm:$0xff]  }
  0xe6   : > { %2051 = vmatprep.subr.bf16.mxu0 %v18279_v16  ;;  %v18321_v15 = vld [vmem:[#allocation5 + $0x24c4] ss:$16 sps:$4 sm:$0xff]   ;;  %v18316_v16 = vld [vmem:[#allocation5 + $0xc0] ss:$16 sps:$4 sm:$0xff]  }
  0xe7   : > { %v18397_v58 = vld [vmem:[#allocation5 + $0x2660] ss:$16 sps:$4 sm:$0xff]  }
  0xe8   : > { %1025 = vmatpush1.bf16.msra.mxu1 %v18274_v24  ;;  %v18325_v24 = vld [vmem:[#allocation5 + $0x24e0] ss:$16 sps:$4 sm:$0xff]  }
  0xe9   : > { %2052 = vmatpush1.bf16.msra.mxu0 %v18277_v25  ;;  %1430 = vmatprep.subr.bf16.mxu1 %v18282_v26  ;;  %v18330_v25 = vld [vmem:[#allocation5 + $0x104] ss:$16 sps:$4 sm:$0xff]  }
  0xea   : > { %4988 = vmatprep.subr.bf16.mxu0 %v18285_v31  ;;  %v18333_v26 = vld [vmem:[#allocation5 + $0x2504] ss:$16 sps:$4 sm:$0xff]   ;;  %v18334_v31 = vld [vmem:[#allocation5 + $0x120] ss:$16 sps:$4 sm:$0xff]  }
  0xeb   : > { %1027 = vmatmul.mubr.bf16.vlgmr.msra.gmra.mrb[0].mxu1 %v21384_v0 }
  0xec   : > { %2054 = vmatmul.mubr.bf16.vlgmr.msra.gmra.mrb[0].mxu0 %v21381_v33  ;;  %1431 = vmatpush1.bf16.msra.mxu1 %v18280_v32  ;;  %v18337_v32 = vld [vmem:[#allocation5 + $0x2520] ss:$16 sps:$4 sm:$0xff]  }
  0xed   : > { %4989 = vmatpush1.bf16.msra.mxu0 %v18283_v35  ;;  %1432 = vmatprep.subr.bf16.mxu1 %v18288_v37  ;;  %v18342_v35 = vld [vmem:[#allocation5 + $0x144] ss:$16 sps:$4 sm:$0xff]  }
  0xee   : > { %4990 = vmatprep.subr.bf16.mxu0 %v18291_v38  ;;  %5020 = vmatprep.mubr.bf16.mxu0 %v21394_v9  ;;  %v18345_v37 = vld [vmem:[#allocation5 + $0x2544] ss:$16 sps:$4 sm:$0xff]   ;;  %v18340_v38 = vld [vmem:[#allocation5 + $0x140] ss:$16 sps:$4 sm:$0xff]  }
  0xef   : > { %1462 = vmatprep.mubr.bf16.mxu1 %v21397_v11 }
  0xf0   : > { %1433 = vmatpush1.bf16.msra.mxu1 %v18286_v39  ;;  %v18343_v39 = vld [vmem:[#allocation5 + $0x2540] ss:$16 sps:$4 sm:$0xff]  }
  0xf1   : > { %4991 = vmatpush1.bf16.msra.mxu0 %v18289_v40  ;;  %1434 = vmatprep.subr.bf16.mxu1 %v18294_v41  ;;  %v18348_v40 = vld [vmem:[#allocation5 + $0x164] ss:$16 sps:$4 sm:$0xff]  }
  0xf2   : > { %4992 = vmatprep.subr.bf16.mxu0 %v18297_v42  ;;  %v18351_v41 = vld [vmem:[#allocation5 + $0x2564] ss:$16 sps:$4 sm:$0xff]   ;;  %v18346_v42 = vld [vmem:[#allocation5 + $0x160] ss:$16 sps:$4 sm:$0xff]  }
  0xf4   : > { %1435 = vmatpush1.bf16.msra.mxu1 %v18292_v45  ;;  %v18357_v45 = vld [vmem:[#allocation5 + $0x2584] ss:$16 sps:$4 sm:$0xff]  }
  0xf5   : > { %4993 = vmatpush1.bf16.msra.mxu0 %v18295_v48  ;;  %1436 = vmatprep.subr.bf16.mxu1 %v18300_v49  ;;  %v18352_v48 = vld [vmem:[#allocation5 + $0x180] ss:$16 sps:$4 sm:$0xff]  }
  0xf6   : > { %4994 = vmatprep.subr.bf16.mxu0 %v18303_v50  ;;  %v18355_v49 = vld [vmem:[#allocation5 + $0x2580] ss:$16 sps:$4 sm:$0xff]   ;;  %v18360_v50 = vld [vmem:[#allocation5 + $0x1a4] ss:$16 sps:$4 sm:$0xff]  }
  0xf8   : > { %1437 = vmatpush1.bf16.msra.mxu1 %v18298_v54  ;;  %v18358_v54 = vld [vmem:[#allocation5 + $0x1a0] ss:$16 sps:$4 sm:$0xff]  }
  0xf9   : > { %4995 = vmatpush1.bf16.msra.mxu0 %v18301_v55  ;;  %1438 = vmatprep.subr.bf16.mxu1 %v18306_v57  ;;  %v1047_v55 = vshrl.u32 %v21346_v22, 16  ;;  %v18361_v57 = vld [vmem:[#allocation5 + $0x25a0] ss:$16 sps:$4 sm:$0xff]   ;;  %v18375_v22 = vld [vmem:[#allocation5 + $0x25e4] ss:$16 sps:$4 sm:$0xff]  }
  0xfa   : > { %4996 = vmatprep.subr.bf16.mxu0 %v18309_v5  ;;  %v18366_v5 = vld [vmem:[#allocation5 + $0x1c4] ss:$16 sps:$4 sm:$0xff]  }
  0xfc   : > { %1439 = vmatpush1.bf16.msra.mxu1 %v18304_v4  ;;  %v18372_v4 = vld [vmem:[#allocation5 + $0x1e4] ss:$16 sps:$4 sm:$0xff]  }
  0xfd   : > { %4997 = vmatpush1.bf16.msra.mxu0 %v18307_v6  ;;  %1440 = vmatprep.subr.bf16.mxu1 %v18312_v7  ;;  %v1049_v6 = vrot.slane %v1047_v55, 3  ;;  %v1052_v7 = vrot.slane %v1050_v56, 4  ;;  %v18396_v55 = vld [vmem:[#allocation5 + $0x264] ss:$16 sps:$4 sm:$0xff]  }
  0xfe   : > { %4998 = vmatprep.subr.bf16.mxu0 %v18315_v10  ;;  %v1044_v10 = vrot.slane %v1042_v60, 4  ;;  %v18399_v56 = vld [vmem:[#allocation5 + $0x2664] ss:$16 sps:$4 sm:$0xff]  }
  0xff   : > { %v18402_v60 = vld [vmem:[#allocation5 + $0x284] ss:$16 sps:$4 sm:$0xff]  }
 0x100   : > { %1441 = vmatpush1.bf16.msra.mxu1 %v18310_v12  ;;  %v468_v12 = vld [vmem:[#allocation3 + $0x18] sm:$0xf8] }
 0x101   : > { %4999 = vmatpush1.bf16.msra.mxu0 %v18313_v13  ;;  %1442 = vmatprep.subr.bf16.mxu1 %v18318_v14  ;;  %v21405_v13 = vld [vmem:[#allocation3 + $0x20] sm:$0x7]  ;;  %v1090_v14 = vshrl.u32 %v468_v12, 16 }
 0x102   : > { %5000 = vmatprep.subr.bf16.mxu0 %v18321_v15  ;;  %v1093_v15 = vshll.u32 %v468_v12, 16 }
 0x103   : > { %v1092_v36 = vrot.slane %v1090_v14, 3  ;;  %v18418_v14 = vld [vmem:[#allocation5 + $0x2e0] ss:$16 sps:$4 sm:$0xff]  }
 0x104   : > { %1443 = vmatpush1.bf16.msra.mxu1 %v18316_v16  ;;  %v18370_v16 = vld [vmem:[#allocation5 + $0x1e0] ss:$16 sps:$4 sm:$0xff]  }
 0x105   : > { %5001 = vmatpush1.bf16.msra.mxu0 %v18319_v17  ;;  %1444 = vmatprep.subr.bf16.mxu1 %v18324_v19  ;;  %v1100_v17 = vrot.slane %v1098_v63, 3  ;;  %v1103_v19 = vrot.slane %v1101_v3, 4  ;;  %v18403_v63 = vld [vmem:[#allocation5 + $0x2680] ss:$16 sps:$4 sm:$0xff]  }
 0x106   : > { %5002 = vmatprep.subr.bf16.mxu0 %v18327_v20  ;;  %v18373_v20 = vld [vmem:[#allocation5 + $0x25e0] ss:$16 sps:$4 sm:$0xff]  }
 0x107   : > { %v18406_v3 = vld [vmem:[#allocation5 + $0x2a0] ss:$16 sps:$4 sm:$0xff]  }
 0x108   : > { %1445 = vmatpush1.bf16.msra.mxu1 %v18322_v21  ;;  %v1095_v21 = vrot.slane %v1093_v15, 4  ;;  %v18421_v15 = vld [vmem:[#allocation5 + $0x26e0] ss:$16 sps:$4 sm:$0xff]  }
 0x109   : > { %5003 = vmatpush1.bf16.msra.mxu0 %v18325_v24  ;;  %1446 = vmatprep.subr.bf16.mxu1 %v18330_v25  ;;  %v18378_v24 = vld [vmem:[#allocation5 + $0x204] ss:$16 sps:$4 sm:$0xff]   ;;  %v1045_v25 = vor.u32 %v1044_v10, %v1041_v8  ;;  %v18415_v8 = vld [vmem:[#allocation5 + $0x26c0] ss:$16 sps:$4 sm:$0xff]  }
 0x10a   : > { %5004 = vmatprep.subr.bf16.mxu0 %v18333_v26  ;;  %v1053_v26 = vor.u32 %v1052_v7, %v1049_v6  ;;  %v18414_v6 = vld [vmem:[#allocation5 + $0x2c4] ss:$16 sps:$4 sm:$0xff]  }
 0x10b   : > { %v18417_v7 = vld [vmem:[#allocation5 + $0x26c4] ss:$16 sps:$4 sm:$0xff]  }
 0x10c   : > { %1447 = vmatpush1.bf16.msra.mxu1 %v18328_v27  ;;  %v2637_v27 = vrot.slane %v465_v52, 3  ;;  %v18388_v52 = vld [vmem:[#allocation5 + $0x240] ss:$16 sps:$4 sm:$0xff]   ;;  %v18420_v10 = vld [vmem:[#allocation5 + $0x2e4] ss:$16 sps:$4 sm:$0xff]  }
 0x10d   : > { %5005 = vmatpush1.bf16.msra.mxu0 %v18331_v28  ;;  %1448 = vmatprep.subr.bf16.mxu1 %v18336_v29  ;;  %v2638_v28 = vrot.slane %v21405_v13, 3  ;;  %v21408_v29 = vld [vmem:[#allocation3 + $0x38] sm:$0x7] }
 0x10e   : > { %5006 = vmatprep.subr.bf16.mxu0 %v18339_v30  ;;  %v18381_v30 = vld [vmem:[#allocation5 + $0x2604] ss:$16 sps:$4 sm:$0xff]  }
 0x110   : > { %1449 = vmatpush1.bf16.msra.mxu1 %v18334_v31  ;;  %v18376_v31 = vld [vmem:[#allocation5 + $0x200] ss:$16 sps:$4 sm:$0xff]  }
 0x111   : > { %5007 = vmatpush1.bf16.msra.mxu0 %v18337_v32  ;;  %1450 = vmatprep.subr.bf16.mxu1 %v18342_v35  ;;  %v18379_v32 = vld [vmem:[#allocation5 + $0x2600] ss:$16 sps:$4 sm:$0xff]   ;;  %v1096_v35 = vor.u32 %v1095_v21, %v1092_v36  ;;  %v18432_v36 = vld [vmem:[#allocation5 + $0x324] ss:$16 sps:$4 sm:$0xff]  }
 0x112   : > { %5008 = vmatprep.subr.bf16.mxu0 %v18345_v37  ;;  %v1104_v37 = vor.u32 %v1103_v19, %v1100_v17  ;;  %v18429_v17 = vld [vmem:[#allocation5 + $0x2704] ss:$16 sps:$4 sm:$0xff]   ;;  %v18424_v19 = vld [vmem:[#allocation5 + $0x300] ss:$16 sps:$4 sm:$0xff]  }
 0x113   : > { %v18435_v21 = vld [vmem:[#allocation5 + $0x2724] ss:$16 sps:$4 sm:$0xff]  }
 0x114   : > { %1451 = vmatpush1.bf16.msra.mxu1 %v18340_v38  ;;  %v2646_v38 = vrot.slane %v468_v12, 3  ;;  %v18423_v12 = vld [vmem:[#allocation5 + $0x26e4] ss:$16 sps:$4 sm:$0xff]  }
 0x115   : > { %5009 = vmatpush1.bf16.msra.mxu0 %v18343_v39  ;;  %1452 = vmatprep.subr.bf16.mxu1 %v18348_v40  ;;  %v2647_v39 = vrot.slane %v21408_v29, 3  ;;  %v21412_v40 = vsel %vm1037_vm3, %v1045_v25, %v1053_v26  ;;  %v18433_v25 = vld [vmem:[#allocation5 + $0x2720] ss:$16 sps:$4 sm:$0xff]   ;;  %v18438_v26 = vld [vmem:[#allocation5 + $0x344] ss:$16 sps:$4 sm:$0xff]  }
 0x116   : > { %5010 = vmatprep.subr.bf16.mxu0 %v18351_v41  ;;  %v21415_v41 = vsel %vm2636_vm2, %v2637_v27, %v2638_v28  ;;  %v18441_v27 = vld [vmem:[#allocation5 + $0x2744] ss:$16 sps:$4 sm:$0xff]   ;;  %v18436_v28 = vld [vmem:[#allocation5 + $0x340] ss:$16 sps:$4 sm:$0xff]  }
 0x118   : > { %1453 = vmatpush1.bf16.msra.mxu1 %v18346_v42  ;;  %v18384_v42 = vld [vmem:[#allocation5 + $0x224] ss:$16 sps:$4 sm:$0xff]  }
 0x119   : > { %5011 = vmatpush1.bf16.msra.mxu0 %v18349_v43  ;;  %1454 = vmatprep.subr.bf16.mxu1 %v18354_v44  ;;  %v18387_v43 = vld [vmem:[#allocation5 + $0x2624] ss:$16 sps:$4 sm:$0xff]   ;;  %v18382_v44 = vld [vmem:[#allocation5 + $0x220] ss:$16 sps:$4 sm:$0xff]  }
 0x11a   : > { %5012 = vmatprep.subr.bf16.mxu0 %v18357_v45  ;;  %v18385_v45 = vld [vmem:[#allocation5 + $0x2620] ss:$16 sps:$4 sm:$0xff]  }
 0x11c   : > { %1455 = vmatpush1.bf16.msra.mxu1 %v18352_v48  ;;  %v21420_v48 = vsel %vm1037_vm3, %v1096_v35, %v1104_v37  ;;  %v18442_v35 = vld [vmem:[#allocation5 + $0x360] ss:$16 sps:$4 sm:$0xff]  }
 0x11d   : > { %5013 = vmatpush1.bf16.msra.mxu0 %v18355_v49  ;;  %1456 = vmatprep.subr.bf16.mxu1 %v18360_v50  ;;  %v21423_v49 = vsel %vm2636_vm2, %v2646_v38, %v2647_v39  ;;  %v18390_v50 = vld [vmem:[#allocation5 + $0x244] ss:$16 sps:$4 sm:$0xff]   ;;  %v18445_v37 = vld [vmem:[#allocation5 + $0x2760] ss:$16 sps:$4 sm:$0xff]  }
 0x11e   : > { %5014 = vmatprep.subr.bf16.mxu0 %v18363_v51  ;;  %v18393_v51 = vld [vmem:[#allocation5 + $0x2644] ss:$16 sps:$4 sm:$0xff]  }
 0x11f   : > { %v18450_v38 = vld [vmem:[#allocation5 + $0x384] ss:$16 sps:$4 sm:$0xff]  }
 0x120   : > { %1457 = vmatpush1.bf16.msra.mxu1 %v18358_v54  ;;  %v18391_v54 = vld [vmem:[#allocation5 + $0x2640] ss:$16 sps:$4 sm:$0xff]   ;;  %v18453_v39 = vld [vmem:[#allocation5 + $0x2784] ss:$16 sps:$4 sm:$0xff]  }
 0x121   : > { %5015 = vmatpush1.bf16.msra.mxu0 %v18361_v57  ;;  %1458 = vmatprep.subr.bf16.mxu1 %v18366_v5  ;;  %v18394_v57 = vld [vmem:[#allocation5 + $0x260] ss:$16 sps:$4 sm:$0xff]   ;;  %v18405_v5 = vld [vmem:[#allocation5 + $0x2684] ss:$16 sps:$4 sm:$0xff]  }
 0x122   : > { %5016 = vmatprep.subr.bf16.mxu0 %v18369_v62  ;;  %v18400_v62 = vld [vmem:[#allocation5 + $0x280] ss:$16 sps:$4 sm:$0xff]  }
 0x124   : > { %1459 = vmatpush1.bf16.msra.mxu1 %v18364_v1  ;;  %v18408_v1 = vld [vmem:[#allocation5 + $0x2a4] ss:$16 sps:$4 sm:$0xff]  }
 0x125   : > { %5017 = vmatpush1.bf16.msra.mxu0 %v18367_v2  ;;  %1460 = vmatprep.subr.bf16.mxu1 %v18372_v4  ;;  %v18411_v2 = vld [vmem:[#allocation5 + $0x26a4] ss:$16 sps:$4 sm:$0xff]   ;;  %v18409_v4 = vld [vmem:[#allocation5 + $0x26a0] ss:$16 sps:$4 sm:$0xff]  }
 0x126   : > { %5018 = vmatprep.subr.bf16.mxu0 %v18375_v22  ;;  %v18412_v22 = vld [vmem:[#allocation5 + $0x2c0] ss:$16 sps:$4 sm:$0xff]  }
 0x128   : > { %1461 = vmatpush1.bf16.msra.mxu1 %v18370_v16  ;;  %v18426_v16 = vld [vmem:[#allocation5 + $0x304] ss:$16 sps:$4 sm:$0xff]  }
 0x129   : > { %5019 = vmatpush1.bf16.msra.mxu0 %v18373_v20  ;;  %1473 = vmatprep.subr.bf16.mxu1 %v18378_v24  ;;  %v18427_v20 = vld [vmem:[#allocation5 + $0x2700] ss:$16 sps:$4 sm:$0xff]  }
 0x12a   : > { %5031 = vmatprep.subr.bf16.mxu0 %v18381_v30  ;;  %v18430_v24 = vld [vmem:[#allocation5 + $0x320] ss:$16 sps:$4 sm:$0xff]  }
 0x12b   : > { %1463 = vmatmul.mubr.bf16.vlgmr.msra.gmra.mrb[0].mxu1 %v21412_v40  ;;  %v18439_v30 = vld [vmem:[#allocation5 + $0x2740] ss:$16 sps:$4 sm:$0xff]  }
 0x12c   : > { %5021 = vmatmul.mubr.bf16.vlgmr.msra.gmra.mrb[4].mxu0 %v21415_v41  ;;  %1474 = vmatpush1.bf16.msra.mxu1 %v18376_v31  ;;  %v18444_v31 = vld [vmem:[#allocation5 + $0x364] ss:$16 sps:$4 sm:$0xff]  }
 0x12d   : > { %5032 = vmatpush1.bf16.msra.mxu0 %v18379_v32  ;;  %1475 = vmatprep.subr.bf16.mxu1 %v18384_v42  ;;  %v18447_v32 = vld [vmem:[#allocation5 + $0x2764] ss:$16 sps:$4 sm:$0xff]   ;;  %v18448_v42 = vld [vmem:[#allocation5 + $0x380] ss:$16 sps:$4 sm:$0xff]  }
 0x12e   : > { %5033 = vmatprep.subr.bf16.mxu0 %v18387_v43  ;;  %1505 = vmatprep.mubr.bf16.mxu1 %v21420_v48  ;;  %v18451_v43 = vld [vmem:[#allocation5 + $0x2780] ss:$16 sps:$4 sm:$0xff]  }
 0x12f   : > { %5063 = vmatprep.mubr.bf16.mxu0 %v21423_v49 }
 0x130   : > { %1476 = vmatpush1.bf16.msra.mxu1 %v18382_v44  ;;  %v18456_v44 = vld [vmem:[#allocation5 + $0x3a4] ss:$16 sps:$4 sm:$0xff]  }
 0x131   : > { %5034 = vmatpush1.bf16.msra.mxu0 %v18385_v45  ;;  %1477 = vmatprep.subr.bf16.mxu1 %v18390_v50  ;;  %v18459_v45 = vld [vmem:[#allocation5 + $0x27a4] ss:$16 sps:$4 sm:$0xff]  }
 0x132   : > { %5035 = vmatprep.subr.bf16.mxu0 %v18393_v51  ;;  %v467_v50 = vld [vmem:[#allocation3 + $0x10] sm:$0xf8]  ;;  %v1081_v51 = vshrl.u32 %v21377_v23, 16 }
 0x134   : > { %1478 = vmatpush1.bf16.msra.mxu1 %v18388_v52  ;;  %v18454_v52 = vld [vmem:[#allocation5 + $0x3a0] ss:$16 sps:$4 sm:$0xff]  }
 0x135   : > { %5036 = vmatpush1.bf16.msra.mxu0 %v18391_v54  ;;  %1479 = vmatprep.subr.bf16.mxu1 %v18396_v55  ;;  %v1084_v54 = vshll.u32 %v21377_v23, 16  ;;  %v18457_v55 = vld [vmem:[#allocation5 + $0x27a0] ss:$16 sps:$4 sm:$0xff]   ;;  %v5104_v23 = vshll.u32 %v21390_v61, 16 }
 0x136   : > { %5037 = vmatprep.subr.bf16.mxu0 %v18399_v56  ;;  %v18462_v56 = vld [vmem:[#allocation5 + $0x3c4] ss:$16 sps:$4 sm:$0xff]  }
 0x138   : > { %1480 = vmatpush1.bf16.msra.mxu1 %v18394_v57  ;;  %v1073_v57 = vshrl.u32 %v467_v50, 16 }
 0x139   : > { %5038 = vmatpush1.bf16.msra.mxu0 %v18397_v58  ;;  %1481 = vmatprep.subr.bf16.mxu1 %v18402_v60  ;;  %v1076_v58 = vshll.u32 %v467_v50, 16  ;;  %v4535_v60 = vld [vmem:[#allocation3 + $0x8] sm:$0xfc] }
 0x13a   : > { %5039 = vmatprep.subr.bf16.mxu0 %v18405_v5  ;;  %v18465_v5 = vld [vmem:[#allocation5 + $0x27c4] ss:$16 sps:$4 sm:$0xff]  }
 0x13c   : > { %1482 = vmatpush1.bf16.msra.mxu1 %v18400_v62  ;;  %v1083_v62 = vrot.slane %v1081_v51, 3  ;;  %v18487_v51 = vld [vmem:[#allocation5 + $0x2040] ss:$16 sps:$4 sm:$0xff]  }
 0x13d   : > { %5040 = vmatpush1.bf16.msra.mxu0 %v18403_v63  ;;  %1483 = vmatprep.subr.bf16.mxu1 %v18408_v1  ;;  %v18460_v63 = vld [vmem:[#allocation5 + $0x3c0] ss:$16 sps:$4 sm:$0xff]  }
 0x13e   : > { %5041 = vmatprep.subr.bf16.mxu0 %v18411_v2  ;;  %v18463_v1 = vld [vmem:[#allocation5 + $0x27c0] ss:$16 sps:$4 sm:$0xff]   ;;  %v1086_v2 = vrot.slane %v1084_v54, 4  ;;  %v18495_v54 = vld [vmem:[#allocation5 + $0x2064] ss:$16 sps:$4 sm:$0xff]  }
 0x140   : > { %1484 = vmatpush1.bf16.msra.mxu1 %v18406_v3  ;;  %v18468_v3 = vld [vmem:[#allocation5 + $0x3e4] ss:$16 sps:$4 sm:$0xff]  }
 0x141   : > { %5042 = vmatpush1.bf16.msra.mxu0 %v18409_v4  ;;  %1485 = vmatprep.subr.bf16.mxu1 %v18414_v6  ;;  %v5093_v4 = vshrl.u32 %v4535_v60, 16  ;;  %v5096_v6 = vshll.u32 %v4535_v60, 16  ;;  %v18496_v60 = vld [vmem:[#allocation5 + $0x1080] ss:$16 sps:$4 sm:$0xff]  }
 0x142   : > { %5043 = vmatprep.subr.bf16.mxu0 %v18417_v7  ;;  %v5101_v7 = vshrl.u32 %v21390_v61, 16  ;;  %v18474_v61 = vld [vmem:[#allocation5 + $0x1004] ss:$16 sps:$4 sm:$0xff]  }
 0x144   : > { %1486 = vmatpush1.bf16.msra.mxu1 %v18412_v22  ;;  %v18471_v22 = vld [vmem:[#allocation5 + $0x27e4] ss:$16 sps:$4 sm:$0xff]  }
 0x145   : > { %5044 = vmatpush1.bf16.msra.mxu0 %v18415_v8  ;;  %1487 = vmatprep.subr.bf16.mxu1 %v18420_v10  ;;  %v1075_v8 = vrot.slane %v1073_v57, 3  ;;  %v1078_v10 = vrot.slane %v1076_v58, 4  ;;  %v18498_v57 = vld [vmem:[#allocation5 + $0x1084] ss:$16 sps:$4 sm:$0xff]  }
 0x146   : > { %5045 = vmatprep.subr.bf16.mxu0 %v18423_v12  ;;  %v21431_v12 = vld [vmem:[#allocation3 + $0x30] sm:$0x7]  ;;  %v18501_v58 = vld [vmem:[#allocation5 + $0x2084] ss:$16 sps:$4 sm:$0xff]  }
 0x148   : > { %1488 = vmatpush1.bf16.msra.mxu1 %v18418_v14  ;;  %v18466_v14 = vld [vmem:[#allocation5 + $0x3e0] ss:$16 sps:$4 sm:$0xff]  }
 0x149   : > { %5046 = vmatpush1.bf16.msra.mxu0 %v18421_v15  ;;  %1489 = vmatprep.subr.bf16.mxu1 %v18426_v16  ;;  %v18469_v15 = vld [vmem:[#allocation5 + $0x27e0] ss:$16 sps:$4 sm:$0xff]   ;;  %v5095_v16 = vrot.slane %v5093_v4, 2  ;;  %v18513_v4 = vld [vmem:[#allocation5 + $0x20c4] ss:$16 sps:$4 sm:$0xff]  }
 0x14a   : > { %5047 = vmatprep.subr.bf16.mxu0 %v18429_v17  ;;  %v5098_v17 = vrot.slane %v5096_v6, 3  ;;  %v18508_v6 = vld [vmem:[#allocation5 + $0x10c0] ss:$16 sps:$4 sm:$0xff]  }
 0x14c   : > { %1490 = vmatpush1.bf16.msra.mxu1 %v18424_v19  ;;  %v5103_v19 = vrot.slane %v5101_v7, 2  ;;  %v18511_v7 = vld [vmem:[#allocation5 + $0x20c0] ss:$16 sps:$4 sm:$0xff]  }
 0x14d   : > { %5048 = vmatpush1.bf16.msra.mxu0 %v18427_v20  ;;  %1491 = vmatprep.subr.bf16.mxu1 %v18432_v36  ;;  %v5106_v20 = vrot.slane %v5104_v23, 3  ;;  %v1079_v36 = vor.u32 %v1078_v10, %v1075_v8  ;;  %v18516_v23 = vld [vmem:[#allocation5 + $0x10e4] ss:$16 sps:$4 sm:$0xff]   ;;  %v18514_v8 = vld [vmem:[#allocation5 + $0x10e0] ss:$16 sps:$4 sm:$0xff]  }
 0x14e   : > { %5049 = vmatprep.subr.bf16.mxu0 %v18435_v21  ;;  %v1087_v21 = vor.u32 %v1086_v2, %v1083_v62  ;;  %v18504_v62 = vld [vmem:[#allocation5 + $0x10a4] ss:$16 sps:$4 sm:$0xff]   ;;  %v18505_v2 = vld [vmem:[#allocation5 + $0x20a0] ss:$16 sps:$4 sm:$0xff]  }
 0x14f   : > { %v18517_v10 = vld [vmem:[#allocation5 + $0x20e0] ss:$16 sps:$4 sm:$0xff]  }
 0x150   : > { %1492 = vmatpush1.bf16.msra.mxu1 %v18430_v24  ;;  %v2643_v24 = vrot.slane %v467_v50, 3  ;;  %v18484_v50 = vld [vmem:[#allocation5 + $0x1040] ss:$16 sps:$4 sm:$0xff]  }
 0x151   : > { %5050 = vmatpush1.bf16.msra.mxu0 %v18433_v25  ;;  %1493 = vmatprep.subr.bf16.mxu1 %v18438_v26  ;;  %v2644_v25 = vrot.slane %v21431_v12, 3  ;;  %v18477_v26 = vld [vmem:[#allocation5 + $0x2004] ss:$16 sps:$4 sm:$0xff]  }
 0x152   : > { %5051 = vmatprep.subr.bf16.mxu0 %v18441_v27  ;;  %v18472_v27 = vld [vmem:[#allocation5 + $0x1000] ss:$16 sps:$4 sm:$0xff]  }
 0x154   : > { %1494 = vmatpush1.bf16.msra.mxu1 %v18436_v28  ;;  %v18475_v28 = vld [vmem:[#allocation5 + $0x2000] ss:$16 sps:$4 sm:$0xff]  }
 0x155   : > { %5052 = vmatpush1.bf16.msra.mxu0 %v18439_v30  ;;  %1495 = vmatprep.subr.bf16.mxu1 %v18444_v31  ;;  %v5099_v30 = vor.u32 %v5098_v17, %v5095_v16  ;;  %v5107_v31 = vor.u32 %v5106_v20, %v5103_v19  ;;  %v18520_v16 = vld [vmem:[#allocation5 + $0x1100] ss:$16 sps:$4 sm:$0xff]   ;;  %v18528_v19 = vld [vmem:[#allocation5 + $0x1124] ss:$16 sps:$4 sm:$0xff]  }
 0x156   : > { %5053 = vmatprep.subr.bf16.mxu0 %v18447_v32  ;;  %v21435_v32 = vsel %vm1037_vm3, %v1079_v36, %v1087_v21  ;;  %v18523_v17 = vld [vmem:[#allocation5 + $0x2100] ss:$16 sps:$4 sm:$0xff]   ;;  %v18531_v20 = vld [vmem:[#allocation5 + $0x2124] ss:$16 sps:$4 sm:$0xff]  }
 0x157   : > { %v18526_v36 = vld [vmem:[#allocation5 + $0x1120] ss:$16 sps:$4 sm:$0xff]  }
 0x158   : > { %1496 = vmatpush1.bf16.msra.mxu1 %v18442_v35  ;;  %v21438_v35 = vsel %vm2636_vm2, %v2643_v24, %v2644_v25  ;;  %v18529_v21 = vld [vmem:[#allocation5 + $0x2120] ss:$16 sps:$4 sm:$0xff]   ;;  %v18537_v24 = vld [vmem:[#allocation5 + $0x2144] ss:$16 sps:$4 sm:$0xff]  }
 0x159   : > { %5054 = vmatpush1.bf16.msra.mxu0 %v18445_v37  ;;  %1497 = vmatprep.subr.bf16.mxu1 %v18450_v38  ;;  %v18480_v37 = vld [vmem:[#allocation5 + $0x1024] ss:$16 sps:$4 sm:$0xff]   ;;  %v18532_v25 = vld [vmem:[#allocation5 + $0x1140] ss:$16 sps:$4 sm:$0xff]  }
 0x15a   : > { %5055 = vmatprep.subr.bf16.mxu0 %v18453_v39  ;;  %v18483_v38 = vld [vmem:[#allocation5 + $0x2024] ss:$16 sps:$4 sm:$0xff]   ;;  %v18478_v39 = vld [vmem:[#allocation5 + $0x1020] ss:$16 sps:$4 sm:$0xff]  }
 0x15c   : > { %1498 = vmatpush1.bf16.msra.mxu1 %v18448_v42  ;;  %v18481_v42 = vld [vmem:[#allocation5 + $0x2020] ss:$16 sps:$4 sm:$0xff]  }
 0x15d   : > { %5056 = vmatpush1.bf16.msra.mxu0 %v18451_v43  ;;  %1499 = vmatprep.subr.bf16.mxu1 %v18456_v44  ;;  %v5108_v43 = vsel %vm5074_vm4, %v5099_v30, %v5107_v31  ;;  %v18486_v44 = vld [vmem:[#allocation5 + $0x1044] ss:$16 sps:$4 sm:$0xff]   ;;  %v18538_v30 = vld [vmem:[#allocation5 + $0x1160] ss:$16 sps:$4 sm:$0xff]  }
 0x15e   : > { %5057 = vmatprep.subr.bf16.mxu0 %v18459_v45  ;;  %v18489_v45 = vld [vmem:[#allocation5 + $0x2044] ss:$16 sps:$4 sm:$0xff]   ;;  %v18541_v31 = vld [vmem:[#allocation5 + $0x2160] ss:$16 sps:$4 sm:$0xff]  }
 0x160   : > { %1500 = vmatpush1.bf16.msra.mxu1 %v18454_v52  ;;  %v18492_v52 = vld [vmem:[#allocation5 + $0x1064] ss:$16 sps:$4 sm:$0xff]  }
 0x161   : > { %5058 = vmatpush1.bf16.msra.mxu0 %v18457_v55  ;;  %1501 = vmatprep.subr.bf16.mxu1 %v18462_v56  ;;  %v18490_v55 = vld [vmem:[#allocation5 + $0x1060] ss:$16 sps:$4 sm:$0xff]  }
 0x162   : > { %5059 = vmatprep.subr.bf16.mxu0 %v18465_v5  ;;  %v18493_v56 = vld [vmem:[#allocation5 + $0x2060] ss:$16 sps:$4 sm:$0xff]  }
 0x163   : > { %v18499_v5 = vld [vmem:[#allocation5 + $0x2080] ss:$16 sps:$4 sm:$0xff]  }
 0x164   : > { %1502 = vmatpush1.bf16.msra.mxu1 %v18460_v63  ;;  %v18507_v63 = vld [vmem:[#allocation5 + $0x20a4] ss:$16 sps:$4 sm:$0xff]  }
 0x165   : > { %5060 = vmatpush1.bf16.msra.mxu0 %v18463_v1  ;;  %1503 = vmatprep.subr.bf16.mxu1 %v18468_v3  ;;  %v18502_v1 = vld [vmem:[#allocation5 + $0x10a0] ss:$16 sps:$4 sm:$0xff]   ;;  %v18510_v3 = vld [vmem:[#allocation5 + $0x10c4] ss:$16 sps:$4 sm:$0xff]  }
 0x166   : > { %5061 = vmatprep.subr.bf16.mxu0 %v18471_v22  ;;  %v18519_v22 = vld [vmem:[#allocation5 + $0x20e4] ss:$16 sps:$4 sm:$0xff]  }
 0x168   : > { %1504 = vmatpush1.bf16.msra.mxu1 %v18466_v14  ;;  %v18522_v14 = vld [vmem:[#allocation5 + $0x1104] ss:$16 sps:$4 sm:$0xff]  }
 0x169   : > { %5062 = vmatpush1.bf16.msra.mxu0 %v18469_v15  ;;  %2542 = vmatprep.subr.bf16.mxu1 %v18474_v61  ;;  %v18525_v15 = vld [vmem:[#allocation5 + $0x2104] ss:$16 sps:$4 sm:$0xff]  }
 0x16a   : > { %5467 = vmatprep.subr.bf16.mxu0 %v18477_v26  ;;  %v18534_v61 = vld [vmem:[#allocation5 + $0x1144] ss:$16 sps:$4 sm:$0xff]   ;;  %v18535_v26 = vld [vmem:[#allocation5 + $0x2140] ss:$16 sps:$4 sm:$0xff]  }
 0x16b   : > { %1506 = vmatmul.mubr.bf16.vlgmr.msra.gmra.mrb[0].mxu1 %v21435_v32 }
 0x16c   : > { %5064 = vmatmul.mubr.bf16.vlgmr.msra.gmra.mrb[4].mxu0 %v21438_v35  ;;  %2543 = vmatpush1.bf16.msra.mxu1 %v18472_v27  ;;  %v18540_v27 = vld [vmem:[#allocation5 + $0x1164] ss:$16 sps:$4 sm:$0xff]  }
 0x16d   : > { %5468 = vmatpush1.bf16.msra.mxu0 %v18475_v28  ;;  %2544 = vmatprep.subr.bf16.mxu1 %v18480_v37  ;;  %v18543_v28 = vld [vmem:[#allocation5 + $0x2164] ss:$16 sps:$4 sm:$0xff]  }
 0x16e   : > { %5469 = vmatprep.subr.bf16.mxu0 %v18483_v38  ;;  %2574 = vmatprep.mubr.bf16.mxu1 %v21397_v11  ;;  %v18546_v37 = vld [vmem:[#allocation5 + $0x1184] ss:$16 sps:$4 sm:$0xff]  }
 0x16f   : > { %5499 = vmatprep.mubr.bf16.mxu0 %v5108_v43  ;;  %v18549_v38 = vld [vmem:[#allocation5 + $0x2184] ss:$16 sps:$4 sm:$0xff]  }
 0x170   : > { %2545 = vmatpush1.bf16.msra.mxu1 %v18478_v39  ;;  %v18544_v39 = vld [vmem:[#allocation5 + $0x1180] ss:$16 sps:$4 sm:$0xff]   ;;  %v18552_v43 = vld [vmem:[#allocation5 + $0x11a4] ss:$16 sps:$4 sm:$0xff]  }
 0x171   : > { %5470 = vmatpush1.bf16.msra.mxu0 %v18481_v42  ;;  %2546 = vmatprep.subr.bf16.mxu1 %v18486_v44  ;;  %v18547_v42 = vld [vmem:[#allocation5 + $0x2180] ss:$16 sps:$4 sm:$0xff]   ;;  %v18555_v44 = vld [vmem:[#allocation5 + $0x21a4] ss:$16 sps:$4 sm:$0xff]  }
 0x172   : > { %5471 = vmatprep.subr.bf16.mxu0 %v18489_v45  ;;  %v4534_v45 = vld [vmem:[#allocation3] sm:$0xfc] }
 0x174   : > { %2547 = vmatpush1.bf16.msra.mxu1 %v18484_v50  ;;  %v18550_v50 = vld [vmem:[#allocation5 + $0x11a0] ss:$16 sps:$4 sm:$0xff]  }
 0x175   : > { %5472 = vmatpush1.bf16.msra.mxu0 %v18487_v51  ;;  %2548 = vmatprep.subr.bf16.mxu1 %v18492_v52  ;;  %v5084_v51 = vshrl.u32 %v21405_v13, 16  ;;  %v5087_v52 = vshll.u32 %v21405_v13, 16  ;;  %v5138_v13 = vshll.u32 %v21408_v29, 16 }
 0x176   : > { %5473 = vmatprep.subr.bf16.mxu0 %v18495_v54  ;;  %v18553_v54 = vld [vmem:[#allocation5 + $0x21a0] ss:$16 sps:$4 sm:$0xff]  }
 0x178   : > { %2549 = vmatpush1.bf16.msra.mxu1 %v18490_v55  ;;  %v18558_v55 = vld [vmem:[#allocation5 + $0x11c4] ss:$16 sps:$4 sm:$0xff]  }
 0x179   : > { %5474 = vmatpush1.bf16.msra.mxu0 %v18493_v56  ;;  %2550 = vmatprep.subr.bf16.mxu1 %v18498_v57  ;;  %v5076_v56 = vshrl.u32 %v4534_v45, 16  ;;  %v5079_v57 = vshll.u32 %v4534_v45, 16  ;;  %v18591_v45 = vld [vmem:[#allocation5 + $0x2264] ss:$16 sps:$4 sm:$0xff]  }
 0x17a   : > { %5475 = vmatprep.subr.bf16.mxu0 %v18501_v58  ;;  %v4537_v58 = vld [vmem:[#allocation3 + $0x18] sm:$0xfc] }
 0x17c   : > { %2551 = vmatpush1.bf16.msra.mxu1 %v18496_v60  ;;  %v18561_v60 = vld [vmem:[#allocation5 + $0x21c4] ss:$16 sps:$4 sm:$0xff]  }
 0x17d   : > { %5476 = vmatpush1.bf16.msra.mxu0 %v18499_v5  ;;  %2552 = vmatprep.subr.bf16.mxu1 %v18504_v62  ;;  %v18556_v5 = vld [vmem:[#allocation5 + $0x11c0] ss:$16 sps:$4 sm:$0xff]   ;;  %v5086_v62 = vrot.slane %v5084_v51, 2 }
 0x17e   : > { %5477 = vmatprep.subr.bf16.mxu0 %v18507_v63  ;;  %v5089_v63 = vrot.slane %v5087_v52, 3  ;;  %v18589_v51 = vld [vmem:[#allocation5 + $0x2260] ss:$16 sps:$4 sm:$0xff]   ;;  %v18594_v52 = vld [vmem:[#allocation5 + $0x1284] ss:$16 sps:$4 sm:$0xff]  }
 0x180   : > { %2553 = vmatpush1.bf16.msra.mxu1 %v18502_v1  ;;  %v5135_v1 = vshrl.u32 %v21408_v29, 16  ;;  %v18570_v29 = vld [vmem:[#allocation5 + $0x1204] ss:$16 sps:$4 sm:$0xff]  }
 0x181   : > { %5478 = vmatpush1.bf16.msra.mxu0 %v18505_v2  ;;  %2554 = vmatprep.subr.bf16.mxu1 %v18510_v3  ;;  %v18559_v2 = vld [vmem:[#allocation5 + $0x21c0] ss:$16 sps:$4 sm:$0xff]   ;;  %v5127_v3 = vshrl.u32 %v4537_v58, 16 }
 0x182   : > { %5479 = vmatprep.subr.bf16.mxu0 %v18513_v4  ;;  %v5130_v4 = vshll.u32 %v4537_v58, 16  ;;  %v18603_v58 = vld [vmem:[#allocation5 + $0x22a4] ss:$16 sps:$4 sm:$0xff]  }
 0x184   : > { %2555 = vmatpush1.bf16.msra.mxu1 %v18508_v6  ;;  %v18564_v6 = vld [vmem:[#allocation5 + $0x11e4] ss:$16 sps:$4 sm:$0xff]  }
 0x185   : > { %5480 = vmatpush1.bf16.msra.mxu0 %v18511_v7  ;;  %2556 = vmatprep.subr.bf16.mxu1 %v18516_v23  ;;  %v5078_v7 = vrot.slane %v5076_v56, 2  ;;  %v5081_v23 = vrot.slane %v5079_v57, 3  ;;  %v18595_v56 = vld [vmem:[#allocation5 + $0x2280] ss:$16 sps:$4 sm:$0xff]   ;;  %v18600_v57 = vld [vmem:[#allocation5 + $0x12a4] ss:$16 sps:$4 sm:$0xff]  }
 0x186   : > { %5481 = vmatprep.subr.bf16.mxu0 %v18519_v22  ;;  %v18567_v22 = vld [vmem:[#allocation5 + $0x21e4] ss:$16 sps:$4 sm:$0xff]  }
 0x188   : > { %2557 = vmatpush1.bf16.msra.mxu1 %v18514_v8  ;;  %v5137_v8 = vrot.slane %v5135_v1, 2 }
 0x189   : > { %5482 = vmatpush1.bf16.msra.mxu0 %v18517_v10  ;;  %2558 = vmatprep.subr.bf16.mxu1 %v18522_v14  ;;  %v5129_v10 = vrot.slane %v5127_v3, 2  ;;  %v5132_v14 = vrot.slane %v5130_v4, 3  ;;  %v18607_v4 = vld [vmem:[#allocation5 + $0x22c0] ss:$16 sps:$4 sm:$0xff]  }
 0x18a   : > { %5483 = vmatprep.subr.bf16.mxu0 %v18525_v15  ;;  %v5140_v15 = vrot.slane %v5138_v13, 3 }
 0x18c   : > { %2559 = vmatpush1.bf16.msra.mxu1 %v18520_v16  ;;  %v18562_v16 = vld [vmem:[#allocation5 + $0x11e0] ss:$16 sps:$4 sm:$0xff]  }
 0x18d   : > { %5484 = vmatpush1.bf16.msra.mxu0 %v18523_v17  ;;  %2560 = vmatprep.subr.bf16.mxu1 %v18528_v19  ;;  %v18565_v17 = vld [vmem:[#allocation5 + $0x21e0] ss:$16 sps:$4 sm:$0xff]   ;;  %v5082_v19 = vor.u32 %v5081_v23, %v5078_v7  ;;  %v18612_v7 = vld [vmem:[#allocation5 + $0x12e4] ss:$16 sps:$4 sm:$0xff]  }
 0x18e   : > { %5485 = vmatprep.subr.bf16.mxu0 %v18531_v20  ;;  %v5090_v20 = vor.u32 %v5089_v63, %v5086_v62  ;;  %v18606_v62 = vld [vmem:[#allocation5 + $0x12c4] ss:$16 sps:$4 sm:$0xff]  }
 0x18f   : > { %v18609_v63 = vld [vmem:[#allocation5 + $0x22c4] ss:$16 sps:$4 sm:$0xff]  }
 0x190   : > { %2561 = vmatpush1.bf16.msra.mxu1 %v18526_v36  ;;  %v18573_v36 = vld [vmem:[#allocation5 + $0x2204] ss:$16 sps:$4 sm:$0xff]  }
 0x191   : > { %5486 = vmatpush1.bf16.msra.mxu0 %v18529_v21  ;;  %2562 = vmatprep.subr.bf16.mxu1 %v18534_v61  ;;  %v5133_v21 = vor.u32 %v5132_v14, %v5129_v10  ;;  %v5141_v61 = vor.u32 %v5140_v15, %v5137_v8  ;;  %v18615_v23 = vld [vmem:[#allocation5 + $0x22e4] ss:$16 sps:$4 sm:$0xff]   ;;  %v18613_v8 = vld [vmem:[#allocation5 + $0x22e0] ss:$16 sps:$4 sm:$0xff]  }
 0x192   : > { %5487 = vmatprep.subr.bf16.mxu0 %v18537_v24  ;;  %v18568_v24 = vld [vmem:[#allocation5 + $0x1200] ss:$16 sps:$4 sm:$0xff]   ;;  %v18618_v10 = vld [vmem:[#allocation5 + $0x1304] ss:$16 sps:$4 sm:$0xff]  }
 0x193   : > { %v18621_v14 = vld [vmem:[#allocation5 + $0x2304] ss:$16 sps:$4 sm:$0xff]   ;;  %v18616_v15 = vld [vmem:[#allocation5 + $0x1300] ss:$16 sps:$4 sm:$0xff]  }
 0x194   : > { %2563 = vmatpush1.bf16.msra.mxu1 %v18532_v25  ;;  %v18571_v25 = vld [vmem:[#allocation5 + $0x2200] ss:$16 sps:$4 sm:$0xff]  }
 0x195   : > { %5488 = vmatpush1.bf16.msra.mxu0 %v18535_v26  ;;  %2564 = vmatprep.subr.bf16.mxu1 %v18540_v27  ;;  %v5091_v26 = vsel %vm5074_vm4, %v5082_v19, %v5090_v20  ;;  %v18576_v27 = vld [vmem:[#allocation5 + $0x1224] ss:$16 sps:$4 sm:$0xff]   ;;  %v18622_v20 = vld [vmem:[#allocation5 + $0x1320] ss:$16 sps:$4 sm:$0xff]  }
 0x196   : > { %5489 = vmatprep.subr.bf16.mxu0 %v18543_v28  ;;  %v18579_v28 = vld [vmem:[#allocation5 + $0x2224] ss:$16 sps:$4 sm:$0xff]  }
 0x197   : > { %v18627_v19 = vld [vmem:[#allocation5 + $0x2324] ss:$16 sps:$4 sm:$0xff]  }
 0x198   : > { %2565 = vmatpush1.bf16.msra.mxu1 %v18538_v30  ;;  %v5142_v30 = vsel %vm5074_vm4, %v5133_v21, %v5141_v61  ;;  %v18633_v21 = vld [vmem:[#allocation5 + $0x2344] ss:$16 sps:$4 sm:$0xff]   ;;  %v18628_v61 = vld [vmem:[#allocation5 + $0x1340] ss:$16 sps:$4 sm:$0xff]  }
 0x199   : > { %5490 = vmatpush1.bf16.msra.mxu0 %v18541_v31  ;;  %2566 = vmatprep.subr.bf16.mxu1 %v18546_v37  ;;  %v18574_v31 = vld [vmem:[#allocation5 + $0x1220] ss:$16 sps:$4 sm:$0xff]  }
 0x19a   : > { %5491 = vmatprep.subr.bf16.mxu0 %v18549_v38  ;;  %v18577_v37 = vld [vmem:[#allocation5 + $0x2220] ss:$16 sps:$4 sm:$0xff]   ;;  %v18582_v38 = vld [vmem:[#allocation5 + $0x1244] ss:$16 sps:$4 sm:$0xff]  }
 0x19c   : > { %2567 = vmatpush1.bf16.msra.mxu1 %v18544_v39  ;;  %v18585_v39 = vld [vmem:[#allocation5 + $0x2244] ss:$16 sps:$4 sm:$0xff]  }
 0x19d   : > { %5492 = vmatpush1.bf16.msra.mxu0 %v18547_v42  ;;  %2568 = vmatprep.subr.bf16.mxu1 %v18552_v43  ;;  %v18580_v42 = vld [vmem:[#allocation5 + $0x1240] ss:$16 sps:$4 sm:$0xff]  }
 0x19e   : > { %5493 = vmatprep.subr.bf16.mxu0 %v18555_v44  ;;  %v18583_v43 = vld [vmem:[#allocation5 + $0x2240] ss:$16 sps:$4 sm:$0xff]   ;;  %v18588_v44 = vld [vmem:[#allocation5 + $0x1264] ss:$16 sps:$4 sm:$0xff]  }
 0x1a0   : > { %2569 = vmatpush1.bf16.msra.mxu1 %v18550_v50  ;;  %v18586_v50 = vld [vmem:[#allocation5 + $0x1260] ss:$16 sps:$4 sm:$0xff]  }
 0x1a1   : > { %5494 = vmatpush1.bf16.msra.mxu0 %v18553_v54  ;;  %2570 = vmatprep.subr.bf16.mxu1 %v18558_v55  ;;  %v18597_v54 = vld [vmem:[#allocation5 + $0x2284] ss:$16 sps:$4 sm:$0xff]   ;;  %v18592_v55 = vld [vmem:[#allocation5 + $0x1280] ss:$16 sps:$4 sm:$0xff]  }
 0x1a2   : > { %5495 = vmatprep.subr.bf16.mxu0 %v18561_v60  ;;  %v18598_v60 = vld [vmem:[#allocation5 + $0x12a0] ss:$16 sps:$4 sm:$0xff]  }
 0x1a4   : > { %2571 = vmatpush1.bf16.msra.mxu1 %v18556_v5  ;;  %v18601_v5 = vld [vmem:[#allocation5 + $0x22a0] ss:$16 sps:$4 sm:$0xff]  }
 0x1a5   : > { %5496 = vmatpush1.bf16.msra.mxu0 %v18559_v2  ;;  %2572 = vmatprep.subr.bf16.mxu1 %v18564_v6  ;;  %v18604_v2 = vld [vmem:[#allocation5 + $0x12c0] ss:$16 sps:$4 sm:$0xff]  }
 0x1a6   : > { %5497 = vmatprep.subr.bf16.mxu0 %v18567_v22  ;;  %v18610_v22 = vld [vmem:[#allocation5 + $0x12e0] ss:$16 sps:$4 sm:$0xff]  }
 0x1a8   : > { %2573 = vmatpush1.bf16.msra.mxu1 %v18562_v16  ;;  %v18619_v16 = vld [vmem:[#allocation5 + $0x2300] ss:$16 sps:$4 sm:$0xff]  }
 0x1a9   : > { %5498 = vmatpush1.bf16.msra.mxu0 %v18565_v17  ;;  %2585 = vmatprep.subr.bf16.mxu1 %v18570_v29  ;;  %v18624_v17 = vld [vmem:[#allocation5 + $0x1324] ss:$16 sps:$4 sm:$0xff]   ;;  %v18625_v29 = vld [vmem:[#allocation5 + $0x2320] ss:$16 sps:$4 sm:$0xff]  }
 0x1aa   : > { %5510 = vmatprep.subr.bf16.mxu0 %v18573_v36  ;;  %v18630_v36 = vld [vmem:[#allocation5 + $0x1344] ss:$16 sps:$4 sm:$0xff]  }
 0x1ab   : > { %2575 = vmatmul.mubr.bf16.vlgmr.msra.gmra.mrb[4].mxu1 %v21412_v40 }
 0x1ac   : > { %5500 = vmatmul.mubr.bf16.vlgmr.msra.gmra.mrb[4].mxu0 %v5091_v26  ;;  %2586 = vmatpush1.bf16.msra.mxu1 %v18568_v24  ;;  %v18631_v24 = vld [vmem:[#allocation5 + $0x2340] ss:$16 sps:$4 sm:$0xff]   ;;  %v18639_v26 = vld [vmem:[#allocation5 + $0x2364] ss:$16 sps:$4 sm:$0xff]  }
 0x1ad   : > { %5511 = vmatpush1.bf16.msra.mxu0 %v18571_v25  ;;  %2587 = vmatprep.subr.bf16.mxu1 %v18576_v27  ;;  %v18636_v25 = vld [vmem:[#allocation5 + $0x1364] ss:$16 sps:$4 sm:$0xff]   ;;  %v18634_v27 = vld [vmem:[#allocation5 + $0x1360] ss:$16 sps:$4 sm:$0xff]  }
 0x1ae   : > { %5512 = vmatprep.subr.bf16.mxu0 %v18579_v28  ;;  %2617 = vmatprep.mubr.bf16.mxu1 %v21420_v48  ;;  %v18637_v28 = vld [vmem:[#allocation5 + $0x2360] ss:$16 sps:$4 sm:$0xff]  }
 0x1af   : > { %5542 = vmatprep.mubr.bf16.mxu0 %v5142_v30  ;;  %v18642_v30 = vld [vmem:[#allocation5 + $0x1384] ss:$16 sps:$4 sm:$0xff]  }
 0x1b0   : > { %2588 = vmatpush1.bf16.msra.mxu1 %v18574_v31  ;;  %v18645_v31 = vld [vmem:[#allocation5 + $0x2384] ss:$16 sps:$4 sm:$0xff]  }
 0x1b1   : > { %5513 = vmatpush1.bf16.msra.mxu0 %v18577_v37  ;;  %2589 = vmatprep.subr.bf16.mxu1 %v18582_v38  ;;  %v18640_v37 = vld [vmem:[#allocation5 + $0x1380] ss:$16 sps:$4 sm:$0xff]  }
 0x1b2   : > { %5514 = vmatprep.subr.bf16.mxu0 %v18585_v39  ;;  %v18643_v38 = vld [vmem:[#allocation5 + $0x2380] ss:$16 sps:$4 sm:$0xff]   ;;  %v18648_v39 = vld [vmem:[#allocation5 + $0x13a4] ss:$16 sps:$4 sm:$0xff]  }
 0x1b4   : > { %2590 = vmatpush1.bf16.msra.mxu1 %v18580_v42  ;;  %v18651_v42 = vld [vmem:[#allocation5 + $0x23a4] ss:$16 sps:$4 sm:$0xff]  }
 0x1b5   : > { %5515 = vmatpush1.bf16.msra.mxu0 %v18583_v43  ;;  %2591 = vmatprep.subr.bf16.mxu1 %v18588_v44  ;;  %v4536_v43 = vld [vmem:[#allocation3 + $0x10] sm:$0xfc] }
 0x1b6   : > { %5516 = vmatprep.subr.bf16.mxu0 %v18591_v45  ;;  %v18646_v44 = vld [vmem:[#allocation5 + $0x13a0] ss:$16 sps:$4 sm:$0xff]   ;;  %v5118_v45 = vshrl.u32 %v21431_v12, 16 }
 0x1b8   : > { %2592 = vmatpush1.bf16.msra.mxu1 %v18586_v50  ;;  %v18649_v50 = vld [vmem:[#allocation5 + $0x23a0] ss:$16 sps:$4 sm:$0xff]  }
 0x1b9   : > { %5517 = vmatpush1.bf16.msra.mxu0 %v18589_v51  ;;  %2593 = vmatprep.subr.bf16.mxu1 %v18594_v52  ;;  %v5110_v51 = vshrl.u32 %v4536_v43, 16  ;;  %v5113_v52 = vshll.u32 %v4536_v43, 16  ;;  %v18702_v43 = vld [vmem:[#allocation5 + $0xcc4] ss:$16 sps:$4 sm:$0xff]  }
 0x1ba   : > { %5518 = vmatprep.subr.bf16.mxu0 %v18597_v54  ;;  %v5121_v54 = vshll.u32 %v21431_v12, 16  ;;  %v18661_v12 = vld [vmem:[#allocation5 + $0x23e0] ss:$16 sps:$4 sm:$0xff]  }
 0x1bc   : > { %2594 = vmatpush1.bf16.msra.mxu1 %v18592_v55  ;;  %v18654_v55 = vld [vmem:[#allocation5 + $0x13c4] ss:$16 sps:$4 sm:$0xff]  }
 0x1bd   : > { %5519 = vmatpush1.bf16.msra.mxu0 %v18595_v56  ;;  %2595 = vmatprep.subr.bf16.mxu1 %v18600_v57  ;;  %v18657_v56 = vld [vmem:[#allocation5 + $0x23c4] ss:$16 sps:$4 sm:$0xff]   ;;  %v18652_v57 = vld [vmem:[#allocation5 + $0x13c0] ss:$16 sps:$4 sm:$0xff]  }
 0x1be   : > { %5520 = vmatprep.subr.bf16.mxu0 %v18603_v58  ;;  %v5120_v58 = vrot.slane %v5118_v45, 2  ;;  %v18700_v45 = vld [vmem:[#allocation5 + $0xcc0] ss:$16 sps:$4 sm:$0xff]  }
 0x1bf   : > { %v21452_v1 = vpop.f32.mrb[0].mxu0 }
 0x1c0   : > { %v21454_v3 = vpop.f32.mrb[1].mxu0  ;;  %2596 = vmatpush1.bf16.msra.mxu1 %v18598_v60  ;;  %v18655_v60 = vld [vmem:[#allocation5 + $0x23c0] ss:$16 sps:$4 sm:$0xff]  }
 0x1c1   : > { %v21456_v13 = vpop.f32.mrb[2].mxu0  ;;  %5521 = vmatpush1.bf16.msra.mxu0 %v18601_v5  ;;  %2597 = vmatprep.subr.bf16.mxu1 %v18606_v62  ;;  %v5112_v5 = vrot.slane %v5110_v51, 2  ;;  %v5115_v62 = vrot.slane %v5113_v52, 3  ;;  %v18708_v51 = vld [vmem:[#allocation5 + $0xce4] ss:$16 sps:$4 sm:$0xff]  }
 0x1c2   : > { %v21458_v6 = vpop.f32.mrb[3].mxu0  ;;  %5522 = vmatprep.subr.bf16.mxu0 %v18609_v63  ;;  %v5123_v63 = vrot.slane %v5121_v54, 3  ;;  %v18711_v52 = vld [vmem:[#allocation5 + $0x28e4] ss:$16 sps:$4 sm:$0xff]   ;;  %v18706_v54 = vld [vmem:[#allocation5 + $0xce0] ss:$16 sps:$4 sm:$0xff]  }
 0x1c4   : > { %2598 = vmatpush1.bf16.msra.mxu1 %v18604_v2  ;;  %v18660_v2 = vld [vmem:[#allocation5 + $0x13e4] ss:$16 sps:$4 sm:$0xff]  }
 0x1c5   : > { %5523 = vmatpush1.bf16.msra.mxu0 %v18607_v4  ;;  %2599 = vmatprep.subr.bf16.mxu1 %v18612_v7  ;;  %v18663_v4 = vld [vmem:[#allocation5 + $0x23e4] ss:$16 sps:$4 sm:$0xff]   ;;  %v18658_v7 = vld [vmem:[#allocation5 + $0x13e0] ss:$16 sps:$4 sm:$0xff]  }
 0x1c6   : > { %5524 = vmatprep.subr.bf16.mxu0 %v18615_v23  ;;  %v5116_v23 = vor.u32 %v5115_v62, %v5112_v5  ;;  %v18720_v5 = vld [vmem:[#allocation5 + $0xd24] ss:$16 sps:$4 sm:$0xff]  }
 0x1c7   : > { %v18723_v62 = vld [vmem:[#allocation5 + $0x2924] ss:$16 sps:$4 sm:$0xff]  }
 0x1c8   : > { %2600 = vmatpush1.bf16.msra.mxu1 %v18610_v22  ;;  %v5124_v22 = vor.u32 %v5123_v63, %v5120_v58  ;;  %v18712_v58 = vld [vmem:[#allocation5 + $0xd00] ss:$16 sps:$4 sm:$0xff]  }
 0x1c9   : > { %5525 = vmatpush1.bf16.msra.mxu0 %v18613_v8  ;;  %2601 = vmatprep.subr.bf16.mxu1 %v18618_v10  ;;  %v18666_v8 = vld [vmem:[#allocation5 + $0xc04] ss:$16 sps:$4 sm:$0xff]   ;;  %v18718_v63 = vld [vmem:[#allocation5 + $0xd20] ss:$16 sps:$4 sm:$0xff]  }
 0x1ca   : > { %5526 = vmatprep.subr.bf16.mxu0 %v18621_v14  ;;  %v18669_v10 = vld [vmem:[#allocation5 + $0x2804] ss:$16 sps:$4 sm:$0xff]   ;;  %v18664_v14 = vld [vmem:[#allocation5 + $0xc00] ss:$16 sps:$4 sm:$0xff]  }
 0x1cc   : > { %2602 = vmatpush1.bf16.msra.mxu1 %v18616_v15  ;;  %v18667_v15 = vld [vmem:[#allocation5 + $0x2800] ss:$16 sps:$4 sm:$0xff]  }
 0x1cd   : > { %5527 = vmatpush1.bf16.msra.mxu0 %v18619_v16  ;;  %2603 = vmatprep.subr.bf16.mxu1 %v18624_v17  ;;  %v5125_v16 = vsel %vm5074_vm4, %v5116_v23, %v5124_v22  ;;  %v18672_v17 = vld [vmem:[#allocation5 + $0xc24] ss:$16 sps:$4 sm:$0xff]   ;;  %v18727_v23 = vld [vmem:[#allocation5 + $0x2940] ss:$16 sps:$4 sm:$0xff]  }
 0x1ce   : > { %5528 = vmatprep.subr.bf16.mxu0 %v18627_v19  ;;  %v18675_v19 = vld [vmem:[#allocation5 + $0x2824] ss:$16 sps:$4 sm:$0xff]  }
 0x1cf   : > { %v18732_v22 = vld [vmem:[#allocation5 + $0xd64] ss:$16 sps:$4 sm:$0xff]  }
 0x1d0   : > { %2604 = vmatpush1.bf16.msra.mxu1 %v18622_v20  ;;  %v18670_v20 = vld [vmem:[#allocation5 + $0xc20] ss:$16 sps:$4 sm:$0xff]  }
 0x1d1   : > { %5529 = vmatpush1.bf16.msra.mxu0 %v18625_v29  ;;  %2605 = vmatprep.subr.bf16.mxu1 %v18630_v36  ;;  %v18673_v29 = vld [vmem:[#allocation5 + $0x2820] ss:$16 sps:$4 sm:$0xff]   ;;  %v18678_v36 = vld [vmem:[#allocation5 + $0xc44] ss:$16 sps:$4 sm:$0xff]  }
 0x1d2   : > { %5530 = vmatprep.subr.bf16.mxu0 %v18633_v21  ;;  %v18681_v21 = vld [vmem:[#allocation5 + $0x2844] ss:$16 sps:$4 sm:$0xff]  }
 0x1d4   : > { %2606 = vmatpush1.bf16.msra.mxu1 %v18628_v61  ;;  %v18676_v61 = vld [vmem:[#allocation5 + $0xc40] ss:$16 sps:$4 sm:$0xff]  }
 0x1d5   : > { %5531 = vmatpush1.bf16.msra.mxu0 %v18631_v24  ;;  %2607 = vmatprep.subr.bf16.mxu1 %v18636_v25  ;;  %v18679_v24 = vld [vmem:[#allocation5 + $0x2840] ss:$16 sps:$4 sm:$0xff]   ;;  %v18684_v25 = vld [vmem:[#allocation5 + $0xc64] ss:$16 sps:$4 sm:$0xff]  }
 0x1d6   : > { %5532 = vmatprep.subr.bf16.mxu0 %v18639_v26  ;;  %v18687_v26 = vld [vmem:[#allocation5 + $0x2864] ss:$16 sps:$4 sm:$0xff]  }
 0x1d8   : > { %2608 = vmatpush1.bf16.msra.mxu1 %v18634_v27  ;;  %v18682_v27 = vld [vmem:[#allocation5 + $0xc60] ss:$16 sps:$4 sm:$0xff]  }
 0x1d9   : > { %5533 = vmatpush1.bf16.msra.mxu0 %v18637_v28  ;;  %2609 = vmatprep.subr.bf16.mxu1 %v18642_v30  ;;  %v18685_v28 = vld [vmem:[#allocation5 + $0x2860] ss:$16 sps:$4 sm:$0xff]   ;;  %v18690_v30 = vld [vmem:[#allocation5 + $0xc84] ss:$16 sps:$4 sm:$0xff]  }
 0x1da   : > { %5534 = vmatprep.subr.bf16.mxu0 %v18645_v31  ;;  %v18693_v31 = vld [vmem:[#allocation5 + $0x2884] ss:$16 sps:$4 sm:$0xff]  }
 0x1dc   : > { %2610 = vmatpush1.bf16.msra.mxu1 %v18640_v37  ;;  %v18696_v37 = vld [vmem:[#allocation5 + $0xca4] ss:$16 sps:$4 sm:$0xff]  }
 0x1dd   : > { %5535 = vmatpush1.bf16.msra.mxu0 %v18643_v38  ;;  %2611 = vmatprep.subr.bf16.mxu1 %v18648_v39  ;;  %v18699_v38 = vld [vmem:[#allocation5 + $0x28a4] ss:$16 sps:$4 sm:$0xff]   ;;  %v18694_v39 = vld [vmem:[#allocation5 + $0xca0] ss:$16 sps:$4 sm:$0xff]  }
 0x1de   : > { %5536 = vmatprep.subr.bf16.mxu0 %v18651_v42  ;;  %v18697_v42 = vld [vmem:[#allocation5 + $0x28a0] ss:$16 sps:$4 sm:$0xff]  }
 0x1e0   : > { %2612 = vmatpush1.bf16.msra.mxu1 %v18646_v44  ;;  %v18705_v44 = vld [vmem:[#allocation5 + $0x28c4] ss:$16 sps:$4 sm:$0xff]  }
 0x1e1   : > { %5537 = vmatpush1.bf16.msra.mxu0 %v18649_v50  ;;  %2613 = vmatprep.subr.bf16.mxu1 %v18654_v55  ;;  %v18703_v50 = vld [vmem:[#allocation5 + $0x28c0] ss:$16 sps:$4 sm:$0xff]  }
 0x1e2   : > { %5538 = vmatprep.subr.bf16.mxu0 %v18657_v56  ;;  %v18709_v55 = vld [vmem:[#allocation5 + $0x28e0] ss:$16 sps:$4 sm:$0xff]   ;;  %v18714_v56 = vld [vmem:[#allocation5 + $0xd04] ss:$16 sps:$4 sm:$0xff]  }
 0x1e4   : > { %2614 = vmatpush1.bf16.msra.mxu1 %v18652_v57  ;;  %v18717_v57 = vld [vmem:[#allocation5 + $0x2904] ss:$16 sps:$4 sm:$0xff]  }
 0x1e5   : > { %5539 = vmatpush1.bf16.msra.mxu0 %v18655_v60  ;;  %2615 = vmatprep.subr.bf16.mxu1 %v18660_v2  ;;  %v18715_v60 = vld [vmem:[#allocation5 + $0x2900] ss:$16 sps:$4 sm:$0xff]  }
 0x1e6   : > { %5540 = vmatprep.subr.bf16.mxu0 %v18663_v4  ;;  %v18721_v2 = vld [vmem:[#allocation5 + $0x2920] ss:$16 sps:$4 sm:$0xff]   ;;  %v18726_v4 = vld [vmem:[#allocation5 + $0xd44] ss:$16 sps:$4 sm:$0xff]  }
 0x1e8   : > { %2616 = vmatpush1.bf16.msra.mxu1 %v18658_v7  ;;  %v18729_v7 = vld [vmem:[#allocation5 + $0x2944] ss:$16 sps:$4 sm:$0xff]  }
 0x1e9   : > { %5541 = vmatpush1.bf16.msra.mxu0 %v18661_v12  ;;  %2973 = vmatprep.subr.bf16.mxu1 %v18666_v8  ;;  %v18724_v12 = vld [vmem:[#allocation5 + $0xd40] ss:$16 sps:$4 sm:$0xff]   ;;  %v18735_v8 = vld [vmem:[#allocation5 + $0x2964] ss:$16 sps:$4 sm:$0xff]  }
 0x1ea   : > { %5938 = vmatprep.subr.bf16.mxu0 %v18669_v10  ;;  %v18730_v10 = vld [vmem:[#allocation5 + $0xd60] ss:$16 sps:$4 sm:$0xff]  }
 0x1eb   : > { %2618 = vmatmul.mubr.bf16.vlgmr.msra.gmra.mrb[4].mxu1 %v21435_v32 }
 0x1ec   : > { %5543 = vmatmul.mubr.bf16.vlgmr.msra.gmra.mrb[4].mxu0 %v5125_v16  ;;  %2974 = vmatpush1.bf16.msra.mxu1 %v18664_v14  ;;  %v18733_v14 = vld [vmem:[#allocation5 + $0x2960] ss:$16 sps:$4 sm:$0xff]   ;;  %v18741_v16 = vld [vmem:[#allocation5 + $0x2984] ss:$16 sps:$4 sm:$0xff]  }
 0x1ed   : > { %5939 = vmatpush1.bf16.msra.mxu0 %v18667_v15  ;;  %2975 = vmatprep.subr.bf16.mxu1 %v18672_v17  ;;  %v18738_v15 = vld [vmem:[#allocation5 + $0xd84] ss:$16 sps:$4 sm:$0xff]   ;;  %v18736_v17 = vld [vmem:[#allocation5 + $0xd80] ss:$16 sps:$4 sm:$0xff]  }
 0x1ee   : > { %5940 = vmatprep.subr.bf16.mxu0 %v18675_v19  ;;  %3005 = vmatprep.mubr.bf16.mxu1 %v21394_v9  ;;  %v18688_v9 = vld [vmem:[#allocation5 + $0xc80] ss:$16 sps:$4 sm:$0xff]  }
 0x1ef   : > { %5970 = vmatprep.mubr.bf16.mxu0 %v21397_v11  ;;  %v18691_v11 = vld [vmem:[#allocation5 + $0x2880] ss:$16 sps:$4 sm:$0xff]  }
 0x1f0   : > { %2976 = vmatpush1.bf16.msra.mxu1 %v18670_v20  ;;  %v18739_v19 = vld [vmem:[#allocation5 + $0x2980] ss:$16 sps:$4 sm:$0xff]   ;;  %v18744_v20 = vld [vmem:[#allocation5 + $0xda4] ss:$16 sps:$4 sm:$0xff]  }
 0x1f1   : > { %5941 = vmatpush1.bf16.msra.mxu0 %v18673_v29  ;;  %2977 = vmatprep.subr.bf16.mxu1 %v18678_v36  ;;  %v18747_v29 = vld [vmem:[#allocation5 + $0x29a4] ss:$16 sps:$4 sm:$0xff]   ;;  %v18742_v36 = vld [vmem:[#allocation5 + $0xda0] ss:$16 sps:$4 sm:$0xff]  }
 0x1f2   : > { %5942 = vmatprep.subr.bf16.mxu0 %v18681_v21  ;;  %v18745_v21 = vld [vmem:[#allocation5 + $0x29a0] ss:$16 sps:$4 sm:$0xff]  }
 0x1f4   : > { %2978 = vmatpush1.bf16.msra.mxu1 %v18676_v61  ;;  %v18750_v61 = vld [vmem:[#allocation5 + $0xdc4] ss:$16 sps:$4 sm:$0xff]  }
 0x1f5   : > { %5943 = vmatpush1.bf16.msra.mxu0 %v18679_v24  ;;  %2979 = vmatprep.subr.bf16.mxu1 %v18684_v25  ;;  %v18753_v24 = vld [vmem:[#allocation5 + $0x29c4] ss:$16 sps:$4 sm:$0xff]   ;;  %v18748_v25 = vld [vmem:[#allocation5 + $0xdc0] ss:$16 sps:$4 sm:$0xff]  }
 0x1f6   : > { %5944 = vmatprep.subr.bf16.mxu0 %v18687_v26  ;;  %v18751_v26 = vld [vmem:[#allocation5 + $0x29c0] ss:$16 sps:$4 sm:$0xff]  }
 0x1f8   : > { %2980 = vmatpush1.bf16.msra.mxu1 %v18682_v27  ;;  %v18756_v27 = vld [vmem:[#allocation5 + $0xde4] ss:$16 sps:$4 sm:$0xff]  }
 0x1f9   : > { %5945 = vmatpush1.bf16.msra.mxu0 %v18685_v28  ;;  %2981 = vmatprep.subr.bf16.mxu1 %v18690_v30  ;;  %v18759_v28 = vld [vmem:[#allocation5 + $0x29e4] ss:$16 sps:$4 sm:$0xff]   ;;  %v18754_v30 = vld [vmem:[#allocation5 + $0xde0] ss:$16 sps:$4 sm:$0xff]  }
 0x1fa   : > { %5946 = vmatprep.subr.bf16.mxu0 %v18693_v31  ;;  %v18757_v31 = vld [vmem:[#allocation5 + $0x29e0] ss:$16 sps:$4 sm:$0xff]  }
 0x1fc   : > { %2982 = vmatpush1.bf16.msra.mxu1 %v18688_v9  ;;  %v18762_v9 = vld [vmem:[#allocation5 + $0xe04] ss:$16 sps:$4 sm:$0xff]  }
 0x1fd   : > { %5947 = vmatpush1.bf16.msra.mxu0 %v18691_v11  ;;  %2983 = vmatprep.subr.bf16.mxu1 %v18696_v37  ;;  %v18765_v11 = vld [vmem:[#allocation5 + $0x2a04] ss:$16 sps:$4 sm:$0xff]   ;;  %v18760_v37 = vld [vmem:[#allocation5 + $0xe00] ss:$16 sps:$4 sm:$0xff]  }
 0x1fe   : > { %5948 = vmatprep.subr.bf16.mxu0 %v18699_v38  ;;  %v18763_v38 = vld [vmem:[#allocation5 + $0x2a00] ss:$16 sps:$4 sm:$0xff]  }
 0x200   : > { %2984 = vmatpush1.bf16.msra.mxu1 %v18694_v39  ;;  %v18768_v39 = vld [vmem:[#allocation5 + $0xe24] ss:$16 sps:$4 sm:$0xff]  }
 0x201   : > { %5949 = vmatpush1.bf16.msra.mxu0 %v18697_v42  ;;  %2985 = vmatprep.subr.bf16.mxu1 %v18702_v43  ;;  %v18771_v42 = vld [vmem:[#allocation5 + $0x2a24] ss:$16 sps:$4 sm:$0xff]   ;;  %v18766_v43 = vld [vmem:[#allocation5 + $0xe20] ss:$16 sps:$4 sm:$0xff]  }
 0x202   : > { %5950 = vmatprep.subr.bf16.mxu0 %v18705_v44  ;;  %v18769_v44 = vld [vmem:[#allocation5 + $0x2a20] ss:$16 sps:$4 sm:$0xff]  }
 0x204   : > { %2986 = vmatpush1.bf16.msra.mxu1 %v18700_v45  ;;  %v18774_v45 = vld [vmem:[#allocation5 + $0xe44] ss:$16 sps:$4 sm:$0xff]  }
 0x205   : > { %5951 = vmatpush1.bf16.msra.mxu0 %v18703_v50  ;;  %2987 = vmatprep.subr.bf16.mxu1 %v18708_v51  ;;  %v18777_v50 = vld [vmem:[#allocation5 + $0x2a44] ss:$16 sps:$4 sm:$0xff]   ;;  %v18772_v51 = vld [vmem:[#allocation5 + $0xe40] ss:$16 sps:$4 sm:$0xff]  }
 0x206   : > { %5952 = vmatprep.subr.bf16.mxu0 %v18711_v52  ;;  %v18775_v52 = vld [vmem:[#allocation5 + $0x2a40] ss:$16 sps:$4 sm:$0xff]  }
 0x208   : > { %2988 = vmatpush1.bf16.msra.mxu1 %v18706_v54  ;;  %v18778_v54 = vld [vmem:[#allocation5 + $0xe60] ss:$16 sps:$4 sm:$0xff]  }
 0x209   : > { %5953 = vmatpush1.bf16.msra.mxu0 %v18709_v55  ;;  %2989 = vmatprep.subr.bf16.mxu1 %v18714_v56  ;;  %v18781_v55 = vld [vmem:[#allocation5 + $0x2a60] ss:$16 sps:$4 sm:$0xff]   ;;  %v18786_v56 = vld [vmem:[#allocation5 + $0xe84] ss:$16 sps:$4 sm:$0xff]  }
 0x20a   : > { %5954 = vmatprep.subr.bf16.mxu0 %v18717_v57  ;;  %v18789_v57 = vld [vmem:[#allocation5 + $0x2a84] ss:$16 sps:$4 sm:$0xff]  }
 0x20c   : > { %2990 = vmatpush1.bf16.msra.mxu1 %v18712_v58  ;;  %v18792_v58 = vld [vmem:[#allocation5 + $0xea4] ss:$16 sps:$4 sm:$0xff]  }
 0x20d   : > { %5955 = vmatpush1.bf16.msra.mxu0 %v18715_v60  ;;  %2991 = vmatprep.subr.bf16.mxu1 %v18720_v5  ;;  %v18795_v60 = vld [vmem:[#allocation5 + $0x2aa4] ss:$16 sps:$4 sm:$0xff]   ;;  %v18790_v5 = vld [vmem:[#allocation5 + $0xea0] ss:$16 sps:$4 sm:$0xff]  }
 0x20e   : > { %5956 = vmatprep.subr.bf16.mxu0 %v18723_v62  ;;  %v18793_v62 = vld [vmem:[#allocation5 + $0x2aa0] ss:$16 sps:$4 sm:$0xff]  }
 0x210   : > { %2992 = vmatpush1.bf16.msra.mxu1 %v18718_v63  ;;  %v18798_v63 = vld [vmem:[#allocation5 + $0xec4] ss:$16 sps:$4 sm:$0xff]  }
 0x211   : > { %5957 = vmatpush1.bf16.msra.mxu0 %v18721_v2  ;;  %2993 = vmatprep.subr.bf16.mxu1 %v18726_v4  ;;  %v18801_v2 = vld [vmem:[#allocation5 + $0x2ac4] ss:$16 sps:$4 sm:$0xff]  }
 0x212   : > { %5958 = vmatprep.subr.bf16.mxu0 %v18729_v7 }
 0x214   : > { %2994 = vmatpush1.bf16.msra.mxu1 %v18724_v12 }
 0x215   : > { %5959 = vmatpush1.bf16.msra.mxu0 %v18727_v23  ;;  %2995 = vmatprep.subr.bf16.mxu1 %v18732_v22 }
 0x216   : > { %5960 = vmatprep.subr.bf16.mxu0 %v18735_v8  ;;  %v18796_v8 = vld [vmem:[#allocation5 + $0xec0] ss:$16 sps:$4 sm:$0xff]  }
 0x218   : > { %2996 = vmatpush1.bf16.msra.mxu1 %v18730_v10  ;;  %v18799_v10 = vld [vmem:[#allocation5 + $0x2ac0] ss:$16 sps:$4 sm:$0xff]  }
 0x219   : > { %5961 = vmatpush1.bf16.msra.mxu0 %v18733_v14  ;;  %2997 = vmatprep.subr.bf16.mxu1 %v18738_v15 }
 0x21a   : > { %5962 = vmatprep.subr.bf16.mxu0 %v18741_v16  ;;  %v18804_v16 = vld [vmem:[#allocation5 + $0xee4] ss:$16 sps:$4 sm:$0xff]  }
 0x21c   : > { %2998 = vmatpush1.bf16.msra.mxu1 %v18736_v17  ;;  %v18807_v17 = vld [vmem:[#allocation5 + $0x2ae4] ss:$16 sps:$4 sm:$0xff]  }
 0x21d   : > { %5963 = vmatpush1.bf16.msra.mxu0 %v18739_v19  ;;  %2999 = vmatprep.subr.bf16.mxu1 %v18744_v20  ;;  %v18805_v19 = vld [vmem:[#allocation5 + $0x2ae0] ss:$16 sps:$4 sm:$0xff]   ;;  %v18810_v20 = vld [vmem:[#allocation5 + $0xf04] ss:$16 sps:$4 sm:$0xff]  }
 0x21e   : > { %5964 = vmatprep.subr.bf16.mxu0 %v18747_v29  ;;  %v18813_v29 = vld [vmem:[#allocation5 + $0x2b04] ss:$16 sps:$4 sm:$0xff]  }
 0x220   : > { %3000 = vmatpush1.bf16.msra.mxu1 %v18742_v36  ;;  %v18811_v36 = vld [vmem:[#allocation5 + $0x2b00] ss:$16 sps:$4 sm:$0xff]  }
 0x221   : > { %5965 = vmatpush1.bf16.msra.mxu0 %v18745_v21  ;;  %3001 = vmatprep.subr.bf16.mxu1 %v18750_v61  ;;  %v18816_v21 = vld [vmem:[#allocation5 + $0xf24] ss:$16 sps:$4 sm:$0xff]  }
 0x222   : > { %5966 = vmatprep.subr.bf16.mxu0 %v18753_v24  ;;  %v18819_v61 = vld [vmem:[#allocation5 + $0x2b24] ss:$16 sps:$4 sm:$0xff]   ;;  %v18817_v24 = vld [vmem:[#allocation5 + $0x2b20] ss:$16 sps:$4 sm:$0xff]  }
 0x224   : > { %3002 = vmatpush1.bf16.msra.mxu1 %v18748_v25  ;;  %v18822_v25 = vld [vmem:[#allocation5 + $0xf44] ss:$16 sps:$4 sm:$0xff]  }
 0x225   : > { %5967 = vmatpush1.bf16.msra.mxu0 %v18751_v26  ;;  %3003 = vmatprep.subr.bf16.mxu1 %v18756_v27  ;;  %v18825_v26 = vld [vmem:[#allocation5 + $0x2b44] ss:$16 sps:$4 sm:$0xff]   ;;  %v18820_v27 = vld [vmem:[#allocation5 + $0xf40] ss:$16 sps:$4 sm:$0xff]  }
 0x226   : > { %5968 = vmatprep.subr.bf16.mxu0 %v18759_v28  ;;  %v18823_v28 = vld [vmem:[#allocation5 + $0x2b40] ss:$16 sps:$4 sm:$0xff]  }
 0x228   : > { %3004 = vmatpush1.bf16.msra.mxu1 %v18754_v30  ;;  %v18828_v30 = vld [vmem:[#allocation5 + $0xf64] ss:$16 sps:$4 sm:$0xff]  }
 0x229   : > { %5969 = vmatpush1.bf16.msra.mxu0 %v18757_v31  ;;  %3016 = vmatprep.subr.bf16.mxu1 %v18762_v9  ;;  %v18831_v31 = vld [vmem:[#allocation5 + $0x2b64] ss:$16 sps:$4 sm:$0xff]   ;;  %v18826_v9 = vld [vmem:[#allocation5 + $0xf60] ss:$16 sps:$4 sm:$0xff]  }
 0x22a   : > { %5981 = vmatprep.subr.bf16.mxu0 %v18765_v11  ;;  %v18829_v11 = vld [vmem:[#allocation5 + $0x2b60] ss:$16 sps:$4 sm:$0xff]  }
 0x22b   : > { %3006 = vmatmul.mubr.bf16.vlgmr.msra.gmra.mrb[4].mxu1 %v21415_v41  ;;  %v18780_v41 = vld [vmem:[#allocation5 + $0xe64] ss:$16 sps:$4 sm:$0xff]  }
 0x22c   : > { %5971 = vmatmul.mubr.bf16.vlgmr.msra.gmra.mrb[4].mxu0 %v21412_v40  ;;  %3017 = vmatpush1.bf16.msra.mxu1 %v18760_v37  ;;  %v18783_v40 = vld [vmem:[#allocation5 + $0x2a64] ss:$16 sps:$4 sm:$0xff]  }
 0x22d   : > { %5982 = vmatpush1.bf16.msra.mxu0 %v18763_v38  ;;  %3018 = vmatprep.subr.bf16.mxu1 %v18768_v39  ;;  %v18834_v37 = vld [vmem:[#allocation5 + $0xf84] ss:$16 sps:$4 sm:$0xff]   ;;  %v18832_v39 = vld [vmem:[#allocation5 + $0xf80] ss:$16 sps:$4 sm:$0xff]  }
 0x22e   : > { %5983 = vmatprep.subr.bf16.mxu0 %v18771_v42  ;;  %3048 = vmatprep.mubr.bf16.mxu1 %v21423_v49  ;;  %v18784_v49 = vld [vmem:[#allocation5 + $0xe80] ss:$16 sps:$4 sm:$0xff]   ;;  %v18837_v38 = vld [vmem:[#allocation5 + $0x2b84] ss:$16 sps:$4 sm:$0xff]  }
 0x22f   : > { %6013 = vmatprep.mubr.bf16.mxu0 %v21420_v48  ;;  %v18787_v48 = vld [vmem:[#allocation5 + $0x2a80] ss:$16 sps:$4 sm:$0xff]  }
 0x230   : > { %3019 = vmatpush1.bf16.msra.mxu1 %v18766_v43  ;;  %v18835_v42 = vld [vmem:[#allocation5 + $0x2b80] ss:$16 sps:$4 sm:$0xff]   ;;  %v18840_v43 = vld [vmem:[#allocation5 + $0xfa4] ss:$16 sps:$4 sm:$0xff]  }
 0x231   : > { %5984 = vmatpush1.bf16.msra.mxu0 %v18769_v44  ;;  %3020 = vmatprep.subr.bf16.mxu1 %v18774_v45  ;;  %v18843_v44 = vld [vmem:[#allocation5 + $0x2ba4] ss:$16 sps:$4 sm:$0xff]   ;;  %v18838_v45 = vld [vmem:[#allocation5 + $0xfa0] ss:$16 sps:$4 sm:$0xff]  }
 0x232   : > { %5985 = vmatprep.subr.bf16.mxu0 %v18777_v50  ;;  %v18841_v50 = vld [vmem:[#allocation5 + $0x2ba0] ss:$16 sps:$4 sm:$0xff]  }
 0x234   : > { %3021 = vmatpush1.bf16.msra.mxu1 %v18772_v51  ;;  %v18846_v51 = vld [vmem:[#allocation5 + $0xfc4] ss:$16 sps:$4 sm:$0xff]  }
 0x235   : > { %5986 = vmatpush1.bf16.msra.mxu0 %v18775_v52  ;;  %3022 = vmatprep.subr.bf16.mxu1 %v18780_v41  ;;  %v18849_v52 = vld [vmem:[#allocation5 + $0x2bc4] ss:$16 sps:$4 sm:$0xff]   ;;  %v18844_v41 = vld [vmem:[#allocation5 + $0xfc0] ss:$16 sps:$4 sm:$0xff]  }
 0x236   : > { %5987 = vmatprep.subr.bf16.mxu0 %v18783_v40  ;;  %v18847_v40 = vld [vmem:[#allocation5 + $0x2bc0] ss:$16 sps:$4 sm:$0xff]  }
 0x238   : > { %3023 = vmatpush1.bf16.msra.mxu1 %v18778_v54  ;;  %v18852_v54 = vld [vmem:[#allocation5 + $0xfe4] ss:$16 sps:$4 sm:$0xff]  }
 0x239   : > { %5988 = vmatpush1.bf16.msra.mxu0 %v18781_v55  ;;  %3024 = vmatprep.subr.bf16.mxu1 %v18786_v56  ;;  %v18855_v55 = vld [vmem:[#allocation5 + $0x2be4] ss:$16 sps:$4 sm:$0xff]   ;;  %v18850_v56 = vld [vmem:[#allocation5 + $0xfe0] ss:$16 sps:$4 sm:$0xff]  }
 0x23a   : > { %5989 = vmatprep.subr.bf16.mxu0 %v18789_v57  ;;  %v18853_v57 = vld [vmem:[#allocation5 + $0x2be0] ss:$16 sps:$4 sm:$0xff]  }
 0x23c   : > { %3025 = vmatpush1.bf16.msra.mxu1 %v18784_v49  ;;  %v18858_v49 = vld [vmem:[#allocation5 + $0x1404] ss:$16 sps:$4 sm:$0xff]  }
 0x23d   : > { %5990 = vmatpush1.bf16.msra.mxu0 %v18787_v48  ;;  %3026 = vmatprep.subr.bf16.mxu1 %v18792_v58  ;;  %v18861_v48 = vld [vmem:[#allocation5 + $0x2c04] ss:$16 sps:$4 sm:$0xff]   ;;  %v18856_v58 = vld [vmem:[#allocation5 + $0x1400] ss:$16 sps:$4 sm:$0xff]  }
 0x23e   : > { %5991 = vmatprep.subr.bf16.mxu0 %v18795_v60  ;;  %v1507_v4 = vpop.f32.mrb[0].mxu1  ;;  %v18859_v60 = vld [vmem:[#allocation5 + $0x2c00] ss:$16 sps:$4 sm:$0xff]  }
 0x23f   : > { %v21471_v7 = vadd.f32 %v21452_v1, %v1507_v4  ;;  %v1509_v12 = vpop.f32.mrb[1].mxu1  ;;  %v18870_v4 = vld [vmem:[#allocation5 + $0x1444] ss:$16 sps:$4 sm:$0xff]  }
 0x240   : > { %v21474_v23 = vadd.f32 %v21454_v3, %v1509_v12  ;;  %v1511_v22 = vpop.f32.mrb[2].mxu1  ;;  %3027 = vmatpush1.bf16.msra.mxu1 %v18790_v5  ;;  %v18802_v3 = vld [vmem:[#allocation5 + $0xee0] ss:$16 sps:$4 sm:$0xff]   ;;  %v18864_v5 = vld [vmem:[#allocation5 + $0x1424] ss:$16 sps:$4 sm:$0xff]  }
 0x241   : > { %5992 = vmatpush1.bf16.msra.mxu0 %v18793_v62  ;;  %v21477_v14 = vadd.f32 %v21456_v13, %v1511_v22  ;;  %v1513_v15 = vpop.f32.mrb[3].mxu1  ;;  %3028 = vmatprep.subr.bf16.mxu1 %v18798_v63  ;;  %v18808_v13 = vld [vmem:[#allocation5 + $0xf00] ss:$16 sps:$4 sm:$0xff]   ;;  %v18867_v62 = vld [vmem:[#allocation5 + $0x2c24] ss:$16 sps:$4 sm:$0xff]  }
 0x242   : > { %5993 = vmatprep.subr.bf16.mxu0 %v18801_v2  ;;  %v21480_v1 = vadd.f32 %v21458_v6, %v1513_v15  ;;  %v18814_v6 = vld [vmem:[#allocation5 + $0xf20] ss:$16 sps:$4 sm:$0xff]   ;;  %v18873_v12 = vld [vmem:[#allocation5 + $0x2c44] ss:$16 sps:$4 sm:$0xff]  }
 0x243   : > { %v18862_v63 = vld [vmem:[#allocation5 + $0x1420] ss:$16 sps:$4 sm:$0xff]  }
 0x244   : > { %3029 = vmatpush1.bf16.msra.mxu1 %v18796_v8  ;;  %v18865_v2 = vld [vmem:[#allocation5 + $0x2c20] ss:$16 sps:$4 sm:$0xff]  }
 0x245   : > { %5994 = vmatpush1.bf16.msra.mxu0 %v18799_v10  ;;  %3030 = vmatprep.subr.bf16.mxu1 %v18804_v16  ;;  %v18868_v22 = vld [vmem:[#allocation5 + $0x1440] ss:$16 sps:$4 sm:$0xff]   ;;  %v18882_v16 = vld [vmem:[#allocation5 + $0x1484] ss:$16 sps:$4 sm:$0xff]  }
 0x246   : > { %5995 = vmatprep.subr.bf16.mxu0 %v18807_v17  ;;  %v18871_v8 = vld [vmem:[#allocation5 + $0x2c40] ss:$16 sps:$4 sm:$0xff]   ;;  %v18885_v17 = vld [vmem:[#allocation5 + $0x2c84] ss:$16 sps:$4 sm:$0xff]  }
 0x247   : > { %v18874_v10 = vld [vmem:[#allocation5 + $0x1460] ss:$16 sps:$4 sm:$0xff]  }
 0x248   : > { %3031 = vmatpush1.bf16.msra.mxu1 %v18802_v3  ;;  %v18877_v15 = vld [vmem:[#allocation5 + $0x2c60] ss:$16 sps:$4 sm:$0xff]  }
 0x249   : > { %5996 = vmatpush1.bf16.msra.mxu0 %v18805_v19  ;;  %3032 = vmatprep.subr.bf16.mxu1 %v18810_v20  ;;  %v18880_v3 = vld [vmem:[#allocation5 + $0x1480] ss:$16 sps:$4 sm:$0xff]   ;;  %v18888_v19 = vld [vmem:[#allocation5 + $0x14a4] ss:$16 sps:$4 sm:$0xff]  }
 0x24a   : > { %5997 = vmatprep.subr.bf16.mxu0 %v18813_v29  ;;  %v18891_v20 = vld [vmem:[#allocation5 + $0x2ca4] ss:$16 sps:$4 sm:$0xff]   ;;  %v18886_v29 = vld [vmem:[#allocation5 + $0x14a0] ss:$16 sps:$4 sm:$0xff]  }
 0x24c   : > { %3033 = vmatpush1.bf16.msra.mxu1 %v18808_v13  ;;  %v18889_v13 = vld [vmem:[#allocation5 + $0x2ca0] ss:$16 sps:$4 sm:$0xff]  }
 0x24d   : > { %5998 = vmatpush1.bf16.msra.mxu0 %v18811_v36  ;;  %3034 = vmatprep.subr.bf16.mxu1 %v18816_v21  ;;  %v18894_v36 = vld [vmem:[#allocation5 + $0x14c4] ss:$16 sps:$4 sm:$0xff]  }
 0x24e   : > { %5999 = vmatprep.subr.bf16.mxu0 %v18819_v61  ;;  %v18897_v21 = vld [vmem:[#allocation5 + $0x2cc4] ss:$16 sps:$4 sm:$0xff]   ;;  %v18892_v61 = vld [vmem:[#allocation5 + $0x14c0] ss:$16 sps:$4 sm:$0xff]  }
 0x250   : > { %3035 = vmatpush1.bf16.msra.mxu1 %v18814_v6  ;;  %v18895_v6 = vld [vmem:[#allocation5 + $0x2cc0] ss:$16 sps:$4 sm:$0xff]  }
 0x251   : > { %6000 = vmatpush1.bf16.msra.mxu0 %v18817_v24  ;;  %3036 = vmatprep.subr.bf16.mxu1 %v18822_v25  ;;  %v18900_v24 = vld [vmem:[#allocation5 + $0x14e4] ss:$16 sps:$4 sm:$0xff]  }
 0x252   : > { %6001 = vmatprep.subr.bf16.mxu0 %v18825_v26  ;;  %v18903_v25 = vld [vmem:[#allocation5 + $0x2ce4] ss:$16 sps:$4 sm:$0xff]   ;;  %v18898_v26 = vld [vmem:[#allocation5 + $0x14e0] ss:$16 sps:$4 sm:$0xff]  }
 0x254   : > { %3037 = vmatpush1.bf16.msra.mxu1 %v18820_v27  ;;  %v18901_v27 = vld [vmem:[#allocation5 + $0x2ce0] ss:$16 sps:$4 sm:$0xff]  }
 0x255   : > { %6002 = vmatpush1.bf16.msra.mxu0 %v18823_v28  ;;  %3038 = vmatprep.subr.bf16.mxu1 %v18828_v30  ;;  %v18906_v28 = vld [vmem:[#allocation5 + $0x1504] ss:$16 sps:$4 sm:$0xff]  }
 0x256   : > { %6003 = vmatprep.subr.bf16.mxu0 %v18831_v31  ;;  %v18909_v30 = vld [vmem:[#allocation5 + $0x2d04] ss:$16 sps:$4 sm:$0xff]   ;;  %v18904_v31 = vld [vmem:[#allocation5 + $0x1500] ss:$16 sps:$4 sm:$0xff]  }
 0x258   : > { %3039 = vmatpush1.bf16.msra.mxu1 %v18826_v9  ;;  %v18907_v9 = vld [vmem:[#allocation5 + $0x2d00] ss:$16 sps:$4 sm:$0xff]  }
 0x259   : > { %6004 = vmatpush1.bf16.msra.mxu0 %v18829_v11  ;;  %3040 = vmatprep.subr.bf16.mxu1 %v18834_v37  ;;  %v18912_v11 = vld [vmem:[#allocation5 + $0x1524] ss:$16 sps:$4 sm:$0xff]  }
 0x25a   : > { %6005 = vmatprep.subr.bf16.mxu0 %v18837_v38  ;;  %v18915_v37 = vld [vmem:[#allocation5 + $0x2d24] ss:$16 sps:$4 sm:$0xff]   ;;  %v18910_v38 = vld [vmem:[#allocation5 + $0x1520] ss:$16 sps:$4 sm:$0xff]  }
 0x25c   : > { %3041 = vmatpush1.bf16.msra.mxu1 %v18832_v39  ;;  %v18913_v39 = vld [vmem:[#allocation5 + $0x2d20] ss:$16 sps:$4 sm:$0xff]  }
 0x25d   : > { %6006 = vmatpush1.bf16.msra.mxu0 %v18835_v42  ;;  %3042 = vmatprep.subr.bf16.mxu1 %v18840_v43  ;;  %v18918_v42 = vld [vmem:[#allocation5 + $0x1544] ss:$16 sps:$4 sm:$0xff]  }
 0x25e   : > { %6007 = vmatprep.subr.bf16.mxu0 %v18843_v44  ;;  %v18921_v43 = vld [vmem:[#allocation5 + $0x2d44] ss:$16 sps:$4 sm:$0xff]   ;;  %v18916_v44 = vld [vmem:[#allocation5 + $0x1540] ss:$16 sps:$4 sm:$0xff]  }
 0x260   : > { %3043 = vmatpush1.bf16.msra.mxu1 %v18838_v45  ;;  %v18919_v45 = vld [vmem:[#allocation5 + $0x2d40] ss:$16 sps:$4 sm:$0xff]  }
 0x261   : > { %6008 = vmatpush1.bf16.msra.mxu0 %v18841_v50  ;;  %3044 = vmatprep.subr.bf16.mxu1 %v18846_v51  ;;  %v18924_v50 = vld [vmem:[#allocation5 + $0x1564] ss:$16 sps:$4 sm:$0xff]  }
 0x262   : > { %6009 = vmatprep.subr.bf16.mxu0 %v18849_v52  ;;  %v18927_v51 = vld [vmem:[#allocation5 + $0x2d64] ss:$16 sps:$4 sm:$0xff]   ;;  %v18922_v52 = vld [vmem:[#allocation5 + $0x1560] ss:$16 sps:$4 sm:$0xff]  }
 0x264   : > { %3045 = vmatpush1.bf16.msra.mxu1 %v18844_v41  ;;  %v18925_v41 = vld [vmem:[#allocation5 + $0x2d60] ss:$16 sps:$4 sm:$0xff]  }
 0x265   : > { %6010 = vmatpush1.bf16.msra.mxu0 %v18847_v40  ;;  %3046 = vmatprep.subr.bf16.mxu1 %v18852_v54  ;;  %v18930_v40 = vld [vmem:[#allocation5 + $0x1584] ss:$16 sps:$4 sm:$0xff]  }
 0x266   : > { %6011 = vmatprep.subr.bf16.mxu0 %v18855_v55  ;;  %v18933_v54 = vld [vmem:[#allocation5 + $0x2d84] ss:$16 sps:$4 sm:$0xff]   ;;  %v18928_v55 = vld [vmem:[#allocation5 + $0x1580] ss:$16 sps:$4 sm:$0xff]  }
 0x268   : > { %3047 = vmatpush1.bf16.msra.mxu1 %v18850_v56  ;;  %v18931_v56 = vld [vmem:[#allocation5 + $0x2d80] ss:$16 sps:$4 sm:$0xff]  }
 0x269   : > { %6012 = vmatpush1.bf16.msra.mxu0 %v18853_v57  ;;  %3444 = vmatprep.subr.bf16.mxu1 %v18858_v49  ;;  %v18936_v57 = vld [vmem:[#allocation5 + $0x15a4] ss:$16 sps:$4 sm:$0xff]  }
 0x26a   : > { %6413 = vmatprep.subr.bf16.mxu0 %v18861_v48  ;;  %v18939_v49 = vld [vmem:[#allocation5 + $0x2da4] ss:$16 sps:$4 sm:$0xff]   ;;  %v18934_v48 = vld [vmem:[#allocation5 + $0x15a0] ss:$16 sps:$4 sm:$0xff]  }
 0x26b   : > { %3049 = vmatmul.mubr.bf16.vlgmr.msra.gmra.mrb[4].mxu1 %v21438_v35  ;;  %v18876_v35 = vld [vmem:[#allocation5 + $0x1464] ss:$16 sps:$4 sm:$0xff]  }
 0x26c   : > { %6014 = vmatmul.mubr.bf16.vlgmr.msra.gmra.mrb[4].mxu0 %v21435_v32  ;;  %3445 = vmatpush1.bf16.msra.mxu1 %v18856_v58  ;;  %v18879_v32 = vld [vmem:[#allocation5 + $0x2c64] ss:$16 sps:$4 sm:$0xff]   ;;  %v18937_v58 = vld [vmem:[#allocation5 + $0x2da0] ss:$16 sps:$4 sm:$0xff]  }
 0x26d   : > { %6414 = vmatpush1.bf16.msra.mxu0 %v18859_v60  ;;  %3446 = vmatprep.subr.bf16.mxu1 %v18864_v5  ;;  %v18942_v60 = vld [vmem:[#allocation5 + $0x15c4] ss:$16 sps:$4 sm:$0xff]  }
 0x26e   : > { %6415 = vmatprep.subr.bf16.mxu0 %v18867_v62  ;;  %3476 = vmatprep.mubr.bf16.mxu1 %v21344_v18  ;;  %v18945_v5 = vld [vmem:[#allocation5 + $0x2dc4] ss:$16 sps:$4 sm:$0xff]   ;;  %v18940_v62 = vld [vmem:[#allocation5 + $0x15c0] ss:$16 sps:$4 sm:$0xff]  }
 0x26f   : > { %6445 = vmatprep.mubr.bf16.mxu0 %v21344_v18  ;;  %v18883_v18 = vld [vmem:[#allocation5 + $0x2c80] ss:$16 sps:$4 sm:$0xff]  }
 0x270   : > { %3447 = vmatpush1.bf16.msra.mxu1 %v18862_v63  ;;  %v18943_v63 = vld [vmem:[#allocation5 + $0x2dc0] ss:$16 sps:$4 sm:$0xff]  }
 0x271   : > { %6416 = vmatpush1.bf16.msra.mxu0 %v18865_v2  ;;  %3448 = vmatprep.subr.bf16.mxu1 %v18870_v4  ;;  %v18948_v2 = vld [vmem:[#allocation5 + $0x15e4] ss:$16 sps:$4 sm:$0xff]  }
 0x272   : > { %6417 = vmatprep.subr.bf16.mxu0 %v18873_v12  ;;  %v18951_v4 = vld [vmem:[#allocation5 + $0x2de4] ss:$16 sps:$4 sm:$0xff]   ;;  %v18946_v12 = vld [vmem:[#allocation5 + $0x15e0] ss:$16 sps:$4 sm:$0xff]  }
 0x274   : > { %3449 = vmatpush1.bf16.msra.mxu1 %v18868_v22  ;;  %v18949_v22 = vld [vmem:[#allocation5 + $0x2de0] ss:$16 sps:$4 sm:$0xff]  }
 0x275   : > { %6418 = vmatpush1.bf16.msra.mxu0 %v18871_v8  ;;  %3450 = vmatprep.subr.bf16.mxu1 %v18876_v35  ;;  %v18954_v8 = vld [vmem:[#allocation5 + $0x1604] ss:$16 sps:$4 sm:$0xff]  }
 0x276   : > { %6419 = vmatprep.subr.bf16.mxu0 %v18879_v32  ;;  %v18957_v35 = vld [vmem:[#allocation5 + $0x2e04] ss:$16 sps:$4 sm:$0xff]   ;;  %v18952_v32 = vld [vmem:[#allocation5 + $0x1600] ss:$16 sps:$4 sm:$0xff]  }
 0x278   : > { %3451 = vmatpush1.bf16.msra.mxu1 %v18874_v10  ;;  %v18955_v10 = vld [vmem:[#allocation5 + $0x2e00] ss:$16 sps:$4 sm:$0xff]  }
 0x279   : > { %6420 = vmatpush1.bf16.msra.mxu0 %v18877_v15  ;;  %3452 = vmatprep.subr.bf16.mxu1 %v18882_v16  ;;  %v18960_v15 = vld [vmem:[#allocation5 + $0x1624] ss:$16 sps:$4 sm:$0xff]  }
 0x27a   : > { %6421 = vmatprep.subr.bf16.mxu0 %v18885_v17  ;;  %v18963_v16 = vld [vmem:[#allocation5 + $0x2e24] ss:$16 sps:$4 sm:$0xff]   ;;  %v18958_v17 = vld [vmem:[#allocation5 + $0x1620] ss:$16 sps:$4 sm:$0xff]  }
 0x27c   : > { %3453 = vmatpush1.bf16.msra.mxu1 %v18880_v3  ;;  %v18961_v3 = vld [vmem:[#allocation5 + $0x2e20] ss:$16 sps:$4 sm:$0xff]  }
 0x27d   : > { %6422 = vmatpush1.bf16.msra.mxu0 %v18883_v18  ;;  %3454 = vmatprep.subr.bf16.mxu1 %v18888_v19  ;;  %v18966_v18 = vld [vmem:[#allocation5 + $0x1644] ss:$16 sps:$4 sm:$0xff]  }
 0x27e   : > { %6423 = vmatprep.subr.bf16.mxu0 %v18891_v20  ;;  %v18969_v19 = vld [vmem:[#allocation5 + $0x2e44] ss:$16 sps:$4 sm:$0xff]   ;;  %v18964_v20 = vld [vmem:[#allocation5 + $0x1640] ss:$16 sps:$4 sm:$0xff]  }
 0x280   : > { %3455 = vmatpush1.bf16.msra.mxu1 %v18886_v29  ;;  %v18967_v29 = vld [vmem:[#allocation5 + $0x2e40] ss:$16 sps:$4 sm:$0xff]  }
 0x281   : > { %6424 = vmatpush1.bf16.msra.mxu0 %v18889_v13  ;;  %3456 = vmatprep.subr.bf16.mxu1 %v18894_v36  ;;  %v18972_v13 = vld [vmem:[#allocation5 + $0x1664] ss:$16 sps:$4 sm:$0xff]   ;;  %v18970_v36 = vld [vmem:[#allocation5 + $0x1660] ss:$16 sps:$4 sm:$0xff]  }
 0x282   : > { %6425 = vmatprep.subr.bf16.mxu0 %v18897_v21  ;;  %v18973_v21 = vld [vmem:[#allocation5 + $0x2e60] ss:$16 sps:$4 sm:$0xff]  }
 0x284   : > { %3457 = vmatpush1.bf16.msra.mxu1 %v18892_v61  ;;  %v18978_v61 = vld [vmem:[#allocation5 + $0x1684] ss:$16 sps:$4 sm:$0xff]  }
 0x285   : > { %6426 = vmatpush1.bf16.msra.mxu0 %v18895_v6  ;;  %3458 = vmatprep.subr.bf16.mxu1 %v18900_v24  ;;  %v18981_v6 = vld [vmem:[#allocation5 + $0x2e84] ss:$16 sps:$4 sm:$0xff]   ;;  %v18976_v24 = vld [vmem:[#allocation5 + $0x1680] ss:$16 sps:$4 sm:$0xff]  }
 0x286   : > { %6427 = vmatprep.subr.bf16.mxu0 %v18903_v25  ;;  %v18984_v25 = vld [vmem:[#allocation5 + $0x16a4] ss:$16 sps:$4 sm:$0xff]  }
 0x288   : > { %3459 = vmatpush1.bf16.msra.mxu1 %v18898_v26  ;;  %v18987_v26 = vld [vmem:[#allocation5 + $0x2ea4] ss:$16 sps:$4 sm:$0xff]  }
 0x289   : > { %6428 = vmatpush1.bf16.msra.mxu0 %v18901_v27  ;;  %3460 = vmatprep.subr.bf16.mxu1 %v18906_v28  ;;  %v18982_v27 = vld [vmem:[#allocation5 + $0x16a0] ss:$16 sps:$4 sm:$0xff]  }
 0x28a   : > { %6429 = vmatprep.subr.bf16.mxu0 %v18909_v30  ;;  %v18985_v28 = vld [vmem:[#allocation5 + $0x2ea0] ss:$16 sps:$4 sm:$0xff]   ;;  %v18990_v30 = vld [vmem:[#allocation5 + $0x16c4] ss:$16 sps:$4 sm:$0xff]  }
 0x28c   : > { %3461 = vmatpush1.bf16.msra.mxu1 %v18904_v31  ;;  %v18993_v31 = vld [vmem:[#allocation5 + $0x2ec4] ss:$16 sps:$4 sm:$0xff]  }
 0x28d   : > { %6430 = vmatpush1.bf16.msra.mxu0 %v18907_v9  ;;  %3462 = vmatprep.subr.bf16.mxu1 %v18912_v11  ;;  %v18988_v9 = vld [vmem:[#allocation5 + $0x16c0] ss:$16 sps:$4 sm:$0xff]  }
 0x28e   : > { %6431 = vmatprep.subr.bf16.mxu0 %v18915_v37  ;;  %v18991_v11 = vld [vmem:[#allocation5 + $0x2ec0] ss:$16 sps:$4 sm:$0xff]   ;;  %v18996_v37 = vld [vmem:[#allocation5 + $0x16e4] ss:$16 sps:$4 sm:$0xff]  }
 0x290   : > { %3463 = vmatpush1.bf16.msra.mxu1 %v18910_v38  ;;  %v18999_v38 = vld [vmem:[#allocation5 + $0x2ee4] ss:$16 sps:$4 sm:$0xff]  }
 0x291   : > { %6432 = vmatpush1.bf16.msra.mxu0 %v18913_v39  ;;  %3464 = vmatprep.subr.bf16.mxu1 %v18918_v42  ;;  %v18994_v39 = vld [vmem:[#allocation5 + $0x16e0] ss:$16 sps:$4 sm:$0xff]  }
 0x292   : > { %6433 = vmatprep.subr.bf16.mxu0 %v18921_v43  ;;  %v18997_v42 = vld [vmem:[#allocation5 + $0x2ee0] ss:$16 sps:$4 sm:$0xff]   ;;  %v19002_v43 = vld [vmem:[#allocation5 + $0x1704] ss:$16 sps:$4 sm:$0xff]  }
 0x294   : > { %3465 = vmatpush1.bf16.msra.mxu1 %v18916_v44  ;;  %v19005_v44 = vld [vmem:[#allocation5 + $0x2f04] ss:$16 sps:$4 sm:$0xff]  }
 0x295   : > { %6434 = vmatpush1.bf16.msra.mxu0 %v18919_v45  ;;  %3466 = vmatprep.subr.bf16.mxu1 %v18924_v50  ;;  %v19000_v45 = vld [vmem:[#allocation5 + $0x1700] ss:$16 sps:$4 sm:$0xff]  }
 0x296   : > { %6435 = vmatprep.subr.bf16.mxu0 %v18927_v51  ;;  %v19003_v50 = vld [vmem:[#allocation5 + $0x2f00] ss:$16 sps:$4 sm:$0xff]   ;;  %v19008_v51 = vld [vmem:[#allocation5 + $0x1724] ss:$16 sps:$4 sm:$0xff]  }
 0x298   : > { %3467 = vmatpush1.bf16.msra.mxu1 %v18922_v52  ;;  %v19011_v52 = vld [vmem:[#allocation5 + $0x2f24] ss:$16 sps:$4 sm:$0xff]  }
 0x299   : > { %6436 = vmatpush1.bf16.msra.mxu0 %v18925_v41  ;;  %3468 = vmatprep.subr.bf16.mxu1 %v18930_v40  ;;  %v19006_v41 = vld [vmem:[#allocation5 + $0x1720] ss:$16 sps:$4 sm:$0xff]  }
 0x29a   : > { %6437 = vmatprep.subr.bf16.mxu0 %v18933_v54  ;;  %v19009_v40 = vld [vmem:[#allocation5 + $0x2f20] ss:$16 sps:$4 sm:$0xff]   ;;  %v19014_v54 = vld [vmem:[#allocation5 + $0x1744] ss:$16 sps:$4 sm:$0xff]  }
 0x29c   : > { %3469 = vmatpush1.bf16.msra.mxu1 %v18928_v55  ;;  %v19017_v55 = vld [vmem:[#allocation5 + $0x2f44] ss:$16 sps:$4 sm:$0xff]  }
 0x29d   : > { %6438 = vmatpush1.bf16.msra.mxu0 %v18931_v56  ;;  %3470 = vmatprep.subr.bf16.mxu1 %v18936_v57  ;;  %v19012_v56 = vld [vmem:[#allocation5 + $0x1740] ss:$16 sps:$4 sm:$0xff]  }
 0x29e   : > { %6439 = vmatprep.subr.bf16.mxu0 %v18939_v49  ;;  %v19015_v57 = vld [vmem:[#allocation5 + $0x2f40] ss:$16 sps:$4 sm:$0xff]   ;;  %v19020_v49 = vld [vmem:[#allocation5 + $0x1764] ss:$16 sps:$4 sm:$0xff]  }
 0x2a0   : > { %3471 = vmatpush1.bf16.msra.mxu1 %v18934_v48  ;;  %v19023_v48 = vld [vmem:[#allocation5 + $0x2f64] ss:$16 sps:$4 sm:$0xff]  }
 0x2a1   : > { %6440 = vmatpush1.bf16.msra.mxu0 %v18937_v58  ;;  %3472 = vmatprep.subr.bf16.mxu1 %v18942_v60  ;;  %v19018_v58 = vld [vmem:[#allocation5 + $0x1760] ss:$16 sps:$4 sm:$0xff]  }
 0x2a2   : > { %6441 = vmatprep.subr.bf16.mxu0 %v18945_v5  ;;  %v19021_v60 = vld [vmem:[#allocation5 + $0x2f60] ss:$16 sps:$4 sm:$0xff]   ;;  %v19026_v5 = vld [vmem:[#allocation5 + $0x1784] ss:$16 sps:$4 sm:$0xff]  }
 0x2a4   : > { %3473 = vmatpush1.bf16.msra.mxu1 %v18940_v62  ;;  %v19029_v62 = vld [vmem:[#allocation5 + $0x2f84] ss:$16 sps:$4 sm:$0xff]  }
 0x2a5   : > { %6442 = vmatpush1.bf16.msra.mxu0 %v18943_v63  ;;  %3474 = vmatprep.subr.bf16.mxu1 %v18948_v2  ;;  %v19024_v63 = vld [vmem:[#allocation5 + $0x1780] ss:$16 sps:$4 sm:$0xff]  }
 0x2a6   : > { %6443 = vmatprep.subr.bf16.mxu0 %v18951_v4  ;;  %v19027_v2 = vld [vmem:[#allocation5 + $0x2f80] ss:$16 sps:$4 sm:$0xff]   ;;  %v19032_v4 = vld [vmem:[#allocation5 + $0x17a4] ss:$16 sps:$4 sm:$0xff]  }
 0x2a8   : > { %3475 = vmatpush1.bf16.msra.mxu1 %v18946_v12  ;;  %v19035_v12 = vld [vmem:[#allocation5 + $0x2fa4] ss:$16 sps:$4 sm:$0xff]  }
 0x2a9   : > { %6444 = vmatpush1.bf16.msra.mxu0 %v18949_v22  ;;  %3487 = vmatprep.subr.bf16.mxu1 %v18954_v8  ;;  %v19030_v22 = vld [vmem:[#allocation5 + $0x17a0] ss:$16 sps:$4 sm:$0xff]  }
 0x2aa   : > { %6456 = vmatprep.subr.bf16.mxu0 %v18957_v35  ;;  %v19033_v8 = vld [vmem:[#allocation5 + $0x2fa0] ss:$16 sps:$4 sm:$0xff]   ;;  %v19038_v35 = vld [vmem:[#allocation5 + $0x17c4] ss:$16 sps:$4 sm:$0xff]  }
 0x2ab   : > { %3477 = vmatmul.mubr.bf16.vlgmr.msra.gmra.mrb[4].mxu1 %v21355_v46 }
 0x2ac   : > { %6446 = vmatmul.mubr.bf16.vlgmr.msra.gmra.mrb[4].mxu0 %v21355_v46  ;;  %3488 = vmatpush1.bf16.msra.mxu1 %v18952_v32  ;;  %v18975_v46 = vld [vmem:[#allocation5 + $0x2e64] ss:$16 sps:$4 sm:$0xff]  }
 0x2ad   : > { %6457 = vmatpush1.bf16.msra.mxu0 %v18955_v10  ;;  %3489 = vmatprep.subr.bf16.mxu1 %v18960_v15  ;;  %v19041_v32 = vld [vmem:[#allocation5 + $0x2fc4] ss:$16 sps:$4 sm:$0xff]   ;;  %v19036_v10 = vld [vmem:[#allocation5 + $0x17c0] ss:$16 sps:$4 sm:$0xff]  }
 0x2ae   : > { %6458 = vmatprep.subr.bf16.mxu0 %v18963_v16  ;;  %3519 = vmatprep.mubr.bf16.mxu1 %v21370_v53  ;;  %v19039_v15 = vld [vmem:[#allocation5 + $0x2fc0] ss:$16 sps:$4 sm:$0xff]   ;;  %v19044_v16 = vld [vmem:[#allocation5 + $0x17e4] ss:$16 sps:$4 sm:$0xff]  }
 0x2af   : > { %6488 = vmatprep.mubr.bf16.mxu0 %v21370_v53  ;;  %v18979_v53 = vld [vmem:[#allocation5 + $0x2e80] ss:$16 sps:$4 sm:$0xff]  }
 0x2b0   : > { %3490 = vmatpush1.bf16.msra.mxu1 %v18958_v17  ;;  %v19047_v17 = vld [vmem:[#allocation5 + $0x2fe4] ss:$16 sps:$4 sm:$0xff]  }
 0x2b1   : > { %6459 = vmatpush1.bf16.msra.mxu0 %v18961_v3  ;;  %3491 = vmatprep.subr.bf16.mxu1 %v18966_v18  ;;  %v19042_v3 = vld [vmem:[#allocation5 + $0x17e0] ss:$16 sps:$4 sm:$0xff]  }
 0x2b2   : > { %6460 = vmatprep.subr.bf16.mxu0 %v18969_v19  ;;  %v19045_v18 = vld [vmem:[#allocation5 + $0x2fe0] ss:$16 sps:$4 sm:$0xff]   ;;  %v19050_v19 = vld [vmem:[#allocation5 + $0x1804] ss:$16 sps:$4 sm:$0xff]  }
 0x2b4   : > { %3492 = vmatpush1.bf16.msra.mxu1 %v18964_v20  ;;  %v19053_v20 = vld [vmem:[#allocation5 + $0x3004] ss:$16 sps:$4 sm:$0xff]  }
 0x2b5   : > { %6461 = vmatpush1.bf16.msra.mxu0 %v18967_v29  ;;  %3493 = vmatprep.subr.bf16.mxu1 %v18972_v13  ;;  %v19048_v29 = vld [vmem:[#allocation5 + $0x1800] ss:$16 sps:$4 sm:$0xff]  }
 0x2b6   : > { %6462 = vmatprep.subr.bf16.mxu0 %v18975_v46  ;;  %v19051_v13 = vld [vmem:[#allocation5 + $0x3000] ss:$16 sps:$4 sm:$0xff]   ;;  %v19056_v46 = vld [vmem:[#allocation5 + $0x1824] ss:$16 sps:$4 sm:$0xff]  }
 0x2b8   : > { %3494 = vmatpush1.bf16.msra.mxu1 %v18970_v36  ;;  %v19059_v36 = vld [vmem:[#allocation5 + $0x3024] ss:$16 sps:$4 sm:$0xff]  }
 0x2b9   : > { %6463 = vmatpush1.bf16.msra.mxu0 %v18973_v21  ;;  %3495 = vmatprep.subr.bf16.mxu1 %v18978_v61  ;;  %v19054_v21 = vld [vmem:[#allocation5 + $0x1820] ss:$16 sps:$4 sm:$0xff]  }
 0x2ba   : > { %6464 = vmatprep.subr.bf16.mxu0 %v18981_v6  ;;  %v19057_v61 = vld [vmem:[#allocation5 + $0x3020] ss:$16 sps:$4 sm:$0xff]   ;;  %v19062_v6 = vld [vmem:[#allocation5 + $0x1844] ss:$16 sps:$4 sm:$0xff]  }
 0x2bc   : > { %3496 = vmatpush1.bf16.msra.mxu1 %v18976_v24  ;;  %v19065_v24 = vld [vmem:[#allocation5 + $0x3044] ss:$16 sps:$4 sm:$0xff]  }
 0x2bd   : > { %6465 = vmatpush1.bf16.msra.mxu0 %v18979_v53  ;;  %3497 = vmatprep.subr.bf16.mxu1 %v18984_v25  ;;  %v19060_v53 = vld [vmem:[#allocation5 + $0x1840] ss:$16 sps:$4 sm:$0xff]  }
 0x2be   : > { %6466 = vmatprep.subr.bf16.mxu0 %v18987_v26  ;;  %v19063_v25 = vld [vmem:[#allocation5 + $0x3040] ss:$16 sps:$4 sm:$0xff]   ;;  %v19068_v26 = vld [vmem:[#allocation5 + $0x1864] ss:$16 sps:$4 sm:$0xff]  }
 0x2c0   : > { %3498 = vmatpush1.bf16.msra.mxu1 %v18982_v27  ;;  %v19066_v27 = vld [vmem:[#allocation5 + $0x1860] ss:$16 sps:$4 sm:$0xff]  }
 0x2c1   : > { %6467 = vmatpush1.bf16.msra.mxu0 %v18985_v28  ;;  %3499 = vmatprep.subr.bf16.mxu1 %v18990_v30  ;;  %v19069_v28 = vld [vmem:[#allocation5 + $0x3060] ss:$16 sps:$4 sm:$0xff]   ;;  %v19074_v30 = vld [vmem:[#allocation5 + $0x1884] ss:$16 sps:$4 sm:$0xff]  }
 0x2c2   : > { %6468 = vmatprep.subr.bf16.mxu0 %v18993_v31  ;;  %v19077_v31 = vld [vmem:[#allocation5 + $0x3084] ss:$16 sps:$4 sm:$0xff]  }
 0x2c4   : > { %3500 = vmatpush1.bf16.msra.mxu1 %v18988_v9  ;;  %v19072_v9 = vld [vmem:[#allocation5 + $0x1880] ss:$16 sps:$4 sm:$0xff]  }
 0x2c5   : > { %6469 = vmatpush1.bf16.msra.mxu0 %v18991_v11  ;;  %3501 = vmatprep.subr.bf16.mxu1 %v18996_v37  ;;  %v19080_v11 = vld [vmem:[#allocation5 + $0x18a4] ss:$16 sps:$4 sm:$0xff]  }
 0x2c6   : > { %6470 = vmatprep.subr.bf16.mxu0 %v18999_v38  ;;  %v19083_v37 = vld [vmem:[#allocation5 + $0x30a4] ss:$16 sps:$4 sm:$0xff]   ;;  %v19078_v38 = vld [vmem:[#allocation5 + $0x18a0] ss:$16 sps:$4 sm:$0xff]  }
 0x2c8   : > { %3502 = vmatpush1.bf16.msra.mxu1 %v18994_v39  ;;  %v19081_v39 = vld [vmem:[#allocation5 + $0x30a0] ss:$16 sps:$4 sm:$0xff]  }
 0x2c9   : > { %6471 = vmatpush1.bf16.msra.mxu0 %v18997_v42  ;;  %3503 = vmatprep.subr.bf16.mxu1 %v19002_v43  ;;  %v19086_v42 = vld [vmem:[#allocation5 + $0x18c4] ss:$16 sps:$4 sm:$0xff]  }
 0x2ca   : > { %6472 = vmatprep.subr.bf16.mxu0 %v19005_v44  ;;  %v19089_v43 = vld [vmem:[#allocation5 + $0x30c4] ss:$16 sps:$4 sm:$0xff]   ;;  %v19084_v44 = vld [vmem:[#allocation5 + $0x18c0] ss:$16 sps:$4 sm:$0xff]  }
 0x2cc   : > { %3504 = vmatpush1.bf16.msra.mxu1 %v19000_v45  ;;  %v19087_v45 = vld [vmem:[#allocation5 + $0x30c0] ss:$16 sps:$4 sm:$0xff]  }
 0x2cd   : > { %6473 = vmatpush1.bf16.msra.mxu0 %v19003_v50  ;;  %3505 = vmatprep.subr.bf16.mxu1 %v19008_v51  ;;  %v19092_v50 = vld [vmem:[#allocation5 + $0x18e4] ss:$16 sps:$4 sm:$0xff]  }
 0x2ce   : > { %6474 = vmatprep.subr.bf16.mxu0 %v19011_v52  ;;  %v19095_v51 = vld [vmem:[#allocation5 + $0x30e4] ss:$16 sps:$4 sm:$0xff]   ;;  %v19090_v52 = vld [vmem:[#allocation5 + $0x18e0] ss:$16 sps:$4 sm:$0xff]  }
 0x2d0   : > { %3506 = vmatpush1.bf16.msra.mxu1 %v19006_v41  ;;  %v19093_v41 = vld [vmem:[#allocation5 + $0x30e0] ss:$16 sps:$4 sm:$0xff]  }
 0x2d1   : > { %6475 = vmatpush1.bf16.msra.mxu0 %v19009_v40  ;;  %3507 = vmatprep.subr.bf16.mxu1 %v19014_v54  ;;  %v19098_v40 = vld [vmem:[#allocation5 + $0x1904] ss:$16 sps:$4 sm:$0xff]  }
 0x2d2   : > { %6476 = vmatprep.subr.bf16.mxu0 %v19017_v55  ;;  %v19101_v54 = vld [vmem:[#allocation5 + $0x3104] ss:$16 sps:$4 sm:$0xff]   ;;  %v19096_v55 = vld [vmem:[#allocation5 + $0x1900] ss:$16 sps:$4 sm:$0xff]  }
 0x2d4   : > { %3508 = vmatpush1.bf16.msra.mxu1 %v19012_v56  ;;  %v19099_v56 = vld [vmem:[#allocation5 + $0x3100] ss:$16 sps:$4 sm:$0xff]  }
 0x2d5   : > { %6477 = vmatpush1.bf16.msra.mxu0 %v19015_v57  ;;  %3509 = vmatprep.subr.bf16.mxu1 %v19020_v49  ;;  %v19104_v57 = vld [vmem:[#allocation5 + $0x1924] ss:$16 sps:$4 sm:$0xff]  }
 0x2d6   : > { %6478 = vmatprep.subr.bf16.mxu0 %v19023_v48  ;;  %v19107_v49 = vld [vmem:[#allocation5 + $0x3124] ss:$16 sps:$4 sm:$0xff]   ;;  %v19102_v48 = vld [vmem:[#allocation5 + $0x1920] ss:$16 sps:$4 sm:$0xff]  }
 0x2d8   : > { %3510 = vmatpush1.bf16.msra.mxu1 %v19018_v58  ;;  %v19105_v58 = vld [vmem:[#allocation5 + $0x3120] ss:$16 sps:$4 sm:$0xff]  }
 0x2d9   : > { %6479 = vmatpush1.bf16.msra.mxu0 %v19021_v60  ;;  %3511 = vmatprep.subr.bf16.mxu1 %v19026_v5  ;;  %v19110_v60 = vld [vmem:[#allocation5 + $0x1944] ss:$16 sps:$4 sm:$0xff]  }
 0x2da   : > { %6480 = vmatprep.subr.bf16.mxu0 %v19029_v62  ;;  %v19113_v5 = vld [vmem:[#allocation5 + $0x3144] ss:$16 sps:$4 sm:$0xff]   ;;  %v19108_v62 = vld [vmem:[#allocation5 + $0x1940] ss:$16 sps:$4 sm:$0xff]  }
 0x2dc   : > { %3512 = vmatpush1.bf16.msra.mxu1 %v19024_v63  ;;  %v19111_v63 = vld [vmem:[#allocation5 + $0x3140] ss:$16 sps:$4 sm:$0xff]  }
 0x2dd   : > { %6481 = vmatpush1.bf16.msra.mxu0 %v19027_v2  ;;  %3513 = vmatprep.subr.bf16.mxu1 %v19032_v4  ;;  %v19116_v2 = vld [vmem:[#allocation5 + $0x1964] ss:$16 sps:$4 sm:$0xff]  }
 0x2de   : > { %6482 = vmatprep.subr.bf16.mxu0 %v19035_v12  ;;  %v19119_v4 = vld [vmem:[#allocation5 + $0x3164] ss:$16 sps:$4 sm:$0xff]   ;;  %v19114_v12 = vld [vmem:[#allocation5 + $0x1960] ss:$16 sps:$4 sm:$0xff]  }
 0x2e0   : > { %3514 = vmatpush1.bf16.msra.mxu1 %v19030_v22  ;;  %v19117_v22 = vld [vmem:[#allocation5 + $0x3160] ss:$16 sps:$4 sm:$0xff]  }
 0x2e1   : > { %6483 = vmatpush1.bf16.msra.mxu0 %v19033_v8  ;;  %3515 = vmatprep.subr.bf16.mxu1 %v19038_v35  ;;  %v19122_v8 = vld [vmem:[#allocation5 + $0x1984] ss:$16 sps:$4 sm:$0xff]  }
 0x2e2   : > { %6484 = vmatprep.subr.bf16.mxu0 %v19041_v32  ;;  %v19125_v35 = vld [vmem:[#allocation5 + $0x3184] ss:$16 sps:$4 sm:$0xff]   ;;  %v19120_v32 = vld [vmem:[#allocation5 + $0x1980] ss:$16 sps:$4 sm:$0xff]  }
 0x2e4   : > { %3516 = vmatpush1.bf16.msra.mxu1 %v19036_v10  ;;  %v19123_v10 = vld [vmem:[#allocation5 + $0x3180] ss:$16 sps:$4 sm:$0xff]  }
 0x2e5   : > { %6485 = vmatpush1.bf16.msra.mxu0 %v19039_v15  ;;  %3517 = vmatprep.subr.bf16.mxu1 %v19044_v16  ;;  %v19128_v15 = vld [vmem:[#allocation5 + $0x19a4] ss:$16 sps:$4 sm:$0xff]  }
 0x2e6   : > { %6486 = vmatprep.subr.bf16.mxu0 %v19047_v17  ;;  %v19131_v16 = vld [vmem:[#allocation5 + $0x31a4] ss:$16 sps:$4 sm:$0xff]   ;;  %v19126_v17 = vld [vmem:[#allocation5 + $0x19a0] ss:$16 sps:$4 sm:$0xff]  }
 0x2e8   : > { %3518 = vmatpush1.bf16.msra.mxu1 %v19042_v3  ;;  %v19129_v3 = vld [vmem:[#allocation5 + $0x31a0] ss:$16 sps:$4 sm:$0xff]  }
 0x2e9   : > { %6487 = vmatpush1.bf16.msra.mxu0 %v19045_v18  ;;  %3919 = vmatprep.subr.bf16.mxu1 %v19050_v19  ;;  %v19134_v18 = vld [vmem:[#allocation5 + $0x19c4] ss:$16 sps:$4 sm:$0xff]  }
 0x2ea   : > { %6888 = vmatprep.subr.bf16.mxu0 %v19053_v20  ;;  %v19137_v19 = vld [vmem:[#allocation5 + $0x31c4] ss:$16 sps:$4 sm:$0xff]   ;;  %v19132_v20 = vld [vmem:[#allocation5 + $0x19c0] ss:$16 sps:$4 sm:$0xff]  }
 0x2eb   : > { %3520 = vmatmul.mubr.bf16.vlgmr.msra.gmra.mrb[4].mxu1 %v21384_v0 }
 0x2ec   : > { %6489 = vmatmul.mubr.bf16.vlgmr.msra.gmra.mrb[4].mxu0 %v21384_v0  ;;  %3920 = vmatpush1.bf16.msra.mxu1 %v19048_v29  ;;  %v19071_v0 = vld [vmem:[#allocation5 + $0x3064] ss:$16 sps:$4 sm:$0xff]   ;;  %v19135_v29 = vld [vmem:[#allocation5 + $0x31c0] ss:$16 sps:$4 sm:$0xff]  }
 0x2ed   : > { %6889 = vmatpush1.bf16.msra.mxu0 %v19051_v13  ;;  %3921 = vmatprep.subr.bf16.mxu1 %v19056_v46  ;;  %v19140_v13 = vld [vmem:[#allocation5 + $0x19e4] ss:$16 sps:$4 sm:$0xff]  }
 0x2ee   : > { %6890 = vmatprep.subr.bf16.mxu0 %v19059_v36  ;;  %3951 = vmatprep.mubr.bf16.mxu1 %v21350_v34  ;;  %v19143_v46 = vld [vmem:[#allocation5 + $0x31e4] ss:$16 sps:$4 sm:$0xff]   ;;  %v19138_v36 = vld [vmem:[#allocation5 + $0x19e0] ss:$16 sps:$4 sm:$0xff]  }
 0x2ef   : > { %6920 = vmatprep.mubr.bf16.mxu0 %v21350_v34  ;;  %v19075_v34 = vld [vmem:[#allocation5 + $0x3080] ss:$16 sps:$4 sm:$0xff]  }
 0x2f0   : > { %3922 = vmatpush1.bf16.msra.mxu1 %v19054_v21  ;;  %v19141_v21 = vld [vmem:[#allocation5 + $0x31e0] ss:$16 sps:$4 sm:$0xff]  }
 0x2f1   : > { %6891 = vmatpush1.bf16.msra.mxu0 %v19057_v61  ;;  %3923 = vmatprep.subr.bf16.mxu1 %v19062_v6  ;;  %v19146_v61 = vld [vmem:[#allocation5 + $0x1a04] ss:$16 sps:$4 sm:$0xff]  }
 0x2f2   : > { %6892 = vmatprep.subr.bf16.mxu0 %v19065_v24  ;;  %v19149_v6 = vld [vmem:[#allocation5 + $0x3204] ss:$16 sps:$4 sm:$0xff]   ;;  %v19144_v24 = vld [vmem:[#allocation5 + $0x1a00] ss:$16 sps:$4 sm:$0xff]  }
 0x2f4   : > { %3924 = vmatpush1.bf16.msra.mxu1 %v19060_v53  ;;  %v19147_v53 = vld [vmem:[#allocation5 + $0x3200] ss:$16 sps:$4 sm:$0xff]  }
 0x2f5   : > { %6893 = vmatpush1.bf16.msra.mxu0 %v19063_v25  ;;  %3925 = vmatprep.subr.bf16.mxu1 %v19068_v26  ;;  %v19152_v25 = vld [vmem:[#allocation5 + $0x1a24] ss:$16 sps:$4 sm:$0xff]  }
 0x2f6   : > { %6894 = vmatprep.subr.bf16.mxu0 %v19071_v0  ;;  %v19155_v26 = vld [vmem:[#allocation5 + $0x3224] ss:$16 sps:$4 sm:$0xff]   ;;  %v19150_v0 = vld [vmem:[#allocation5 + $0x1a20] ss:$16 sps:$4 sm:$0xff]  }
 0x2f8   : > { %3926 = vmatpush1.bf16.msra.mxu1 %v19066_v27  ;;  %v19153_v27 = vld [vmem:[#allocation5 + $0x3220] ss:$16 sps:$4 sm:$0xff]  }
 0x2f9   : > { %6895 = vmatpush1.bf16.msra.mxu0 %v19069_v28  ;;  %3927 = vmatprep.subr.bf16.mxu1 %v19074_v30  ;;  %v19158_v28 = vld [vmem:[#allocation5 + $0x1a44] ss:$16 sps:$4 sm:$0xff]  }
 0x2fa   : > { %6896 = vmatprep.subr.bf16.mxu0 %v19077_v31  ;;  %v19161_v30 = vld [vmem:[#allocation5 + $0x3244] ss:$16 sps:$4 sm:$0xff]   ;;  %v19156_v31 = vld [vmem:[#allocation5 + $0x1a40] ss:$16 sps:$4 sm:$0xff]  }
 0x2fc   : > { %3928 = vmatpush1.bf16.msra.mxu1 %v19072_v9  ;;  %v19159_v9 = vld [vmem:[#allocation5 + $0x3240] ss:$16 sps:$4 sm:$0xff]  }
 0x2fd   : > { %6897 = vmatpush1.bf16.msra.mxu0 %v19075_v34  ;;  %3929 = vmatprep.subr.bf16.mxu1 %v19080_v11  ;;  %v19164_v34 = vld [vmem:[#allocation5 + $0x1a64] ss:$16 sps:$4 sm:$0xff]   ;;  %v19162_v11 = vld [vmem:[#allocation5 + $0x1a60] ss:$16 sps:$4 sm:$0xff]  }
 0x2fe   : > { %6898 = vmatprep.subr.bf16.mxu0 %v19083_v37  ;;  %v19165_v37 = vld [vmem:[#allocation5 + $0x3260] ss:$16 sps:$4 sm:$0xff]  }
 0x300   : > { %3930 = vmatpush1.bf16.msra.mxu1 %v19078_v38  ;;  %v19170_v38 = vld [vmem:[#allocation5 + $0x1a84] ss:$16 sps:$4 sm:$0xff]  }
 0x301   : > { %6899 = vmatpush1.bf16.msra.mxu0 %v19081_v39  ;;  %3931 = vmatprep.subr.bf16.mxu1 %v19086_v42  ;;  %v19173_v39 = vld [vmem:[#allocation5 + $0x3284] ss:$16 sps:$4 sm:$0xff]   ;;  %v19168_v42 = vld [vmem:[#allocation5 + $0x1a80] ss:$16 sps:$4 sm:$0xff]  }
 0x302   : > { %6900 = vmatprep.subr.bf16.mxu0 %v19089_v43  ;;  %v19176_v43 = vld [vmem:[#allocation5 + $0x1aa4] ss:$16 sps:$4 sm:$0xff]  }
 0x304   : > { %3932 = vmatpush1.bf16.msra.mxu1 %v19084_v44  ;;  %v19179_v44 = vld [vmem:[#allocation5 + $0x32a4] ss:$16 sps:$4 sm:$0xff]  }
 0x305   : > { %6901 = vmatpush1.bf16.msra.mxu0 %v19087_v45  ;;  %3933 = vmatprep.subr.bf16.mxu1 %v19092_v50  ;;  %v19174_v45 = vld [vmem:[#allocation5 + $0x1aa0] ss:$16 sps:$4 sm:$0xff]  }
 0x306   : > { %6902 = vmatprep.subr.bf16.mxu0 %v19095_v51  ;;  %v19177_v50 = vld [vmem:[#allocation5 + $0x32a0] ss:$16 sps:$4 sm:$0xff]   ;;  %v19182_v51 = vld [vmem:[#allocation5 + $0x1ac4] ss:$16 sps:$4 sm:$0xff]  }
 0x308   : > { %3934 = vmatpush1.bf16.msra.mxu1 %v19090_v52  ;;  %v19185_v52 = vld [vmem:[#allocation5 + $0x32c4] ss:$16 sps:$4 sm:$0xff]  }
 0x309   : > { %6903 = vmatpush1.bf16.msra.mxu0 %v19093_v41  ;;  %3935 = vmatprep.subr.bf16.mxu1 %v19098_v40  ;;  %v19180_v41 = vld [vmem:[#allocation5 + $0x1ac0] ss:$16 sps:$4 sm:$0xff]  }
 0x30a   : > { %6904 = vmatprep.subr.bf16.mxu0 %v19101_v54  ;;  %v19183_v40 = vld [vmem:[#allocation5 + $0x32c0] ss:$16 sps:$4 sm:$0xff]   ;;  %v19188_v54 = vld [vmem:[#allocation5 + $0x1ae4] ss:$16 sps:$4 sm:$0xff]  }
 0x30c   : > { %3936 = vmatpush1.bf16.msra.mxu1 %v19096_v55  ;;  %v19191_v55 = vld [vmem:[#allocation5 + $0x32e4] ss:$16 sps:$4 sm:$0xff]  }
 0x30d   : > { %6905 = vmatpush1.bf16.msra.mxu0 %v19099_v56  ;;  %3937 = vmatprep.subr.bf16.mxu1 %v19104_v57  ;;  %v19186_v56 = vld [vmem:[#allocation5 + $0x1ae0] ss:$16 sps:$4 sm:$0xff]  }
 0x30e   : > { %6906 = vmatprep.subr.bf16.mxu0 %v19107_v49  ;;  %v19189_v57 = vld [vmem:[#allocation5 + $0x32e0] ss:$16 sps:$4 sm:$0xff]   ;;  %v19194_v49 = vld [vmem:[#allocation5 + $0x1b04] ss:$16 sps:$4 sm:$0xff]  }
 0x310   : > { %3938 = vmatpush1.bf16.msra.mxu1 %v19102_v48  ;;  %v19197_v48 = vld [vmem:[#allocation5 + $0x3304] ss:$16 sps:$4 sm:$0xff]  }
 0x311   : > { %6907 = vmatpush1.bf16.msra.mxu0 %v19105_v58  ;;  %3939 = vmatprep.subr.bf16.mxu1 %v19110_v60  ;;  %v19192_v58 = vld [vmem:[#allocation5 + $0x1b00] ss:$16 sps:$4 sm:$0xff]  }
 0x312   : > { %6908 = vmatprep.subr.bf16.mxu0 %v19113_v5  ;;  %v19195_v60 = vld [vmem:[#allocation5 + $0x3300] ss:$16 sps:$4 sm:$0xff]   ;;  %v19200_v5 = vld [vmem:[#allocation5 + $0x1b24] ss:$16 sps:$4 sm:$0xff]  }
 0x314   : > { %3940 = vmatpush1.bf16.msra.mxu1 %v19108_v62  ;;  %v19203_v62 = vld [vmem:[#allocation5 + $0x3324] ss:$16 sps:$4 sm:$0xff]  }
 0x315   : > { %6909 = vmatpush1.bf16.msra.mxu0 %v19111_v63  ;;  %3941 = vmatprep.subr.bf16.mxu1 %v19116_v2  ;;  %v19198_v63 = vld [vmem:[#allocation5 + $0x1b20] ss:$16 sps:$4 sm:$0xff]  }
 0x316   : > { %6910 = vmatprep.subr.bf16.mxu0 %v19119_v4  ;;  %v19201_v2 = vld [vmem:[#allocation5 + $0x3320] ss:$16 sps:$4 sm:$0xff]   ;;  %v19206_v4 = vld [vmem:[#allocation5 + $0x1b44] ss:$16 sps:$4 sm:$0xff]  }
 0x318   : > { %3942 = vmatpush1.bf16.msra.mxu1 %v19114_v12  ;;  %v19209_v12 = vld [vmem:[#allocation5 + $0x3344] ss:$16 sps:$4 sm:$0xff]  }
 0x319   : > { %6911 = vmatpush1.bf16.msra.mxu0 %v19117_v22  ;;  %3943 = vmatprep.subr.bf16.mxu1 %v19122_v8  ;;  %v19204_v22 = vld [vmem:[#allocation5 + $0x1b40] ss:$16 sps:$4 sm:$0xff]  }
 0x31a   : > { %6912 = vmatprep.subr.bf16.mxu0 %v19125_v35  ;;  %v19207_v8 = vld [vmem:[#allocation5 + $0x3340] ss:$16 sps:$4 sm:$0xff]   ;;  %v19212_v35 = vld [vmem:[#allocation5 + $0x1b64] ss:$16 sps:$4 sm:$0xff]  }
 0x31c   : > { %3944 = vmatpush1.bf16.msra.mxu1 %v19120_v32  ;;  %v19215_v32 = vld [vmem:[#allocation5 + $0x3364] ss:$16 sps:$4 sm:$0xff]  }
 0x31d   : > { %6913 = vmatpush1.bf16.msra.mxu0 %v19123_v10  ;;  %3945 = vmatprep.subr.bf16.mxu1 %v19128_v15  ;;  %v19210_v10 = vld [vmem:[#allocation5 + $0x1b60] ss:$16 sps:$4 sm:$0xff]  }
 0x31e   : > { %6914 = vmatprep.subr.bf16.mxu0 %v19131_v16  ;;  %v19213_v15 = vld [vmem:[#allocation5 + $0x3360] ss:$16 sps:$4 sm:$0xff]   ;;  %v19218_v16 = vld [vmem:[#allocation5 + $0x1b84] ss:$16 sps:$4 sm:$0xff]  }
 0x320   : > { %3946 = vmatpush1.bf16.msra.mxu1 %v19126_v17  ;;  %v19221_v17 = vld [vmem:[#allocation5 + $0x3384] ss:$16 sps:$4 sm:$0xff]  }
 0x321   : > { %6915 = vmatpush1.bf16.msra.mxu0 %v19129_v3  ;;  %3947 = vmatprep.subr.bf16.mxu1 %v19134_v18  ;;  %v19216_v3 = vld [vmem:[#allocation5 + $0x1b80] ss:$16 sps:$4 sm:$0xff]  }
 0x322   : > { %6916 = vmatprep.subr.bf16.mxu0 %v19137_v19  ;;  %v19219_v18 = vld [vmem:[#allocation5 + $0x3380] ss:$16 sps:$4 sm:$0xff]   ;;  %v19224_v19 = vld [vmem:[#allocation5 + $0x1ba4] ss:$16 sps:$4 sm:$0xff]  }
 0x324   : > { %3948 = vmatpush1.bf16.msra.mxu1 %v19132_v20  ;;  %v19227_v20 = vld [vmem:[#allocation5 + $0x33a4] ss:$16 sps:$4 sm:$0xff]  }
 0x325   : > { %6917 = vmatpush1.bf16.msra.mxu0 %v19135_v29  ;;  %3949 = vmatprep.subr.bf16.mxu1 %v19140_v13  ;;  %v19222_v29 = vld [vmem:[#allocation5 + $0x1ba0] ss:$16 sps:$4 sm:$0xff]  }
 0x326   : > { %6918 = vmatprep.subr.bf16.mxu0 %v19143_v46  ;;  %v19225_v13 = vld [vmem:[#allocation5 + $0x33a0] ss:$16 sps:$4 sm:$0xff]   ;;  %v19230_v46 = vld [vmem:[#allocation5 + $0x1bc4] ss:$16 sps:$4 sm:$0xff]  }
 0x328   : > { %3950 = vmatpush1.bf16.msra.mxu1 %v19138_v36  ;;  %v19233_v36 = vld [vmem:[#allocation5 + $0x33c4] ss:$16 sps:$4 sm:$0xff]  }
 0x329   : > { %6919 = vmatpush1.bf16.msra.mxu0 %v19141_v21  ;;  %3962 = vmatprep.subr.bf16.mxu1 %v19146_v61  ;;  %v19228_v21 = vld [vmem:[#allocation5 + $0x1bc0] ss:$16 sps:$4 sm:$0xff]  }
 0x32a   : > { %6931 = vmatprep.subr.bf16.mxu0 %v19149_v6  ;;  %v19231_v61 = vld [vmem:[#allocation5 + $0x33c0] ss:$16 sps:$4 sm:$0xff]   ;;  %v19236_v6 = vld [vmem:[#allocation5 + $0x1be4] ss:$16 sps:$4 sm:$0xff]  }
 0x32b   : > { %3952 = vmatmul.mubr.bf16.vlgmr.msra.gmra.mrb[4].mxu1 %v21358_v47 }
 0x32c   : > { %6921 = vmatmul.mubr.bf16.vlgmr.msra.gmra.mrb[4].mxu0 %v21358_v47  ;;  %3963 = vmatpush1.bf16.msra.mxu1 %v19144_v24  ;;  %v19167_v47 = vld [vmem:[#allocation5 + $0x3264] ss:$16 sps:$4 sm:$0xff]  }
 0x32d   : > { %6932 = vmatpush1.bf16.msra.mxu0 %v19147_v53  ;;  %3964 = vmatprep.subr.bf16.mxu1 %v19152_v25  ;;  %v19239_v24 = vld [vmem:[#allocation5 + $0x33e4] ss:$16 sps:$4 sm:$0xff]   ;;  %v19234_v53 = vld [vmem:[#allocation5 + $0x1be0] ss:$16 sps:$4 sm:$0xff]  }
 0x32e   : > { %6933 = vmatprep.subr.bf16.mxu0 %v19155_v26  ;;  %3994 = vmatprep.mubr.bf16.mxu1 %v21374_v59  ;;  %v19237_v25 = vld [vmem:[#allocation5 + $0x33e0] ss:$16 sps:$4 sm:$0xff]   ;;  %v21498_v26 = vld [vmem:[#allocation3 + $0x8] sm:$0xe0] }
 0x32f   : > { %6963 = vmatprep.mubr.bf16.mxu0 %v21374_v59  ;;  %v19171_v59 = vld [vmem:[#allocation5 + $0x3280] ss:$16 sps:$4 sm:$0xff]  }
 0x330   : > { %3965 = vmatpush1.bf16.msra.mxu1 %v19150_v0  ;;  %v19242_v0 = vld [vmem:[#allocation5 + $0x1c04] ss:$16 sps:$4 sm:$0xff]  }
 0x331   : > { %6934 = vmatpush1.bf16.msra.mxu0 %v19153_v27  ;;  %3966 = vmatprep.subr.bf16.mxu1 %v19158_v28  ;;  %v19245_v27 = vld [vmem:[#allocation5 + $0x3404] ss:$16 sps:$4 sm:$0xff]   ;;  %v19240_v28 = vld [vmem:[#allocation5 + $0x1c00] ss:$16 sps:$4 sm:$0xff]  }
 0x332   : > { %6935 = vmatprep.subr.bf16.mxu0 %v19161_v30  ;;  %v19243_v30 = vld [vmem:[#allocation5 + $0x3400] ss:$16 sps:$4 sm:$0xff]  }
 0x334   : > { %3967 = vmatpush1.bf16.msra.mxu1 %v19156_v31  ;;  %v4090_v31 = vrot.slane %v21498_v26, 5 }
 0x335   : > { %6936 = vmatpush1.bf16.msra.mxu0 %v19159_v9  ;;  %3968 = vmatprep.subr.bf16.mxu1 %v19164_v34  ;;  %v20968_v9 = vld [vmem:[#allocation3 + $0x28] sm:$0x1f] }
 0x336   : > { %6937 = vmatprep.subr.bf16.mxu0 %v19167_v47  ;;  %v4091_v34 = vrot.slane %v20968_v9, 5  ;;  %v19248_v47 = vld [vmem:[#allocation5 + $0x1c24] ss:$16 sps:$4 sm:$0xff]  }
 0x337   : > { %v19332_v9 = vld [vmem:[#allocation5 + $0x1de4] ss:$16 sps:$4 sm:$0xff]  }
 0x338   : > { %3969 = vmatpush1.bf16.msra.mxu1 %v19162_v11  ;;  %v19251_v11 = vld [vmem:[#allocation5 + $0x3424] ss:$16 sps:$4 sm:$0xff]  }
 0x339   : > { %6938 = vmatpush1.bf16.msra.mxu0 %v19165_v37  ;;  %3970 = vmatprep.subr.bf16.mxu1 %v19170_v38  ;;  %v4092_v37 = vsel %vm4086_vm5, %v4090_v31, %v4091_v34  ;;  %v19246_v38 = vld [vmem:[#allocation5 + $0x1c20] ss:$16 sps:$4 sm:$0xff]   ;;  %v19335_v34 = vld [vmem:[#allocation5 + $0x35e4] ss:$16 sps:$4 sm:$0xff]  }
 0x33a   : > { %6939 = vmatprep.subr.bf16.mxu0 %v19173_v39  ;;  %v19249_v39 = vld [vmem:[#allocation5 + $0x3420] ss:$16 sps:$4 sm:$0xff]  }
 0x33b   : > { %v19327_v31 = vld [vmem:[#allocation5 + $0x35c0] ss:$16 sps:$4 sm:$0xff]  }
 0x33c   : > { %3971 = vmatpush1.bf16.msra.mxu1 %v19168_v42  ;;  %v19254_v42 = vld [vmem:[#allocation5 + $0x1c44] ss:$16 sps:$4 sm:$0xff]  }
 0x33d   : > { %6940 = vmatpush1.bf16.msra.mxu0 %v19171_v59  ;;  %3972 = vmatprep.subr.bf16.mxu1 %v19176_v43  ;;  %v19257_v59 = vld [vmem:[#allocation5 + $0x3444] ss:$16 sps:$4 sm:$0xff]   ;;  %v19252_v43 = vld [vmem:[#allocation5 + $0x1c40] ss:$16 sps:$4 sm:$0xff]  }
 0x33e   : > { %6941 = vmatprep.subr.bf16.mxu0 %v19179_v44  ;;  %v19255_v44 = vld [vmem:[#allocation5 + $0x3440] ss:$16 sps:$4 sm:$0xff]  }
 0x340   : > { %3973 = vmatpush1.bf16.msra.mxu1 %v19174_v45  ;;  %v19260_v45 = vld [vmem:[#allocation5 + $0x1c64] ss:$16 sps:$4 sm:$0xff]  }
 0x341   : > { %6942 = vmatpush1.bf16.msra.mxu0 %v19177_v50  ;;  %3974 = vmatprep.subr.bf16.mxu1 %v19182_v51  ;;  %v19258_v50 = vld [vmem:[#allocation5 + $0x1c60] ss:$16 sps:$4 sm:$0xff]  }
 0x342   : > { %6943 = vmatprep.subr.bf16.mxu0 %v19185_v52  ;;  %v19261_v51 = vld [vmem:[#allocation5 + $0x3460] ss:$16 sps:$4 sm:$0xff]   ;;  %v19266_v52 = vld [vmem:[#allocation5 + $0x1c84] ss:$16 sps:$4 sm:$0xff]  }
 0x344   : > { %3975 = vmatpush1.bf16.msra.mxu1 %v19180_v41  ;;  %v19269_v41 = vld [vmem:[#allocation5 + $0x3484] ss:$16 sps:$4 sm:$0xff]  }
 0x345   : > { %6944 = vmatpush1.bf16.msra.mxu0 %v19183_v40  ;;  %3976 = vmatprep.subr.bf16.mxu1 %v19188_v54  ;;  %v19264_v40 = vld [vmem:[#allocation5 + $0x1c80] ss:$16 sps:$4 sm:$0xff]  }
 0x346   : > { %6945 = vmatprep.subr.bf16.mxu0 %v19191_v55  ;;  %v19267_v54 = vld [vmem:[#allocation5 + $0x3480] ss:$16 sps:$4 sm:$0xff]   ;;  %v19272_v55 = vld [vmem:[#allocation5 + $0x1ca4] ss:$16 sps:$4 sm:$0xff]  }
 0x348   : > { %3977 = vmatpush1.bf16.msra.mxu1 %v19186_v56  ;;  %v19275_v56 = vld [vmem:[#allocation5 + $0x34a4] ss:$16 sps:$4 sm:$0xff]  }
 0x349   : > { %6946 = vmatpush1.bf16.msra.mxu0 %v19189_v57  ;;  %3978 = vmatprep.subr.bf16.mxu1 %v19194_v49  ;;  %v19270_v57 = vld [vmem:[#allocation5 + $0x1ca0] ss:$16 sps:$4 sm:$0xff]  }
 0x34a   : > { %6947 = vmatprep.subr.bf16.mxu0 %v19197_v48  ;;  %v19273_v49 = vld [vmem:[#allocation5 + $0x34a0] ss:$16 sps:$4 sm:$0xff]   ;;  %v19278_v48 = vld [vmem:[#allocation5 + $0x1cc4] ss:$16 sps:$4 sm:$0xff]  }
 0x34c   : > { %3979 = vmatpush1.bf16.msra.mxu1 %v19192_v58  ;;  %v19281_v58 = vld [vmem:[#allocation5 + $0x34c4] ss:$16 sps:$4 sm:$0xff]  }
 0x34d   : > { %6948 = vmatpush1.bf16.msra.mxu0 %v19195_v60  ;;  %3980 = vmatprep.subr.bf16.mxu1 %v19200_v5  ;;  %v19276_v60 = vld [vmem:[#allocation5 + $0x1cc0] ss:$16 sps:$4 sm:$0xff]  }
 0x34e   : > { %6949 = vmatprep.subr.bf16.mxu0 %v19203_v62  ;;  %v19279_v5 = vld [vmem:[#allocation5 + $0x34c0] ss:$16 sps:$4 sm:$0xff]   ;;  %v19284_v62 = vld [vmem:[#allocation5 + $0x1ce4] ss:$16 sps:$4 sm:$0xff]  }
 0x350   : > { %3981 = vmatpush1.bf16.msra.mxu1 %v19198_v63  ;;  %v19287_v63 = vld [vmem:[#allocation5 + $0x34e4] ss:$16 sps:$4 sm:$0xff]  }
 0x351   : > { %6950 = vmatpush1.bf16.msra.mxu0 %v19201_v2  ;;  %3982 = vmatprep.subr.bf16.mxu1 %v19206_v4  ;;  %v19282_v2 = vld [vmem:[#allocation5 + $0x1ce0] ss:$16 sps:$4 sm:$0xff]  }
 0x352   : > { %6951 = vmatprep.subr.bf16.mxu0 %v19209_v12  ;;  %v19285_v4 = vld [vmem:[#allocation5 + $0x34e0] ss:$16 sps:$4 sm:$0xff]   ;;  %v19290_v12 = vld [vmem:[#allocation5 + $0x1d04] ss:$16 sps:$4 sm:$0xff]  }
 0x354   : > { %3983 = vmatpush1.bf16.msra.mxu1 %v19204_v22  ;;  %v19293_v22 = vld [vmem:[#allocation5 + $0x3504] ss:$16 sps:$4 sm:$0xff]  }
 0x355   : > { %6952 = vmatpush1.bf16.msra.mxu0 %v19207_v8  ;;  %3984 = vmatprep.subr.bf16.mxu1 %v19212_v35  ;;  %v19288_v8 = vld [vmem:[#allocation5 + $0x1d00] ss:$16 sps:$4 sm:$0xff]  }
 0x356   : > { %6953 = vmatprep.subr.bf16.mxu0 %v19215_v32  ;;  %v19291_v35 = vld [vmem:[#allocation5 + $0x3500] ss:$16 sps:$4 sm:$0xff]   ;;  %v19296_v32 = vld [vmem:[#allocation5 + $0x1d24] ss:$16 sps:$4 sm:$0xff]  }
 0x358   : > { %3985 = vmatpush1.bf16.msra.mxu1 %v19210_v10  ;;  %v19299_v10 = vld [vmem:[#allocation5 + $0x3524] ss:$16 sps:$4 sm:$0xff]  }
 0x359   : > { %6954 = vmatpush1.bf16.msra.mxu0 %v19213_v15  ;;  %3986 = vmatprep.subr.bf16.mxu1 %v19218_v16  ;;  %v19294_v15 = vld [vmem:[#allocation5 + $0x1d20] ss:$16 sps:$4 sm:$0xff]  }
 0x35a   : > { %6955 = vmatprep.subr.bf16.mxu0 %v19221_v17  ;;  %v19297_v16 = vld [vmem:[#allocation5 + $0x3520] ss:$16 sps:$4 sm:$0xff]   ;;  %v19302_v17 = vld [vmem:[#allocation5 + $0x1d44] ss:$16 sps:$4 sm:$0xff]  }
 0x35c   : > { %3987 = vmatpush1.bf16.msra.mxu1 %v19216_v3  ;;  %v19305_v3 = vld [vmem:[#allocation5 + $0x3544] ss:$16 sps:$4 sm:$0xff]  }
 0x35d   : > { %6956 = vmatpush1.bf16.msra.mxu0 %v19219_v18  ;;  %3988 = vmatprep.subr.bf16.mxu1 %v19224_v19  ;;  %v19300_v18 = vld [vmem:[#allocation5 + $0x1d40] ss:$16 sps:$4 sm:$0xff]  }
 0x35e   : > { %6957 = vmatprep.subr.bf16.mxu0 %v19227_v20  ;;  %v19303_v19 = vld [vmem:[#allocation5 + $0x3540] ss:$16 sps:$4 sm:$0xff]   ;;  %v19308_v20 = vld [vmem:[#allocation5 + $0x1d64] ss:$16 sps:$4 sm:$0xff]  }
 0x360   : > { %3989 = vmatpush1.bf16.msra.mxu1 %v19222_v29  ;;  %v19311_v29 = vld [vmem:[#allocation5 + $0x3564] ss:$16 sps:$4 sm:$0xff]  }
 0x361   : > { %6958 = vmatpush1.bf16.msra.mxu0 %v19225_v13  ;;  %3990 = vmatprep.subr.bf16.mxu1 %v19230_v46  ;;  %v19306_v13 = vld [vmem:[#allocation5 + $0x1d60] ss:$16 sps:$4 sm:$0xff]  }
 0x362   : > { %6959 = vmatprep.subr.bf16.mxu0 %v19233_v36  ;;  %v19309_v46 = vld [vmem:[#allocation5 + $0x3560] ss:$16 sps:$4 sm:$0xff]   ;;  %v19314_v36 = vld [vmem:[#allocation5 + $0x1d84] ss:$16 sps:$4 sm:$0xff]  }
 0x364   : > { %3991 = vmatpush1.bf16.msra.mxu1 %v19228_v21  ;;  %v19317_v21 = vld [vmem:[#allocation5 + $0x3584] ss:$16 sps:$4 sm:$0xff]  }
 0x365   : > { %6960 = vmatpush1.bf16.msra.mxu0 %v19231_v61  ;;  %3992 = vmatprep.subr.bf16.mxu1 %v19236_v6  ;;  %v19312_v61 = vld [vmem:[#allocation5 + $0x1d80] ss:$16 sps:$4 sm:$0xff]  }
 0x366   : > { %6961 = vmatprep.subr.bf16.mxu0 %v19239_v24  ;;  %v19315_v6 = vld [vmem:[#allocation5 + $0x3580] ss:$16 sps:$4 sm:$0xff]   ;;  %v19320_v24 = vld [vmem:[#allocation5 + $0x1da4] ss:$16 sps:$4 sm:$0xff]  }
 0x368   : > { %3993 = vmatpush1.bf16.msra.mxu1 %v19234_v53  ;;  %v19323_v53 = vld [vmem:[#allocation5 + $0x35a4] ss:$16 sps:$4 sm:$0xff]  }
 0x369   : > { %6962 = vmatpush1.bf16.msra.mxu0 %v19237_v25  ;;  %4423 = vmatprep.subr.bf16.mxu1 %v19242_v0  ;;  %v19318_v25 = vld [vmem:[#allocation5 + $0x1da0] ss:$16 sps:$4 sm:$0xff]  }
 0x36a   : > { %7363 = vmatprep.subr.bf16.mxu0 %v19245_v27  ;;  %v19321_v0 = vld [vmem:[#allocation5 + $0x35a0] ss:$16 sps:$4 sm:$0xff]   ;;  %v19326_v27 = vld [vmem:[#allocation5 + $0x1dc4] ss:$16 sps:$4 sm:$0xff]  }
 0x36b   : > { %3995 = vmatmul.mubr.bf16.vlgmr.msra.gmra.mrb[4].mxu1 %v21381_v33 }
 0x36c   : > { %6964 = vmatmul.mubr.bf16.vlgmr.msra.gmra.mrb[4].mxu0 %v21381_v33  ;;  %4424 = vmatpush1.bf16.msra.mxu1 %v19240_v28  ;;  %v19263_v33 = vld [vmem:[#allocation5 + $0x3464] ss:$16 sps:$4 sm:$0xff]  }
 0x36d   : > { %7364 = vmatpush1.bf16.msra.mxu0 %v19243_v30  ;;  %4425 = vmatprep.subr.bf16.mxu1 %v19248_v47  ;;  %v19329_v28 = vld [vmem:[#allocation5 + $0x35c4] ss:$16 sps:$4 sm:$0xff]   ;;  %v19324_v30 = vld [vmem:[#allocation5 + $0x1dc0] ss:$16 sps:$4 sm:$0xff]  }
 0x36e   : > { %7365 = vmatprep.subr.bf16.mxu0 %v19251_v11  ;;  %4455 = vmatprep.mubr.bf16.mxu1 %v4092_v37  ;;  %v21504_v47 = vld [vmem:[#allocation3] sm:$0xe0]  ;;  %v19330_v11 = vld [vmem:[#allocation5 + $0x1de0] ss:$16 sps:$4 sm:$0xff]  }
 0x36f   : > { %7395 = vmatprep.mubr.bf16.mxu0 %v4092_v37  ;;  %v19333_v37 = vld [vmem:[#allocation5 + $0x35e0] ss:$16 sps:$4 sm:$0xff]  }
 0x370   : > { %4426 = vmatpush1.bf16.msra.mxu1 %v19246_v38  ;;  %v4087_v38 = vrot.slane %v21504_v47, 5 }
 0x371   : > { %7366 = vmatpush1.bf16.msra.mxu0 %v19249_v39  ;;  %4427 = vmatprep.subr.bf16.mxu1 %v19254_v42  ;;  %v20969_v39 = vld [vmem:[#allocation3 + $0x20] sm:$0x1f] }
 0x372   : > { %7367 = vmatprep.subr.bf16.mxu0 %v19257_v59  ;;  %v4088_v42 = vrot.slane %v20969_v39, 5  ;;  %v21507_v59 = vld [vmem:[#allocation3 + $0x18] sm:$0xe0]  ;;  %v19408_v39 = vld [vmem:[#allocation5 + $0x1f80] ss:$16 sps:$4 sm:$0xff]  }
 0x374   : > { %4428 = vmatpush1.bf16.msra.mxu1 %v19252_v43  ;;  %v19338_v43 = vld [vmem:[#allocation5 + $0x1e04] ss:$16 sps:$4 sm:$0xff]  }
 0x375   : > { %7368 = vmatpush1.bf16.msra.mxu0 %v19255_v44  ;;  %4429 = vmatprep.subr.bf16.mxu1 %v19260_v45  ;;  %v19341_v44 = vld [vmem:[#allocation5 + $0x3604] ss:$16 sps:$4 sm:$0xff]   ;;  %v4096_v45 = vrot.slane %v21507_v59, 5 }
 0x376   : > { %7369 = vmatprep.subr.bf16.mxu0 %v19263_v33  ;;  %v20970_v33 = vld [vmem:[#allocation3 + $0x38] sm:$0x1f] }
 0x378   : > { %4430 = vmatpush1.bf16.msra.mxu1 %v19258_v50  ;;  %v4097_v50 = vrot.slane %v20970_v33, 5  ;;  %v19417_v33 = vld [vmem:[#allocation5 + $0x37a0] ss:$16 sps:$4 sm:$0xff]  }
 0x379   : > { %7370 = vmatpush1.bf16.msra.mxu0 %v19261_v51  ;;  %4431 = vmatprep.subr.bf16.mxu1 %v19266_v52  ;;  %v19336_v51 = vld [vmem:[#allocation5 + $0x1e00] ss:$16 sps:$4 sm:$0xff]  }
 0x37a   : > { %7371 = vmatprep.subr.bf16.mxu0 %v19269_v41  ;;  %v19339_v52 = vld [vmem:[#allocation5 + $0x3600] ss:$16 sps:$4 sm:$0xff]   ;;  %v4089_v41 = vsel %vm4086_vm5, %v4087_v38, %v4088_v42  ;;  %v19413_v38 = vld [vmem:[#allocation5 + $0x3784] ss:$16 sps:$4 sm:$0xff]  }
 0x37b   : > { %v19411_v42 = vld [vmem:[#allocation5 + $0x3780] ss:$16 sps:$4 sm:$0xff]  }
 0x37c   : > { %4432 = vmatpush1.bf16.msra.mxu1 %v19264_v40  ;;  %v19344_v40 = vld [vmem:[#allocation5 + $0x1e24] ss:$16 sps:$4 sm:$0xff]  }
 0x37d   : > { %7372 = vmatpush1.bf16.msra.mxu0 %v19267_v54  ;;  %4433 = vmatprep.subr.bf16.mxu1 %v19272_v55  ;;  %v19347_v54 = vld [vmem:[#allocation5 + $0x3624] ss:$16 sps:$4 sm:$0xff]   ;;  %v4098_v55 = vsel %vm4086_vm5, %v4096_v45, %v4097_v50  ;;  %v19414_v45 = vld [vmem:[#allocation5 + $0x1fa0] ss:$16 sps:$4 sm:$0xff]   ;;  %v7454_v50 = vld [vmem:[#allocation3 + $0x28] sm:$0x3f] }
 0x37e   : > { %7373 = vmatprep.subr.bf16.mxu0 %v19275_v56  ;;  %v19342_v56 = vld [vmem:[#allocation5 + $0x1e20] ss:$16 sps:$4 sm:$0xff]  }
 0x380   : > { %4434 = vmatpush1.bf16.msra.mxu1 %v19270_v57  ;;  %v19345_v57 = vld [vmem:[#allocation5 + $0x3620] ss:$16 sps:$4 sm:$0xff]  }
 0x381   : > { %7374 = vmatpush1.bf16.msra.mxu0 %v19273_v49  ;;  %4435 = vmatprep.subr.bf16.mxu1 %v19278_v48  ;;  %v19350_v49 = vld [vmem:[#allocation5 + $0x1e44] ss:$16 sps:$4 sm:$0xff]  }
 0x382   : > { %7375 = vmatprep.subr.bf16.mxu0 %v19281_v58  ;;  %v19353_v48 = vld [vmem:[#allocation5 + $0x3644] ss:$16 sps:$4 sm:$0xff]   ;;  %v19348_v58 = vld [vmem:[#allocation5 + $0x1e40] ss:$16 sps:$4 sm:$0xff]  }
 0x384   : > { %4436 = vmatpush1.bf16.msra.mxu1 %v19276_v60  ;;  %v19351_v60 = vld [vmem:[#allocation5 + $0x3640] ss:$16 sps:$4 sm:$0xff]  }
 0x385   : > { %7376 = vmatpush1.bf16.msra.mxu0 %v19279_v5  ;;  %4437 = vmatprep.subr.bf16.mxu1 %v19284_v62  ;;  %v19356_v5 = vld [vmem:[#allocation5 + $0x1e64] ss:$16 sps:$4 sm:$0xff]  }
 0x386   : > { %7377 = vmatprep.subr.bf16.mxu0 %v19287_v63  ;;  %v19359_v62 = vld [vmem:[#allocation5 + $0x3664] ss:$16 sps:$4 sm:$0xff]   ;;  %v19354_v63 = vld [vmem:[#allocation5 + $0x1e60] ss:$16 sps:$4 sm:$0xff]  }
 0x388   : > { %4438 = vmatpush1.bf16.msra.mxu1 %v19282_v2  ;;  %v19357_v2 = vld [vmem:[#allocation5 + $0x3660] ss:$16 sps:$4 sm:$0xff]  }
 0x389   : > { %7378 = vmatpush1.bf16.msra.mxu0 %v19285_v4  ;;  %4439 = vmatprep.subr.bf16.mxu1 %v19290_v12  ;;  %v19362_v4 = vld [vmem:[#allocation5 + $0x1e84] ss:$16 sps:$4 sm:$0xff]  }
 0x38a   : > { %7379 = vmatprep.subr.bf16.mxu0 %v19293_v22  ;;  %v19365_v12 = vld [vmem:[#allocation5 + $0x3684] ss:$16 sps:$4 sm:$0xff]   ;;  %v19360_v22 = vld [vmem:[#allocation5 + $0x1e80] ss:$16 sps:$4 sm:$0xff]  }
 0x38c   : > { %4440 = vmatpush1.bf16.msra.mxu1 %v19288_v8  ;;  %v19363_v8 = vld [vmem:[#allocation5 + $0x3680] ss:$16 sps:$4 sm:$0xff]  }
 0x38d   : > { %7380 = vmatpush1.bf16.msra.mxu0 %v19291_v35  ;;  %4441 = vmatprep.subr.bf16.mxu1 %v19296_v32  ;;  %v19368_v35 = vld [vmem:[#allocation5 + $0x1ea4] ss:$16 sps:$4 sm:$0xff]  }
 0x38e   : > { %7381 = vmatprep.subr.bf16.mxu0 %v19299_v10  ;;  %v19371_v32 = vld [vmem:[#allocation5 + $0x36a4] ss:$16 sps:$4 sm:$0xff]   ;;  %v19366_v10 = vld [vmem:[#allocation5 + $0x1ea0] ss:$16 sps:$4 sm:$0xff]  }
 0x390   : > { %4442 = vmatpush1.bf16.msra.mxu1 %v19294_v15  ;;  %v19369_v15 = vld [vmem:[#allocation5 + $0x36a0] ss:$16 sps:$4 sm:$0xff]  }
 0x391   : > { %7382 = vmatpush1.bf16.msra.mxu0 %v19297_v16  ;;  %4443 = vmatprep.subr.bf16.mxu1 %v19302_v17  ;;  %v19374_v16 = vld [vmem:[#allocation5 + $0x1ec4] ss:$16 sps:$4 sm:$0xff]  }
 0x392   : > { %7383 = vmatprep.subr.bf16.mxu0 %v19305_v3  ;;  %v19377_v17 = vld [vmem:[#allocation5 + $0x36c4] ss:$16 sps:$4 sm:$0xff]   ;;  %v19372_v3 = vld [vmem:[#allocation5 + $0x1ec0] ss:$16 sps:$4 sm:$0xff]  }
 0x394   : > { %4444 = vmatpush1.bf16.msra.mxu1 %v19300_v18  ;;  %v19375_v18 = vld [vmem:[#allocation5 + $0x36c0] ss:$16 sps:$4 sm:$0xff]  }
 0x395   : > { %7384 = vmatpush1.bf16.msra.mxu0 %v19303_v19  ;;  %4445 = vmatprep.subr.bf16.mxu1 %v19308_v20  ;;  %v19380_v19 = vld [vmem:[#allocation5 + $0x1ee4] ss:$16 sps:$4 sm:$0xff]  }
 0x396   : > { %7385 = vmatprep.subr.bf16.mxu0 %v19311_v29  ;;  %v19383_v20 = vld [vmem:[#allocation5 + $0x36e4] ss:$16 sps:$4 sm:$0xff]   ;;  %v19378_v29 = vld [vmem:[#allocation5 + $0x1ee0] ss:$16 sps:$4 sm:$0xff]  }
 0x398   : > { %4446 = vmatpush1.bf16.msra.mxu1 %v19306_v13  ;;  %v19381_v13 = vld [vmem:[#allocation5 + $0x36e0] ss:$16 sps:$4 sm:$0xff]  }
 0x399   : > { %7386 = vmatpush1.bf16.msra.mxu0 %v19309_v46  ;;  %4447 = vmatprep.subr.bf16.mxu1 %v19314_v36  ;;  %v19386_v46 = vld [vmem:[#allocation5 + $0x1f04] ss:$16 sps:$4 sm:$0xff]  }
 0x39a   : > { %7387 = vmatprep.subr.bf16.mxu0 %v19317_v21  ;;  %v19389_v36 = vld [vmem:[#allocation5 + $0x3704] ss:$16 sps:$4 sm:$0xff]   ;;  %v19384_v21 = vld [vmem:[#allocation5 + $0x1f00] ss:$16 sps:$4 sm:$0xff]  }
 0x39c   : > { %4448 = vmatpush1.bf16.msra.mxu1 %v19312_v61  ;;  %v19387_v61 = vld [vmem:[#allocation5 + $0x3700] ss:$16 sps:$4 sm:$0xff]  }
 0x39d   : > { %7388 = vmatpush1.bf16.msra.mxu0 %v19315_v6  ;;  %4449 = vmatprep.subr.bf16.mxu1 %v19320_v24  ;;  %v19392_v6 = vld [vmem:[#allocation5 + $0x1f24] ss:$16 sps:$4 sm:$0xff]  }
 0x39e   : > { %7389 = vmatprep.subr.bf16.mxu0 %v19323_v53  ;;  %v19395_v24 = vld [vmem:[#allocation5 + $0x3724] ss:$16 sps:$4 sm:$0xff]   ;;  %v19390_v53 = vld [vmem:[#allocation5 + $0x1f20] ss:$16 sps:$4 sm:$0xff]  }
 0x3a0   : > { %4450 = vmatpush1.bf16.msra.mxu1 %v19318_v25  ;;  %v19393_v25 = vld [vmem:[#allocation5 + $0x3720] ss:$16 sps:$4 sm:$0xff]  }
 0x3a1   : > { %7390 = vmatpush1.bf16.msra.mxu0 %v19321_v0  ;;  %4451 = vmatprep.subr.bf16.mxu1 %v19326_v27  ;;  %v19398_v0 = vld [vmem:[#allocation5 + $0x1f44] ss:$16 sps:$4 sm:$0xff]  }
 0x3a2   : > { %7391 = vmatprep.subr.bf16.mxu0 %v19329_v28  ;;  %v19401_v27 = vld [vmem:[#allocation5 + $0x3744] ss:$16 sps:$4 sm:$0xff]   ;;  %v19396_v28 = vld [vmem:[#allocation5 + $0x1f40] ss:$16 sps:$4 sm:$0xff]  }
 0x3a4   : > { %4452 = vmatpush1.bf16.msra.mxu1 %v19324_v30  ;;  %v19399_v30 = vld [vmem:[#allocation5 + $0x3740] ss:$16 sps:$4 sm:$0xff]  }
 0x3a5   : > { %7392 = vmatpush1.bf16.msra.mxu0 %v19327_v31  ;;  %4453 = vmatprep.subr.bf16.mxu1 %v19332_v9  ;;  %v19404_v31 = vld [vmem:[#allocation5 + $0x1f64] ss:$16 sps:$4 sm:$0xff]  }
 0x3a6   : > { %7393 = vmatprep.subr.bf16.mxu0 %v19335_v34  ;;  %v19407_v9 = vld [vmem:[#allocation5 + $0x3764] ss:$16 sps:$4 sm:$0xff]   ;;  %v19402_v34 = vld [vmem:[#allocation5 + $0x1f60] ss:$16 sps:$4 sm:$0xff]  }
 0x3a8   : > { %4454 = vmatpush1.bf16.msra.mxu1 %v19330_v11  ;;  %v19405_v11 = vld [vmem:[#allocation5 + $0x3760] ss:$16 sps:$4 sm:$0xff]  }
 0x3a9   : > { %7394 = vmatpush1.bf16.msra.mxu0 %v19333_v37  ;;  %4466 = vmatprep.subr.bf16.mxu1 %v19338_v43  ;;  %v19410_v37 = vld [vmem:[#allocation5 + $0x1f84] ss:$16 sps:$4 sm:$0xff]  }
 0x3aa   : > { %7406 = vmatprep.subr.bf16.mxu0 %v19341_v44  ;;  %v19416_v43 = vld [vmem:[#allocation5 + $0x1fa4] ss:$16 sps:$4 sm:$0xff]  }
 0x3ab   : > { %4456 = vmatmul.mubr.bf16.vlgmr.msra.gmra.mrb[4].mxu1 %v4089_v41  ;;  %v19419_v44 = vld [vmem:[#allocation5 + $0x37a4] ss:$16 sps:$4 sm:$0xff]  }
 0x3ac   : > { %7396 = vmatmul.mubr.bf16.vlgmr.msra.gmra.mrb[4].mxu0 %v4089_v41  ;;  %4467 = vmatpush1.bf16.msra.mxu1 %v19336_v51  ;;  %v19422_v51 = vld [vmem:[#allocation5 + $0x1fc4] ss:$16 sps:$4 sm:$0xff]   ;;  %v19420_v41 = vld [vmem:[#allocation5 + $0x1fc0] ss:$16 sps:$4 sm:$0xff]  }
 0x3ad   : > { %7407 = vmatpush1.bf16.msra.mxu0 %v19339_v52  ;;  %4468 = vmatprep.subr.bf16.mxu1 %v19344_v40  ;;  %v19425_v52 = vld [vmem:[#allocation5 + $0x37c4] ss:$16 sps:$4 sm:$0xff]   ;;  %v7541_v40 = vshrl.u32 %v21498_v26, 16 }
 0x3ae   : > { %7408 = vmatprep.subr.bf16.mxu0 %v19347_v54  ;;  %4498 = vmatprep.mubr.bf16.mxu1 %v4098_v55  ;;  %v7544_v54 = vshll.u32 %v21498_v26, 16  ;;  %v20971_v26 = vld [vmem:[#allocation3 + $0x30] sm:$0x1f] }
 0x3af   : > { %7438 = vmatprep.mubr.bf16.mxu0 %v4098_v55  ;;  %v7549_v55 = vshrl.u32 %v7454_v50, 16 }
 0x3b0   : > { %4469 = vmatpush1.bf16.msra.mxu1 %v19342_v56  ;;  %v7552_v56 = vshll.u32 %v7454_v50, 16  ;;  %v19476_v50 = vld [vmem:[#allocation5 + $0x38e4] ss:$16 sps:$4 sm:$0xff]  }
 0x3b1   : > { %7409 = vmatpush1.bf16.msra.mxu0 %v19345_v57  ;;  %4470 = vmatprep.subr.bf16.mxu1 %v19350_v49  ;;  %v19423_v57 = vld [vmem:[#allocation5 + $0x37c0] ss:$16 sps:$4 sm:$0xff]   ;;  %v19428_v49 = vld [vmem:[#allocation5 + $0x1fe4] ss:$16 sps:$4 sm:$0xff]  }
 0x3b2   : > { %7410 = vmatprep.subr.bf16.mxu0 %v19353_v48  ;;  %v19431_v48 = vld [vmem:[#allocation5 + $0x37e4] ss:$16 sps:$4 sm:$0xff]  }
 0x3b4   : > { %4471 = vmatpush1.bf16.msra.mxu1 %v19348_v58  ;;  %v4011_v58 = vld [vmem:[#allocation3 + $0x10] sm:$0xe0] }
 0x3b5   : > { %7411 = vmatpush1.bf16.msra.mxu0 %v19351_v60  ;;  %4472 = vmatprep.subr.bf16.mxu1 %v19356_v5  ;;  %v19426_v60 = vld [vmem:[#allocation5 + $0x1fe0] ss:$16 sps:$4 sm:$0xff]  }
 0x3b6   : > { %7412 = vmatprep.subr.bf16.mxu0 %v19359_v62  ;;  %v19429_v5 = vld [vmem:[#allocation5 + $0x37e0] ss:$16 sps:$4 sm:$0xff]   ;;  %v7543_v62 = vrot.slane %v7541_v40, 5  ;;  %v19482_v40 = vld [vmem:[#allocation5 + $0x3904] ss:$16 sps:$4 sm:$0xff]  }
 0x3b8   : > { %4473 = vmatpush1.bf16.msra.mxu1 %v19354_v63  ;;  %v7546_v63 = vrot.slane %v7544_v54, 6  ;;  %v19485_v54 = vld [vmem:[#allocation5 + $0x50c] ss:$16 sps:$4 sm:$0xff]  }
 0x3b9   : > { %7413 = vmatpush1.bf16.msra.mxu0 %v19357_v2  ;;  %4474 = vmatprep.subr.bf16.mxu1 %v19362_v4  ;;  %v7551_v2 = vrot.slane %v7549_v55, 5  ;;  %v7554_v4 = vrot.slane %v7552_v56, 6  ;;  %v19480_v55 = vld [vmem:[#allocation5 + $0x3900] ss:$16 sps:$4 sm:$0xff]   ;;  %v19483_v56 = vld [vmem:[#allocation5 + $0x508] ss:$16 sps:$4 sm:$0xff]  }
 0x3ba   : > { %7414 = vmatprep.subr.bf16.mxu0 %v19365_v12  ;;  %v4093_v12 = vrot.slane %v4011_v58, 5  ;;  %v19489_v58 = vld [vmem:[#allocation5 + $0x528] ss:$16 sps:$4 sm:$0xff]  }
 0x3bc   : > { %4475 = vmatpush1.bf16.msra.mxu1 %v19360_v22  ;;  %v4094_v22 = vrot.slane %v20971_v26, 5  ;;  %v19501_v26 = vld [vmem:[#allocation5 + $0x568] ss:$16 sps:$4 sm:$0xff]  }
 0x3bd   : > { %7415 = vmatpush1.bf16.msra.mxu0 %v19363_v8  ;;  %4476 = vmatprep.subr.bf16.mxu1 %v19368_v35  ;;  %v8067_v8 = vld [vmem:[#allocation3 + $0x28] sm:$0xf]  ;;  %v8135_v35 = vld [vmem:[#allocation3 + $0x8] sm:$0xf0] }
 0x3be   : > { %7416 = vmatprep.subr.bf16.mxu0 %v19371_v32  ;;  %v19434_v32 = vld [vmem:[#allocation5 + $0x3804] ss:$16 sps:$4 sm:$0xff]  }
 0x3c0   : > { %4477 = vmatpush1.bf16.msra.mxu1 %v19366_v10  ;;  %v19437_v10 = vld [vmem:[#allocation5 + $0x40c] ss:$16 sps:$4 sm:$0xff]  }
 0x3c1   : > { %7417 = vmatpush1.bf16.msra.mxu0 %v19369_v15  ;;  %4478 = vmatprep.subr.bf16.mxu1 %v19374_v16  ;;  %v7547_v15 = vor.u32 %v7546_v63, %v7543_v62  ;;  %v7555_v16 = vor.u32 %v7554_v4, %v7551_v2  ;;  %v19492_v62 = vld [vmem:[#allocation5 + $0x3940] ss:$16 sps:$4 sm:$0xff]   ;;  %v19495_v63 = vld [vmem:[#allocation5 + $0x548] ss:$16 sps:$4 sm:$0xff]   ;;  %v19500_v2 = vld [vmem:[#allocation5 + $0x3964] ss:$16 sps:$4 sm:$0xff]  }
 0x3c2   : > { %7418 = vmatprep.subr.bf16.mxu0 %v19377_v17  ;;  %v8213_v17 = vrot.slane %v8135_v35, 4  ;;  %v19503_v4 = vld [vmem:[#allocation5 + $0x56c] ss:$16 sps:$4 sm:$0xff]   ;;  %v19504_v35 = vld [vmem:[#allocation5 + $0x3980] ss:$16 sps:$4 sm:$0xff]  }
 0x3c4   : > { %4479 = vmatpush1.bf16.msra.mxu1 %v19372_v3  ;;  %v8214_v3 = vrot.slane %v8067_v8, 4  ;;  %v19509_v8 = vld [vmem:[#allocation5 + $0x58c] ss:$16 sps:$4 sm:$0xff]  }
 0x3c5   : > { %7419 = vmatpush1.bf16.msra.mxu0 %v19375_v18  ;;  %4480 = vmatprep.subr.bf16.mxu1 %v19380_v19  ;;  %v4095_v18 = vsel %vm4086_vm5, %v4093_v12, %v4094_v22  ;;  %v19432_v19 = vld [vmem:[#allocation5 + $0x3800] ss:$16 sps:$4 sm:$0xff]   ;;  %v19506_v22 = vld [vmem:[#allocation5 + $0x3984] ss:$16 sps:$4 sm:$0xff]  }
 0x3c6   : > { %7420 = vmatprep.subr.bf16.mxu0 %v19383_v20  ;;  %v19435_v20 = vld [vmem:[#allocation5 + $0x408] ss:$16 sps:$4 sm:$0xff]   ;;  %v19498_v12 = vld [vmem:[#allocation5 + $0x3960] ss:$16 sps:$4 sm:$0xff]  }
 0x3c8   : > { %4481 = vmatpush1.bf16.msra.mxu1 %v19378_v29  ;;  %v19440_v29 = vld [vmem:[#allocation5 + $0x3824] ss:$16 sps:$4 sm:$0xff]  }
 0x3c9   : > { %7421 = vmatpush1.bf16.msra.mxu0 %v19381_v13  ;;  %4482 = vmatprep.subr.bf16.mxu1 %v19386_v46  ;;  %v19443_v13 = vld [vmem:[#allocation5 + $0x42c] ss:$16 sps:$4 sm:$0xff]   ;;  %v7556_v46 = vsel %vm7522_vm6, %v7547_v15, %v7555_v16  ;;  %v7453_v16 = vld [vmem:[#allocation3 + $0x20] sm:$0x3f] }
 0x3ca   : > { %7422 = vmatprep.subr.bf16.mxu0 %v19389_v36  ;;  %v21517_v36 = vsel %vm614_vm0, %v8213_v17, %v8214_v3  ;;  %v19515_v15 = vld [vmem:[#allocation5 + $0x5ac] ss:$16 sps:$4 sm:$0xff]   ;;  %v19510_v17 = vld [vmem:[#allocation5 + $0x39a0] ss:$16 sps:$4 sm:$0xff]   ;;  %v19513_v3 = vld [vmem:[#allocation5 + $0x5a8] ss:$16 sps:$4 sm:$0xff]  }
 0x3cc   : > { %4483 = vmatpush1.bf16.msra.mxu1 %v19384_v21  ;;  %v19438_v21 = vld [vmem:[#allocation5 + $0x3820] ss:$16 sps:$4 sm:$0xff]  }
 0x3cd   : > { %7423 = vmatpush1.bf16.msra.mxu0 %v19387_v61  ;;  %4484 = vmatprep.subr.bf16.mxu1 %v19392_v6  ;;  %v19441_v61 = vld [vmem:[#allocation5 + $0x428] ss:$16 sps:$4 sm:$0xff]   ;;  %v19446_v6 = vld [vmem:[#allocation5 + $0x3844] ss:$16 sps:$4 sm:$0xff]  }
 0x3ce   : > { %7424 = vmatprep.subr.bf16.mxu0 %v19395_v24  ;;  %v19449_v24 = vld [vmem:[#allocation5 + $0x44c] ss:$16 sps:$4 sm:$0xff]  }
 0x3d0   : > { %4485 = vmatpush1.bf16.msra.mxu1 %v19390_v53  ;;  %v19444_v53 = vld [vmem:[#allocation5 + $0x3840] ss:$16 sps:$4 sm:$0xff]  }
 0x3d1   : > { %7425 = vmatpush1.bf16.msra.mxu0 %v19393_v25  ;;  %4486 = vmatprep.subr.bf16.mxu1 %v19398_v0  ;;  %v19447_v25 = vld [vmem:[#allocation5 + $0x448] ss:$16 sps:$4 sm:$0xff]   ;;  %v19452_v0 = vld [vmem:[#allocation5 + $0x3864] ss:$16 sps:$4 sm:$0xff]  }
 0x3d2   : > { %7426 = vmatprep.subr.bf16.mxu0 %v19401_v27  ;;  %v19455_v27 = vld [vmem:[#allocation5 + $0x46c] ss:$16 sps:$4 sm:$0xff]  }
 0x3d4   : > { %4487 = vmatpush1.bf16.msra.mxu1 %v19396_v28  ;;  %v19450_v28 = vld [vmem:[#allocation5 + $0x3860] ss:$16 sps:$4 sm:$0xff]  }
 0x3d5   : > { %7427 = vmatpush1.bf16.msra.mxu0 %v19399_v30  ;;  %4488 = vmatprep.subr.bf16.mxu1 %v19404_v31  ;;  %v19453_v30 = vld [vmem:[#allocation5 + $0x468] ss:$16 sps:$4 sm:$0xff]   ;;  %v19458_v31 = vld [vmem:[#allocation5 + $0x3884] ss:$16 sps:$4 sm:$0xff]  }
 0x3d6   : > { %7428 = vmatprep.subr.bf16.mxu0 %v19407_v9  ;;  %v19461_v9 = vld [vmem:[#allocation5 + $0x48c] ss:$16 sps:$4 sm:$0xff]  }
 0x3d8   : > { %4489 = vmatpush1.bf16.msra.mxu1 %v19402_v34  ;;  %v19456_v34 = vld [vmem:[#allocation5 + $0x3880] ss:$16 sps:$4 sm:$0xff]  }
 0x3d9   : > { %7429 = vmatpush1.bf16.msra.mxu0 %v19405_v11  ;;  %4490 = vmatprep.subr.bf16.mxu1 %v19410_v37  ;;  %v19459_v11 = vld [vmem:[#allocation5 + $0x488] ss:$16 sps:$4 sm:$0xff]   ;;  %v19464_v37 = vld [vmem:[#allocation5 + $0x38a4] ss:$16 sps:$4 sm:$0xff]  }
 0x3da   : > { %7430 = vmatprep.subr.bf16.mxu0 %v19413_v38  ;;  %v19467_v38 = vld [vmem:[#allocation5 + $0x4ac] ss:$16 sps:$4 sm:$0xff]  }
 0x3dc   : > { %4491 = vmatpush1.bf16.msra.mxu1 %v19408_v39  ;;  %v19462_v39 = vld [vmem:[#allocation5 + $0x38a0] ss:$16 sps:$4 sm:$0xff]  }
 0x3dd   : > { %7431 = vmatpush1.bf16.msra.mxu0 %v19411_v42  ;;  %4492 = vmatprep.subr.bf16.mxu1 %v19416_v43  ;;  %v19465_v42 = vld [vmem:[#allocation5 + $0x4a8] ss:$16 sps:$4 sm:$0xff]   ;;  %v19470_v43 = vld [vmem:[#allocation5 + $0x38c4] ss:$16 sps:$4 sm:$0xff]  }
 0x3de   : > { %7432 = vmatprep.subr.bf16.mxu0 %v19419_v44  ;;  %v19473_v44 = vld [vmem:[#allocation5 + $0x4cc] ss:$16 sps:$4 sm:$0xff]  }
 0x3e0   : > { %4493 = vmatpush1.bf16.msra.mxu1 %v19414_v45  ;;  %v19468_v45 = vld [vmem:[#allocation5 + $0x38c0] ss:$16 sps:$4 sm:$0xff]  }
 0x3e1   : > { %7433 = vmatpush1.bf16.msra.mxu0 %v19417_v33  ;;  %4494 = vmatprep.subr.bf16.mxu1 %v19422_v51  ;;  %v19471_v33 = vld [vmem:[#allocation5 + $0x4c8] ss:$16 sps:$4 sm:$0xff]   ;;  %v19479_v51 = vld [vmem:[#allocation5 + $0x4ec] ss:$16 sps:$4 sm:$0xff]  }
 0x3e2   : > { %7434 = vmatprep.subr.bf16.mxu0 %v19425_v52  ;;  %v19474_v52 = vld [vmem:[#allocation5 + $0x38e0] ss:$16 sps:$4 sm:$0xff]  }
 0x3e4   : > { %4495 = vmatpush1.bf16.msra.mxu1 %v19420_v41  ;;  %v19477_v41 = vld [vmem:[#allocation5 + $0x4e8] ss:$16 sps:$4 sm:$0xff]  }
 0x3e5   : > { %7435 = vmatpush1.bf16.msra.mxu0 %v19423_v57  ;;  %4496 = vmatprep.subr.bf16.mxu1 %v19428_v49  ;;  %v19488_v57 = vld [vmem:[#allocation5 + $0x3924] ss:$16 sps:$4 sm:$0xff]   ;;  %v19491_v49 = vld [vmem:[#allocation5 + $0x52c] ss:$16 sps:$4 sm:$0xff]  }
 0x3e6   : > { %7436 = vmatprep.subr.bf16.mxu0 %v19431_v48  ;;  %v19486_v48 = vld [vmem:[#allocation5 + $0x3920] ss:$16 sps:$4 sm:$0xff]  }
 0x3e8   : > { %4497 = vmatpush1.bf16.msra.mxu1 %v19426_v60  ;;  %v19494_v60 = vld [vmem:[#allocation5 + $0x3944] ss:$16 sps:$4 sm:$0xff]  }
 0x3e9   : > { %7437 = vmatpush1.bf16.msra.mxu0 %v19429_v5  ;;  %8546 = vmatprep.subr.bf16.mxu1 %v19437_v10  ;;  %v19497_v5 = vld [vmem:[#allocation5 + $0x54c] ss:$16 sps:$4 sm:$0xff]   ;;  %v19512_v10 = vld [vmem:[#allocation5 + $0x39a4] ss:$16 sps:$4 sm:$0xff]  }
 0x3ea   : > { %7915 = vmatprep.subr.bf16.mxu0 %v19434_v32  ;;  %v19507_v32 = vld [vmem:[#allocation5 + $0x588] ss:$16 sps:$4 sm:$0xff]  }
 0x3eb   : > { %4499 = vmatmul.mubr.bf16.vlgmr.msra.gmra.mrb[4].mxu1 %v4095_v18 }
 0x3ec   : > { %7439 = vmatmul.mubr.bf16.vlgmr.msra.gmra.mrb[4].mxu0 %v4095_v18  ;;  %8547 = vmatpush1.bf16.msra.mxu1 %v19435_v20  ;;  %v7524_v18 = vshrl.u32 %v21504_v47, 16  ;;  %v7532_v20 = vshrl.u32 %v7453_v16, 16 }
 0x3ed   : > { %7916 = vmatpush1.bf16.msra.mxu0 %v19432_v19  ;;  %8548 = vmatprep.subr.bf16.mxu1 %v19443_v13  ;;  %v7527_v19 = vshll.u32 %v21504_v47, 16  ;;  %v7456_v13 = vld [vmem:[#allocation3 + $0x38] sm:$0x3f] }
 0x3ee   : > { %7917 = vmatprep.subr.bf16.mxu0 %v19440_v29  ;;  %7947 = vmatprep.mubr.bf16.mxu0 %v7556_v46  ;;  %v7535_v29 = vshll.u32 %v7453_v16, 16  ;;  %v19518_v46 = vld [vmem:[#allocation5 + $0x39c4] ss:$16 sps:$4 sm:$0xff]   ;;  %v7526_v47 = vrot.slane %v7524_v18, 5  ;;  %v19549_v16 = vld [vmem:[#allocation5 + $0x668] ss:$16 sps:$4 sm:$0xff]  }
 0x3ef   : > { %8578 = vmatprep.mubr.bf16.mxu1 %v21517_v36  ;;  %v19552_v18 = vld [vmem:[#allocation5 + $0x3a80] ss:$16 sps:$4 sm:$0xff]  }
 0x3f0   : > { %8549 = vmatpush1.bf16.msra.mxu1 %v19441_v61  ;;  %v19516_v61 = vld [vmem:[#allocation5 + $0x39c0] ss:$16 sps:$4 sm:$0xff]  }
 0x3f1   : > { %7918 = vmatpush1.bf16.msra.mxu0 %v19438_v21  ;;  %8550 = vmatprep.subr.bf16.mxu1 %v19449_v24  ;;  %v19521_v21 = vld [vmem:[#allocation5 + $0x5cc] ss:$16 sps:$4 sm:$0xff]   ;;  %v7575_v24 = vshrl.u32 %v21507_v59, 16 }
 0x3f2   : > { %7919 = vmatprep.subr.bf16.mxu0 %v19446_v6  ;;  %v19519_v6 = vld [vmem:[#allocation5 + $0x5c8] ss:$16 sps:$4 sm:$0xff]  }
 0x3f4   : > { %8551 = vmatpush1.bf16.msra.mxu1 %v19447_v25  ;;  %v19527_v25 = vld [vmem:[#allocation5 + $0x5ec] ss:$16 sps:$4 sm:$0xff]  }
 0x3f5   : > { %7920 = vmatpush1.bf16.msra.mxu0 %v19444_v53  ;;  %8552 = vmatprep.subr.bf16.mxu1 %v19455_v27  ;;  %v19524_v53 = vld [vmem:[#allocation5 + $0x39e4] ss:$16 sps:$4 sm:$0xff]   ;;  %v7583_v27 = vshrl.u32 %v7456_v13, 16 }
 0x3f6   : > { %7921 = vmatprep.subr.bf16.mxu0 %v19452_v0  ;;  %v7578_v0 = vshll.u32 %v21507_v59, 16 }
 0x3f8   : > { %8553 = vmatpush1.bf16.msra.mxu1 %v19453_v30  ;;  %v7529_v30 = vrot.slane %v7527_v19, 6  ;;  %v19555_v19 = vld [vmem:[#allocation5 + $0x688] ss:$16 sps:$4 sm:$0xff]  }
 0x3f9   : > { %7922 = vmatpush1.bf16.msra.mxu0 %v19450_v28  ;;  %8554 = vmatprep.subr.bf16.mxu1 %v19461_v9  ;;  %v7586_v28 = vshll.u32 %v7456_v13, 16  ;;  %v7537_v9 = vrot.slane %v7535_v29, 6  ;;  %v19563_v29 = vld [vmem:[#allocation5 + $0x6ac] ss:$16 sps:$4 sm:$0xff]   ;;  %v19558_v13 = vld [vmem:[#allocation5 + $0x3aa0] ss:$16 sps:$4 sm:$0xff]  }
 0x3fa   : > { %7923 = vmatprep.subr.bf16.mxu0 %v19458_v31  ;;  %v7534_v31 = vrot.slane %v7532_v20, 5  ;;  %v7530_v59 = vor.u32 %v7529_v30, %v7526_v47  ;;  %v19560_v20 = vld [vmem:[#allocation5 + $0x3aa4] ss:$16 sps:$4 sm:$0xff]   ;;  %v19581_v47 = vld [vmem:[#allocation5 + $0x70c] ss:$16 sps:$4 sm:$0xff]  }
 0x3fb   : > { %v19576_v30 = vld [vmem:[#allocation5 + $0x3b00] ss:$16 sps:$4 sm:$0xff]  }
 0x3fc   : > { %8555 = vmatpush1.bf16.msra.mxu1 %v19459_v11  ;;  %v8134_v11 = vld [vmem:[#allocation3] sm:$0xf0] }
 0x3fd   : > { %7924 = vmatpush1.bf16.msra.mxu0 %v19456_v34  ;;  %8556 = vmatprep.subr.bf16.mxu1 %v19467_v38  ;;  %v8066_v34 = vld [vmem:[#allocation3 + $0x20] sm:$0xf]  ;;  %v19525_v38 = vld [vmem:[#allocation5 + $0x5e8] ss:$16 sps:$4 sm:$0xff]  }
 0x3fe   : > { %7925 = vmatprep.subr.bf16.mxu0 %v19464_v37  ;;  %v19522_v37 = vld [vmem:[#allocation5 + $0x39e0] ss:$16 sps:$4 sm:$0xff]  }
 0x400   : > { %8557 = vmatpush1.bf16.msra.mxu1 %v19465_v42  ;;  %v7580_v42 = vrot.slane %v7578_v0, 6  ;;  %v19570_v0 = vld [vmem:[#allocation5 + $0x3ae0] ss:$16 sps:$4 sm:$0xff]  }
 0x401   : > { %7926 = vmatpush1.bf16.msra.mxu0 %v19462_v39  ;;  %8558 = vmatprep.subr.bf16.mxu1 %v19473_v44  ;;  %v7577_v39 = vrot.slane %v7575_v24, 5  ;;  %v7588_v44 = vrot.slane %v7586_v28, 6  ;;  %v19567_v24 = vld [vmem:[#allocation5 + $0x6c8] ss:$16 sps:$4 sm:$0xff]   ;;  %v19578_v28 = vld [vmem:[#allocation5 + $0x3b04] ss:$16 sps:$4 sm:$0xff]  }
 0x402   : > { %7927 = vmatprep.subr.bf16.mxu0 %v19470_v43  ;;  %v7585_v43 = vrot.slane %v7583_v27, 5  ;;  %v19573_v27 = vld [vmem:[#allocation5 + $0x6e8] ss:$16 sps:$4 sm:$0xff]  }
 0x404   : > { %8559 = vmatpush1.bf16.msra.mxu1 %v19471_v33  ;;  %v8210_v33 = vrot.slane %v8134_v11, 4  ;;  %v19582_v11 = vld [vmem:[#allocation5 + $0x3b20] ss:$16 sps:$4 sm:$0xff]  }
 0x405   : > { %7928 = vmatpush1.bf16.msra.mxu0 %v19468_v45  ;;  %8560 = vmatprep.subr.bf16.mxu1 %v19479_v51  ;;  %v7538_v45 = vor.u32 %v7537_v9, %v7534_v31  ;;  %v8069_v51 = vld [vmem:[#allocation3 + $0x38] sm:$0xf]  ;;  %v19584_v9 = vld [vmem:[#allocation5 + $0x3b24] ss:$16 sps:$4 sm:$0xff]  }
 0x406   : > { %7929 = vmatprep.subr.bf16.mxu0 %v19476_v50  ;;  %v8211_v50 = vrot.slane %v8066_v34, 4  ;;  %v19579_v31 = vld [vmem:[#allocation5 + $0x708] ss:$16 sps:$4 sm:$0xff]   ;;  %v19587_v34 = vld [vmem:[#allocation5 + $0x72c] ss:$16 sps:$4 sm:$0xff]  }
 0x408   : > { %8561 = vmatpush1.bf16.msra.mxu1 %v19477_v41  ;;  %v19530_v41 = vld [vmem:[#allocation5 + $0x3a04] ss:$16 sps:$4 sm:$0xff]  }
 0x409   : > { %7930 = vmatpush1.bf16.msra.mxu0 %v19474_v52  ;;  %8562 = vmatprep.subr.bf16.mxu1 %v19485_v54  ;;  %v8137_v52 = vld [vmem:[#allocation3 + $0x18] sm:$0xf0]  ;;  %v7581_v54 = vor.u32 %v7580_v42, %v7577_v39  ;;  %v19588_v42 = vld [vmem:[#allocation5 + $0x3b40] ss:$16 sps:$4 sm:$0xff]  }
 0x40a   : > { %7931 = vmatprep.subr.bf16.mxu0 %v19482_v40  ;;  %v19533_v40 = vld [vmem:[#allocation5 + $0x60c] ss:$16 sps:$4 sm:$0xff]  }
 0x40b   : > { %v19593_v39 = vld [vmem:[#allocation5 + $0x74c] ss:$16 sps:$4 sm:$0xff]  }
 0x40c   : > { %8563 = vmatpush1.bf16.msra.mxu1 %v19483_v56  ;;  %v8219_v56 = vrot.slane %v8137_v52, 4  ;;  %v19600_v52 = vld [vmem:[#allocation5 + $0x3b80] ss:$16 sps:$4 sm:$0xff]  }
 0x40d   : > { %7932 = vmatpush1.bf16.msra.mxu0 %v19480_v55  ;;  %8564 = vmatprep.subr.bf16.mxu1 %v19491_v49  ;;  %v7589_v55 = vor.u32 %v7588_v44, %v7585_v43  ;;  %v19528_v49 = vld [vmem:[#allocation5 + $0x3a00] ss:$16 sps:$4 sm:$0xff]   ;;  %v19591_v43 = vld [vmem:[#allocation5 + $0x748] ss:$16 sps:$4 sm:$0xff]   ;;  %v19596_v44 = vld [vmem:[#allocation5 + $0x3b64] ss:$16 sps:$4 sm:$0xff]  }
 0x40e   : > { %7933 = vmatprep.subr.bf16.mxu0 %v19488_v57  ;;  %v8220_v57 = vrot.slane %v8069_v51, 4  ;;  %v19605_v51 = vld [vmem:[#allocation5 + $0x78c] ss:$16 sps:$4 sm:$0xff]  }
 0x410   : > { %8565 = vmatpush1.bf16.msra.mxu1 %v19489_v58  ;;  %v7539_v58 = vsel %vm7522_vm6, %v7530_v59, %v7538_v45  ;;  %v19599_v59 = vld [vmem:[#allocation5 + $0x76c] ss:$16 sps:$4 sm:$0xff]   ;;  %v19594_v45 = vld [vmem:[#allocation5 + $0x3b60] ss:$16 sps:$4 sm:$0xff]  }
 0x411   : > { %7934 = vmatpush1.bf16.msra.mxu0 %v19486_v48  ;;  %8566 = vmatprep.subr.bf16.mxu1 %v19497_v5  ;;  %v19531_v48 = vld [vmem:[#allocation5 + $0x608] ss:$16 sps:$4 sm:$0xff]   ;;  %v19536_v5 = vld [vmem:[#allocation5 + $0x3a24] ss:$16 sps:$4 sm:$0xff]  }
 0x412   : > { %7935 = vmatprep.subr.bf16.mxu0 %v19494_v60  ;;  %v21526_v60 = vsel %vm614_vm0, %v8210_v33, %v8211_v50  ;;  %v19597_v33 = vld [vmem:[#allocation5 + $0x768] ss:$16 sps:$4 sm:$0xff]   ;;  %v19602_v50 = vld [vmem:[#allocation5 + $0x3b84] ss:$16 sps:$4 sm:$0xff]  }
 0x414   : > { %8567 = vmatpush1.bf16.msra.mxu1 %v19495_v63  ;;  %v7590_v63 = vsel %vm7522_vm6, %v7581_v54, %v7589_v55  ;;  %v19611_v54 = vld [vmem:[#allocation5 + $0x7ac] ss:$16 sps:$4 sm:$0xff]   ;;  %v7455_v55 = vld [vmem:[#allocation3 + $0x30] sm:$0x3f] }
 0x415   : > { %7936 = vmatpush1.bf16.msra.mxu0 %v19492_v62  ;;  %8568 = vmatprep.subr.bf16.mxu1 %v19503_v4  ;;  %v19539_v62 = vld [vmem:[#allocation5 + $0x62c] ss:$16 sps:$4 sm:$0xff]   ;;  %v19534_v4 = vld [vmem:[#allocation5 + $0x3a20] ss:$16 sps:$4 sm:$0xff]  }
 0x416   : > { %7937 = vmatprep.subr.bf16.mxu0 %v19500_v2  ;;  %v21531_v2 = vsel %vm614_vm0, %v8219_v56, %v8220_v57  ;;  %v21534_v56 = vld [vmem:[#allocation3 + $0x8] sm:$0xf8]  ;;  %v19606_v57 = vld [vmem:[#allocation5 + $0x3ba0] ss:$16 sps:$4 sm:$0xff]  }
 0x418   : > { %8569 = vmatpush1.bf16.msra.mxu1 %v19501_v26  ;;  %v19542_v26 = vld [vmem:[#allocation5 + $0x3a44] ss:$16 sps:$4 sm:$0xff]  }
 0x419   : > { %7938 = vmatpush1.bf16.msra.mxu0 %v19498_v12  ;;  %8570 = vmatprep.subr.bf16.mxu1 %v19509_v8  ;;  %v19537_v12 = vld [vmem:[#allocation5 + $0x628] ss:$16 sps:$4 sm:$0xff]   ;;  %v19540_v8 = vld [vmem:[#allocation5 + $0x3a40] ss:$16 sps:$4 sm:$0xff]  }
 0x41a   : > { %7939 = vmatprep.subr.bf16.mxu0 %v19506_v22  ;;  %v19545_v22 = vld [vmem:[#allocation5 + $0x64c] ss:$16 sps:$4 sm:$0xff]  }
 0x41c   : > { %8571 = vmatpush1.bf16.msra.mxu1 %v19507_v32  ;;  %v19548_v32 = vld [vmem:[#allocation5 + $0x3a64] ss:$16 sps:$4 sm:$0xff]  }
 0x41d   : > { %7940 = vmatpush1.bf16.msra.mxu0 %v19504_v35  ;;  %8572 = vmatprep.subr.bf16.mxu1 %v19515_v15  ;;  %v19543_v35 = vld [vmem:[#allocation5 + $0x648] ss:$16 sps:$4 sm:$0xff]   ;;  %v19546_v15 = vld [vmem:[#allocation5 + $0x3a60] ss:$16 sps:$4 sm:$0xff]  }
 0x41e   : > { %7941 = vmatprep.subr.bf16.mxu0 %v19512_v10  ;;  %v19551_v10 = vld [vmem:[#allocation5 + $0x66c] ss:$16 sps:$4 sm:$0xff]  }
 0x420   : > { %8573 = vmatpush1.bf16.msra.mxu1 %v19513_v3  ;;  %v19557_v3 = vld [vmem:[#allocation5 + $0x68c] ss:$16 sps:$4 sm:$0xff]  }
 0x421   : > { %7942 = vmatpush1.bf16.msra.mxu0 %v19510_v17  ;;  %8574 = vmatprep.subr.bf16.mxu1 %v19521_v21  ;;  %v19554_v17 = vld [vmem:[#allocation5 + $0x3a84] ss:$16 sps:$4 sm:$0xff]  }
 0x422   : > { %7943 = vmatprep.subr.bf16.mxu0 %v19518_v46  ;;  %v19561_v46 = vld [vmem:[#allocation5 + $0x6a8] ss:$16 sps:$4 sm:$0xff]   ;;  %v19566_v21 = vld [vmem:[#allocation5 + $0x3ac4] ss:$16 sps:$4 sm:$0xff]  }
 0x424   : > { %8575 = vmatpush1.bf16.msra.mxu1 %v19519_v6  ;;  %v19564_v6 = vld [vmem:[#allocation5 + $0x3ac0] ss:$16 sps:$4 sm:$0xff]  }
 0x425   : > { %7944 = vmatpush1.bf16.msra.mxu0 %v19516_v61  ;;  %8576 = vmatprep.subr.bf16.mxu1 %v19527_v25  ;;  %v19569_v61 = vld [vmem:[#allocation5 + $0x6cc] ss:$16 sps:$4 sm:$0xff]  }
 0x426   : > { %7945 = vmatprep.subr.bf16.mxu0 %v19524_v53  ;;  %v19572_v53 = vld [vmem:[#allocation5 + $0x3ae4] ss:$16 sps:$4 sm:$0xff]   ;;  %v19575_v25 = vld [vmem:[#allocation5 + $0x6ec] ss:$16 sps:$4 sm:$0xff]  }
 0x428   : > { %8577 = vmatpush1.bf16.msra.mxu1 %v19525_v38  ;;  %v19590_v38 = vld [vmem:[#allocation5 + $0x3b44] ss:$16 sps:$4 sm:$0xff]  }
 0x429   : > { %7946 = vmatpush1.bf16.msra.mxu0 %v19522_v37  ;;  %8589 = vmatprep.subr.bf16.mxu1 %v19533_v40  ;;  %v19585_v37 = vld [vmem:[#allocation5 + $0x728] ss:$16 sps:$4 sm:$0xff]   ;;  %v19608_v40 = vld [vmem:[#allocation5 + $0x3ba4] ss:$16 sps:$4 sm:$0xff]  }
 0x42a   : > { %7958 = vmatprep.subr.bf16.mxu0 %v19530_v41  ;;  %v19603_v41 = vld [vmem:[#allocation5 + $0x788] ss:$16 sps:$4 sm:$0xff]  }
 0x42b   : > { %8579 = vmatmul.mubr.bf16.vlgmr.msra.gmra.mrb[8].mxu1 %v21526_v60 }
 0x42c   : > { %7948 = vmatmul.mubr.bf16.vlgmr.msra.gmra.mrb[4].mxu0 %v7539_v58  ;;  %8590 = vmatpush1.bf16.msra.mxu1 %v19531_v48  ;;  %v20972_v48 = vld [vmem:[#allocation3 + $0x10] sm:$0xe0] }
 0x42d   : > { %7959 = vmatpush1.bf16.msra.mxu0 %v19528_v49  ;;  %8591 = vmatprep.subr.bf16.mxu1 %v19539_v62  ;;  %v19609_v49 = vld [vmem:[#allocation5 + $0x7a8] ss:$16 sps:$4 sm:$0xff]   ;;  %v7558_v58 = vshrl.u32 %v20972_v48, 16  ;;  %v7566_v62 = vshrl.u32 %v7455_v55, 16 }
 0x42e   : > { %7960 = vmatprep.subr.bf16.mxu0 %v19536_v5  ;;  %7990 = vmatprep.mubr.bf16.mxu0 %v7590_v63  ;;  %v7561_v5 = vshll.u32 %v20972_v48, 16  ;;  %v7569_v63 = vshll.u32 %v7455_v55, 16  ;;  %v19644_v55 = vld [vmem:[#allocation5 + $0x6c] ss:$16 sps:$4 sm:$0xff]  }
 0x42f   : > { %8621 = vmatprep.mubr.bf16.mxu1 %v21531_v2  ;;  %v19650_v48 = vld [vmem:[#allocation5 + $0x8c] ss:$16 sps:$4 sm:$0xff]  }
 0x430   : > { %8592 = vmatpush1.bf16.msra.mxu1 %v19537_v12  ;;  %v19617_v12 = vld [vmem:[#allocation5 + $0x7cc] ss:$16 sps:$4 sm:$0xff]  }
 0x431   : > { %7961 = vmatpush1.bf16.msra.mxu0 %v19534_v4  ;;  %8593 = vmatprep.subr.bf16.mxu1 %v19545_v22  ;;  %v19614_v4 = vld [vmem:[#allocation5 + $0x3bc4] ss:$16 sps:$4 sm:$0xff]   ;;  %v19615_v22 = vld [vmem:[#allocation5 + $0x7c8] ss:$16 sps:$4 sm:$0xff]  }
 0x432   : > { %7962 = vmatprep.subr.bf16.mxu0 %v19542_v26  ;;  %v19612_v26 = vld [vmem:[#allocation5 + $0x3bc0] ss:$16 sps:$4 sm:$0xff]  }
 0x434   : > { %8594 = vmatpush1.bf16.msra.mxu1 %v19543_v35  ;;  %v19620_v35 = vld [vmem:[#allocation5 + $0x3be4] ss:$16 sps:$4 sm:$0xff]  }
 0x435   : > { %7963 = vmatpush1.bf16.msra.mxu0 %v19540_v8  ;;  %8595 = vmatprep.subr.bf16.mxu1 %v19551_v10  ;;  %v8650_v8 = vshrl.u32 %v21534_v56, 16  ;;  %v8653_v10 = vshll.u32 %v21534_v56, 16 }
 0x436   : > { %7964 = vmatprep.subr.bf16.mxu0 %v19548_v32  ;;  %v19623_v32 = vld [vmem:[#allocation5 + $0x7ec] ss:$16 sps:$4 sm:$0xff]  }
 0x438   : > { %8596 = vmatpush1.bf16.msra.mxu1 %v19549_v16 }
 0x439   : > { %7965 = vmatpush1.bf16.msra.mxu0 %v19546_v15  ;;  %8597 = vmatprep.subr.bf16.mxu1 %v19557_v3  ;;  %v20973_v15 = vld [vmem:[#allocation3 + $0x28] sm:$0xf]  ;;  %v7560_v3 = vrot.slane %v7558_v58, 5  ;;  %v19653_v58 = vld [vmem:[#allocation5 + $0x248c] ss:$16 sps:$4 sm:$0xff]  }
 0x43a   : > { %7966 = vmatprep.subr.bf16.mxu0 %v19554_v17  ;;  %v8658_v16 = vshrl.u32 %v20973_v15, 16  ;;  %v8661_v17 = vshll.u32 %v20973_v15, 16  ;;  %v19671_v15 = vld [vmem:[#allocation5 + $0x24ec] ss:$16 sps:$4 sm:$0xff]  }
 0x43c   : > { %8598 = vmatpush1.bf16.msra.mxu1 %v19555_v19  ;;  %v7568_v19 = vrot.slane %v7566_v62, 5  ;;  %v19651_v62 = vld [vmem:[#allocation5 + $0x2488] ss:$16 sps:$4 sm:$0xff]  }
 0x43d   : > { %7967 = vmatpush1.bf16.msra.mxu0 %v19552_v18  ;;  %8599 = vmatprep.subr.bf16.mxu1 %v19563_v29  ;;  %v7563_v18 = vrot.slane %v7561_v5, 6  ;;  %v21538_v29 = vld [vmem:[#allocation3 + $0x30] sm:$0xf]  ;;  %v19648_v5 = vld [vmem:[#allocation5 + $0x88] ss:$16 sps:$4 sm:$0xff]  }
 0x43e   : > { %7968 = vmatprep.subr.bf16.mxu0 %v19560_v20  ;;  %v7571_v20 = vrot.slane %v7569_v63, 6  ;;  %v19656_v63 = vld [vmem:[#allocation5 + $0xac] ss:$16 sps:$4 sm:$0xff]  }
 0x440   : > { %8600 = vmatpush1.bf16.msra.mxu1 %v19561_v46  ;;  %v19618_v46 = vld [vmem:[#allocation5 + $0x3be0] ss:$16 sps:$4 sm:$0xff]  }
 0x441   : > { %7969 = vmatpush1.bf16.msra.mxu0 %v19558_v13  ;;  %8601 = vmatprep.subr.bf16.mxu1 %v19569_v61  ;;  %v8136_v13 = vld [vmem:[#allocation3 + $0x10] sm:$0xf0]  ;;  %v8652_v61 = vrot.slane %v8650_v8, 3  ;;  %v19665_v8 = vld [vmem:[#allocation5 + $0x24cc] ss:$16 sps:$4 sm:$0xff]  }
 0x442   : > { %7970 = vmatprep.subr.bf16.mxu0 %v19566_v21  ;;  %v19621_v21 = vld [vmem:[#allocation5 + $0x7e8] ss:$16 sps:$4 sm:$0xff]  }
 0x444   : > { %8602 = vmatpush1.bf16.msra.mxu1 %v19567_v24  ;;  %v8660_v24 = vrot.slane %v8658_v16, 3  ;;  %v19666_v16 = vld [vmem:[#allocation5 + $0xe8] ss:$16 sps:$4 sm:$0xff]  }
 0x445   : > { %7971 = vmatpush1.bf16.msra.mxu0 %v19564_v6  ;;  %8603 = vmatprep.subr.bf16.mxu1 %v19575_v25  ;;  %v8655_v6 = vrot.slane %v8653_v10, 4  ;;  %v7564_v25 = vor.u32 %v7563_v18, %v7560_v3  ;;  %v19668_v10 = vld [vmem:[#allocation5 + $0xec] ss:$16 sps:$4 sm:$0xff]  }
 0x446   : > { %7972 = vmatprep.subr.bf16.mxu0 %v19572_v53  ;;  %v8663_v53 = vrot.slane %v8661_v17, 4  ;;  %v19669_v17 = vld [vmem:[#allocation5 + $0x24e8] ss:$16 sps:$4 sm:$0xff]   ;;  %v19674_v3 = vld [vmem:[#allocation5 + $0x10c] ss:$16 sps:$4 sm:$0xff]  }
 0x447   : > { %v19677_v18 = vld [vmem:[#allocation5 + $0x250c] ss:$16 sps:$4 sm:$0xff]  }
 0x448   : > { %8604 = vmatpush1.bf16.msra.mxu1 %v19573_v27  ;;  %v8216_v27 = vrot.slane %v8136_v13, 4  ;;  %v19680_v13 = vld [vmem:[#allocation5 + $0x12c] ss:$16 sps:$4 sm:$0xff]  }
 0x449   : > { %7973 = vmatpush1.bf16.msra.mxu0 %v19570_v0  ;;  %8605 = vmatprep.subr.bf16.mxu1 %v19581_v47  ;;  %v7572_v0 = vor.u32 %v7571_v20, %v7568_v19  ;;  %v21541_v47 = vld [vmem:[#allocation3 + $0x28] sm:$0x7] }
 0x44a   : > { %7974 = vmatprep.subr.bf16.mxu0 %v19578_v28  ;;  %v8217_v28 = vrot.slane %v21538_v29, 4  ;;  %v19672_v19 = vld [vmem:[#allocation5 + $0x108] ss:$16 sps:$4 sm:$0xff]  }
 0x44b   : > { %v19675_v20 = vld [vmem:[#allocation5 + $0x2508] ss:$16 sps:$4 sm:$0xff]  }
 0x44c   : > { %8606 = vmatpush1.bf16.msra.mxu1 %v19579_v31  ;;  %v19629_v31 = vld [vmem:[#allocation5 + $0x240c] ss:$16 sps:$4 sm:$0xff]  }
 0x44d   : > { %7975 = vmatpush1.bf16.msra.mxu0 %v19576_v30  ;;  %8607 = vmatprep.subr.bf16.mxu1 %v19587_v34  ;;  %v19626_v30 = vld [vmem:[#allocation5 + $0xc] ss:$16 sps:$4 sm:$0xff]   ;;  %v8664_v34 = vor.u32 %v8663_v53, %v8660_v24  ;;  %v19684_v53 = vld [vmem:[#allocation5 + $0x148] ss:$16 sps:$4 sm:$0xff]  }
 0x44e   : > { %7976 = vmatprep.subr.bf16.mxu0 %v19584_v9  ;;  %v8656_v9 = vor.u32 %v8655_v6, %v8652_v61  ;;  %v19681_v61 = vld [vmem:[#allocation5 + $0x2528] ss:$16 sps:$4 sm:$0xff]   ;;  %v19686_v6 = vld [vmem:[#allocation5 + $0x14c] ss:$16 sps:$4 sm:$0xff]  }
 0x44f   : > { %v19689_v24 = vld [vmem:[#allocation5 + $0x254c] ss:$16 sps:$4 sm:$0xff]  }
 0x450   : > { %8608 = vmatpush1.bf16.msra.mxu1 %v19585_v37  ;;  %v10230_v37 = vrot.slane %v21541_v47, 3 }
 0x451   : > { %7977 = vmatpush1.bf16.msra.mxu0 %v19582_v11  ;;  %8609 = vmatprep.subr.bf16.mxu1 %v19593_v39  ;;  %v10229_v11 = vrot.slane %v21534_v56, 3  ;;  %v19624_v39 = vld [vmem:[#allocation5 + $0x8] ss:$16 sps:$4 sm:$0xff]   ;;  %v19647_v56 = vld [vmem:[#allocation5 + $0x246c] ss:$16 sps:$4 sm:$0xff]  }
 0x452   : > { %7978 = vmatprep.subr.bf16.mxu0 %v19590_v38  ;;  %v7573_v38 = vsel %vm7522_vm6, %v7564_v25, %v7572_v0  ;;  %v19687_v25 = vld [vmem:[#allocation5 + $0x2548] ss:$16 sps:$4 sm:$0xff]   ;;  %v19692_v0 = vld [vmem:[#allocation5 + $0x16c] ss:$16 sps:$4 sm:$0xff]  }
 0x454   : > { %8610 = vmatpush1.bf16.msra.mxu1 %v19591_v43  ;;  %v21547_v43 = vsel %vm614_vm0, %v8216_v27, %v8217_v28  ;;  %v19695_v27 = vld [vmem:[#allocation5 + $0x256c] ss:$16 sps:$4 sm:$0xff]   ;;  %v19690_v28 = vld [vmem:[#allocation5 + $0x168] ss:$16 sps:$4 sm:$0xff]  }
 0x455   : > { %7979 = vmatpush1.bf16.msra.mxu0 %v19588_v42  ;;  %8611 = vmatprep.subr.bf16.mxu1 %v19599_v59  ;;  %v19627_v42 = vld [vmem:[#allocation5 + $0x2408] ss:$16 sps:$4 sm:$0xff]   ;;  %v19635_v59 = vld [vmem:[#allocation5 + $0x242c] ss:$16 sps:$4 sm:$0xff]  }
 0x456   : > { %7980 = vmatprep.subr.bf16.mxu0 %v19596_v44  ;;  %v19632_v44 = vld [vmem:[#allocation5 + $0x2c] ss:$16 sps:$4 sm:$0xff]  }
 0x458   : > { %8612 = vmatpush1.bf16.msra.mxu1 %v19597_v33  ;;  %v21554_v33 = vsel %vm2636_vm2, %v10229_v11, %v10230_v37  ;;  %v19699_v11 = vld [vmem:[#allocation5 + $0x2588] ss:$16 sps:$4 sm:$0xff]   ;;  %v19704_v37 = vld [vmem:[#allocation5 + $0x1ac] ss:$16 sps:$4 sm:$0xff]  }
 0x459   : > { %7981 = vmatpush1.bf16.msra.mxu0 %v19594_v45  ;;  %8613 = vmatprep.subr.bf16.mxu1 %v19605_v51  ;;  %v21551_v45 = vsel %vm1037_vm3, %v8656_v9, %v8664_v34  ;;  %v19633_v51 = vld [vmem:[#allocation5 + $0x2428] ss:$16 sps:$4 sm:$0xff]   ;;  %v19701_v9 = vld [vmem:[#allocation5 + $0x258c] ss:$16 sps:$4 sm:$0xff]  }
 0x45a   : > { %7982 = vmatprep.subr.bf16.mxu0 %v19602_v50  ;;  %v19630_v50 = vld [vmem:[#allocation5 + $0x28] ss:$16 sps:$4 sm:$0xff]  }
 0x45b   : > { %v19696_v34 = vld [vmem:[#allocation5 + $0x188] ss:$16 sps:$4 sm:$0xff]  }
 0x45c   : > { %8614 = vmatpush1.bf16.msra.mxu1 %v19603_v41  ;;  %v19641_v41 = vld [vmem:[#allocation5 + $0x244c] ss:$16 sps:$4 sm:$0xff]  }
 0x45d   : > { %7983 = vmatpush1.bf16.msra.mxu0 %v19600_v52  ;;  %8615 = vmatprep.subr.bf16.mxu1 %v19611_v54  ;;  %v19638_v52 = vld [vmem:[#allocation5 + $0x4c] ss:$16 sps:$4 sm:$0xff]   ;;  %v19639_v54 = vld [vmem:[#allocation5 + $0x2448] ss:$16 sps:$4 sm:$0xff]  }
 0x45e   : > { %7984 = vmatprep.subr.bf16.mxu0 %v19608_v40  ;;  %v19636_v40 = vld [vmem:[#allocation5 + $0x48] ss:$16 sps:$4 sm:$0xff]  }
 0x460   : > { %8616 = vmatpush1.bf16.msra.mxu1 %v19609_v49  ;;  %v19645_v49 = vld [vmem:[#allocation5 + $0x2468] ss:$16 sps:$4 sm:$0xff]  }
 0x461   : > { %7985 = vmatpush1.bf16.msra.mxu0 %v19606_v57  ;;  %8617 = vmatprep.subr.bf16.mxu1 %v19617_v12  ;;  %v19642_v57 = vld [vmem:[#allocation5 + $0x68] ss:$16 sps:$4 sm:$0xff]  }
 0x462   : > { %7986 = vmatprep.subr.bf16.mxu0 %v19614_v4  ;;  %v19659_v4 = vld [vmem:[#allocation5 + $0x24ac] ss:$16 sps:$4 sm:$0xff]   ;;  %v19654_v12 = vld [vmem:[#allocation5 + $0xa8] ss:$16 sps:$4 sm:$0xff]  }
 0x464   : > { %8618 = vmatpush1.bf16.msra.mxu1 %v19615_v22  ;;  %v19662_v22 = vld [vmem:[#allocation5 + $0xcc] ss:$16 sps:$4 sm:$0xff]  }
 0x465   : > { %7987 = vmatpush1.bf16.msra.mxu0 %v19612_v26  ;;  %8619 = vmatprep.subr.bf16.mxu1 %v19623_v32  ;;  %v19657_v26 = vld [vmem:[#allocation5 + $0x24a8] ss:$16 sps:$4 sm:$0xff]  }
 0x466   : > { %7988 = vmatprep.subr.bf16.mxu0 %v19620_v35  ;;  %v19660_v35 = vld [vmem:[#allocation5 + $0xc8] ss:$16 sps:$4 sm:$0xff]  }
 0x467   : > { %v19663_v32 = vld [vmem:[#allocation5 + $0x24c8] ss:$16 sps:$4 sm:$0xff]  }
 0x468   : > { %8620 = vmatpush1.bf16.msra.mxu1 %v19621_v21  ;;  %v19678_v21 = vld [vmem:[#allocation5 + $0x128] ss:$16 sps:$4 sm:$0xff]  }
 0x469   : > { %7989 = vmatpush1.bf16.msra.mxu0 %v19618_v46  ;;  %9024 = vmatprep.subr.bf16.mxu1 %v19626_v30  ;;  %v19683_v46 = vld [vmem:[#allocation5 + $0x252c] ss:$16 sps:$4 sm:$0xff]   ;;  %v19693_v30 = vld [vmem:[#allocation5 + $0x2568] ss:$16 sps:$4 sm:$0xff]  }
 0x46a   : > { %12570 = vmatprep.subr.bf16.mxu0 %v19629_v31  ;;  %v19698_v31 = vld [vmem:[#allocation5 + $0x18c] ss:$16 sps:$4 sm:$0xff]  }
 0x46b   : > { %8622 = vmatmul.mubr.bf16.vlgmr.msra.gmra.mrb[8].mxu1 %v21547_v43 }
 0x46c   : > { %7991 = vmatmul.mubr.bf16.vlgmr.msra.gmra.mrb[4].mxu0 %v7573_v38  ;;  %9025 = vmatpush1.bf16.msra.mxu1 %v19624_v39  ;;  %v19707_v38 = vld [vmem:[#allocation5 + $0x25ac] ss:$16 sps:$4 sm:$0xff]   ;;  %v8062_v39 = vld [vmem:[#allocation3] sm:$0xf8] }
 0x46d   : > { %12571 = vmatpush1.bf16.msra.mxu0 %v19627_v42  ;;  %9026 = vmatprep.subr.bf16.mxu1 %v19632_v44  ;;  %v19702_v42 = vld [vmem:[#allocation5 + $0x1a8] ss:$16 sps:$4 sm:$0xff]  }
 0x46e   : > { %12572 = vmatprep.subr.bf16.mxu0 %v19635_v59  ;;  %9056 = vmatprep.mubr.bf16.mxu1 %v21551_v45  ;;  %v19705_v44 = vld [vmem:[#allocation5 + $0x25a8] ss:$16 sps:$4 sm:$0xff]   ;;  %v20974_v59 = vld [vmem:[#allocation3 + $0x20] sm:$0xf] }
 0x46f   : > { %12602 = vmatprep.mubr.bf16.mxu0 %v21554_v33 }
 0x470   : > { %9027 = vmatpush1.bf16.msra.mxu1 %v19630_v50  ;;  %v8641_v50 = vshrl.u32 %v20974_v59, 16 }
 0x471   : > { %12573 = vmatpush1.bf16.msra.mxu0 %v19633_v51  ;;  %9028 = vmatprep.subr.bf16.mxu1 %v19638_v52  ;;  %v8633_v51 = vshrl.u32 %v8062_v39, 16  ;;  %v8636_v52 = vshll.u32 %v8062_v39, 16 }
 0x472   : > { %12574 = vmatprep.subr.bf16.mxu0 %v19641_v41  ;;  %v8644_v41 = vshll.u32 %v20974_v59, 16 }
 0x474   : > { %9029 = vmatpush1.bf16.msra.mxu1 %v19636_v40  ;;  %v8065_v40 = vld [vmem:[#allocation3 + $0x18] sm:$0xf8] }
 0x475   : > { %12575 = vmatpush1.bf16.msra.mxu0 %v19639_v54  ;;  %9030 = vmatprep.subr.bf16.mxu1 %v19644_v55  ;;  %v19710_v54 = vld [vmem:[#allocation5 + $0x1cc] ss:$16 sps:$4 sm:$0xff]  }
 0x476   : > { %12576 = vmatprep.subr.bf16.mxu0 %v19647_v56  ;;  %v19713_v55 = vld [vmem:[#allocation5 + $0x25cc] ss:$16 sps:$4 sm:$0xff]   ;;  %v19708_v56 = vld [vmem:[#allocation5 + $0x1c8] ss:$16 sps:$4 sm:$0xff]  }
 0x478   : > { %9031 = vmatpush1.bf16.msra.mxu1 %v19642_v57  ;;  %v19711_v57 = vld [vmem:[#allocation5 + $0x25c8] ss:$16 sps:$4 sm:$0xff]  }
 0x479   : > { %12577 = vmatpush1.bf16.msra.mxu0 %v19645_v49  ;;  %9032 = vmatprep.subr.bf16.mxu1 %v19650_v48  ;;  %v20975_v49 = vld [vmem:[#allocation3 + $0x38] sm:$0xf] }
 0x47a   : > { %12578 = vmatprep.subr.bf16.mxu0 %v19653_v58  ;;  %v8692_v48 = vshrl.u32 %v20975_v49, 16  ;;  %v19716_v58 = vld [vmem:[#allocation5 + $0x1ec] ss:$16 sps:$4 sm:$0xff]  }
 0x47c   : > { %9033 = vmatpush1.bf16.msra.mxu1 %v19648_v5  ;;  %v8684_v5 = vshrl.u32 %v8065_v40, 16 }
 0x47d   : > { %12579 = vmatpush1.bf16.msra.mxu0 %v19651_v62  ;;  %9034 = vmatprep.subr.bf16.mxu1 %v19656_v63  ;;  %v8687_v62 = vshll.u32 %v8065_v40, 16  ;;  %v8695_v63 = vshll.u32 %v20975_v49, 16  ;;  %v437_v49 = vld [vmem:[#allocation2 + $0x8] sm:$0x80] }
 0x47e   : > { %12580 = vmatprep.subr.bf16.mxu0 %v19659_v4  ;;  %v8635_v4 = vrot.slane %v8633_v51, 3  ;;  %v19732_v51 = vld [vmem:[#allocation5 + $0x248] ss:$16 sps:$4 sm:$0xff]  }
 0x480   : > { %9035 = vmatpush1.bf16.msra.mxu1 %v19654_v12  ;;  %v8638_v12 = vrot.slane %v8636_v52, 4  ;;  %v19735_v52 = vld [vmem:[#allocation5 + $0x2648] ss:$16 sps:$4 sm:$0xff]  }
 0x481   : > { %12581 = vmatpush1.bf16.msra.mxu0 %v19657_v26  ;;  %9036 = vmatprep.subr.bf16.mxu1 %v19662_v22  ;;  %v8643_v26 = vrot.slane %v8641_v50, 3  ;;  %v8646_v22 = vrot.slane %v8644_v41, 4  ;;  %v21580_v50 = vld [vmem:[#allocation2 + $0x20] sm:$0xff] }
 0x482   : > { %12582 = vmatprep.subr.bf16.mxu0 %v19665_v8  ;;  %v19719_v8 = vld [vmem:[#allocation5 + $0x25ec] ss:$16 sps:$4 sm:$0xff]   ;;  %v436_v41 = vld [vmem:[#allocation2] sm:$0x80] }
 0x484   : > { %9037 = vmatpush1.bf16.msra.mxu1 %v19660_v35  ;;  %v21558_v35 = vld [vmem:[#allocation3 + $0x20] sm:$0x7] }
 0x485   : > { %12583 = vmatpush1.bf16.msra.mxu0 %v19663_v32  ;;  %9038 = vmatprep.subr.bf16.mxu1 %v19668_v10  ;;  %v19714_v32 = vld [vmem:[#allocation5 + $0x1e8] ss:$16 sps:$4 sm:$0xff]  }
 0x486   : > { %12584 = vmatprep.subr.bf16.mxu0 %v19671_v15  ;;  %v19717_v10 = vld [vmem:[#allocation5 + $0x25e8] ss:$16 sps:$4 sm:$0xff]   ;;  %v8694_v15 = vrot.slane %v8692_v48, 3 }
 0x488   : > { %9039 = vmatpush1.bf16.msra.mxu1 %v19666_v16  ;;  %v8686_v16 = vrot.slane %v8684_v5, 3  ;;  %v448_v5 = vrot.slane %v21580_v50, 7 }
 0x489   : > { %12585 = vmatpush1.bf16.msra.mxu0 %v19669_v17  ;;  %9040 = vmatprep.subr.bf16.mxu1 %v19674_v3  ;;  %v8689_v17 = vrot.slane %v8687_v62, 4  ;;  %v8697_v3 = vrot.slane %v8695_v63, 4  ;;  %v438_v62 = vld [vmem:[#allocation2 + $0x40] sm:$0x7f]  ;;  %v19738_v63 = vld [vmem:[#allocation5 + $0x268] ss:$16 sps:$4 sm:$0xff]  }
 0x48a   : > { %12586 = vmatprep.subr.bf16.mxu0 %v19677_v18  ;;  %v8639_v18 = vor.u32 %v8638_v12, %v8635_v4  ;;  %v19741_v4 = vld [vmem:[#allocation5 + $0x2668] ss:$16 sps:$4 sm:$0xff]  }
 0x48b   : > { %v439_v12 = vld [vmem:[#allocation2 + $0x48] sm:$0x7f] }
 0x48c   : > { %9041 = vmatpush1.bf16.msra.mxu1 %v19672_v19  ;;  %v8647_v19 = vor.u32 %v8646_v22, %v8643_v26  ;;  %v19746_v26 = vld [vmem:[#allocation5 + $0x28c] ss:$16 sps:$4 sm:$0xff]  }
 0x48d   : > { %12587 = vmatpush1.bf16.msra.mxu0 %v19675_v20  ;;  %9042 = vmatprep.subr.bf16.mxu1 %v19680_v13  ;;  %v10226_v20 = vrot.slane %v8062_v39, 3  ;;  %v10227_v13 = vrot.slane %v21558_v35, 3  ;;  %v19729_v39 = vld [vmem:[#allocation5 + $0x2628] ss:$16 sps:$4 sm:$0xff]   ;;  %v19749_v22 = vld [vmem:[#allocation5 + $0x268c] ss:$16 sps:$4 sm:$0xff]  }
 0x48e   : > { %12588 = vmatprep.subr.bf16.mxu0 %v19683_v46  ;;  %v21561_v46 = vld [vmem:[#allocation3 + $0x38] sm:$0x7] }
 0x490   : > { %9043 = vmatpush1.bf16.msra.mxu1 %v19678_v21  ;;  %v19722_v21 = vld [vmem:[#allocation5 + $0x20c] ss:$16 sps:$4 sm:$0xff]  }
 0x491   : > { %12589 = vmatpush1.bf16.msra.mxu0 %v19681_v61  ;;  %9044 = vmatprep.subr.bf16.mxu1 %v19686_v6  ;;  %v19725_v61 = vld [vmem:[#allocation5 + $0x260c] ss:$16 sps:$4 sm:$0xff]   ;;  %v8690_v6 = vor.u32 %v8689_v17, %v8686_v16  ;;  %v455_v16 = vrot.slane %v439_v12, 7 }
 0x492   : > { %12590 = vmatprep.subr.bf16.mxu0 %v19689_v24  ;;  %v8698_v24 = vor.u32 %v8697_v3, %v8694_v15  ;;  %v19744_v3 = vld [vmem:[#allocation5 + $0x288] ss:$16 sps:$4 sm:$0xff]   ;;  %v19767_v12 = vld [vmem:[#allocation5 + $0x26ec] ss:$16 sps:$4 sm:$0xff]  }
 0x494   : > { %9045 = vmatpush1.bf16.msra.mxu1 %v19684_v53  ;;  %v10235_v53 = vrot.slane %v8065_v40, 3  ;;  %v19740_v40 = vld [vmem:[#allocation5 + $0x26c] ss:$16 sps:$4 sm:$0xff]  }
 0x495   : > { %12591 = vmatpush1.bf16.msra.mxu0 %v19687_v25  ;;  %9046 = vmatprep.subr.bf16.mxu1 %v19692_v0  ;;  %v10236_v25 = vrot.slane %v21561_v46, 3  ;;  %v19720_v0 = vld [vmem:[#allocation5 + $0x208] ss:$16 sps:$4 sm:$0xff]  }
 0x496   : > { %12592 = vmatprep.subr.bf16.mxu0 %v19695_v27  ;;  %v19723_v27 = vld [vmem:[#allocation5 + $0x2608] ss:$16 sps:$4 sm:$0xff]  }
 0x498   : > { %9047 = vmatpush1.bf16.msra.mxu1 %v19690_v28  ;;  %v21565_v28 = vsel %vm1037_vm3, %v8639_v18, %v8647_v19  ;;  %v19747_v18 = vld [vmem:[#allocation5 + $0x2688] ss:$16 sps:$4 sm:$0xff]  }
 0x499   : > { %12593 = vmatpush1.bf16.msra.mxu0 %v19693_v30  ;;  %9048 = vmatprep.subr.bf16.mxu1 %v19698_v31  ;;  %v21568_v30 = vsel %vm2636_vm2, %v10226_v20, %v10227_v13  ;;  %v19728_v31 = vld [vmem:[#allocation5 + $0x22c] ss:$16 sps:$4 sm:$0xff]   ;;  %v4514_v20 = vld [vmem:[#allocation8 + $0x4] sm:$0x3] }
 0x49a   : > { %12594 = vmatprep.subr.bf16.mxu0 %v19701_v9  ;;  %v19731_v9 = vld [vmem:[#allocation5 + $0x262c] ss:$16 sps:$4 sm:$0xff]  }
 0x49c   : > { %9049 = vmatpush1.bf16.msra.mxu1 %v19696_v34  ;;  %v2070_v34 = vlaneseq }
 0x49d   : > { %12595 = vmatpush1.bf16.msra.mxu0 %v19699_v11  ;;  %9050 = vmatprep.subr.bf16.mxu1 %v19704_v37  ;;  %v21573_v11 = vsel %vm1037_vm3, %v8690_v6, %v8698_v24  ;;  %v21576_v37 = vsel %vm2636_vm2, %v10235_v53, %v10236_v25  ;;  %v434_v6 = vld [vmem:[#allocation2 + $0x40] sm:$0xff] }
 0x49e   : > { %12596 = vmatprep.subr.bf16.mxu0 %v19707_v38  ;;  %v19726_v38 = vld [vmem:[#allocation5 + $0x228] ss:$16 sps:$4 sm:$0xff]   ;;  %v2071_v59 = vshrl.u32 %v2070_v34, 7 }
 0x4a0   : > { %9051 = vmatpush1.bf16.msra.mxu1 %v19702_v42  ;;  %v19734_v42 = vld [vmem:[#allocation5 + $0x24c] ss:$16 sps:$4 sm:$0xff]   ;;  %v21584_v48 = vsub.s32 1, %v2071_v59 }
 0x4a1   : > { %12597 = vmatpush1.bf16.msra.mxu0 %v19705_v44  ;;  %9052 = vmatprep.subr.bf16.mxu1 %v19710_v54  ;;  %v19737_v44 = vld [vmem:[#allocation5 + $0x264c] ss:$16 sps:$4 sm:$0xff]  }
 0x4a2   : > { %12598 = vmatprep.subr.bf16.mxu0 %v19713_v55  ;;  %v19743_v54 = vld [vmem:[#allocation5 + $0x266c] ss:$16 sps:$4 sm:$0xff]   ;;  %v2068_v55 = vld [vmem:[#allocation8] sm:$0x3] }
 0x4a3   : > { %v2077_v17 = vrot.slane %v2068_v55, %v21584_v48 }
 0x4a4   : > { %9053 = vmatpush1.bf16.msra.mxu1 %v19708_v56  ;;  %v21582_v56 = vsub.s32 0, %v2071_v59  ;;  %v19758_v59 = vld [vmem:[#allocation5 + $0x2cc] ss:$16 sps:$4 sm:$0xff]  }
 0x4a5   : > { %12599 = vmatpush1.bf16.msra.mxu0 %v19711_v57  ;;  %9054 = vmatprep.subr.bf16.mxu1 %v19716_v58  ;;  %v433_v57 = vld [vmem:[#allocation2 + $0x28] sm:$0xff]  ;;  %v447_v58 = vrot.slane %v436_v41, 7 }
 0x4a6   : > { %12600 = vmatprep.subr.bf16.mxu0 %v19719_v8  ;;  %v450_v8 = vrot.slane %v437_v49, 7  ;;  %v2073_v15 = vrot.slane %v2068_v55, %v21582_v56 }
 0x4a7   : > { %v449_v19 = vsel %vm446_vm7, %v447_v58, %v448_v5  ;;  %v19759_v58 = vld [vmem:[#allocation5 + $0x26c8] ss:$16 sps:$4 sm:$0xff]  }
 0x4a8   : > { %9055 = vmatpush1.bf16.msra.mxu1 %v19714_v32  ;;  %v451_v32 = vrot.slane %v433_v57, 7  ;;  %v2080_v53 = vadd.f32 %v21471_v7, %v2073_v15  ;;  %v461_v25 = vmax.f32 %v21580_v50, %v449_v19  ;;  %v19761_v50 = vld [vmem:[#allocation5 + $0x26cc] ss:$16 sps:$4 sm:$0xff]   ;;  %v19771_v19 = vld [vmem:[#allocation5 + $0x2708] ss:$16 sps:$4 sm:$0xff]  }
 0x4a9   : > { %12601 = vmatpush1.bf16.msra.mxu0 %v19717_v10  ;;  %9067 = vmatprep.subr.bf16.mxu1 %v19722_v21  ;;  %v453_v10 = vrot.slane %v438_v62, 7  ;;  %v19752_v21 = vld [vmem:[#allocation5 + $0x2ac] ss:$16 sps:$4 sm:$0xff]  }
 0x4aa   : > { %12613 = vmatprep.subr.bf16.mxu0 %v19725_v61  ;;  %v452_v13 = vsel %vm446_vm7, %v450_v8, %v451_v32  ;;  %v19755_v61 = vld [vmem:[#allocation5 + $0x26ac] ss:$16 sps:$4 sm:$0xff]  }
 0x4ab   : > { %9057 = vmatmul.mubr.bf16.vlgmr.msra.gmra.mrb[8].mxu1 %v21565_v28  ;;  %v454_v24 = vsel %vm446_vm7, %v448_v5, %v453_v10  ;;  %v462_v34 = vmax.f32 %v433_v57, %v452_v13  ;;  %v19779_v13 = vld [vmem:[#allocation5 + $0x272c] ss:$16 sps:$4 sm:$0xff]  }
 0x4ac   : > { %12603 = vmatmul.mubr.bf16.vlgmr.msra.gmra.mrb[8].mxu0 %v21568_v30  ;;  %9068 = vmatpush1.bf16.msra.mxu1 %v19720_v0  ;;  %v4519_v0 = vrot.slane %v4514_v20, %v21582_v56  ;;  %v463_v7 = vmax.f32 %v434_v6, %v454_v24  ;;  %v19782_v6 = vld [vmem:[#allocation5 + $0x34c] ss:$16 sps:$4 sm:$0xff]  }
 0x4ad   : > { %12614 = vmatpush1.bf16.msra.mxu0 %v19723_v27  ;;  %9069 = vmatprep.subr.bf16.mxu1 %v19728_v31  ;;  %v435_v27 = vld [vmem:[#allocation2 + $0x48] sm:$0xff]  ;;  %v456_v31 = vsel %vm446_vm7, %v451_v32, %v455_v16 }
 0x4ae   : > { %12615 = vmatprep.subr.bf16.mxu0 %v19731_v9  ;;  %9099 = vmatprep.mubr.bf16.mxu1 %v21573_v11  ;;  %v2081_v9 = vadd.f32 %v21474_v23, %v2077_v17  ;;  %v464_v41 = vmax.f32 %v435_v27, %v456_v31  ;;  %v19765_v16 = vld [vmem:[#allocation5 + $0x26e8] ss:$16 sps:$4 sm:$0xff]   ;;  %v19785_v24 = vld [vmem:[#allocation5 + $0x274c] ss:$16 sps:$4 sm:$0xff]  }
 0x4af   : > { %12645 = vmatprep.mubr.bf16.mxu0 %v21576_v37  ;;  %v19791_v27 = vld [vmem:[#allocation5 + $0x276c] ss:$16 sps:$4 sm:$0xff]   ;;  %v19786_v31 = vld [vmem:[#allocation5 + $0x368] ss:$16 sps:$4 sm:$0xff]  }
 0x4b0   : > { %9070 = vmatpush1.bf16.msra.mxu1 %v19726_v38  ;;  %v4523_v38 = vrot.slane %v4514_v20, %v21584_v48  ;;  %v21604_v55 = vmax.f32 %v462_v34, %v2081_v9  ;;  %v19776_v20 = vld [vmem:[#allocation5 + $0x32c] ss:$16 sps:$4 sm:$0xff]   ;;  %v19789_v9 = vld [vmem:[#allocation5 + $0x2768] ss:$16 sps:$4 sm:$0xff]  }
 0x4b1   : > { %12616 = vmatpush1.bf16.msra.mxu0 %v19729_v39  ;;  %9071 = vmatprep.subr.bf16.mxu1 %v19734_v42  ;;  %v19750_v39 = vld [vmem:[#allocation5 + $0x2a8] ss:$16 sps:$4 sm:$0xff]   ;;  %v19794_v34 = vld [vmem:[#allocation5 + $0x38c] ss:$16 sps:$4 sm:$0xff]  }
 0x4b2   : > { %12617 = vmatprep.subr.bf16.mxu0 %v19737_v44  ;;  %v19753_v42 = vld [vmem:[#allocation5 + $0x26a8] ss:$16 sps:$4 sm:$0xff]   ;;  %v2082_v44 = vadd.f32 %v21477_v14, %v2073_v15 }
 0x4b3   : > { %v19756_v14 = vld [vmem:[#allocation5 + $0x2c8] ss:$16 sps:$4 sm:$0xff]  }
 0x4b4   : > { %9072 = vmatpush1.bf16.msra.mxu1 %v19732_v51  ;;  %v2083_v51 = vadd.f32 %v21480_v1, %v2077_v17  ;;  %v21610_v1 = vmax.f32 %v463_v7, %v2082_v44  ;;  %v19762_v15 = vld [vmem:[#allocation5 + $0x2e8] ss:$16 sps:$4 sm:$0xff]   ;;  %v19770_v17 = vld [vmem:[#allocation5 + $0x30c] ss:$16 sps:$4 sm:$0xff]  }
 0x4b5   : > { %12618 = vmatpush1.bf16.msra.mxu0 %v19735_v52  ;;  %9073 = vmatprep.subr.bf16.mxu1 %v19740_v40  ;;  %v21600_v40 = vmax.f32 %v461_v25, %v2080_v53  ;;  %v19780_v53 = vld [vmem:[#allocation5 + $0x348] ss:$16 sps:$4 sm:$0xff]   ;;  %v19800_v44 = vld [vmem:[#allocation5 + $0x3ac] ss:$16 sps:$4 sm:$0xff]  }
 0x4b6   : > { %12619 = vmatprep.subr.bf16.mxu0 %v19743_v54  ;;  %v19783_v25 = vld [vmem:[#allocation5 + $0x2748] ss:$16 sps:$4 sm:$0xff]   ;;  %v19803_v7 = vld [vmem:[#allocation5 + $0x27ac] ss:$16 sps:$4 sm:$0xff]  }
 0x4b8   : > { %9074 = vmatpush1.bf16.msra.mxu1 %v19738_v63 }
 0x4b9   : > { %12620 = vmatpush1.bf16.msra.mxu0 %v19741_v4  ;;  %9075 = vmatprep.subr.bf16.mxu1 %v19746_v26  ;;  %v19764_v4 = vld [vmem:[#allocation5 + $0x2ec] ss:$16 sps:$4 sm:$0xff]  }
 0x4ba   : > { %12621 = vmatprep.subr.bf16.mxu0 %v19749_v22  ;;  %v21616_v22 = vmax.f32 %v464_v41, %v2083_v51  ;;  %v19801_v51 = vld [vmem:[#allocation5 + $0x27a8] ss:$16 sps:$4 sm:$0xff]  }
 0x4bc   : > { %9076 = vmatpush1.bf16.msra.mxu1 %v19744_v3  ;;  %v19773_v3 = vld [vmem:[#allocation5 + $0x270c] ss:$16 sps:$4 sm:$0xff]  }
 0x4bd   : > { %12622 = vmatpush1.bf16.msra.mxu0 %v19747_v18  ;;  %9077 = vmatprep.subr.bf16.mxu1 %v19752_v21  ;;  %v19768_v18 = vld [vmem:[#allocation5 + $0x308] ss:$16 sps:$4 sm:$0xff]  }
 0x4be   : > { %12623 = vmatprep.subr.bf16.mxu0 %v19755_v61  ;;  %v4500_v52 = vpop.f32.mrb[4].mxu1  ;;  %v19774_v21 = vld [vmem:[#allocation5 + $0x328] ss:$16 sps:$4 sm:$0xff]  }
 0x4bf   : > { %v21602_v23 = vadd.f32 %v4519_v0, %v4500_v52  ;;  %v4502_v54 = vpop.f32.mrb[5].mxu1  ;;  %v19777_v61 = vld [vmem:[#allocation5 + $0x2728] ss:$16 sps:$4 sm:$0xff]  }
 0x4c0   : > { %v21606_v57 = vadd.f32 %v4523_v38, %v4502_v54  ;;  %v4504_v49 = vpop.f32.mrb[6].mxu1  ;;  %9078 = vmatpush1.bf16.msra.mxu1 %v19750_v39  ;;  %v19792_v39 = vld [vmem:[#allocation5 + $0x388] ss:$16 sps:$4 sm:$0xff]  }
 0x4c1   : > { %12624 = vmatpush1.bf16.msra.mxu0 %v19753_v42  ;;  %v4530_v5 = vmax.f32 %v21600_v40, %v21602_v23  ;;  %v21612_v62 = vadd.f32 %v4519_v0, %v4504_v49  ;;  %v4506_v63 = vpop.f32.mrb[7].mxu1  ;;  %9079 = vmatprep.subr.bf16.mxu1 %v19758_v59  ;;  %v19788_v0 = vld [vmem:[#allocation5 + $0x36c] ss:$16 sps:$4 sm:$0xff]   ;;  %v19795_v42 = vld [vmem:[#allocation5 + $0x2788] ss:$16 sps:$4 sm:$0xff]   ;;  %v8675_v49 = vshrl.u32 %v21538_v29, 16 }
 0x4c2   : > { %12625 = vmatprep.subr.bf16.mxu0 %v19761_v50  ;;  %v4531_v26 = vmax.f32 %v21604_v55, %v21606_v57  ;;  %v21618_v8 = vadd.f32 %v4523_v38, %v4506_v63  ;;  %v19797_v38 = vld [vmem:[#allocation5 + $0x278c] ss:$16 sps:$4 sm:$0xff]   ;;  %v21624_v59 = vld [vmem:[#allocation3 + $0x10] sm:$0xf8]  ;;  %v19798_v50 = vld [vmem:[#allocation5 + $0x3a8] ss:$16 sps:$4 sm:$0xff]  }
 0x4c3   : > { %v4532_v32 = vmax.f32 %v21610_v1, %v21612_v62  ;;  %v9111_v52 = vld [vmem:[#allocation3 + $0x28] sm:$0x1f]  ;;  %v8667_v41 = vshrl.u32 %v21624_v59, 16  ;;  %v8670_v54 = vshll.u32 %v21624_v59, 16 }
 0x4c4   : > { %9080 = vmatpush1.bf16.msra.mxu1 %v19756_v14  ;;  %v8678_v14 = vshll.u32 %v21538_v29, 16  ;;  %v19806_v63 = vld [vmem:[#allocation5 + $0x3cc] ss:$16 sps:$4 sm:$0xff]   ;;  %v19807_v29 = vld [vmem:[#allocation5 + $0x27c8] ss:$16 sps:$4 sm:$0xff]   ;;  %v21859_v40 = vmax.f32 %v21616_v22, %v21618_v8 }
 0x4c5   : > { %12626 = vmatpush1.bf16.msra.mxu0 %v19759_v58  ;;  %9081 = vmatprep.subr.bf16.mxu1 %v19764_v4  ;;  %v12119_v58 = vld [vmem:[#allocation3 + $0x8] sm:$0xfc] }
 0x4c6   : > { %12627 = vmatprep.subr.bf16.mxu0 %v19767_v12  ;;  %v19809_v4 = vld [vmem:[#allocation5 + $0x27cc] ss:$16 sps:$4 sm:$0xff]   ;;  %v19963_v1 = vld [vmem:[#allocation5 + $0x2308] ss:$16 sps:$4 sm:$0xff]  }
 0x4c7   : > { %v20976_v12 = vld [vmem:[#allocation3 + $0x8] sm:$0xf0]  ;;  %v19966_v22 = vld [vmem:[#allocation5 + $0xb28] ss:$16 sps:$4 sm:$0xff]  }
 0x4c8   : > { %9082 = vmatpush1.bf16.msra.mxu1 %v19762_v15  ;;  %v9196_v15 = vshrl.u32 %v20976_v12, 16  ;;  %v19962_v55 = vld [vmem:[#allocation5 + $0xb0c] ss:$16 sps:$4 sm:$0xff]   ;;  %v19969_v8 = vld [vmem:[#allocation5 + $0x2328] ss:$16 sps:$4 sm:$0xff]  }
 0x4c9   : > { %12628 = vmatpush1.bf16.msra.mxu0 %v19765_v16  ;;  %9083 = vmatprep.subr.bf16.mxu1 %v19770_v17  ;;  %v9199_v16 = vshll.u32 %v20976_v12, 16  ;;  %v9204_v17 = vshrl.u32 %v9111_v52, 16  ;;  %v19965_v57 = vld [vmem:[#allocation5 + $0x230c] ss:$16 sps:$4 sm:$0xff]  }
 0x4ca   : > { %12629 = vmatprep.subr.bf16.mxu0 %v19773_v3  ;;  %v9207_v3 = vshll.u32 %v9111_v52, 16  ;;  %v19968_v62 = vld [vmem:[#allocation5 + $0xb2c] ss:$16 sps:$4 sm:$0xff]  }
 0x4cc   : > { %9084 = vmatpush1.bf16.msra.mxu1 %v19768_v18  ;;  %v19804_v18 = vld [vmem:[#allocation5 + $0x3c8] ss:$16 sps:$4 sm:$0xff]  }
 0x4cd   : > { %12630 = vmatpush1.bf16.msra.mxu0 %v19771_v19  ;;  %9085 = vmatprep.subr.bf16.mxu1 %v19776_v20  ;;  %v12674_v19 = vshrl.u32 %v12119_v58, 16  ;;  %v12677_v20 = vshll.u32 %v12119_v58, 16 }
 0x4ce   : > { %12631 = vmatprep.subr.bf16.mxu0 %v19779_v13  ;;  %v12682_v13 = vshrl.u32 %v21541_v47, 16 }
 0x4d0   : > { %9086 = vmatpush1.bf16.msra.mxu1 %v19774_v21  ;;  %v12685_v21 = vshll.u32 %v21541_v47, 16  ;;  %v12684_v47 = vrot.slane %v12682_v13, 2  ;;  %v19822_v13 = vld [vmem:[#allocation5 + $0x828] ss:$16 sps:$4 sm:$0xff]  }
 0x4d1   : > { %12632 = vmatpush1.bf16.msra.mxu0 %v19777_v61  ;;  %9087 = vmatprep.subr.bf16.mxu1 %v19782_v6  ;;  %v8669_v61 = vrot.slane %v8667_v41, 3  ;;  %v8672_v6 = vrot.slane %v8670_v54, 4  ;;  %v10232_v41 = vrot.slane %v21624_v59, 3  ;;  %v19824_v59 = vld [vmem:[#allocation5 + $0x82c] ss:$16 sps:$4 sm:$0xff]  }
 0x4d2   : > { %12633 = vmatprep.subr.bf16.mxu0 %v19785_v24  ;;  %v8677_v24 = vrot.slane %v8675_v49, 3  ;;  %v19818_v49 = vld [vmem:[#allocation5 + $0x80c] ss:$16 sps:$4 sm:$0xff]  }
 0x4d4   : > { %9088 = vmatpush1.bf16.msra.mxu1 %v19780_v53  ;;  %v8680_v53 = vrot.slane %v8678_v14, 4  ;;  %v19821_v14 = vld [vmem:[#allocation5 + $0x200c] ss:$16 sps:$4 sm:$0xff]  }
 0x4d5   : > { %12634 = vmatpush1.bf16.msra.mxu0 %v19783_v25  ;;  %9089 = vmatprep.subr.bf16.mxu1 %v19788_v0  ;;  %v19812_v25 = vld [vmem:[#allocation5 + $0x3ec] ss:$16 sps:$4 sm:$0xff]  }
 0x4d6   : > { %12635 = vmatprep.subr.bf16.mxu0 %v19791_v27  ;;  %v19815_v0 = vld [vmem:[#allocation5 + $0x27ec] ss:$16 sps:$4 sm:$0xff]   ;;  %v21632_v27 = vld [vmem:[#allocation3 + $0x30] sm:$0x7]  ;;  %v8681_v52 = vor.u32 %v8680_v53, %v8677_v24  ;;  %v19831_v24 = vld [vmem:[#allocation5 + $0x2048] ss:$16 sps:$4 sm:$0xff]  }
 0x4d7   : > { %v10233_v54 = vrot.slane %v21632_v27, 3  ;;  %v19836_v53 = vld [vmem:[#allocation5 + $0x86c] ss:$16 sps:$4 sm:$0xff]  }
 0x4d8   : > { %9090 = vmatpush1.bf16.msra.mxu1 %v19786_v31  ;;  %v9198_v31 = vrot.slane %v9196_v15, 4  ;;  %v19816_v15 = vld [vmem:[#allocation5 + $0x808] ss:$16 sps:$4 sm:$0xff]  }
 0x4d9   : > { %12636 = vmatpush1.bf16.msra.mxu0 %v19789_v9  ;;  %9091 = vmatprep.subr.bf16.mxu1 %v19794_v34  ;;  %v9201_v9 = vrot.slane %v9199_v16, 5  ;;  %v9206_v34 = vrot.slane %v9204_v17, 4  ;;  %v19819_v16 = vld [vmem:[#allocation5 + $0x2008] ss:$16 sps:$4 sm:$0xff]  }
 0x4da   : > { %12637 = vmatprep.subr.bf16.mxu0 %v19797_v38  ;;  %v9209_v38 = vrot.slane %v9207_v3, 5  ;;  %v21640_v3 = vsel %vm2636_vm2, %v10232_v41, %v10233_v54  ;;  %v19855_v41 = vld [vmem:[#allocation5 + $0x20c8] ss:$16 sps:$4 sm:$0xff]   ;;  %v19860_v54 = vld [vmem:[#allocation5 + $0x8ec] ss:$16 sps:$4 sm:$0xff]  }
 0x4db   : > { %v9202_v58 = vor.u32 %v9201_v9, %v9198_v31  ;;  %v19837_v31 = vld [vmem:[#allocation5 + $0x2068] ss:$16 sps:$4 sm:$0xff]   ;;  %v19842_v9 = vld [vmem:[#allocation5 + $0x88c] ss:$16 sps:$4 sm:$0xff]  }
 0x4dc   : > { %9092 = vmatpush1.bf16.msra.mxu1 %v19792_v39  ;;  %v12676_v39 = vrot.slane %v12674_v19, 2 }
 0x4dd   : > { %12638 = vmatpush1.bf16.msra.mxu0 %v19795_v42  ;;  %9093 = vmatprep.subr.bf16.mxu1 %v19800_v44  ;;  %v12679_v42 = vrot.slane %v12677_v20, 3  ;;  %v12687_v44 = vrot.slane %v12685_v21, 3  ;;  %v19825_v21 = vld [vmem:[#allocation5 + $0x2028] ss:$16 sps:$4 sm:$0xff]  }
 0x4de   : > { %12639 = vmatprep.subr.bf16.mxu0 %v19803_v7  ;;  %v19810_v7 = vld [vmem:[#allocation5 + $0x3e8] ss:$16 sps:$4 sm:$0xff]  }
 0x4df   : > { %v12688_v12 = vor.u32 %v12687_v44, %v12684_v47  ;;  %v19851_v47 = vld [vmem:[#allocation5 + $0x20ac] ss:$16 sps:$4 sm:$0xff]   ;;  %v19846_v44 = vld [vmem:[#allocation5 + $0x8a8] ss:$16 sps:$4 sm:$0xff]  }
 0x4e0   : > { %9094 = vmatpush1.bf16.msra.mxu1 %v19798_v50  ;;  %v19813_v50 = vld [vmem:[#allocation5 + $0x27e8] ss:$16 sps:$4 sm:$0xff]  }
 0x4e1   : > { %12640 = vmatpush1.bf16.msra.mxu0 %v19801_v51  ;;  %9095 = vmatprep.subr.bf16.mxu1 %v19806_v63  ;;  %v8673_v51 = vor.u32 %v8672_v6, %v8669_v61  ;;  %v9210_v63 = vor.u32 %v9209_v38, %v9206_v34  ;;  %v19833_v61 = vld [vmem:[#allocation5 + $0x204c] ss:$16 sps:$4 sm:$0xff]   ;;  %v19828_v6 = vld [vmem:[#allocation5 + $0x848] ss:$16 sps:$4 sm:$0xff]  }
 0x4e2   : > { %12641 = vmatprep.subr.bf16.mxu0 %v19809_v4  ;;  %v12680_v4 = vor.u32 %v12679_v42, %v12676_v39  ;;  %v19845_v34 = vld [vmem:[#allocation5 + $0x208c] ss:$16 sps:$4 sm:$0xff]   ;;  %v19840_v38 = vld [vmem:[#allocation5 + $0x888] ss:$16 sps:$4 sm:$0xff]  }
 0x4e3   : > { %v21637_v17 = vsel %vm1037_vm3, %v8673_v51, %v8681_v52  ;;  %v21645_v19 = vsel %vm1585_vm1, %v9202_v58, %v9210_v63  ;;  %v19843_v39 = vld [vmem:[#allocation5 + $0x2088] ss:$16 sps:$4 sm:$0xff]   ;;  %v19848_v42 = vld [vmem:[#allocation5 + $0x8ac] ss:$16 sps:$4 sm:$0xff]  }
 0x4e4   : > { %9096 = vmatpush1.bf16.msra.mxu1 %v19804_v18  ;;  %v19827_v18 = vld [vmem:[#allocation5 + $0x202c] ss:$16 sps:$4 sm:$0xff]   ;;  %v12689_v20 = vsel %vm5074_vm4, %v12680_v4, %v12688_v12  ;;  %v19852_v52 = vld [vmem:[#allocation5 + $0x8c8] ss:$16 sps:$4 sm:$0xff]  }
 0x4e5   : > { %12642 = vmatpush1.bf16.msra.mxu0 %v19807_v29  ;;  %9097 = vmatprep.subr.bf16.mxu1 %v19812_v25  ;;  %v19830_v29 = vld [vmem:[#allocation5 + $0x84c] ss:$16 sps:$4 sm:$0xff]   ;;  %v19861_v58 = vld [vmem:[#allocation5 + $0x20e8] ss:$16 sps:$4 sm:$0xff]  }
 0x4e6   : > { %12643 = vmatprep.subr.bf16.mxu0 %v19815_v0  ;;  %v19839_v25 = vld [vmem:[#allocation5 + $0x206c] ss:$16 sps:$4 sm:$0xff]   ;;  %v19834_v0 = vld [vmem:[#allocation5 + $0x868] ss:$16 sps:$4 sm:$0xff]  }
 0x4e7   : > { %v19857_v51 = vld [vmem:[#allocation5 + $0x20cc] ss:$16 sps:$4 sm:$0xff]   ;;  %v19864_v12 = vld [vmem:[#allocation5 + $0x908] ss:$16 sps:$4 sm:$0xff]  }
 0x4e8   : > { %9098 = vmatpush1.bf16.msra.mxu1 %v19810_v7  ;;  %v19849_v7 = vld [vmem:[#allocation5 + $0x20a8] ss:$16 sps:$4 sm:$0xff]   ;;  %v19866_v63 = vld [vmem:[#allocation5 + $0x90c] ss:$16 sps:$4 sm:$0xff]  }
 0x4e9   : > { %12644 = vmatpush1.bf16.msra.mxu0 %v19813_v50  ;;  %9570 = vmatprep.subr.bf16.mxu1 %v19818_v49  ;;  %v19854_v50 = vld [vmem:[#allocation5 + $0x8cc] ss:$16 sps:$4 sm:$0xff]  }
 0x4ea   : > { %13048 = vmatprep.subr.bf16.mxu0 %v19821_v14  ;;  %v19863_v49 = vld [vmem:[#allocation5 + $0x20ec] ss:$16 sps:$4 sm:$0xff]   ;;  %v19858_v14 = vld [vmem:[#allocation5 + $0x8e8] ss:$16 sps:$4 sm:$0xff]  }
 0x4eb   : > { %9100 = vmatmul.mubr.bf16.vlgmr.msra.gmra.mrb[8].mxu1 %v21637_v17  ;;  %v19869_v4 = vld [vmem:[#allocation5 + $0x210c] ss:$16 sps:$4 sm:$0xff]  }
 0x4ec   : > { %12646 = vmatmul.mubr.bf16.vlgmr.msra.gmra.mrb[8].mxu0 %v21640_v3  ;;  %9571 = vmatpush1.bf16.msra.mxu1 %v19816_v15  ;;  %v19867_v15 = vld [vmem:[#allocation5 + $0x2108] ss:$16 sps:$4 sm:$0xff]  }
 0x4ed   : > { %13049 = vmatpush1.bf16.msra.mxu0 %v19819_v16  ;;  %9572 = vmatprep.subr.bf16.mxu1 %v19824_v59  ;;  %v19872_v16 = vld [vmem:[#allocation5 + $0x92c] ss:$16 sps:$4 sm:$0xff]  }
 0x4ee   : > { %13050 = vmatprep.subr.bf16.mxu0 %v19827_v18  ;;  %9602 = vmatprep.mubr.bf16.mxu1 %v21645_v19  ;;  %v19875_v59 = vld [vmem:[#allocation5 + $0x212c] ss:$16 sps:$4 sm:$0xff]   ;;  %v19870_v18 = vld [vmem:[#allocation5 + $0x928] ss:$16 sps:$4 sm:$0xff]  }
 0x4ef   : > { %13080 = vmatprep.mubr.bf16.mxu0 %v12689_v20  ;;  %v19873_v20 = vld [vmem:[#allocation5 + $0x2128] ss:$16 sps:$4 sm:$0xff]  }
 0x4f0   : > { %9573 = vmatpush1.bf16.msra.mxu1 %v19822_v13  ;;  %v19878_v13 = vld [vmem:[#allocation5 + $0x94c] ss:$16 sps:$4 sm:$0xff]  }
 0x4f1   : > { %13051 = vmatpush1.bf16.msra.mxu0 %v19825_v21  ;;  %9574 = vmatprep.subr.bf16.mxu1 %v19830_v29  ;;  %v19881_v21 = vld [vmem:[#allocation5 + $0x214c] ss:$16 sps:$4 sm:$0xff]   ;;  %v19876_v29 = vld [vmem:[#allocation5 + $0x948] ss:$16 sps:$4 sm:$0xff]  }
 0x4f2   : > { %13052 = vmatprep.subr.bf16.mxu0 %v19833_v61  ;;  %v19879_v61 = vld [vmem:[#allocation5 + $0x2148] ss:$16 sps:$4 sm:$0xff]  }
 0x4f4   : > { %9575 = vmatpush1.bf16.msra.mxu1 %v19828_v6  ;;  %v19884_v6 = vld [vmem:[#allocation5 + $0x96c] ss:$16 sps:$4 sm:$0xff]  }
 0x4f5   : > { %13053 = vmatpush1.bf16.msra.mxu0 %v19831_v24  ;;  %9576 = vmatprep.subr.bf16.mxu1 %v19836_v53  ;;  %v19887_v24 = vld [vmem:[#allocation5 + $0x216c] ss:$16 sps:$4 sm:$0xff]   ;;  %v19882_v53 = vld [vmem:[#allocation5 + $0x968] ss:$16 sps:$4 sm:$0xff]  }
 0x4f6   : > { %13054 = vmatprep.subr.bf16.mxu0 %v19839_v25  ;;  %v19885_v25 = vld [vmem:[#allocation5 + $0x2168] ss:$16 sps:$4 sm:$0xff]  }
 0x4f8   : > { %9577 = vmatpush1.bf16.msra.mxu1 %v19834_v0  ;;  %v19890_v0 = vld [vmem:[#allocation5 + $0x98c] ss:$16 sps:$4 sm:$0xff]  }
 0x4f9   : > { %13055 = vmatpush1.bf16.msra.mxu0 %v19837_v31  ;;  %9578 = vmatprep.subr.bf16.mxu1 %v19842_v9  ;;  %v19893_v31 = vld [vmem:[#allocation5 + $0x218c] ss:$16 sps:$4 sm:$0xff]   ;;  %v9110_v9 = vld [vmem:[#allocation3 + $0x20] sm:$0x1f] }
 0x4fa   : > { %13056 = vmatprep.subr.bf16.mxu0 %v19845_v34  ;;  %v19888_v34 = vld [vmem:[#allocation5 + $0x988] ss:$16 sps:$4 sm:$0xff]  }
 0x4fc   : > { %9579 = vmatpush1.bf16.msra.mxu1 %v19840_v38  ;;  %v19891_v38 = vld [vmem:[#allocation5 + $0x2188] ss:$16 sps:$4 sm:$0xff]  }
 0x4fd   : > { %13057 = vmatpush1.bf16.msra.mxu0 %v19843_v39  ;;  %9580 = vmatprep.subr.bf16.mxu1 %v19848_v42  ;;  %v19896_v39 = vld [vmem:[#allocation5 + $0x9ac] ss:$16 sps:$4 sm:$0xff]  }
 0x4fe   : > { %13058 = vmatprep.subr.bf16.mxu0 %v19851_v47  ;;  %v19899_v42 = vld [vmem:[#allocation5 + $0x21ac] ss:$16 sps:$4 sm:$0xff]   ;;  %v20977_v47 = vld [vmem:[#allocation3] sm:$0xf0] }
 0x500   : > { %9581 = vmatpush1.bf16.msra.mxu1 %v19846_v44  ;;  %v9179_v44 = vshrl.u32 %v20977_v47, 16 }
 0x501   : > { %13059 = vmatpush1.bf16.msra.mxu0 %v19849_v7  ;;  %9582 = vmatprep.subr.bf16.mxu1 %v19854_v50  ;;  %v9182_v7 = vshll.u32 %v20977_v47, 16  ;;  %v9187_v50 = vshrl.u32 %v9110_v9, 16  ;;  %v19908_v47 = vld [vmem:[#allocation5 + $0x9ec] ss:$16 sps:$4 sm:$0xff]  }
 0x502   : > { %13060 = vmatprep.subr.bf16.mxu0 %v19857_v51  ;;  %v9190_v51 = vshll.u32 %v9110_v9, 16  ;;  %v19903_v9 = vld [vmem:[#allocation5 + $0x21c8] ss:$16 sps:$4 sm:$0xff]  }
 0x504   : > { %9583 = vmatpush1.bf16.msra.mxu1 %v19852_v52  ;;  %v12118_v52 = vld [vmem:[#allocation3] sm:$0xfc] }
 0x505   : > { %13061 = vmatpush1.bf16.msra.mxu0 %v19855_v41  ;;  %9584 = vmatprep.subr.bf16.mxu1 %v19860_v54  ;;  %v19894_v41 = vld [vmem:[#allocation5 + $0x9a8] ss:$16 sps:$4 sm:$0xff]  }
 0x506   : > { %13062 = vmatprep.subr.bf16.mxu0 %v19863_v49  ;;  %v19897_v54 = vld [vmem:[#allocation5 + $0x21a8] ss:$16 sps:$4 sm:$0xff]   ;;  %v19902_v49 = vld [vmem:[#allocation5 + $0x9cc] ss:$16 sps:$4 sm:$0xff]  }
 0x508   : > { %9585 = vmatpush1.bf16.msra.mxu1 %v19858_v14  ;;  %v9113_v14 = vld [vmem:[#allocation3 + $0x38] sm:$0x1f] }
 0x509   : > { %13063 = vmatpush1.bf16.msra.mxu0 %v19861_v58  ;;  %9586 = vmatprep.subr.bf16.mxu1 %v19866_v63  ;;  %v12657_v58 = vshrl.u32 %v12118_v52, 16  ;;  %v12660_v63 = vshll.u32 %v12118_v52, 16 }
 0x50a   : > { %13064 = vmatprep.subr.bf16.mxu0 %v19869_v4  ;;  %v12665_v4 = vshrl.u32 %v21558_v35, 16 }
 0x50c   : > { %9587 = vmatpush1.bf16.msra.mxu1 %v19864_v12  ;;  %v12668_v12 = vshll.u32 %v21558_v35, 16  ;;  %v12719_v35 = vshll.u32 %v21561_v46, 16 }
 0x50d   : > { %13065 = vmatpush1.bf16.msra.mxu0 %v19867_v15  ;;  %9588 = vmatprep.subr.bf16.mxu1 %v19872_v16  ;;  %v12121_v15 = vld [vmem:[#allocation3 + $0x18] sm:$0xfc] }
 0x50e   : > { %13066 = vmatprep.subr.bf16.mxu0 %v19875_v59  ;;  %v19905_v16 = vld [vmem:[#allocation5 + $0x21cc] ss:$16 sps:$4 sm:$0xff]   ;;  %v9181_v59 = vrot.slane %v9179_v44, 4 }
 0x50f   : > { %v19911_v44 = vld [vmem:[#allocation5 + $0x21ec] ss:$16 sps:$4 sm:$0xff]  }
 0x510   : > { %9589 = vmatpush1.bf16.msra.mxu1 %v19870_v18  ;;  %v9184_v18 = vrot.slane %v9182_v7, 5 }
 0x511   : > { %13067 = vmatpush1.bf16.msra.mxu0 %v19873_v20  ;;  %9590 = vmatprep.subr.bf16.mxu1 %v19878_v13  ;;  %v9189_v20 = vrot.slane %v9187_v50, 4  ;;  %v9192_v13 = vrot.slane %v9190_v51, 5 }
 0x512   : > { %13068 = vmatprep.subr.bf16.mxu0 %v19881_v21  ;;  %v20978_v21 = vld [vmem:[#allocation3 + $0x18] sm:$0xf0]  ;;  %v9185_v7 = vor.u32 %v9184_v18, %v9181_v59 }
 0x514   : > { %9591 = vmatpush1.bf16.msra.mxu1 %v19876_v29  ;;  %v9230_v29 = vshrl.u32 %v20978_v21, 16 }
 0x515   : > { %13069 = vmatpush1.bf16.msra.mxu0 %v19879_v61  ;;  %9592 = vmatprep.subr.bf16.mxu1 %v19884_v6  ;;  %v9233_v61 = vshll.u32 %v20978_v21, 16  ;;  %v9238_v6 = vshrl.u32 %v9113_v14, 16 }
 0x516   : > { %13070 = vmatprep.subr.bf16.mxu0 %v19887_v24  ;;  %v9241_v24 = vshll.u32 %v9113_v14, 16  ;;  %v9232_v50 = vrot.slane %v9230_v29, 4 }
 0x517   : > { %v9235_v51 = vrot.slane %v9233_v61, 5  ;;  %v9240_v52 = vrot.slane %v9238_v6, 4  ;;  %v19912_v61 = vld [vmem:[#allocation5 + $0xa08] ss:$16 sps:$4 sm:$0xff]  }
 0x518   : > { %9593 = vmatpush1.bf16.msra.mxu1 %v19882_v53  ;;  %v19900_v53 = vld [vmem:[#allocation5 + $0x9c8] ss:$16 sps:$4 sm:$0xff]   ;;  %v9243_v14 = vrot.slane %v9241_v24, 5 }
 0x519   : > { %13071 = vmatpush1.bf16.msra.mxu0 %v19885_v25  ;;  %9594 = vmatprep.subr.bf16.mxu1 %v19890_v0  ;;  %v12708_v25 = vshrl.u32 %v12121_v15, 16  ;;  %v12711_v0 = vshll.u32 %v12121_v15, 16  ;;  %v19915_v6 = vld [vmem:[#allocation5 + $0x2208] ss:$16 sps:$4 sm:$0xff]  }
 0x51a   : > { %13072 = vmatprep.subr.bf16.mxu0 %v19893_v31  ;;  %v12716_v31 = vshrl.u32 %v21561_v46, 16  ;;  %v12721_v46 = vrot.slane %v12719_v35, 3  ;;  %v9244_v59 = vor.u32 %v9243_v14, %v9240_v52  ;;  %v19926_v35 = vld [vmem:[#allocation5 + $0xa4c] ss:$16 sps:$4 sm:$0xff]   ;;  %v19939_v52 = vld [vmem:[#allocation5 + $0x2288] ss:$16 sps:$4 sm:$0xff]  }
 0x51b   : > { %v12710_v15 = vrot.slane %v12708_v25, 2  ;;  %v12713_v21 = vrot.slane %v12711_v0, 3  ;;  %v19918_v0 = vld [vmem:[#allocation5 + $0xa28] ss:$16 sps:$4 sm:$0xff]  }
 0x51c   : > { %9595 = vmatpush1.bf16.msra.mxu1 %v19888_v34  ;;  %v12659_v34 = vrot.slane %v12657_v58, 2  ;;  %v12718_v10 = vrot.slane %v12716_v31, 2  ;;  %v9193_v58 = vor.u32 %v9192_v13, %v9189_v20  ;;  %v19920_v20 = vld [vmem:[#allocation5 + $0xa2c] ss:$16 sps:$4 sm:$0xff]   ;;  %v19921_v31 = vld [vmem:[#allocation5 + $0x2228] ss:$16 sps:$4 sm:$0xff]  }
 0x51d   : > { %13073 = vmatpush1.bf16.msra.mxu0 %v19891_v38  ;;  %9596 = vmatprep.subr.bf16.mxu1 %v19896_v39  ;;  %v12662_v38 = vrot.slane %v12660_v63, 3  ;;  %v12667_v39 = vrot.slane %v12665_v4, 2  ;;  %v12714_v18 = vor.u32 %v12713_v21, %v12710_v15  ;;  %v19923_v13 = vld [vmem:[#allocation5 + $0x222c] ss:$16 sps:$4 sm:$0xff]   ;;  %v8006_v14 = vld [vmem:[#allocation8 + $0x8] sm:$0x3] }
 0x51e   : > { %13074 = vmatprep.subr.bf16.mxu0 %v19899_v42  ;;  %v12670_v42 = vrot.slane %v12668_v12, 3  ;;  %v19917_v12 = vld [vmem:[#allocation5 + $0x220c] ss:$16 sps:$4 sm:$0xff]   ;;  %v12722_v29 = vor.u32 %v12721_v46, %v12718_v10  ;;  %v21654_v24 = vsel %vm1585_vm1, %v9185_v7, %v9193_v58  ;;  %v8011_v46 = vrot.slane %v8006_v14, %v21582_v56  ;;  %v19945_v58 = vld [vmem:[#allocation5 + $0x22a8] ss:$16 sps:$4 sm:$0xff]  }
 0x51f   : > { %v12663_v63 = vor.u32 %v12662_v38, %v12659_v34  ;;  %v19924_v34 = vld [vmem:[#allocation5 + $0xa48] ss:$16 sps:$4 sm:$0xff]   ;;  %v19938_v7 = vld [vmem:[#allocation5 + $0xa8c] ss:$16 sps:$4 sm:$0xff]  }
 0x520   : > { %9597 = vmatpush1.bf16.msra.mxu1 %v19894_v41  ;;  %v19906_v41 = vld [vmem:[#allocation5 + $0x9e8] ss:$16 sps:$4 sm:$0xff]   ;;  %v12671_v4 = vor.u32 %v12670_v42, %v12667_v39  ;;  %v12723_v10 = vsel %vm5074_vm4, %v12714_v18, %v12722_v29  ;;  %v19932_v39 = vld [vmem:[#allocation5 + $0xa6c] ss:$16 sps:$4 sm:$0xff]  }
 0x521   : > { %13075 = vmatpush1.bf16.msra.mxu0 %v19897_v54  ;;  %9598 = vmatprep.subr.bf16.mxu1 %v19902_v49  ;;  %v19909_v54 = vld [vmem:[#allocation5 + $0x21e8] ss:$16 sps:$4 sm:$0xff]   ;;  %v19914_v49 = vld [vmem:[#allocation5 + $0xa0c] ss:$16 sps:$4 sm:$0xff]  }
 0x522   : > { %13076 = vmatprep.subr.bf16.mxu0 %v19905_v16  ;;  %v9236_v16 = vor.u32 %v9235_v51, %v9232_v50  ;;  %v19927_v38 = vld [vmem:[#allocation5 + $0x2248] ss:$16 sps:$4 sm:$0xff]   ;;  %v19935_v42 = vld [vmem:[#allocation5 + $0x226c] ss:$16 sps:$4 sm:$0xff]  }
 0x523   : > { %v19941_v50 = vld [vmem:[#allocation5 + $0x228c] ss:$16 sps:$4 sm:$0xff]   ;;  %v19936_v51 = vld [vmem:[#allocation5 + $0xa88] ss:$16 sps:$4 sm:$0xff]  }
 0x524   : > { %9599 = vmatpush1.bf16.msra.mxu1 %v19900_v53  ;;  %v12672_v53 = vsel %vm5074_vm4, %v12663_v63, %v12671_v4  ;;  %v21659_v25 = vsel %vm1585_vm1, %v9236_v16, %v9244_v59  ;;  %v19944_v15 = vld [vmem:[#allocation5 + $0xaac] ss:$16 sps:$4 sm:$0xff]   ;;  %v19948_v29 = vld [vmem:[#allocation5 + $0xac8] ss:$16 sps:$4 sm:$0xff]  }
 0x525   : > { %13077 = vmatpush1.bf16.msra.mxu0 %v19903_v9  ;;  %9600 = vmatprep.subr.bf16.mxu1 %v19908_v47  ;;  %v19929_v9 = vld [vmem:[#allocation5 + $0x224c] ss:$16 sps:$4 sm:$0xff]   ;;  %v19930_v47 = vld [vmem:[#allocation5 + $0xa68] ss:$16 sps:$4 sm:$0xff]  }
 0x526   : > { %13078 = vmatprep.subr.bf16.mxu0 %v19911_v44  ;;  %v19933_v44 = vld [vmem:[#allocation5 + $0x2268] ss:$16 sps:$4 sm:$0xff]   ;;  %v19947_v21 = vld [vmem:[#allocation5 + $0x22ac] ss:$16 sps:$4 sm:$0xff]  }
 0x527   : > { %v19950_v63 = vld [vmem:[#allocation5 + $0xacc] ss:$16 sps:$4 sm:$0xff]  }
 0x528   : > { %9601 = vmatpush1.bf16.msra.mxu1 %v19906_v41  ;;  %v8015_v41 = vrot.slane %v8006_v14, %v21584_v48  ;;  %v19953_v4 = vld [vmem:[#allocation5 + $0x22cc] ss:$16 sps:$4 sm:$0xff]   ;;  %v19984_v14 = vld [vmem:[#allocation5 + $0xb88] ss:$16 sps:$4 sm:$0xff]  }
 0x529   : > { %13079 = vmatpush1.bf16.msra.mxu0 %v19909_v54  ;;  %9613 = vmatprep.subr.bf16.mxu1 %v19914_v49  ;;  %v19942_v54 = vld [vmem:[#allocation5 + $0xaa8] ss:$16 sps:$4 sm:$0xff]  }
 0x52a   : > { %13091 = vmatprep.subr.bf16.mxu0 %v19917_v12 }
 0x52b   : > { %9603 = vmatmul.mubr.bf16.vlgmr.msra.gmra.mrb[8].mxu1 %v21654_v24 }
 0x52c   : > { %13081 = vmatmul.mubr.bf16.vlgmr.msra.gmra.mrb[8].mxu0 %v12672_v53  ;;  %9614 = vmatpush1.bf16.msra.mxu1 %v19912_v61  ;;  %v19951_v61 = vld [vmem:[#allocation5 + $0x22c8] ss:$16 sps:$4 sm:$0xff]  }
 0x52d   : > { %13092 = vmatpush1.bf16.msra.mxu0 %v19915_v6  ;;  %9615 = vmatprep.subr.bf16.mxu1 %v19920_v20 }
 0x52e   : > { %13093 = vmatprep.subr.bf16.mxu0 %v19923_v13  ;;  %9645 = vmatprep.mubr.bf16.mxu1 %v21659_v25  ;;  %v19956_v13 = vld [vmem:[#allocation5 + $0xaec] ss:$16 sps:$4 sm:$0xff]  }
 0x52f   : > { %13123 = vmatprep.mubr.bf16.mxu0 %v12723_v10  ;;  %v19959_v10 = vld [vmem:[#allocation5 + $0x22ec] ss:$16 sps:$4 sm:$0xff]  }
 0x530   : > { %9616 = vmatpush1.bf16.msra.mxu1 %v19918_v0 }
 0x531   : > { %13094 = vmatpush1.bf16.msra.mxu0 %v19921_v31  ;;  %9617 = vmatprep.subr.bf16.mxu1 %v19926_v35 }
 0x532   : > { %13095 = vmatprep.subr.bf16.mxu0 %v19929_v9  ;;  %v19957_v9 = vld [vmem:[#allocation5 + $0x22e8] ss:$16 sps:$4 sm:$0xff]  }
 0x534   : > { %9618 = vmatpush1.bf16.msra.mxu1 %v19924_v34  ;;  %v19974_v34 = vld [vmem:[#allocation5 + $0xb4c] ss:$16 sps:$4 sm:$0xff]  }
 0x535   : > { %13096 = vmatpush1.bf16.msra.mxu0 %v19927_v38  ;;  %9619 = vmatprep.subr.bf16.mxu1 %v19932_v39  ;;  %v19977_v38 = vld [vmem:[#allocation5 + $0x234c] ss:$16 sps:$4 sm:$0xff]   ;;  %v19972_v39 = vld [vmem:[#allocation5 + $0xb48] ss:$16 sps:$4 sm:$0xff]  }
 0x536   : > { %13097 = vmatprep.subr.bf16.mxu0 %v19935_v42  ;;  %v19975_v42 = vld [vmem:[#allocation5 + $0x2348] ss:$16 sps:$4 sm:$0xff]  }
 0x538   : > { %9620 = vmatpush1.bf16.msra.mxu1 %v19930_v47  ;;  %v19980_v47 = vld [vmem:[#allocation5 + $0xb6c] ss:$16 sps:$4 sm:$0xff]  }
 0x539   : > { %13098 = vmatpush1.bf16.msra.mxu0 %v19933_v44  ;;  %9621 = vmatprep.subr.bf16.mxu1 %v19938_v7  ;;  %v19983_v44 = vld [vmem:[#allocation5 + $0x236c] ss:$16 sps:$4 sm:$0xff]   ;;  %v19978_v7 = vld [vmem:[#allocation5 + $0xb68] ss:$16 sps:$4 sm:$0xff]  }
 0x53a   : > { %13099 = vmatprep.subr.bf16.mxu0 %v19941_v50  ;;  %v19981_v50 = vld [vmem:[#allocation5 + $0x2368] ss:$16 sps:$4 sm:$0xff]  }
 0x53c   : > { %9622 = vmatpush1.bf16.msra.mxu1 %v19936_v51  ;;  %v19986_v51 = vld [vmem:[#allocation5 + $0xb8c] ss:$16 sps:$4 sm:$0xff]  }
 0x53d   : > { %13100 = vmatpush1.bf16.msra.mxu0 %v19939_v52  ;;  %9623 = vmatprep.subr.bf16.mxu1 %v19944_v15  ;;  %v19989_v52 = vld [vmem:[#allocation5 + $0x238c] ss:$16 sps:$4 sm:$0xff]   ;;  %v19987_v15 = vld [vmem:[#allocation5 + $0x2388] ss:$16 sps:$4 sm:$0xff]  }
 0x53e   : > { %13101 = vmatprep.subr.bf16.mxu0 %v19947_v21  ;;  %v9112_v21 = vld [vmem:[#allocation3 + $0x30] sm:$0x1f] }
 0x53f   : > { %v7992_v49 = vpop.f32.mrb[4].mxu0 }
 0x540   : > { %v8018_v12 = vadd.f32 %v8011_v46, %v7992_v49  ;;  %v7994_v16 = vpop.f32.mrb[5].mxu0  ;;  %9624 = vmatpush1.bf16.msra.mxu1 %v19942_v54  ;;  %v12120_v54 = vld [vmem:[#allocation3 + $0x10] sm:$0xfc] }
 0x541   : > { %v8019_v59 = vadd.f32 %v8015_v41, %v7994_v16  ;;  %v7996_v18 = vpop.f32.mrb[6].mxu0  ;;  %13102 = vmatpush1.bf16.msra.mxu0 %v19945_v58  ;;  %9625 = vmatprep.subr.bf16.mxu1 %v19950_v63  ;;  %v19990_v58 = vld [vmem:[#allocation5 + $0xba8] ss:$16 sps:$4 sm:$0xff]   ;;  %v20979_v63 = vld [vmem:[#allocation3 + $0x10] sm:$0xf0]  ;;  %v9224_v16 = vshll.u32 %v9112_v21, 16 }
 0x542   : > { %v8022_v6 = vmax.f32 %v4530_v5, %v8018_v12  ;;  %v8020_v53 = vadd.f32 %v8011_v46, %v7996_v18  ;;  %v7998_v20 = vpop.f32.mrb[7].mxu0  ;;  %13103 = vmatprep.subr.bf16.mxu0 %v19953_v4  ;;  %v19954_v5 = vld [vmem:[#allocation5 + $0xae8] ss:$16 sps:$4 sm:$0xff]   ;;  %v19992_v46 = vld [vmem:[#allocation5 + $0xbac] ss:$16 sps:$4 sm:$0xff]   ;;  %v9213_v4 = vshrl.u32 %v20979_v63, 16 }
 0x543   : > { %v8023_v0 = vmax.f32 %v4531_v26, %v8019_v59  ;;  %v8021_v31 = vadd.f32 %v8015_v41, %v7998_v20  ;;  %v19960_v26 = vld [vmem:[#allocation5 + $0xb08] ss:$16 sps:$4 sm:$0xff]   ;;  %v19995_v41 = vld [vmem:[#allocation5 + $0x23ac] ss:$16 sps:$4 sm:$0xff]   ;;  %v9216_v49 = vshll.u32 %v20979_v63, 16  ;;  %v9221_v12 = vshrl.u32 %v9112_v21, 16 }
 0x544   : > { %8026 = vst [vmem:[%s21330_s6] sm:$0xff] %v8022_v6  ;;  %v8024_v35 = vmax.f32 %v4532_v32, %v8020_v53  ;;  %9626 = vmatpush1.bf16.msra.mxu1 %v19948_v29  ;;  %v19971_v32 = vld [vmem:[#allocation5 + $0x232c] ss:$16 sps:$4 sm:$0xff]   ;;  %v19993_v59 = vld [vmem:[#allocation5 + $0x23a8] ss:$16 sps:$4 sm:$0xff]   ;;  %v12691_v18 = vshrl.u32 %v12120_v54, 16  ;;  %v12694_v29 = vshll.u32 %v12120_v54, 16 }
 0x545   : > { %8027 = vst [vmem:[%s21330_s6 + $0x8] sm:$0xff] %v8023_v0  ;;  %v8025_v23 = vmax.f32 %v21859_v40, %v8021_v31  ;;  %13104 = vmatpush1.bf16.msra.mxu0 %v19951_v61  ;;  %9627 = vmatprep.subr.bf16.mxu1 %v19956_v13  ;;  %v12699_v61 = vshrl.u32 %v21632_v27, 16  ;;  %v12702_v6 = vshll.u32 %v21632_v27, 16  ;;  %v19998_v53 = vld [vmem:[#allocation5 + $0xbcc] ss:$16 sps:$4 sm:$0xff]   ;;  %v9218_v0 = vrot.slane %v9216_v49, 5 }
 0x546   : > { %8028 = vst [vmem:[%s21330_s6 + $0x20] sm:$0xff] %v8024_v35  ;;  %13105 = vmatprep.subr.bf16.mxu0 %v19959_v10  ;;  %v20001_v20 = vld [vmem:[#allocation5 + $0x23cc] ss:$16 sps:$4 sm:$0xff]   ;;  %v19996_v13 = vld [vmem:[#allocation5 + $0xbc8] ss:$16 sps:$4 sm:$0xff]   ;;  %v9215_v10 = vrot.slane %v9213_v4, 4 }
 0x547   : > { %8029 = vst [vmem:[%s21330_s6 + $0x28] sm:$0xff] %v8025_v23  ;;  %v9223_v31 = vrot.slane %v9221_v12, 4  ;;  %v9226_v35 = vrot.slane %v9224_v16, 5  ;;  %v19999_v40 = vld [vmem:[#allocation5 + $0x23c8] ss:$16 sps:$4 sm:$0xff]   ;;  %v12693_v23 = vrot.slane %v12691_v18, 2 }
 0x548   : > { %9628 = vmatpush1.bf16.msra.mxu1 %v19954_v5  ;;  %v12696_v5 = vrot.slane %v12694_v29, 3  ;;  %v20007_v27 = vld [vmem:[#allocation5 + $0x23ec] ss:$16 sps:$4 sm:$0xff]   ;;  %v20020_v21 = vld [vmem:[#allocation5 + $0x1048] ss:$16 sps:$4 sm:$0xff]  }
 0x549   : > { %13106 = vmatpush1.bf16.msra.mxu0 %v19957_v9  ;;  %9629 = vmatprep.subr.bf16.mxu1 %v19962_v55  ;;  %v12701_v9 = vrot.slane %v12699_v61, 2  ;;  %v12704_v55 = vrot.slane %v12702_v6, 3  ;;  %v20031_v54 = vld [vmem:[#allocation5 + $0x286c] ss:$16 sps:$4 sm:$0xff]   ;;  %v20029_v63 = vld [vmem:[#allocation5 + $0x2868] ss:$16 sps:$4 sm:$0xff]  }
 0x54a   : > { %13107 = vmatprep.subr.bf16.mxu0 %v19965_v57  ;;  %v20004_v57 = vld [vmem:[#allocation5 + $0xbec] ss:$16 sps:$4 sm:$0xff]   ;;  %v20032_v12 = vld [vmem:[#allocation5 + $0x1088] ss:$16 sps:$4 sm:$0xff]  }
 0x54b   : > { %v20034_v4 = vld [vmem:[#allocation5 + $0x108c] ss:$16 sps:$4 sm:$0xff]   ;;  %v20038_v18 = vld [vmem:[#allocation5 + $0x10a8] ss:$16 sps:$4 sm:$0xff]  }
 0x54c   : > { %9630 = vmatpush1.bf16.msra.mxu1 %v19960_v26  ;;  %v9219_v26 = vor.u32 %v9218_v0, %v9215_v10  ;;  %v20037_v49 = vld [vmem:[#allocation5 + $0x288c] ss:$16 sps:$4 sm:$0xff]   ;;  %v20041_v29 = vld [vmem:[#allocation5 + $0x28a8] ss:$16 sps:$4 sm:$0xff]  }
 0x54d   : > { %13108 = vmatpush1.bf16.msra.mxu0 %v19963_v1  ;;  %9631 = vmatprep.subr.bf16.mxu1 %v19968_v62  ;;  %v20002_v1 = vld [vmem:[#allocation5 + $0xbe8] ss:$16 sps:$4 sm:$0xff]   ;;  %v20040_v16 = vld [vmem:[#allocation5 + $0x10ac] ss:$16 sps:$4 sm:$0xff]  }
 0x54e   : > { %13109 = vmatprep.subr.bf16.mxu0 %v19971_v32  ;;  %v20005_v62 = vld [vmem:[#allocation5 + $0x23e8] ss:$16 sps:$4 sm:$0xff]   ;;  %v9227_v32 = vor.u32 %v9226_v35, %v9223_v31  ;;  %v20046_v61 = vld [vmem:[#allocation5 + $0x10cc] ss:$16 sps:$4 sm:$0xff]  }
 0x54f   : > { %v20049_v6 = vld [vmem:[#allocation5 + $0x28cc] ss:$16 sps:$4 sm:$0xff]   ;;  %v20050_v0 = vld [vmem:[#allocation5 + $0x10e8] ss:$16 sps:$4 sm:$0xff]  }
 0x550   : > { %9632 = vmatpush1.bf16.msra.mxu1 %v19966_v22  ;;  %v12697_v22 = vor.u32 %v12696_v5, %v12693_v23  ;;  %v20055_v10 = vld [vmem:[#allocation5 + $0x28ec] ss:$16 sps:$4 sm:$0xff]   ;;  %v20053_v31 = vld [vmem:[#allocation5 + $0x28e8] ss:$16 sps:$4 sm:$0xff]  }
 0x551   : > { %13110 = vmatpush1.bf16.msra.mxu0 %v19969_v8  ;;  %9633 = vmatprep.subr.bf16.mxu1 %v19974_v34  ;;  %v12705_v8 = vor.u32 %v12704_v55, %v12701_v9  ;;  %v20010_v34 = vld [vmem:[#allocation5 + $0x100c] ss:$16 sps:$4 sm:$0xff]   ;;  %v20056_v23 = vld [vmem:[#allocation5 + $0x1108] ss:$16 sps:$4 sm:$0xff]  }
 0x552   : > { %13111 = vmatprep.subr.bf16.mxu0 %v19977_v38  ;;  %v20013_v38 = vld [vmem:[#allocation5 + $0x280c] ss:$16 sps:$4 sm:$0xff]   ;;  %v20059_v5 = vld [vmem:[#allocation5 + $0x2908] ss:$16 sps:$4 sm:$0xff]  }
 0x553   : > { %v20058_v35 = vld [vmem:[#allocation5 + $0x110c] ss:$16 sps:$4 sm:$0xff]  }
 0x554   : > { %9634 = vmatpush1.bf16.msra.mxu1 %v19972_v39  ;;  %v21684_v39 = vsel %vm1585_vm1, %v9219_v26, %v9227_v32  ;;  %v20064_v9 = vld [vmem:[#allocation5 + $0x112c] ss:$16 sps:$4 sm:$0xff]   ;;  %v20071_v32 = vld [vmem:[#allocation5 + $0x2948] ss:$16 sps:$4 sm:$0xff]  }
 0x555   : > { %13112 = vmatpush1.bf16.msra.mxu0 %v19975_v42  ;;  %9635 = vmatprep.subr.bf16.mxu1 %v19980_v47  ;;  %v20008_v42 = vld [vmem:[#allocation5 + $0x1008] ss:$16 sps:$4 sm:$0xff]   ;;  %v20067_v55 = vld [vmem:[#allocation5 + $0x292c] ss:$16 sps:$4 sm:$0xff]  }
 0x556   : > { %13113 = vmatprep.subr.bf16.mxu0 %v19983_v44  ;;  %v20011_v47 = vld [vmem:[#allocation5 + $0x2808] ss:$16 sps:$4 sm:$0xff]   ;;  %v12706_v44 = vsel %vm5074_vm4, %v12697_v22, %v12705_v8  ;;  %v20070_v26 = vld [vmem:[#allocation5 + $0x114c] ss:$16 sps:$4 sm:$0xff]  }
 0x557   : > { %v20076_v22 = vld [vmem:[#allocation5 + $0x116c] ss:$16 sps:$4 sm:$0xff]  }
 0x558   : > { %9636 = vmatpush1.bf16.msra.mxu1 %v19978_v7  ;;  %v20016_v7 = vld [vmem:[#allocation5 + $0x102c] ss:$16 sps:$4 sm:$0xff]  }
 0x559   : > { %13114 = vmatpush1.bf16.msra.mxu0 %v19981_v50  ;;  %9637 = vmatprep.subr.bf16.mxu1 %v19986_v51  ;;  %v20019_v50 = vld [vmem:[#allocation5 + $0x282c] ss:$16 sps:$4 sm:$0xff]   ;;  %v20014_v51 = vld [vmem:[#allocation5 + $0x1028] ss:$16 sps:$4 sm:$0xff]  }
 0x55a   : > { %13115 = vmatprep.subr.bf16.mxu0 %v19989_v52  ;;  %v20017_v52 = vld [vmem:[#allocation5 + $0x2828] ss:$16 sps:$4 sm:$0xff]   ;;  %v20079_v8 = vld [vmem:[#allocation5 + $0x296c] ss:$16 sps:$4 sm:$0xff]  }
 0x55c   : > { %9638 = vmatpush1.bf16.msra.mxu1 %v19984_v14  ;;  %v20022_v14 = vld [vmem:[#allocation5 + $0x104c] ss:$16 sps:$4 sm:$0xff]  }
 0x55d   : > { %13116 = vmatpush1.bf16.msra.mxu0 %v19987_v15  ;;  %9639 = vmatprep.subr.bf16.mxu1 %v19992_v46  ;;  %v20025_v15 = vld [vmem:[#allocation5 + $0x284c] ss:$16 sps:$4 sm:$0xff]   ;;  %v20023_v46 = vld [vmem:[#allocation5 + $0x2848] ss:$16 sps:$4 sm:$0xff]  }
 0x55e   : > { %13117 = vmatprep.subr.bf16.mxu0 %v19995_v41  ;;  %v20028_v41 = vld [vmem:[#allocation5 + $0x106c] ss:$16 sps:$4 sm:$0xff]  }
 0x560   : > { %9640 = vmatpush1.bf16.msra.mxu1 %v19990_v58  ;;  %v20026_v58 = vld [vmem:[#allocation5 + $0x1068] ss:$16 sps:$4 sm:$0xff]  }
 0x561   : > { %13118 = vmatpush1.bf16.msra.mxu0 %v19993_v59  ;;  %9641 = vmatprep.subr.bf16.mxu1 %v19998_v53  ;;  %v20043_v59 = vld [vmem:[#allocation5 + $0x28ac] ss:$16 sps:$4 sm:$0xff]   ;;  %v20044_v53 = vld [vmem:[#allocation5 + $0x10c8] ss:$16 sps:$4 sm:$0xff]  }
 0x562   : > { %13119 = vmatprep.subr.bf16.mxu0 %v20001_v20  ;;  %v20047_v20 = vld [vmem:[#allocation5 + $0x28c8] ss:$16 sps:$4 sm:$0xff]  }
 0x564   : > { %9642 = vmatpush1.bf16.msra.mxu1 %v19996_v13  ;;  %v20052_v13 = vld [vmem:[#allocation5 + $0x10ec] ss:$16 sps:$4 sm:$0xff]  }
 0x565   : > { %13120 = vmatpush1.bf16.msra.mxu0 %v19999_v40  ;;  %9643 = vmatprep.subr.bf16.mxu1 %v20004_v57  ;;  %v20061_v40 = vld [vmem:[#allocation5 + $0x290c] ss:$16 sps:$4 sm:$0xff]   ;;  %v20062_v57 = vld [vmem:[#allocation5 + $0x1128] ss:$16 sps:$4 sm:$0xff]  }
 0x566   : > { %13121 = vmatprep.subr.bf16.mxu0 %v20007_v27  ;;  %v20065_v27 = vld [vmem:[#allocation5 + $0x2928] ss:$16 sps:$4 sm:$0xff]  }
 0x568   : > { %9644 = vmatpush1.bf16.msra.mxu1 %v20002_v1  ;;  %v20073_v1 = vld [vmem:[#allocation5 + $0x294c] ss:$16 sps:$4 sm:$0xff]  }
 0x569   : > { %13122 = vmatpush1.bf16.msra.mxu0 %v20005_v62  ;;  %10132 = vmatprep.subr.bf16.mxu1 %v20010_v34  ;;  %v20068_v62 = vld [vmem:[#allocation5 + $0x1148] ss:$16 sps:$4 sm:$0xff]  }
 0x56a   : > { %13518 = vmatprep.subr.bf16.mxu0 %v20013_v38  ;;  %v20074_v34 = vld [vmem:[#allocation5 + $0x1168] ss:$16 sps:$4 sm:$0xff]  }
 0x56b   : > { %9646 = vmatmul.mubr.bf16.vlgmr.msra.gmra.mrb[8].mxu1 %v21684_v39  ;;  %v20077_v38 = vld [vmem:[#allocation5 + $0x2968] ss:$16 sps:$4 sm:$0xff]  }
 0x56c   : > { %13124 = vmatmul.mubr.bf16.vlgmr.msra.gmra.mrb[8].mxu0 %v12706_v44  ;;  %10133 = vmatpush1.bf16.msra.mxu1 %v20008_v42  ;;  %v20082_v42 = vld [vmem:[#allocation5 + $0x118c] ss:$16 sps:$4 sm:$0xff]   ;;  %v20080_v44 = vld [vmem:[#allocation5 + $0x1188] ss:$16 sps:$4 sm:$0xff]  }
 0x56d   : > { %13519 = vmatpush1.bf16.msra.mxu0 %v20011_v47  ;;  %10134 = vmatprep.subr.bf16.mxu1 %v20016_v7  ;;  %v20085_v47 = vld [vmem:[#allocation5 + $0x298c] ss:$16 sps:$4 sm:$0xff]   ;;  %v20083_v7 = vld [vmem:[#allocation5 + $0x2988] ss:$16 sps:$4 sm:$0xff]  }
 0x56e   : > { %13520 = vmatprep.subr.bf16.mxu0 %v20019_v50  ;;  %10164 = vmatprep.mubr.bf16.mxu1 %v21551_v45  ;;  %v20088_v50 = vld [vmem:[#allocation5 + $0x11ac] ss:$16 sps:$4 sm:$0xff]  }
 0x56f   : > { %13550 = vmatprep.mubr.bf16.mxu0 %v21551_v45  ;;  %v20035_v45 = vld [vmem:[#allocation5 + $0x2888] ss:$16 sps:$4 sm:$0xff]  }
 0x570   : > { %10135 = vmatpush1.bf16.msra.mxu1 %v20014_v51  ;;  %v20091_v51 = vld [vmem:[#allocation5 + $0x29ac] ss:$16 sps:$4 sm:$0xff]  }
 0x571   : > { %13521 = vmatpush1.bf16.msra.mxu0 %v20017_v52  ;;  %10136 = vmatprep.subr.bf16.mxu1 %v20022_v14  ;;  %v20086_v52 = vld [vmem:[#allocation5 + $0x11a8] ss:$16 sps:$4 sm:$0xff]  }
 0x572   : > { %13522 = vmatprep.subr.bf16.mxu0 %v20025_v15  ;;  %v20089_v14 = vld [vmem:[#allocation5 + $0x29a8] ss:$16 sps:$4 sm:$0xff]   ;;  %v20094_v15 = vld [vmem:[#allocation5 + $0x11cc] ss:$16 sps:$4 sm:$0xff]  }
 0x574   : > { %10137 = vmatpush1.bf16.msra.mxu1 %v20020_v21  ;;  %v20097_v21 = vld [vmem:[#allocation5 + $0x29cc] ss:$16 sps:$4 sm:$0xff]  }
 0x575   : > { %13523 = vmatpush1.bf16.msra.mxu0 %v20023_v46  ;;  %10138 = vmatprep.subr.bf16.mxu1 %v20028_v41  ;;  %v20092_v46 = vld [vmem:[#allocation5 + $0x11c8] ss:$16 sps:$4 sm:$0xff]  }
 0x576   : > { %13524 = vmatprep.subr.bf16.mxu0 %v20031_v54  ;;  %v20095_v41 = vld [vmem:[#allocation5 + $0x29c8] ss:$16 sps:$4 sm:$0xff]   ;;  %v20100_v54 = vld [vmem:[#allocation5 + $0x11ec] ss:$16 sps:$4 sm:$0xff]  }
 0x578   : > { %10139 = vmatpush1.bf16.msra.mxu1 %v20026_v58  ;;  %v20103_v58 = vld [vmem:[#allocation5 + $0x29ec] ss:$16 sps:$4 sm:$0xff]  }
 0x579   : > { %13525 = vmatpush1.bf16.msra.mxu0 %v20029_v63  ;;  %10140 = vmatprep.subr.bf16.mxu1 %v20034_v4  ;;  %v20098_v63 = vld [vmem:[#allocation5 + $0x11e8] ss:$16 sps:$4 sm:$0xff]  }
 0x57a   : > { %13526 = vmatprep.subr.bf16.mxu0 %v20037_v49  ;;  %v20101_v4 = vld [vmem:[#allocation5 + $0x29e8] ss:$16 sps:$4 sm:$0xff]   ;;  %v20106_v49 = vld [vmem:[#allocation5 + $0x120c] ss:$16 sps:$4 sm:$0xff]  }
 0x57c   : > { %10141 = vmatpush1.bf16.msra.mxu1 %v20032_v12  ;;  %v20109_v12 = vld [vmem:[#allocation5 + $0x2a0c] ss:$16 sps:$4 sm:$0xff]  }
 0x57d   : > { %13527 = vmatpush1.bf16.msra.mxu0 %v20035_v45  ;;  %10142 = vmatprep.subr.bf16.mxu1 %v20040_v16  ;;  %v20104_v45 = vld [vmem:[#allocation5 + $0x1208] ss:$16 sps:$4 sm:$0xff]  }
 0x57e   : > { %13528 = vmatprep.subr.bf16.mxu0 %v20043_v59  ;;  %v20107_v16 = vld [vmem:[#allocation5 + $0x2a08] ss:$16 sps:$4 sm:$0xff]   ;;  %v20112_v59 = vld [vmem:[#allocation5 + $0x122c] ss:$16 sps:$4 sm:$0xff]  }
 0x580   : > { %10143 = vmatpush1.bf16.msra.mxu1 %v20038_v18  ;;  %v20115_v18 = vld [vmem:[#allocation5 + $0x2a2c] ss:$16 sps:$4 sm:$0xff]  }
 0x581   : > { %13529 = vmatpush1.bf16.msra.mxu0 %v20041_v29  ;;  %10144 = vmatprep.subr.bf16.mxu1 %v20046_v61  ;;  %v20110_v29 = vld [vmem:[#allocation5 + $0x1228] ss:$16 sps:$4 sm:$0xff]  }
 0x582   : > { %13530 = vmatprep.subr.bf16.mxu0 %v20049_v6  ;;  %v20113_v61 = vld [vmem:[#allocation5 + $0x2a28] ss:$16 sps:$4 sm:$0xff]   ;;  %v20118_v6 = vld [vmem:[#allocation5 + $0x124c] ss:$16 sps:$4 sm:$0xff]  }
 0x584   : > { %10145 = vmatpush1.bf16.msra.mxu1 %v20044_v53  ;;  %v20121_v53 = vld [vmem:[#allocation5 + $0x2a4c] ss:$16 sps:$4 sm:$0xff]  }
 0x585   : > { %13531 = vmatpush1.bf16.msra.mxu0 %v20047_v20  ;;  %10146 = vmatprep.subr.bf16.mxu1 %v20052_v13  ;;  %v20116_v20 = vld [vmem:[#allocation5 + $0x1248] ss:$16 sps:$4 sm:$0xff]  }
 0x586   : > { %13532 = vmatprep.subr.bf16.mxu0 %v20055_v10  ;;  %v20119_v13 = vld [vmem:[#allocation5 + $0x2a48] ss:$16 sps:$4 sm:$0xff]   ;;  %v20124_v10 = vld [vmem:[#allocation5 + $0x126c] ss:$16 sps:$4 sm:$0xff]  }
 0x588   : > { %10147 = vmatpush1.bf16.msra.mxu1 %v20050_v0  ;;  %v20122_v0 = vld [vmem:[#allocation5 + $0x1268] ss:$16 sps:$4 sm:$0xff]  }
 0x589   : > { %13533 = vmatpush1.bf16.msra.mxu0 %v20053_v31  ;;  %10148 = vmatprep.subr.bf16.mxu1 %v20058_v35  ;;  %v20125_v31 = vld [vmem:[#allocation5 + $0x2a68] ss:$16 sps:$4 sm:$0xff]   ;;  %v20130_v35 = vld [vmem:[#allocation5 + $0x128c] ss:$16 sps:$4 sm:$0xff]  }
 0x58a   : > { %13534 = vmatprep.subr.bf16.mxu0 %v20061_v40  ;;  %v20133_v40 = vld [vmem:[#allocation5 + $0x2a8c] ss:$16 sps:$4 sm:$0xff]  }
 0x58c   : > { %10149 = vmatpush1.bf16.msra.mxu1 %v20056_v23  ;;  %v20128_v23 = vld [vmem:[#allocation5 + $0x1288] ss:$16 sps:$4 sm:$0xff]  }
 0x58d   : > { %13535 = vmatpush1.bf16.msra.mxu0 %v20059_v5  ;;  %10150 = vmatprep.subr.bf16.mxu1 %v20064_v9  ;;  %v20136_v5 = vld [vmem:[#allocation5 + $0x12ac] ss:$16 sps:$4 sm:$0xff]  }
 0x58e   : > { %13536 = vmatprep.subr.bf16.mxu0 %v20067_v55  ;;  %v20139_v9 = vld [vmem:[#allocation5 + $0x2aac] ss:$16 sps:$4 sm:$0xff]   ;;  %v20134_v55 = vld [vmem:[#allocation5 + $0x12a8] ss:$16 sps:$4 sm:$0xff]  }
 0x590   : > { %10151 = vmatpush1.bf16.msra.mxu1 %v20062_v57  ;;  %v20137_v57 = vld [vmem:[#allocation5 + $0x2aa8] ss:$16 sps:$4 sm:$0xff]  }
 0x591   : > { %13537 = vmatpush1.bf16.msra.mxu0 %v20065_v27  ;;  %10152 = vmatprep.subr.bf16.mxu1 %v20070_v26  ;;  %v20142_v27 = vld [vmem:[#allocation5 + $0x12cc] ss:$16 sps:$4 sm:$0xff]  }
 0x592   : > { %13538 = vmatprep.subr.bf16.mxu0 %v20073_v1  ;;  %v20145_v26 = vld [vmem:[#allocation5 + $0x2acc] ss:$16 sps:$4 sm:$0xff]   ;;  %v20140_v1 = vld [vmem:[#allocation5 + $0x12c8] ss:$16 sps:$4 sm:$0xff]  }
 0x594   : > { %10153 = vmatpush1.bf16.msra.mxu1 %v20068_v62  ;;  %v20143_v62 = vld [vmem:[#allocation5 + $0x2ac8] ss:$16 sps:$4 sm:$0xff]  }
 0x595   : > { %13539 = vmatpush1.bf16.msra.mxu0 %v20071_v32  ;;  %10154 = vmatprep.subr.bf16.mxu1 %v20076_v22  ;;  %v20148_v32 = vld [vmem:[#allocation5 + $0x12ec] ss:$16 sps:$4 sm:$0xff]  }
 0x596   : > { %13540 = vmatprep.subr.bf16.mxu0 %v20079_v8  ;;  %v20151_v22 = vld [vmem:[#allocation5 + $0x2aec] ss:$16 sps:$4 sm:$0xff]   ;;  %v20146_v8 = vld [vmem:[#allocation5 + $0x12e8] ss:$16 sps:$4 sm:$0xff]  }
 0x598   : > { %10155 = vmatpush1.bf16.msra.mxu1 %v20074_v34  ;;  %v20149_v34 = vld [vmem:[#allocation5 + $0x2ae8] ss:$16 sps:$4 sm:$0xff]  }
 0x599   : > { %13541 = vmatpush1.bf16.msra.mxu0 %v20077_v38  ;;  %10156 = vmatprep.subr.bf16.mxu1 %v20082_v42  ;;  %v20154_v38 = vld [vmem:[#allocation5 + $0x130c] ss:$16 sps:$4 sm:$0xff]  }
 0x59a   : > { %13542 = vmatprep.subr.bf16.mxu0 %v20085_v47  ;;  %v20157_v42 = vld [vmem:[#allocation5 + $0x2b0c] ss:$16 sps:$4 sm:$0xff]   ;;  %v20152_v47 = vld [vmem:[#allocation5 + $0x1308] ss:$16 sps:$4 sm:$0xff]  }
 0x59c   : > { %10157 = vmatpush1.bf16.msra.mxu1 %v20080_v44  ;;  %v20155_v44 = vld [vmem:[#allocation5 + $0x2b08] ss:$16 sps:$4 sm:$0xff]  }
 0x59d   : > { %13543 = vmatpush1.bf16.msra.mxu0 %v20083_v7  ;;  %10158 = vmatprep.subr.bf16.mxu1 %v20088_v50  ;;  %v20160_v7 = vld [vmem:[#allocation5 + $0x132c] ss:$16 sps:$4 sm:$0xff]  }
 0x59e   : > { %13544 = vmatprep.subr.bf16.mxu0 %v20091_v51  ;;  %v20163_v50 = vld [vmem:[#allocation5 + $0x2b2c] ss:$16 sps:$4 sm:$0xff]   ;;  %v20158_v51 = vld [vmem:[#allocation5 + $0x1328] ss:$16 sps:$4 sm:$0xff]  }
 0x5a0   : > { %10159 = vmatpush1.bf16.msra.mxu1 %v20086_v52  ;;  %v20161_v52 = vld [vmem:[#allocation5 + $0x2b28] ss:$16 sps:$4 sm:$0xff]  }
 0x5a1   : > { %13545 = vmatpush1.bf16.msra.mxu0 %v20089_v14  ;;  %10160 = vmatprep.subr.bf16.mxu1 %v20094_v15  ;;  %v20166_v14 = vld [vmem:[#allocation5 + $0x134c] ss:$16 sps:$4 sm:$0xff]  }
 0x5a2   : > { %13546 = vmatprep.subr.bf16.mxu0 %v20097_v21  ;;  %v20169_v15 = vld [vmem:[#allocation5 + $0x2b4c] ss:$16 sps:$4 sm:$0xff]   ;;  %v20164_v21 = vld [vmem:[#allocation5 + $0x1348] ss:$16 sps:$4 sm:$0xff]  }
 0x5a4   : > { %10161 = vmatpush1.bf16.msra.mxu1 %v20092_v46  ;;  %v20167_v46 = vld [vmem:[#allocation5 + $0x2b48] ss:$16 sps:$4 sm:$0xff]  }
 0x5a5   : > { %13547 = vmatpush1.bf16.msra.mxu0 %v20095_v41  ;;  %10162 = vmatprep.subr.bf16.mxu1 %v20100_v54  ;;  %v20172_v41 = vld [vmem:[#allocation5 + $0x136c] ss:$16 sps:$4 sm:$0xff]  }
 0x5a6   : > { %13548 = vmatprep.subr.bf16.mxu0 %v20103_v58  ;;  %v20175_v54 = vld [vmem:[#allocation5 + $0x2b6c] ss:$16 sps:$4 sm:$0xff]   ;;  %v20170_v58 = vld [vmem:[#allocation5 + $0x1368] ss:$16 sps:$4 sm:$0xff]  }
 0x5a8   : > { %10163 = vmatpush1.bf16.msra.mxu1 %v20098_v63  ;;  %v20173_v63 = vld [vmem:[#allocation5 + $0x2b68] ss:$16 sps:$4 sm:$0xff]  }
 0x5a9   : > { %13549 = vmatpush1.bf16.msra.mxu0 %v20101_v4  ;;  %10175 = vmatprep.subr.bf16.mxu1 %v20106_v49  ;;  %v20178_v4 = vld [vmem:[#allocation5 + $0x138c] ss:$16 sps:$4 sm:$0xff]  }
 0x5aa   : > { %13561 = vmatprep.subr.bf16.mxu0 %v20109_v12  ;;  %v20181_v49 = vld [vmem:[#allocation5 + $0x2b8c] ss:$16 sps:$4 sm:$0xff]   ;;  %v20176_v12 = vld [vmem:[#allocation5 + $0x1388] ss:$16 sps:$4 sm:$0xff]  }
 0x5ab   : > { %10165 = vmatmul.mubr.bf16.vlgmr.msra.gmra.mrb[12].mxu1 %v21565_v28 }
 0x5ac   : > { %13551 = vmatmul.mubr.bf16.vlgmr.msra.gmra.mrb[8].mxu0 %v21565_v28  ;;  %10176 = vmatpush1.bf16.msra.mxu1 %v20104_v45  ;;  %v20127_v28 = vld [vmem:[#allocation5 + $0x2a6c] ss:$16 sps:$4 sm:$0xff]   ;;  %v20179_v45 = vld [vmem:[#allocation5 + $0x2b88] ss:$16 sps:$4 sm:$0xff]  }
 0x5ad   : > { %13562 = vmatpush1.bf16.msra.mxu0 %v20107_v16  ;;  %10177 = vmatprep.subr.bf16.mxu1 %v20112_v59  ;;  %v20184_v16 = vld [vmem:[#allocation5 + $0x13ac] ss:$16 sps:$4 sm:$0xff]  }
 0x5ae   : > { %13563 = vmatprep.subr.bf16.mxu0 %v20115_v18  ;;  %10207 = vmatprep.mubr.bf16.mxu1 %v21573_v11  ;;  %v20187_v59 = vld [vmem:[#allocation5 + $0x2bac] ss:$16 sps:$4 sm:$0xff]   ;;  %v20182_v18 = vld [vmem:[#allocation5 + $0x13a8] ss:$16 sps:$4 sm:$0xff]  }
 0x5af   : > { %13593 = vmatprep.mubr.bf16.mxu0 %v21573_v11  ;;  %v20131_v11 = vld [vmem:[#allocation5 + $0x2a88] ss:$16 sps:$4 sm:$0xff]  }
 0x5b0   : > { %10178 = vmatpush1.bf16.msra.mxu1 %v20110_v29  ;;  %v20185_v29 = vld [vmem:[#allocation5 + $0x2ba8] ss:$16 sps:$4 sm:$0xff]  }
 0x5b1   : > { %13564 = vmatpush1.bf16.msra.mxu0 %v20113_v61  ;;  %10179 = vmatprep.subr.bf16.mxu1 %v20118_v6  ;;  %v20190_v61 = vld [vmem:[#allocation5 + $0x13cc] ss:$16 sps:$4 sm:$0xff]  }
 0x5b2   : > { %13565 = vmatprep.subr.bf16.mxu0 %v20121_v53  ;;  %v20193_v6 = vld [vmem:[#allocation5 + $0x2bcc] ss:$16 sps:$4 sm:$0xff]   ;;  %v20188_v53 = vld [vmem:[#allocation5 + $0x13c8] ss:$16 sps:$4 sm:$0xff]  }
 0x5b4   : > { %10180 = vmatpush1.bf16.msra.mxu1 %v20116_v20  ;;  %v20191_v20 = vld [vmem:[#allocation5 + $0x2bc8] ss:$16 sps:$4 sm:$0xff]  }
 0x5b5   : > { %13566 = vmatpush1.bf16.msra.mxu0 %v20119_v13  ;;  %10181 = vmatprep.subr.bf16.mxu1 %v20124_v10  ;;  %v20196_v13 = vld [vmem:[#allocation5 + $0x13ec] ss:$16 sps:$4 sm:$0xff]  }
 0x5b6   : > { %13567 = vmatprep.subr.bf16.mxu0 %v20127_v28  ;;  %v20199_v10 = vld [vmem:[#allocation5 + $0x2bec] ss:$16 sps:$4 sm:$0xff]   ;;  %v20194_v28 = vld [vmem:[#allocation5 + $0x13e8] ss:$16 sps:$4 sm:$0xff]  }
 0x5b8   : > { %10182 = vmatpush1.bf16.msra.mxu1 %v20122_v0  ;;  %v20197_v0 = vld [vmem:[#allocation5 + $0x2be8] ss:$16 sps:$4 sm:$0xff]  }
 0x5b9   : > { %13568 = vmatpush1.bf16.msra.mxu0 %v20125_v31  ;;  %10183 = vmatprep.subr.bf16.mxu1 %v20130_v35  ;;  %v20202_v31 = vld [vmem:[#allocation5 + $0xc0c] ss:$16 sps:$4 sm:$0xff]  }
 0x5ba   : > { %13569 = vmatprep.subr.bf16.mxu0 %v20133_v40  ;;  %v20205_v35 = vld [vmem:[#allocation5 + $0x2c0c] ss:$16 sps:$4 sm:$0xff]   ;;  %v20200_v40 = vld [vmem:[#allocation5 + $0xc08] ss:$16 sps:$4 sm:$0xff]  }
 0x5bc   : > { %10184 = vmatpush1.bf16.msra.mxu1 %v20128_v23  ;;  %v20203_v23 = vld [vmem:[#allocation5 + $0x2c08] ss:$16 sps:$4 sm:$0xff]  }
 0x5bd   : > { %13570 = vmatpush1.bf16.msra.mxu0 %v20131_v11  ;;  %10185 = vmatprep.subr.bf16.mxu1 %v20136_v5  ;;  %v20208_v11 = vld [vmem:[#allocation5 + $0xc2c] ss:$16 sps:$4 sm:$0xff]  }
 0x5be   : > { %13571 = vmatprep.subr.bf16.mxu0 %v20139_v9  ;;  %v20211_v5 = vld [vmem:[#allocation5 + $0x2c2c] ss:$16 sps:$4 sm:$0xff]   ;;  %v20206_v9 = vld [vmem:[#allocation5 + $0xc28] ss:$16 sps:$4 sm:$0xff]  }
 0x5c0   : > { %10186 = vmatpush1.bf16.msra.mxu1 %v20134_v55  ;;  %v20209_v55 = vld [vmem:[#allocation5 + $0x2c28] ss:$16 sps:$4 sm:$0xff]  }
 0x5c1   : > { %13572 = vmatpush1.bf16.msra.mxu0 %v20137_v57  ;;  %10187 = vmatprep.subr.bf16.mxu1 %v20142_v27  ;;  %v20214_v57 = vld [vmem:[#allocation5 + $0xc4c] ss:$16 sps:$4 sm:$0xff]  }
 0x5c2   : > { %13573 = vmatprep.subr.bf16.mxu0 %v20145_v26  ;;  %v20217_v27 = vld [vmem:[#allocation5 + $0x2c4c] ss:$16 sps:$4 sm:$0xff]   ;;  %v20212_v26 = vld [vmem:[#allocation5 + $0xc48] ss:$16 sps:$4 sm:$0xff]  }
 0x5c4   : > { %10188 = vmatpush1.bf16.msra.mxu1 %v20140_v1  ;;  %v20215_v1 = vld [vmem:[#allocation5 + $0x2c48] ss:$16 sps:$4 sm:$0xff]  }
 0x5c5   : > { %13574 = vmatpush1.bf16.msra.mxu0 %v20143_v62  ;;  %10189 = vmatprep.subr.bf16.mxu1 %v20148_v32  ;;  %v20220_v62 = vld [vmem:[#allocation5 + $0xc6c] ss:$16 sps:$4 sm:$0xff]   ;;  %v20218_v32 = vld [vmem:[#allocation5 + $0xc68] ss:$16 sps:$4 sm:$0xff]  }
 0x5c6   : > { %13575 = vmatprep.subr.bf16.mxu0 %v20151_v22  ;;  %v20221_v22 = vld [vmem:[#allocation5 + $0x2c68] ss:$16 sps:$4 sm:$0xff]  }
 0x5c8   : > { %10190 = vmatpush1.bf16.msra.mxu1 %v20146_v8  ;;  %v20226_v8 = vld [vmem:[#allocation5 + $0xc8c] ss:$16 sps:$4 sm:$0xff]  }
 0x5c9   : > { %13576 = vmatpush1.bf16.msra.mxu0 %v20149_v34  ;;  %10191 = vmatprep.subr.bf16.mxu1 %v20154_v38  ;;  %v20229_v34 = vld [vmem:[#allocation5 + $0x2c8c] ss:$16 sps:$4 sm:$0xff]   ;;  %v20227_v38 = vld [vmem:[#allocation5 + $0x2c88] ss:$16 sps:$4 sm:$0xff]  }
 0x5ca   : > { %13577 = vmatprep.subr.bf16.mxu0 %v20157_v42  ;;  %v20232_v42 = vld [vmem:[#allocation5 + $0xcac] ss:$16 sps:$4 sm:$0xff]  }
 0x5cc   : > { %10192 = vmatpush1.bf16.msra.mxu1 %v20152_v47  ;;  %v20235_v47 = vld [vmem:[#allocation5 + $0x2cac] ss:$16 sps:$4 sm:$0xff]  }
 0x5cd   : > { %13578 = vmatpush1.bf16.msra.mxu0 %v20155_v44  ;;  %10193 = vmatprep.subr.bf16.mxu1 %v20160_v7  ;;  %v20230_v44 = vld [vmem:[#allocation5 + $0xca8] ss:$16 sps:$4 sm:$0xff]  }
 0x5ce   : > { %13579 = vmatprep.subr.bf16.mxu0 %v20163_v50  ;;  %v20233_v7 = vld [vmem:[#allocation5 + $0x2ca8] ss:$16 sps:$4 sm:$0xff]   ;;  %v20238_v50 = vld [vmem:[#allocation5 + $0xccc] ss:$16 sps:$4 sm:$0xff]  }
 0x5d0   : > { %10194 = vmatpush1.bf16.msra.mxu1 %v20158_v51  ;;  %v20241_v51 = vld [vmem:[#allocation5 + $0x2ccc] ss:$16 sps:$4 sm:$0xff]  }
 0x5d1   : > { %13580 = vmatpush1.bf16.msra.mxu0 %v20161_v52  ;;  %10195 = vmatprep.subr.bf16.mxu1 %v20166_v14  ;;  %v20236_v52 = vld [vmem:[#allocation5 + $0xcc8] ss:$16 sps:$4 sm:$0xff]  }
 0x5d2   : > { %13581 = vmatprep.subr.bf16.mxu0 %v20169_v15  ;;  %v20239_v14 = vld [vmem:[#allocation5 + $0x2cc8] ss:$16 sps:$4 sm:$0xff]   ;;  %v20244_v15 = vld [vmem:[#allocation5 + $0xcec] ss:$16 sps:$4 sm:$0xff]  }
 0x5d4   : > { %10196 = vmatpush1.bf16.msra.mxu1 %v20164_v21  ;;  %v20247_v21 = vld [vmem:[#allocation5 + $0x2cec] ss:$16 sps:$4 sm:$0xff]  }
 0x5d5   : > { %13582 = vmatpush1.bf16.msra.mxu0 %v20167_v46  ;;  %10197 = vmatprep.subr.bf16.mxu1 %v20172_v41  ;;  %v20242_v46 = vld [vmem:[#allocation5 + $0xce8] ss:$16 sps:$4 sm:$0xff]  }
 0x5d6   : > { %13583 = vmatprep.subr.bf16.mxu0 %v20175_v54  ;;  %v20245_v41 = vld [vmem:[#allocation5 + $0x2ce8] ss:$16 sps:$4 sm:$0xff]   ;;  %v20250_v54 = vld [vmem:[#allocation5 + $0xd0c] ss:$16 sps:$4 sm:$0xff]  }
 0x5d8   : > { %10198 = vmatpush1.bf16.msra.mxu1 %v20170_v58  ;;  %v20253_v58 = vld [vmem:[#allocation5 + $0x2d0c] ss:$16 sps:$4 sm:$0xff]  }
 0x5d9   : > { %13584 = vmatpush1.bf16.msra.mxu0 %v20173_v63  ;;  %10199 = vmatprep.subr.bf16.mxu1 %v20178_v4  ;;  %v20248_v63 = vld [vmem:[#allocation5 + $0xd08] ss:$16 sps:$4 sm:$0xff]  }
 0x5da   : > { %13585 = vmatprep.subr.bf16.mxu0 %v20181_v49  ;;  %v20251_v4 = vld [vmem:[#allocation5 + $0x2d08] ss:$16 sps:$4 sm:$0xff]   ;;  %v20256_v49 = vld [vmem:[#allocation5 + $0xd2c] ss:$16 sps:$4 sm:$0xff]  }
 0x5dc   : > { %10200 = vmatpush1.bf16.msra.mxu1 %v20176_v12  ;;  %v20259_v12 = vld [vmem:[#allocation5 + $0x2d2c] ss:$16 sps:$4 sm:$0xff]  }
 0x5dd   : > { %13586 = vmatpush1.bf16.msra.mxu0 %v20179_v45  ;;  %10201 = vmatprep.subr.bf16.mxu1 %v20184_v16  ;;  %v20254_v45 = vld [vmem:[#allocation5 + $0xd28] ss:$16 sps:$4 sm:$0xff]  }
 0x5de   : > { %13587 = vmatprep.subr.bf16.mxu0 %v20187_v59  ;;  %v20257_v16 = vld [vmem:[#allocation5 + $0x2d28] ss:$16 sps:$4 sm:$0xff]   ;;  %v20262_v59 = vld [vmem:[#allocation5 + $0xd4c] ss:$16 sps:$4 sm:$0xff]  }
 0x5e0   : > { %10202 = vmatpush1.bf16.msra.mxu1 %v20182_v18  ;;  %v20265_v18 = vld [vmem:[#allocation5 + $0x2d4c] ss:$16 sps:$4 sm:$0xff]  }
 0x5e1   : > { %13588 = vmatpush1.bf16.msra.mxu0 %v20185_v29  ;;  %10203 = vmatprep.subr.bf16.mxu1 %v20190_v61  ;;  %v20260_v29 = vld [vmem:[#allocation5 + $0xd48] ss:$16 sps:$4 sm:$0xff]  }
 0x5e2   : > { %13589 = vmatprep.subr.bf16.mxu0 %v20193_v6  ;;  %v20263_v61 = vld [vmem:[#allocation5 + $0x2d48] ss:$16 sps:$4 sm:$0xff]   ;;  %v20268_v6 = vld [vmem:[#allocation5 + $0xd6c] ss:$16 sps:$4 sm:$0xff]  }
 0x5e4   : > { %10204 = vmatpush1.bf16.msra.mxu1 %v20188_v53  ;;  %v20271_v53 = vld [vmem:[#allocation5 + $0x2d6c] ss:$16 sps:$4 sm:$0xff]  }
 0x5e5   : > { %13590 = vmatpush1.bf16.msra.mxu0 %v20191_v20  ;;  %10205 = vmatprep.subr.bf16.mxu1 %v20196_v13  ;;  %v20266_v20 = vld [vmem:[#allocation5 + $0xd68] ss:$16 sps:$4 sm:$0xff]  }
 0x5e6   : > { %13591 = vmatprep.subr.bf16.mxu0 %v20199_v10  ;;  %v20269_v13 = vld [vmem:[#allocation5 + $0x2d68] ss:$16 sps:$4 sm:$0xff]   ;;  %v20274_v10 = vld [vmem:[#allocation5 + $0xd8c] ss:$16 sps:$4 sm:$0xff]  }
 0x5e8   : > { %10206 = vmatpush1.bf16.msra.mxu1 %v20194_v28  ;;  %v20277_v28 = vld [vmem:[#allocation5 + $0x2d8c] ss:$16 sps:$4 sm:$0xff]  }
 0x5e9   : > { %13592 = vmatpush1.bf16.msra.mxu0 %v20197_v0  ;;  %10562 = vmatprep.subr.bf16.mxu1 %v20202_v31  ;;  %v20272_v0 = vld [vmem:[#allocation5 + $0xd88] ss:$16 sps:$4 sm:$0xff]  }
 0x5ea   : > { %13992 = vmatprep.subr.bf16.mxu0 %v20205_v35  ;;  %v20275_v31 = vld [vmem:[#allocation5 + $0x2d88] ss:$16 sps:$4 sm:$0xff]   ;;  %v20280_v35 = vld [vmem:[#allocation5 + $0xdac] ss:$16 sps:$4 sm:$0xff]  }
 0x5eb   : > { %10208 = vmatmul.mubr.bf16.vlgmr.msra.gmra.mrb[12].mxu1 %v21637_v17 }
 0x5ec   : > { %13594 = vmatmul.mubr.bf16.vlgmr.msra.gmra.mrb[8].mxu0 %v21637_v17  ;;  %10563 = vmatpush1.bf16.msra.mxu1 %v20200_v40  ;;  %v20223_v17 = vld [vmem:[#allocation5 + $0x2c6c] ss:$16 sps:$4 sm:$0xff]  }
 0x5ed   : > { %13993 = vmatpush1.bf16.msra.mxu0 %v20203_v23  ;;  %10564 = vmatprep.subr.bf16.mxu1 %v20208_v11  ;;  %v20283_v40 = vld [vmem:[#allocation5 + $0x2dac] ss:$16 sps:$4 sm:$0xff]   ;;  %v20278_v23 = vld [vmem:[#allocation5 + $0xda8] ss:$16 sps:$4 sm:$0xff]  }
 0x5ee   : > { %13994 = vmatprep.subr.bf16.mxu0 %v20211_v5  ;;  %10594 = vmatprep.mubr.bf16.mxu1 %v21554_v33  ;;  %v20224_v33 = vld [vmem:[#allocation5 + $0xc88] ss:$16 sps:$4 sm:$0xff]   ;;  %v20286_v5 = vld [vmem:[#allocation5 + $0xdcc] ss:$16 sps:$4 sm:$0xff]  }
 0x5ef   : > { %14024 = vmatprep.mubr.bf16.mxu0 %v21517_v36  ;;  %v20281_v11 = vld [vmem:[#allocation5 + $0x2da8] ss:$16 sps:$4 sm:$0xff]  }
 0x5f0   : > { %10565 = vmatpush1.bf16.msra.mxu1 %v20206_v9  ;;  %v20289_v9 = vld [vmem:[#allocation5 + $0x2dcc] ss:$16 sps:$4 sm:$0xff]  }
 0x5f1   : > { %13995 = vmatpush1.bf16.msra.mxu0 %v20209_v55  ;;  %10566 = vmatprep.subr.bf16.mxu1 %v20214_v57  ;;  %v20284_v55 = vld [vmem:[#allocation5 + $0xdc8] ss:$16 sps:$4 sm:$0xff]  }
 0x5f2   : > { %13996 = vmatprep.subr.bf16.mxu0 %v20217_v27  ;;  %v20287_v57 = vld [vmem:[#allocation5 + $0x2dc8] ss:$16 sps:$4 sm:$0xff]   ;;  %v20292_v27 = vld [vmem:[#allocation5 + $0xdec] ss:$16 sps:$4 sm:$0xff]  }
 0x5f4   : > { %10567 = vmatpush1.bf16.msra.mxu1 %v20212_v26  ;;  %v20295_v26 = vld [vmem:[#allocation5 + $0x2dec] ss:$16 sps:$4 sm:$0xff]  }
 0x5f5   : > { %13997 = vmatpush1.bf16.msra.mxu0 %v20215_v1  ;;  %10568 = vmatprep.subr.bf16.mxu1 %v20220_v62  ;;  %v20290_v1 = vld [vmem:[#allocation5 + $0xde8] ss:$16 sps:$4 sm:$0xff]  }
 0x5f6   : > { %13998 = vmatprep.subr.bf16.mxu0 %v20223_v17  ;;  %v20293_v62 = vld [vmem:[#allocation5 + $0x2de8] ss:$16 sps:$4 sm:$0xff]   ;;  %v20298_v17 = vld [vmem:[#allocation5 + $0xe0c] ss:$16 sps:$4 sm:$0xff]  }
 0x5f8   : > { %10569 = vmatpush1.bf16.msra.mxu1 %v20218_v32  ;;  %v20301_v32 = vld [vmem:[#allocation5 + $0x2e0c] ss:$16 sps:$4 sm:$0xff]  }
 0x5f9   : > { %13999 = vmatpush1.bf16.msra.mxu0 %v20221_v22  ;;  %10570 = vmatprep.subr.bf16.mxu1 %v20226_v8  ;;  %v20296_v22 = vld [vmem:[#allocation5 + $0xe08] ss:$16 sps:$4 sm:$0xff]  }
 0x5fa   : > { %14000 = vmatprep.subr.bf16.mxu0 %v20229_v34  ;;  %v20299_v8 = vld [vmem:[#allocation5 + $0x2e08] ss:$16 sps:$4 sm:$0xff]   ;;  %v20304_v34 = vld [vmem:[#allocation5 + $0xe2c] ss:$16 sps:$4 sm:$0xff]  }
 0x5fc   : > { %10571 = vmatpush1.bf16.msra.mxu1 %v20224_v33  ;;  %v20307_v33 = vld [vmem:[#allocation5 + $0x2e2c] ss:$16 sps:$4 sm:$0xff]  }
 0x5fd   : > { %14001 = vmatpush1.bf16.msra.mxu0 %v20227_v38  ;;  %10572 = vmatprep.subr.bf16.mxu1 %v20232_v42  ;;  %v20302_v38 = vld [vmem:[#allocation5 + $0xe28] ss:$16 sps:$4 sm:$0xff]  }
 0x5fe   : > { %14002 = vmatprep.subr.bf16.mxu0 %v20235_v47  ;;  %v20305_v42 = vld [vmem:[#allocation5 + $0x2e28] ss:$16 sps:$4 sm:$0xff]   ;;  %v20310_v47 = vld [vmem:[#allocation5 + $0xe4c] ss:$16 sps:$4 sm:$0xff]  }
 0x600   : > { %10573 = vmatpush1.bf16.msra.mxu1 %v20230_v44  ;;  %v20313_v44 = vld [vmem:[#allocation5 + $0x2e4c] ss:$16 sps:$4 sm:$0xff]  }
 0x601   : > { %14003 = vmatpush1.bf16.msra.mxu0 %v20233_v7  ;;  %10574 = vmatprep.subr.bf16.mxu1 %v20238_v50  ;;  %v20308_v7 = vld [vmem:[#allocation5 + $0xe48] ss:$16 sps:$4 sm:$0xff]  }
 0x602   : > { %14004 = vmatprep.subr.bf16.mxu0 %v20241_v51  ;;  %v20311_v50 = vld [vmem:[#allocation5 + $0x2e48] ss:$16 sps:$4 sm:$0xff]   ;;  %v20319_v51 = vld [vmem:[#allocation5 + $0x2e6c] ss:$16 sps:$4 sm:$0xff]  }
 0x604   : > { %10575 = vmatpush1.bf16.msra.mxu1 %v20236_v52  ;;  %v20314_v52 = vld [vmem:[#allocation5 + $0xe68] ss:$16 sps:$4 sm:$0xff]  }
 0x605   : > { %14005 = vmatpush1.bf16.msra.mxu0 %v20239_v14  ;;  %10576 = vmatprep.subr.bf16.mxu1 %v20244_v15  ;;  %v20317_v14 = vld [vmem:[#allocation5 + $0x2e68] ss:$16 sps:$4 sm:$0xff]   ;;  %v20322_v15 = vld [vmem:[#allocation5 + $0xe8c] ss:$16 sps:$4 sm:$0xff]  }
 0x606   : > { %14006 = vmatprep.subr.bf16.mxu0 %v20247_v21  ;;  %v20325_v21 = vld [vmem:[#allocation5 + $0x2e8c] ss:$16 sps:$4 sm:$0xff]  }
 0x608   : > { %10577 = vmatpush1.bf16.msra.mxu1 %v20242_v46  ;;  %v20323_v46 = vld [vmem:[#allocation5 + $0x2e88] ss:$16 sps:$4 sm:$0xff]  }
 0x609   : > { %14007 = vmatpush1.bf16.msra.mxu0 %v20245_v41  ;;  %10578 = vmatprep.subr.bf16.mxu1 %v20250_v54  ;;  %v20328_v41 = vld [vmem:[#allocation5 + $0xeac] ss:$16 sps:$4 sm:$0xff]  }
 0x60a   : > { %14008 = vmatprep.subr.bf16.mxu0 %v20253_v58  ;;  %v20331_v54 = vld [vmem:[#allocation5 + $0x2eac] ss:$16 sps:$4 sm:$0xff]   ;;  %v20326_v58 = vld [vmem:[#allocation5 + $0xea8] ss:$16 sps:$4 sm:$0xff]  }
 0x60c   : > { %10579 = vmatpush1.bf16.msra.mxu1 %v20248_v63  ;;  %v20329_v63 = vld [vmem:[#allocation5 + $0x2ea8] ss:$16 sps:$4 sm:$0xff]  }
 0x60d   : > { %14009 = vmatpush1.bf16.msra.mxu0 %v20251_v4  ;;  %10580 = vmatprep.subr.bf16.mxu1 %v20256_v49  ;;  %v20334_v4 = vld [vmem:[#allocation5 + $0xecc] ss:$16 sps:$4 sm:$0xff]  }
 0x60e   : > { %14010 = vmatprep.subr.bf16.mxu0 %v20259_v12  ;;  %v20337_v49 = vld [vmem:[#allocation5 + $0x2ecc] ss:$16 sps:$4 sm:$0xff]  }
 0x610   : > { %10581 = vmatpush1.bf16.msra.mxu1 %v20254_v45 }
 0x611   : > { %14011 = vmatpush1.bf16.msra.mxu0 %v20257_v16  ;;  %10582 = vmatprep.subr.bf16.mxu1 %v20262_v59  ;;  %v20332_v59 = vld [vmem:[#allocation5 + $0xec8] ss:$16 sps:$4 sm:$0xff]  }
 0x612   : > { %14012 = vmatprep.subr.bf16.mxu0 %v20265_v18  ;;  %v20335_v18 = vld [vmem:[#allocation5 + $0x2ec8] ss:$16 sps:$4 sm:$0xff]  }
 0x614   : > { %10583 = vmatpush1.bf16.msra.mxu1 %v20260_v29 }
 0x615   : > { %14013 = vmatpush1.bf16.msra.mxu0 %v20263_v61  ;;  %10584 = vmatprep.subr.bf16.mxu1 %v20268_v6  ;;  %v20340_v61 = vld [vmem:[#allocation5 + $0xeec] ss:$16 sps:$4 sm:$0xff]  }
 0x616   : > { %14014 = vmatprep.subr.bf16.mxu0 %v20271_v53  ;;  %v20343_v6 = vld [vmem:[#allocation5 + $0x2eec] ss:$16 sps:$4 sm:$0xff]   ;;  %v20338_v53 = vld [vmem:[#allocation5 + $0xee8] ss:$16 sps:$4 sm:$0xff]  }
 0x618   : > { %10585 = vmatpush1.bf16.msra.mxu1 %v20266_v20  ;;  %v20341_v20 = vld [vmem:[#allocation5 + $0x2ee8] ss:$16 sps:$4 sm:$0xff]  }
 0x619   : > { %14015 = vmatpush1.bf16.msra.mxu0 %v20269_v13  ;;  %10586 = vmatprep.subr.bf16.mxu1 %v20274_v10  ;;  %v20346_v13 = vld [vmem:[#allocation5 + $0xf0c] ss:$16 sps:$4 sm:$0xff]  }
 0x61a   : > { %14016 = vmatprep.subr.bf16.mxu0 %v20277_v28  ;;  %v20349_v10 = vld [vmem:[#allocation5 + $0x2f0c] ss:$16 sps:$4 sm:$0xff]   ;;  %v20344_v28 = vld [vmem:[#allocation5 + $0xf08] ss:$16 sps:$4 sm:$0xff]  }
 0x61c   : > { %10587 = vmatpush1.bf16.msra.mxu1 %v20272_v0  ;;  %v20347_v0 = vld [vmem:[#allocation5 + $0x2f08] ss:$16 sps:$4 sm:$0xff]  }
 0x61d   : > { %14017 = vmatpush1.bf16.msra.mxu0 %v20275_v31  ;;  %10588 = vmatprep.subr.bf16.mxu1 %v20280_v35  ;;  %v20352_v31 = vld [vmem:[#allocation5 + $0xf2c] ss:$16 sps:$4 sm:$0xff]  }
 0x61e   : > { %14018 = vmatprep.subr.bf16.mxu0 %v20283_v40  ;;  %v20355_v35 = vld [vmem:[#allocation5 + $0x2f2c] ss:$16 sps:$4 sm:$0xff]   ;;  %v20350_v40 = vld [vmem:[#allocation5 + $0xf28] ss:$16 sps:$4 sm:$0xff]  }
 0x620   : > { %10589 = vmatpush1.bf16.msra.mxu1 %v20278_v23  ;;  %v20353_v23 = vld [vmem:[#allocation5 + $0x2f28] ss:$16 sps:$4 sm:$0xff]  }
 0x621   : > { %14019 = vmatpush1.bf16.msra.mxu0 %v20281_v11  ;;  %10590 = vmatprep.subr.bf16.mxu1 %v20286_v5  ;;  %v20358_v11 = vld [vmem:[#allocation5 + $0xf4c] ss:$16 sps:$4 sm:$0xff]  }
 0x622   : > { %14020 = vmatprep.subr.bf16.mxu0 %v20289_v9  ;;  %v20361_v5 = vld [vmem:[#allocation5 + $0x2f4c] ss:$16 sps:$4 sm:$0xff]   ;;  %v20356_v9 = vld [vmem:[#allocation5 + $0xf48] ss:$16 sps:$4 sm:$0xff]  }
 0x624   : > { %10591 = vmatpush1.bf16.msra.mxu1 %v20284_v55  ;;  %v20359_v55 = vld [vmem:[#allocation5 + $0x2f48] ss:$16 sps:$4 sm:$0xff]  }
 0x625   : > { %14021 = vmatpush1.bf16.msra.mxu0 %v20287_v57  ;;  %10592 = vmatprep.subr.bf16.mxu1 %v20292_v27  ;;  %v20364_v57 = vld [vmem:[#allocation5 + $0xf6c] ss:$16 sps:$4 sm:$0xff]  }
 0x626   : > { %14022 = vmatprep.subr.bf16.mxu0 %v20295_v26  ;;  %v20367_v27 = vld [vmem:[#allocation5 + $0x2f6c] ss:$16 sps:$4 sm:$0xff]   ;;  %v20362_v26 = vld [vmem:[#allocation5 + $0xf68] ss:$16 sps:$4 sm:$0xff]  }
 0x628   : > { %10593 = vmatpush1.bf16.msra.mxu1 %v20290_v1  ;;  %v20365_v1 = vld [vmem:[#allocation5 + $0x2f68] ss:$16 sps:$4 sm:$0xff]  }
 0x629   : > { %14023 = vmatpush1.bf16.msra.mxu0 %v20293_v62  ;;  %10605 = vmatprep.subr.bf16.mxu1 %v20298_v17  ;;  %v20370_v62 = vld [vmem:[#allocation5 + $0xf8c] ss:$16 sps:$4 sm:$0xff]  }
 0x62a   : > { %14035 = vmatprep.subr.bf16.mxu0 %v20301_v32  ;;  %v20373_v17 = vld [vmem:[#allocation5 + $0x2f8c] ss:$16 sps:$4 sm:$0xff]   ;;  %v20368_v32 = vld [vmem:[#allocation5 + $0xf88] ss:$16 sps:$4 sm:$0xff]  }
 0x62b   : > { %10595 = vmatmul.mubr.bf16.vlgmr.msra.gmra.mrb[12].mxu1 %v21568_v30  ;;  %v20316_v30 = vld [vmem:[#allocation5 + $0xe6c] ss:$16 sps:$4 sm:$0xff]  }
 0x62c   : > { %14025 = vmatmul.mubr.bf16.vlgmr.msra.gmra.mrb[8].mxu0 %v21526_v60  ;;  %10606 = vmatpush1.bf16.msra.mxu1 %v20296_v22  ;;  %v20371_v22 = vld [vmem:[#allocation5 + $0x2f88] ss:$16 sps:$4 sm:$0xff]  }
 0x62d   : > { %14036 = vmatpush1.bf16.msra.mxu0 %v20299_v8  ;;  %10607 = vmatprep.subr.bf16.mxu1 %v20304_v34  ;;  %v20376_v8 = vld [vmem:[#allocation5 + $0xfac] ss:$16 sps:$4 sm:$0xff]  }
 0x62e   : > { %14037 = vmatprep.subr.bf16.mxu0 %v20307_v33  ;;  %10637 = vmatprep.mubr.bf16.mxu1 %v21576_v37  ;;  %v20320_v37 = vld [vmem:[#allocation5 + $0xe88] ss:$16 sps:$4 sm:$0xff]   ;;  %v20379_v34 = vld [vmem:[#allocation5 + $0x2fac] ss:$16 sps:$4 sm:$0xff]  }
 0x62f   : > { %14067 = vmatprep.mubr.bf16.mxu0 %v21531_v2  ;;  %v20374_v33 = vld [vmem:[#allocation5 + $0xfa8] ss:$16 sps:$4 sm:$0xff]  }
 0x630   : > { %10608 = vmatpush1.bf16.msra.mxu1 %v20302_v38  ;;  %v20377_v38 = vld [vmem:[#allocation5 + $0x2fa8] ss:$16 sps:$4 sm:$0xff]  }
 0x631   : > { %14038 = vmatpush1.bf16.msra.mxu0 %v20305_v42  ;;  %10609 = vmatprep.subr.bf16.mxu1 %v20310_v47  ;;  %v20382_v42 = vld [vmem:[#allocation5 + $0xfcc] ss:$16 sps:$4 sm:$0xff]  }
 0x632   : > { %14039 = vmatprep.subr.bf16.mxu0 %v20313_v44  ;;  %v20385_v47 = vld [vmem:[#allocation5 + $0x2fcc] ss:$16 sps:$4 sm:$0xff]   ;;  %v20380_v44 = vld [vmem:[#allocation5 + $0xfc8] ss:$16 sps:$4 sm:$0xff]  }
 0x634   : > { %10610 = vmatpush1.bf16.msra.mxu1 %v20308_v7  ;;  %v20383_v7 = vld [vmem:[#allocation5 + $0x2fc8] ss:$16 sps:$4 sm:$0xff]  }
 0x635   : > { %14040 = vmatpush1.bf16.msra.mxu0 %v20311_v50  ;;  %10611 = vmatprep.subr.bf16.mxu1 %v20316_v30  ;;  %v20388_v50 = vld [vmem:[#allocation5 + $0xfec] ss:$16 sps:$4 sm:$0xff]  }
 0x636   : > { %14041 = vmatprep.subr.bf16.mxu0 %v20319_v51  ;;  %v20391_v30 = vld [vmem:[#allocation5 + $0x2fec] ss:$16 sps:$4 sm:$0xff]   ;;  %v20386_v51 = vld [vmem:[#allocation5 + $0xfe8] ss:$16 sps:$4 sm:$0xff]  }
 0x638   : > { %10612 = vmatpush1.bf16.msra.mxu1 %v20314_v52  ;;  %v20389_v52 = vld [vmem:[#allocation5 + $0x2fe8] ss:$16 sps:$4 sm:$0xff]  }
 0x639   : > { %14042 = vmatpush1.bf16.msra.mxu0 %v20317_v14  ;;  %10613 = vmatprep.subr.bf16.mxu1 %v20322_v15  ;;  %v20394_v14 = vld [vmem:[#allocation5 + $0x140c] ss:$16 sps:$4 sm:$0xff]  }
 0x63a   : > { %14043 = vmatprep.subr.bf16.mxu0 %v20325_v21  ;;  %v20397_v15 = vld [vmem:[#allocation5 + $0x300c] ss:$16 sps:$4 sm:$0xff]   ;;  %v20392_v21 = vld [vmem:[#allocation5 + $0x1408] ss:$16 sps:$4 sm:$0xff]  }
 0x63c   : > { %10614 = vmatpush1.bf16.msra.mxu1 %v20320_v37  ;;  %v20395_v37 = vld [vmem:[#allocation5 + $0x3008] ss:$16 sps:$4 sm:$0xff]  }
 0x63d   : > { %14044 = vmatpush1.bf16.msra.mxu0 %v20323_v46  ;;  %10615 = vmatprep.subr.bf16.mxu1 %v20328_v41  ;;  %v20400_v46 = vld [vmem:[#allocation5 + $0x142c] ss:$16 sps:$4 sm:$0xff]  }
 0x63e   : > { %14045 = vmatprep.subr.bf16.mxu0 %v20331_v54  ;;  %v21702_v12 = vpop.f32.mrb[8].mxu1  ;;  %v20403_v41 = vld [vmem:[#allocation5 + $0x302c] ss:$16 sps:$4 sm:$0xff]   ;;  %v20398_v54 = vld [vmem:[#allocation5 + $0x1428] ss:$16 sps:$4 sm:$0xff]  }
 0x63f   : > { %v21704_v45 = vpop.f32.mrb[9].mxu1 }
 0x640   : > { %v21706_v16 = vpop.f32.mrb[10].mxu1  ;;  %10616 = vmatpush1.bf16.msra.mxu1 %v20326_v58  ;;  %v20401_v58 = vld [vmem:[#allocation5 + $0x3028] ss:$16 sps:$4 sm:$0xff]  }
 0x641   : > { %14046 = vmatpush1.bf16.msra.mxu0 %v20329_v63  ;;  %v21708_v29 = vpop.f32.mrb[11].mxu1  ;;  %10617 = vmatprep.subr.bf16.mxu1 %v20334_v4  ;;  %v20406_v63 = vld [vmem:[#allocation5 + $0x144c] ss:$16 sps:$4 sm:$0xff]  }
 0x642   : > { %14047 = vmatprep.subr.bf16.mxu0 %v20337_v49  ;;  %v20409_v4 = vld [vmem:[#allocation5 + $0x304c] ss:$16 sps:$4 sm:$0xff]   ;;  %v20404_v49 = vld [vmem:[#allocation5 + $0x1448] ss:$16 sps:$4 sm:$0xff]  }
 0x644   : > { %10618 = vmatpush1.bf16.msra.mxu1 %v20332_v59  ;;  %v20407_v59 = vld [vmem:[#allocation5 + $0x3048] ss:$16 sps:$4 sm:$0xff]  }
 0x645   : > { %14048 = vmatpush1.bf16.msra.mxu0 %v20335_v18  ;;  %10619 = vmatprep.subr.bf16.mxu1 %v20340_v61  ;;  %v20415_v18 = vld [vmem:[#allocation5 + $0x306c] ss:$16 sps:$4 sm:$0xff]   ;;  %v20410_v61 = vld [vmem:[#allocation5 + $0x1468] ss:$16 sps:$4 sm:$0xff]  }
 0x646   : > { %14049 = vmatprep.subr.bf16.mxu0 %v20343_v6  ;;  %v20413_v6 = vld [vmem:[#allocation5 + $0x3068] ss:$16 sps:$4 sm:$0xff]  }
 0x648   : > { %10620 = vmatpush1.bf16.msra.mxu1 %v20338_v53  ;;  %v20418_v53 = vld [vmem:[#allocation5 + $0x148c] ss:$16 sps:$4 sm:$0xff]  }
 0x649   : > { %14050 = vmatpush1.bf16.msra.mxu0 %v20341_v20  ;;  %10621 = vmatprep.subr.bf16.mxu1 %v20346_v13  ;;  %v20421_v20 = vld [vmem:[#allocation5 + $0x308c] ss:$16 sps:$4 sm:$0xff]   ;;  %v20419_v13 = vld [vmem:[#allocation5 + $0x3088] ss:$16 sps:$4 sm:$0xff]  }
 0x64a   : > { %14051 = vmatprep.subr.bf16.mxu0 %v20349_v10  ;;  %v20424_v10 = vld [vmem:[#allocation5 + $0x14ac] ss:$16 sps:$4 sm:$0xff]  }
 0x64c   : > { %10622 = vmatpush1.bf16.msra.mxu1 %v20344_v28  ;;  %v20427_v28 = vld [vmem:[#allocation5 + $0x30ac] ss:$16 sps:$4 sm:$0xff]  }
 0x64d   : > { %14052 = vmatpush1.bf16.msra.mxu0 %v20347_v0  ;;  %10623 = vmatprep.subr.bf16.mxu1 %v20352_v31  ;;  %v20422_v0 = vld [vmem:[#allocation5 + $0x14a8] ss:$16 sps:$4 sm:$0xff]  }
 0x64e   : > { %14053 = vmatprep.subr.bf16.mxu0 %v20355_v35  ;;  %v20425_v31 = vld [vmem:[#allocation5 + $0x30a8] ss:$16 sps:$4 sm:$0xff]   ;;  %v20430_v35 = vld [vmem:[#allocation5 + $0x14cc] ss:$16 sps:$4 sm:$0xff]  }
 0x650   : > { %10624 = vmatpush1.bf16.msra.mxu1 %v20350_v40  ;;  %v20433_v40 = vld [vmem:[#allocation5 + $0x30cc] ss:$16 sps:$4 sm:$0xff]  }
 0x651   : > { %14054 = vmatpush1.bf16.msra.mxu0 %v20353_v23  ;;  %10625 = vmatprep.subr.bf16.mxu1 %v20358_v11  ;;  %v20428_v23 = vld [vmem:[#allocation5 + $0x14c8] ss:$16 sps:$4 sm:$0xff]  }
 0x652   : > { %14055 = vmatprep.subr.bf16.mxu0 %v20361_v5  ;;  %v20431_v11 = vld [vmem:[#allocation5 + $0x30c8] ss:$16 sps:$4 sm:$0xff]   ;;  %v20436_v5 = vld [vmem:[#allocation5 + $0x14ec] ss:$16 sps:$4 sm:$0xff]  }
 0x654   : > { %10626 = vmatpush1.bf16.msra.mxu1 %v20356_v9  ;;  %v20439_v9 = vld [vmem:[#allocation5 + $0x30ec] ss:$16 sps:$4 sm:$0xff]  }
 0x655   : > { %14056 = vmatpush1.bf16.msra.mxu0 %v20359_v55  ;;  %10627 = vmatprep.subr.bf16.mxu1 %v20364_v57  ;;  %v20434_v55 = vld [vmem:[#allocation5 + $0x14e8] ss:$16 sps:$4 sm:$0xff]  }
 0x656   : > { %14057 = vmatprep.subr.bf16.mxu0 %v20367_v27  ;;  %v20437_v57 = vld [vmem:[#allocation5 + $0x30e8] ss:$16 sps:$4 sm:$0xff]   ;;  %v20442_v27 = vld [vmem:[#allocation5 + $0x150c] ss:$16 sps:$4 sm:$0xff]  }
 0x658   : > { %10628 = vmatpush1.bf16.msra.mxu1 %v20362_v26  ;;  %v20445_v26 = vld [vmem:[#allocation5 + $0x310c] ss:$16 sps:$4 sm:$0xff]  }
 0x659   : > { %14058 = vmatpush1.bf16.msra.mxu0 %v20365_v1  ;;  %10629 = vmatprep.subr.bf16.mxu1 %v20370_v62  ;;  %v20440_v1 = vld [vmem:[#allocation5 + $0x1508] ss:$16 sps:$4 sm:$0xff]  }
 0x65a   : > { %14059 = vmatprep.subr.bf16.mxu0 %v20373_v17  ;;  %v20443_v62 = vld [vmem:[#allocation5 + $0x3108] ss:$16 sps:$4 sm:$0xff]   ;;  %v20448_v17 = vld [vmem:[#allocation5 + $0x152c] ss:$16 sps:$4 sm:$0xff]  }
 0x65c   : > { %10630 = vmatpush1.bf16.msra.mxu1 %v20368_v32  ;;  %v20451_v32 = vld [vmem:[#allocation5 + $0x312c] ss:$16 sps:$4 sm:$0xff]  }
 0x65d   : > { %14060 = vmatpush1.bf16.msra.mxu0 %v20371_v22  ;;  %10631 = vmatprep.subr.bf16.mxu1 %v20376_v8  ;;  %v20446_v22 = vld [vmem:[#allocation5 + $0x1528] ss:$16 sps:$4 sm:$0xff]  }
 0x65e   : > { %14061 = vmatprep.subr.bf16.mxu0 %v20379_v34  ;;  %v20449_v8 = vld [vmem:[#allocation5 + $0x3128] ss:$16 sps:$4 sm:$0xff]   ;;  %v20454_v34 = vld [vmem:[#allocation5 + $0x154c] ss:$16 sps:$4 sm:$0xff]  }
 0x660   : > { %10632 = vmatpush1.bf16.msra.mxu1 %v20374_v33  ;;  %v20457_v33 = vld [vmem:[#allocation5 + $0x314c] ss:$16 sps:$4 sm:$0xff]  }
 0x661   : > { %14062 = vmatpush1.bf16.msra.mxu0 %v20377_v38  ;;  %10633 = vmatprep.subr.bf16.mxu1 %v20382_v42  ;;  %v20452_v38 = vld [vmem:[#allocation5 + $0x1548] ss:$16 sps:$4 sm:$0xff]  }
 0x662   : > { %14063 = vmatprep.subr.bf16.mxu0 %v20385_v47  ;;  %v20455_v42 = vld [vmem:[#allocation5 + $0x3148] ss:$16 sps:$4 sm:$0xff]   ;;  %v20460_v47 = vld [vmem:[#allocation5 + $0x156c] ss:$16 sps:$4 sm:$0xff]  }
 0x664   : > { %10634 = vmatpush1.bf16.msra.mxu1 %v20380_v44  ;;  %v20463_v44 = vld [vmem:[#allocation5 + $0x316c] ss:$16 sps:$4 sm:$0xff]  }
 0x665   : > { %14064 = vmatpush1.bf16.msra.mxu0 %v20383_v7  ;;  %10635 = vmatprep.subr.bf16.mxu1 %v20388_v50  ;;  %v20458_v7 = vld [vmem:[#allocation5 + $0x1568] ss:$16 sps:$4 sm:$0xff]  }
 0x666   : > { %14065 = vmatprep.subr.bf16.mxu0 %v20391_v30  ;;  %v20461_v50 = vld [vmem:[#allocation5 + $0x3168] ss:$16 sps:$4 sm:$0xff]   ;;  %v20466_v30 = vld [vmem:[#allocation5 + $0x158c] ss:$16 sps:$4 sm:$0xff]  }
 0x668   : > { %10636 = vmatpush1.bf16.msra.mxu1 %v20386_v51  ;;  %v20469_v51 = vld [vmem:[#allocation5 + $0x318c] ss:$16 sps:$4 sm:$0xff]  }
 0x669   : > { %14066 = vmatpush1.bf16.msra.mxu0 %v20389_v52  ;;  %11032 = vmatprep.subr.bf16.mxu1 %v20394_v14  ;;  %v20464_v52 = vld [vmem:[#allocation5 + $0x1588] ss:$16 sps:$4 sm:$0xff]  }
 0x66a   : > { %14466 = vmatprep.subr.bf16.mxu0 %v20397_v15  ;;  %v20467_v14 = vld [vmem:[#allocation5 + $0x3188] ss:$16 sps:$4 sm:$0xff]   ;;  %v20472_v15 = vld [vmem:[#allocation5 + $0x15ac] ss:$16 sps:$4 sm:$0xff]  }
 0x66b   : > { %10638 = vmatmul.mubr.bf16.vlgmr.msra.gmra.mrb[12].mxu1 %v21640_v3  ;;  %v20412_v3 = vld [vmem:[#allocation5 + $0x146c] ss:$16 sps:$4 sm:$0xff]  }
 0x66c   : > { %14068 = vmatmul.mubr.bf16.vlgmr.msra.gmra.mrb[8].mxu0 %v21547_v43  ;;  %11033 = vmatpush1.bf16.msra.mxu1 %v20392_v21  ;;  %v20475_v21 = vld [vmem:[#allocation5 + $0x31ac] ss:$16 sps:$4 sm:$0xff]  }
 0x66d   : > { %14467 = vmatpush1.bf16.msra.mxu0 %v20395_v37  ;;  %11034 = vmatprep.subr.bf16.mxu1 %v20400_v46  ;;  %v20470_v37 = vld [vmem:[#allocation5 + $0x15a8] ss:$16 sps:$4 sm:$0xff]  }
 0x66e   : > { %14468 = vmatprep.subr.bf16.mxu0 %v20403_v41  ;;  %11064 = vmatprep.mubr.bf16.mxu1 %v21517_v36  ;;  %v20416_v36 = vld [vmem:[#allocation5 + $0x1488] ss:$16 sps:$4 sm:$0xff]   ;;  %v20478_v41 = vld [vmem:[#allocation5 + $0x15cc] ss:$16 sps:$4 sm:$0xff]  }
 0x66f   : > { %14498 = vmatprep.mubr.bf16.mxu0 %v21645_v19  ;;  %v20473_v46 = vld [vmem:[#allocation5 + $0x31a8] ss:$16 sps:$4 sm:$0xff]  }
 0x670   : > { %11035 = vmatpush1.bf16.msra.mxu1 %v20398_v54  ;;  %v20481_v54 = vld [vmem:[#allocation5 + $0x31cc] ss:$16 sps:$4 sm:$0xff]  }
 0x671   : > { %14469 = vmatpush1.bf16.msra.mxu0 %v20401_v58  ;;  %11036 = vmatprep.subr.bf16.mxu1 %v20406_v63  ;;  %v20476_v58 = vld [vmem:[#allocation5 + $0x15c8] ss:$16 sps:$4 sm:$0xff]  }
 0x672   : > { %14470 = vmatprep.subr.bf16.mxu0 %v20409_v4  ;;  %v20479_v63 = vld [vmem:[#allocation5 + $0x31c8] ss:$16 sps:$4 sm:$0xff]   ;;  %v20484_v4 = vld [vmem:[#allocation5 + $0x15ec] ss:$16 sps:$4 sm:$0xff]  }
 0x674   : > { %11037 = vmatpush1.bf16.msra.mxu1 %v20404_v49  ;;  %v20487_v49 = vld [vmem:[#allocation5 + $0x31ec] ss:$16 sps:$4 sm:$0xff]  }
 0x675   : > { %14471 = vmatpush1.bf16.msra.mxu0 %v20407_v59  ;;  %11038 = vmatprep.subr.bf16.mxu1 %v20412_v3  ;;  %v20482_v59 = vld [vmem:[#allocation5 + $0x15e8] ss:$16 sps:$4 sm:$0xff]  }
 0x676   : > { %14472 = vmatprep.subr.bf16.mxu0 %v20415_v18  ;;  %v20485_v3 = vld [vmem:[#allocation5 + $0x31e8] ss:$16 sps:$4 sm:$0xff]   ;;  %v20490_v18 = vld [vmem:[#allocation5 + $0x160c] ss:$16 sps:$4 sm:$0xff]  }
 0x678   : > { %11039 = vmatpush1.bf16.msra.mxu1 %v20410_v61  ;;  %v20493_v61 = vld [vmem:[#allocation5 + $0x320c] ss:$16 sps:$4 sm:$0xff]  }
 0x679   : > { %14473 = vmatpush1.bf16.msra.mxu0 %v20413_v6  ;;  %11040 = vmatprep.subr.bf16.mxu1 %v20418_v53  ;;  %v20488_v6 = vld [vmem:[#allocation5 + $0x1608] ss:$16 sps:$4 sm:$0xff]  }
 0x67a   : > { %14474 = vmatprep.subr.bf16.mxu0 %v20421_v20  ;;  %v20491_v53 = vld [vmem:[#allocation5 + $0x3208] ss:$16 sps:$4 sm:$0xff]   ;;  %v20496_v20 = vld [vmem:[#allocation5 + $0x162c] ss:$16 sps:$4 sm:$0xff]  }
 0x67c   : > { %11041 = vmatpush1.bf16.msra.mxu1 %v20416_v36  ;;  %v20499_v36 = vld [vmem:[#allocation5 + $0x322c] ss:$16 sps:$4 sm:$0xff]  }
 0x67d   : > { %14475 = vmatpush1.bf16.msra.mxu0 %v20419_v13  ;;  %11042 = vmatprep.subr.bf16.mxu1 %v20424_v10  ;;  %v20494_v13 = vld [vmem:[#allocation5 + $0x1628] ss:$16 sps:$4 sm:$0xff]  }
 0x67e   : > { %14476 = vmatprep.subr.bf16.mxu0 %v20427_v28  ;;  %v20497_v10 = vld [vmem:[#allocation5 + $0x3228] ss:$16 sps:$4 sm:$0xff]   ;;  %v20502_v28 = vld [vmem:[#allocation5 + $0x164c] ss:$16 sps:$4 sm:$0xff]  }
 0x680   : > { %11043 = vmatpush1.bf16.msra.mxu1 %v20422_v0  ;;  %v20505_v0 = vld [vmem:[#allocation5 + $0x324c] ss:$16 sps:$4 sm:$0xff]  }
 0x681   : > { %14477 = vmatpush1.bf16.msra.mxu0 %v20425_v31  ;;  %11044 = vmatprep.subr.bf16.mxu1 %v20430_v35  ;;  %v20500_v31 = vld [vmem:[#allocation5 + $0x1648] ss:$16 sps:$4 sm:$0xff]  }
 0x682   : > { %14478 = vmatprep.subr.bf16.mxu0 %v20433_v40  ;;  %v20503_v35 = vld [vmem:[#allocation5 + $0x3248] ss:$16 sps:$4 sm:$0xff]   ;;  %v20511_v40 = vld [vmem:[#allocation5 + $0x326c] ss:$16 sps:$4 sm:$0xff]  }
 0x684   : > { %11045 = vmatpush1.bf16.msra.mxu1 %v20428_v23  ;;  %v20506_v23 = vld [vmem:[#allocation5 + $0x1668] ss:$16 sps:$4 sm:$0xff]  }
 0x685   : > { %14479 = vmatpush1.bf16.msra.mxu0 %v20431_v11  ;;  %11046 = vmatprep.subr.bf16.mxu1 %v20436_v5  ;;  %v20509_v11 = vld [vmem:[#allocation5 + $0x3268] ss:$16 sps:$4 sm:$0xff]   ;;  %v20514_v5 = vld [vmem:[#allocation5 + $0x168c] ss:$16 sps:$4 sm:$0xff]  }
 0x686   : > { %14480 = vmatprep.subr.bf16.mxu0 %v20439_v9  ;;  %v20517_v9 = vld [vmem:[#allocation5 + $0x328c] ss:$16 sps:$4 sm:$0xff]  }
 0x688   : > { %11047 = vmatpush1.bf16.msra.mxu1 %v20434_v55  ;;  %v20515_v55 = vld [vmem:[#allocation5 + $0x3288] ss:$16 sps:$4 sm:$0xff]  }
 0x689   : > { %14481 = vmatpush1.bf16.msra.mxu0 %v20437_v57  ;;  %11048 = vmatprep.subr.bf16.mxu1 %v20442_v27  ;;  %v20520_v57 = vld [vmem:[#allocation5 + $0x16ac] ss:$16 sps:$4 sm:$0xff]  }
 0x68a   : > { %14482 = vmatprep.subr.bf16.mxu0 %v20445_v26  ;;  %v20523_v27 = vld [vmem:[#allocation5 + $0x32ac] ss:$16 sps:$4 sm:$0xff]   ;;  %v20518_v26 = vld [vmem:[#allocation5 + $0x16a8] ss:$16 sps:$4 sm:$0xff]  }
 0x68c   : > { %11049 = vmatpush1.bf16.msra.mxu1 %v20440_v1  ;;  %v20521_v1 = vld [vmem:[#allocation5 + $0x32a8] ss:$16 sps:$4 sm:$0xff]  }
 0x68d   : > { %14483 = vmatpush1.bf16.msra.mxu0 %v20443_v62  ;;  %11050 = vmatprep.subr.bf16.mxu1 %v20448_v17  ;;  %v20526_v62 = vld [vmem:[#allocation5 + $0x16cc] ss:$16 sps:$4 sm:$0xff]  }
 0x68e   : > { %14484 = vmatprep.subr.bf16.mxu0 %v20451_v32  ;;  %v20529_v17 = vld [vmem:[#allocation5 + $0x32cc] ss:$16 sps:$4 sm:$0xff]   ;;  %v20524_v32 = vld [vmem:[#allocation5 + $0x16c8] ss:$16 sps:$4 sm:$0xff]  }
 0x690   : > { %11051 = vmatpush1.bf16.msra.mxu1 %v20446_v22  ;;  %v20527_v22 = vld [vmem:[#allocation5 + $0x32c8] ss:$16 sps:$4 sm:$0xff]  }
 0x691   : > { %14485 = vmatpush1.bf16.msra.mxu0 %v20449_v8  ;;  %11052 = vmatprep.subr.bf16.mxu1 %v20454_v34  ;;  %v20532_v8 = vld [vmem:[#allocation5 + $0x16ec] ss:$16 sps:$4 sm:$0xff]  }
 0x692   : > { %14486 = vmatprep.subr.bf16.mxu0 %v20457_v33  ;;  %v20535_v34 = vld [vmem:[#allocation5 + $0x32ec] ss:$16 sps:$4 sm:$0xff]   ;;  %v20530_v33 = vld [vmem:[#allocation5 + $0x16e8] ss:$16 sps:$4 sm:$0xff]  }
 0x694   : > { %11053 = vmatpush1.bf16.msra.mxu1 %v20452_v38  ;;  %v20533_v38 = vld [vmem:[#allocation5 + $0x32e8] ss:$16 sps:$4 sm:$0xff]  }
 0x695   : > { %14487 = vmatpush1.bf16.msra.mxu0 %v20455_v42  ;;  %11054 = vmatprep.subr.bf16.mxu1 %v20460_v47  ;;  %v20538_v42 = vld [vmem:[#allocation5 + $0x170c] ss:$16 sps:$4 sm:$0xff]  }
 0x696   : > { %14488 = vmatprep.subr.bf16.mxu0 %v20463_v44  ;;  %v20541_v47 = vld [vmem:[#allocation5 + $0x330c] ss:$16 sps:$4 sm:$0xff]   ;;  %v20536_v44 = vld [vmem:[#allocation5 + $0x1708] ss:$16 sps:$4 sm:$0xff]  }
 0x698   : > { %11055 = vmatpush1.bf16.msra.mxu1 %v20458_v7  ;;  %v20539_v7 = vld [vmem:[#allocation5 + $0x3308] ss:$16 sps:$4 sm:$0xff]  }
 0x699   : > { %14489 = vmatpush1.bf16.msra.mxu0 %v20461_v50  ;;  %11056 = vmatprep.subr.bf16.mxu1 %v20466_v30  ;;  %v20544_v50 = vld [vmem:[#allocation5 + $0x172c] ss:$16 sps:$4 sm:$0xff]  }
 0x69a   : > { %14490 = vmatprep.subr.bf16.mxu0 %v20469_v51  ;;  %v20547_v30 = vld [vmem:[#allocation5 + $0x332c] ss:$16 sps:$4 sm:$0xff]   ;;  %v20542_v51 = vld [vmem:[#allocation5 + $0x1728] ss:$16 sps:$4 sm:$0xff]  }
 0x69c   : > { %11057 = vmatpush1.bf16.msra.mxu1 %v20464_v52  ;;  %v20545_v52 = vld [vmem:[#allocation5 + $0x3328] ss:$16 sps:$4 sm:$0xff]  }
 0x69d   : > { %14491 = vmatpush1.bf16.msra.mxu0 %v20467_v14  ;;  %11058 = vmatprep.subr.bf16.mxu1 %v20472_v15  ;;  %v20550_v14 = vld [vmem:[#allocation5 + $0x174c] ss:$16 sps:$4 sm:$0xff]  }
 0x69e   : > { %14492 = vmatprep.subr.bf16.mxu0 %v20475_v21  ;;  %v20553_v15 = vld [vmem:[#allocation5 + $0x334c] ss:$16 sps:$4 sm:$0xff]   ;;  %v20548_v21 = vld [vmem:[#allocation5 + $0x1748] ss:$16 sps:$4 sm:$0xff]  }
 0x6a0   : > { %11059 = vmatpush1.bf16.msra.mxu1 %v20470_v37  ;;  %v20551_v37 = vld [vmem:[#allocation5 + $0x3348] ss:$16 sps:$4 sm:$0xff]  }
 0x6a1   : > { %14493 = vmatpush1.bf16.msra.mxu0 %v20473_v46  ;;  %11060 = vmatprep.subr.bf16.mxu1 %v20478_v41  ;;  %v20556_v46 = vld [vmem:[#allocation5 + $0x176c] ss:$16 sps:$4 sm:$0xff]  }
 0x6a2   : > { %14494 = vmatprep.subr.bf16.mxu0 %v20481_v54  ;;  %v20559_v41 = vld [vmem:[#allocation5 + $0x336c] ss:$16 sps:$4 sm:$0xff]   ;;  %v20554_v54 = vld [vmem:[#allocation5 + $0x1768] ss:$16 sps:$4 sm:$0xff]  }
 0x6a4   : > { %11061 = vmatpush1.bf16.msra.mxu1 %v20476_v58  ;;  %v20557_v58 = vld [vmem:[#allocation5 + $0x3368] ss:$16 sps:$4 sm:$0xff]  }
 0x6a5   : > { %14495 = vmatpush1.bf16.msra.mxu0 %v20479_v63  ;;  %11062 = vmatprep.subr.bf16.mxu1 %v20484_v4  ;;  %v20562_v63 = vld [vmem:[#allocation5 + $0x178c] ss:$16 sps:$4 sm:$0xff]  }
 0x6a6   : > { %14496 = vmatprep.subr.bf16.mxu0 %v20487_v49  ;;  %v20565_v4 = vld [vmem:[#allocation5 + $0x338c] ss:$16 sps:$4 sm:$0xff]   ;;  %v20560_v49 = vld [vmem:[#allocation5 + $0x1788] ss:$16 sps:$4 sm:$0xff]  }
 0x6a8   : > { %11063 = vmatpush1.bf16.msra.mxu1 %v20482_v59  ;;  %v20563_v59 = vld [vmem:[#allocation5 + $0x3388] ss:$16 sps:$4 sm:$0xff]  }
 0x6a9   : > { %14497 = vmatpush1.bf16.msra.mxu0 %v20485_v3  ;;  %11075 = vmatprep.subr.bf16.mxu1 %v20490_v18  ;;  %v20568_v3 = vld [vmem:[#allocation5 + $0x17ac] ss:$16 sps:$4 sm:$0xff]  }
 0x6aa   : > { %14509 = vmatprep.subr.bf16.mxu0 %v20493_v61  ;;  %v20571_v18 = vld [vmem:[#allocation5 + $0x33ac] ss:$16 sps:$4 sm:$0xff]   ;;  %v20566_v61 = vld [vmem:[#allocation5 + $0x17a8] ss:$16 sps:$4 sm:$0xff]  }
 0x6ab   : > { %11065 = vmatmul.mubr.bf16.vlgmr.msra.gmra.mrb[12].mxu1 %v21526_v60  ;;  %v20508_v60 = vld [vmem:[#allocation5 + $0x166c] ss:$16 sps:$4 sm:$0xff]  }
 0x6ac   : > { %14499 = vmatmul.mubr.bf16.vlgmr.msra.gmra.mrb[8].mxu0 %v21654_v24  ;;  %11076 = vmatpush1.bf16.msra.mxu1 %v20488_v6  ;;  %v20569_v6 = vld [vmem:[#allocation5 + $0x33a8] ss:$16 sps:$4 sm:$0xff]  }
 0x6ad   : > { %14510 = vmatpush1.bf16.msra.mxu0 %v20491_v53  ;;  %11077 = vmatprep.subr.bf16.mxu1 %v20496_v20  ;;  %v20574_v53 = vld [vmem:[#allocation5 + $0x17cc] ss:$16 sps:$4 sm:$0xff]  }
 0x6ae   : > { %14511 = vmatprep.subr.bf16.mxu0 %v20499_v36  ;;  %11107 = vmatprep.mubr.bf16.mxu1 %v21531_v2  ;;  %v20512_v2 = vld [vmem:[#allocation5 + $0x1688] ss:$16 sps:$4 sm:$0xff]   ;;  %v20577_v20 = vld [vmem:[#allocation5 + $0x33cc] ss:$16 sps:$4 sm:$0xff]  }
 0x6af   : > { %14541 = vmatprep.mubr.bf16.mxu0 %v21659_v25  ;;  %v20572_v36 = vld [vmem:[#allocation5 + $0x17c8] ss:$16 sps:$4 sm:$0xff]  }
 0x6b0   : > { %11078 = vmatpush1.bf16.msra.mxu1 %v20494_v13  ;;  %v20575_v13 = vld [vmem:[#allocation5 + $0x33c8] ss:$16 sps:$4 sm:$0xff]  }
 0x6b1   : > { %14512 = vmatpush1.bf16.msra.mxu0 %v20497_v10  ;;  %11079 = vmatprep.subr.bf16.mxu1 %v20502_v28  ;;  %v20580_v10 = vld [vmem:[#allocation5 + $0x17ec] ss:$16 sps:$4 sm:$0xff]  }
 0x6b2   : > { %14513 = vmatprep.subr.bf16.mxu0 %v20505_v0  ;;  %v20583_v28 = vld [vmem:[#allocation5 + $0x33ec] ss:$16 sps:$4 sm:$0xff]   ;;  %v20578_v0 = vld [vmem:[#allocation5 + $0x17e8] ss:$16 sps:$4 sm:$0xff]  }
 0x6b4   : > { %11080 = vmatpush1.bf16.msra.mxu1 %v20500_v31  ;;  %v20581_v31 = vld [vmem:[#allocation5 + $0x33e8] ss:$16 sps:$4 sm:$0xff]  }
 0x6b5   : > { %14514 = vmatpush1.bf16.msra.mxu0 %v20503_v35  ;;  %11081 = vmatprep.subr.bf16.mxu1 %v20508_v60  ;;  %v21718_v35 = vld [vmem:[#allocation3 + $0x8] sm:$0xe0] }
 0x6b6   : > { %14515 = vmatprep.subr.bf16.mxu0 %v20511_v40  ;;  %v20586_v60 = vld [vmem:[#allocation5 + $0x180c] ss:$16 sps:$4 sm:$0xff]  }
 0x6b7   : > { %v20589_v40 = vld [vmem:[#allocation5 + $0x340c] ss:$16 sps:$4 sm:$0xff]  }
 0x6b8   : > { %11082 = vmatpush1.bf16.msra.mxu1 %v20506_v23  ;;  %v11675_v23 = vrot.slane %v21718_v35, 5 }
 0x6b9   : > { %14516 = vmatpush1.bf16.msra.mxu0 %v20509_v11  ;;  %11083 = vmatprep.subr.bf16.mxu1 %v20514_v5  ;;  %v20980_v11 = vld [vmem:[#allocation3 + $0x28] sm:$0x1f] }
 0x6ba   : > { %14517 = vmatprep.subr.bf16.mxu0 %v20517_v9  ;;  %v11676_v5 = vrot.slane %v20980_v11, 5  ;;  %v20584_v9 = vld [vmem:[#allocation5 + $0x1808] ss:$16 sps:$4 sm:$0xff]   ;;  %v20667_v11 = vld [vmem:[#allocation5 + $0x35ac] ss:$16 sps:$4 sm:$0xff]  }
 0x6bc   : > { %11084 = vmatpush1.bf16.msra.mxu1 %v20512_v2  ;;  %v20587_v2 = vld [vmem:[#allocation5 + $0x3408] ss:$16 sps:$4 sm:$0xff]  }
 0x6bd   : > { %14518 = vmatpush1.bf16.msra.mxu0 %v20515_v55  ;;  %11085 = vmatprep.subr.bf16.mxu1 %v20520_v57  ;;  %v20592_v55 = vld [vmem:[#allocation5 + $0x182c] ss:$16 sps:$4 sm:$0xff]  }
 0x6be   : > { %14519 = vmatprep.subr.bf16.mxu0 %v20523_v27  ;;  %v20595_v57 = vld [vmem:[#allocation5 + $0x342c] ss:$16 sps:$4 sm:$0xff]   ;;  %v21724_v27 = vsel %vm4086_vm5, %v11675_v23, %v11676_v5  ;;  %v20662_v5 = vld [vmem:[#allocation5 + $0x19a8] ss:$16 sps:$4 sm:$0xff]  }
 0x6bf   : > { %v20664_v23 = vld [vmem:[#allocation5 + $0x19ac] ss:$16 sps:$4 sm:$0xff]  }
 0x6c0   : > { %11086 = vmatpush1.bf16.msra.mxu1 %v20518_v26  ;;  %v20590_v26 = vld [vmem:[#allocation5 + $0x1828] ss:$16 sps:$4 sm:$0xff]  }
 0x6c1   : > { %14520 = vmatpush1.bf16.msra.mxu0 %v20521_v1  ;;  %11087 = vmatprep.subr.bf16.mxu1 %v20526_v62  ;;  %v20593_v1 = vld [vmem:[#allocation5 + $0x3428] ss:$16 sps:$4 sm:$0xff]   ;;  %v20598_v62 = vld [vmem:[#allocation5 + $0x184c] ss:$16 sps:$4 sm:$0xff]  }
 0x6c2   : > { %14521 = vmatprep.subr.bf16.mxu0 %v20529_v17  ;;  %v20601_v17 = vld [vmem:[#allocation5 + $0x344c] ss:$16 sps:$4 sm:$0xff]  }
 0x6c4   : > { %11088 = vmatpush1.bf16.msra.mxu1 %v20524_v32  ;;  %v20599_v32 = vld [vmem:[#allocation5 + $0x3448] ss:$16 sps:$4 sm:$0xff]  }
 0x6c5   : > { %14522 = vmatpush1.bf16.msra.mxu0 %v20527_v22  ;;  %11089 = vmatprep.subr.bf16.mxu1 %v20532_v8  ;;  %v20604_v22 = vld [vmem:[#allocation5 + $0x186c] ss:$16 sps:$4 sm:$0xff]  }
 0x6c6   : > { %14523 = vmatprep.subr.bf16.mxu0 %v20535_v34  ;;  %v20607_v8 = vld [vmem:[#allocation5 + $0x346c] ss:$16 sps:$4 sm:$0xff]   ;;  %v20602_v34 = vld [vmem:[#allocation5 + $0x1868] ss:$16 sps:$4 sm:$0xff]  }
 0x6c8   : > { %11090 = vmatpush1.bf16.msra.mxu1 %v20530_v33  ;;  %v20605_v33 = vld [vmem:[#allocation5 + $0x3468] ss:$16 sps:$4 sm:$0xff]  }
 0x6c9   : > { %14524 = vmatpush1.bf16.msra.mxu0 %v20533_v38  ;;  %11091 = vmatprep.subr.bf16.mxu1 %v20538_v42  ;;  %v20610_v38 = vld [vmem:[#allocation5 + $0x188c] ss:$16 sps:$4 sm:$0xff]  }
 0x6ca   : > { %14525 = vmatprep.subr.bf16.mxu0 %v20541_v47  ;;  %v20613_v42 = vld [vmem:[#allocation5 + $0x348c] ss:$16 sps:$4 sm:$0xff]   ;;  %v20611_v47 = vld [vmem:[#allocation5 + $0x3488] ss:$16 sps:$4 sm:$0xff]  }
 0x6cc   : > { %11092 = vmatpush1.bf16.msra.mxu1 %v20536_v44  ;;  %v20616_v44 = vld [vmem:[#allocation5 + $0x18ac] ss:$16 sps:$4 sm:$0xff]  }
 0x6cd   : > { %14526 = vmatpush1.bf16.msra.mxu0 %v20539_v7  ;;  %11093 = vmatprep.subr.bf16.mxu1 %v20544_v50  ;;  %v20619_v7 = vld [vmem:[#allocation5 + $0x34ac] ss:$16 sps:$4 sm:$0xff]   ;;  %v20614_v50 = vld [vmem:[#allocation5 + $0x18a8] ss:$16 sps:$4 sm:$0xff]  }
 0x6ce   : > { %14527 = vmatprep.subr.bf16.mxu0 %v20547_v30  ;;  %v20617_v30 = vld [vmem:[#allocation5 + $0x34a8] ss:$16 sps:$4 sm:$0xff]  }
 0x6d0   : > { %11094 = vmatpush1.bf16.msra.mxu1 %v20542_v51  ;;  %v20622_v51 = vld [vmem:[#allocation5 + $0x18cc] ss:$16 sps:$4 sm:$0xff]  }
 0x6d1   : > { %14528 = vmatpush1.bf16.msra.mxu0 %v20545_v52  ;;  %11095 = vmatprep.subr.bf16.mxu1 %v20550_v14  ;;  %v20625_v52 = vld [vmem:[#allocation5 + $0x34cc] ss:$16 sps:$4 sm:$0xff]   ;;  %v20620_v14 = vld [vmem:[#allocation5 + $0x18c8] ss:$16 sps:$4 sm:$0xff]  }
 0x6d2   : > { %14529 = vmatprep.subr.bf16.mxu0 %v20553_v15  ;;  %v20623_v15 = vld [vmem:[#allocation5 + $0x34c8] ss:$16 sps:$4 sm:$0xff]  }
 0x6d4   : > { %11096 = vmatpush1.bf16.msra.mxu1 %v20548_v21  ;;  %v20628_v21 = vld [vmem:[#allocation5 + $0x18ec] ss:$16 sps:$4 sm:$0xff]  }
 0x6d5   : > { %14530 = vmatpush1.bf16.msra.mxu0 %v20551_v37  ;;  %11097 = vmatprep.subr.bf16.mxu1 %v20556_v46  ;;  %v20631_v37 = vld [vmem:[#allocation5 + $0x34ec] ss:$16 sps:$4 sm:$0xff]   ;;  %v20626_v46 = vld [vmem:[#allocation5 + $0x18e8] ss:$16 sps:$4 sm:$0xff]  }
 0x6d6   : > { %14531 = vmatprep.subr.bf16.mxu0 %v20559_v41  ;;  %v20629_v41 = vld [vmem:[#allocation5 + $0x34e8] ss:$16 sps:$4 sm:$0xff]  }
 0x6d8   : > { %11098 = vmatpush1.bf16.msra.mxu1 %v20554_v54  ;;  %v20634_v54 = vld [vmem:[#allocation5 + $0x190c] ss:$16 sps:$4 sm:$0xff]  }
 0x6d9   : > { %14532 = vmatpush1.bf16.msra.mxu0 %v20557_v58  ;;  %11099 = vmatprep.subr.bf16.mxu1 %v20562_v63  ;;  %v20637_v58 = vld [vmem:[#allocation5 + $0x350c] ss:$16 sps:$4 sm:$0xff]   ;;  %v20632_v63 = vld [vmem:[#allocation5 + $0x1908] ss:$16 sps:$4 sm:$0xff]  }
 0x6da   : > { %14533 = vmatprep.subr.bf16.mxu0 %v20565_v4  ;;  %v20635_v4 = vld [vmem:[#allocation5 + $0x3508] ss:$16 sps:$4 sm:$0xff]  }
 0x6dc   : > { %11100 = vmatpush1.bf16.msra.mxu1 %v20560_v49  ;;  %v20640_v49 = vld [vmem:[#allocation5 + $0x192c] ss:$16 sps:$4 sm:$0xff]  }
 0x6dd   : > { %14534 = vmatpush1.bf16.msra.mxu0 %v20563_v59  ;;  %11101 = vmatprep.subr.bf16.mxu1 %v20568_v3  ;;  %v20643_v59 = vld [vmem:[#allocation5 + $0x352c] ss:$16 sps:$4 sm:$0xff]   ;;  %v20638_v3 = vld [vmem:[#allocation5 + $0x1928] ss:$16 sps:$4 sm:$0xff]  }
 0x6de   : > { %14535 = vmatprep.subr.bf16.mxu0 %v20571_v18  ;;  %v20641_v18 = vld [vmem:[#allocation5 + $0x3528] ss:$16 sps:$4 sm:$0xff]  }
 0x6e0   : > { %11102 = vmatpush1.bf16.msra.mxu1 %v20566_v61  ;;  %v20646_v61 = vld [vmem:[#allocation5 + $0x194c] ss:$16 sps:$4 sm:$0xff]  }
 0x6e1   : > { %14536 = vmatpush1.bf16.msra.mxu0 %v20569_v6  ;;  %11103 = vmatprep.subr.bf16.mxu1 %v20574_v53  ;;  %v20649_v6 = vld [vmem:[#allocation5 + $0x354c] ss:$16 sps:$4 sm:$0xff]   ;;  %v20644_v53 = vld [vmem:[#allocation5 + $0x1948] ss:$16 sps:$4 sm:$0xff]  }
 0x6e2   : > { %14537 = vmatprep.subr.bf16.mxu0 %v20577_v20  ;;  %v20647_v20 = vld [vmem:[#allocation5 + $0x3548] ss:$16 sps:$4 sm:$0xff]  }
 0x6e4   : > { %11104 = vmatpush1.bf16.msra.mxu1 %v20572_v36  ;;  %v20652_v36 = vld [vmem:[#allocation5 + $0x196c] ss:$16 sps:$4 sm:$0xff]  }
 0x6e5   : > { %14538 = vmatpush1.bf16.msra.mxu0 %v20575_v13  ;;  %11105 = vmatprep.subr.bf16.mxu1 %v20580_v10  ;;  %v20655_v13 = vld [vmem:[#allocation5 + $0x356c] ss:$16 sps:$4 sm:$0xff]   ;;  %v20650_v10 = vld [vmem:[#allocation5 + $0x1968] ss:$16 sps:$4 sm:$0xff]  }
 0x6e6   : > { %14539 = vmatprep.subr.bf16.mxu0 %v20583_v28  ;;  %v20653_v28 = vld [vmem:[#allocation5 + $0x3568] ss:$16 sps:$4 sm:$0xff]  }
 0x6e8   : > { %11106 = vmatpush1.bf16.msra.mxu1 %v20578_v0  ;;  %v20658_v0 = vld [vmem:[#allocation5 + $0x198c] ss:$16 sps:$4 sm:$0xff]  }
 0x6e9   : > { %14540 = vmatpush1.bf16.msra.mxu0 %v20581_v31  ;;  %11506 = vmatprep.subr.bf16.mxu1 %v20586_v60  ;;  %v20661_v31 = vld [vmem:[#allocation5 + $0x358c] ss:$16 sps:$4 sm:$0xff]   ;;  %v20656_v60 = vld [vmem:[#allocation5 + $0x1988] ss:$16 sps:$4 sm:$0xff]  }
 0x6ea   : > { %14940 = vmatprep.subr.bf16.mxu0 %v20589_v40  ;;  %v20659_v40 = vld [vmem:[#allocation5 + $0x3588] ss:$16 sps:$4 sm:$0xff]  }
 0x6eb   : > { %11108 = vmatmul.mubr.bf16.vlgmr.msra.gmra.mrb[12].mxu1 %v21547_v43  ;;  %v20596_v43 = vld [vmem:[#allocation5 + $0x1848] ss:$16 sps:$4 sm:$0xff]  }
 0x6ec   : > { %14542 = vmatmul.mubr.bf16.vlgmr.msra.gmra.mrb[8].mxu0 %v21684_v39  ;;  %11507 = vmatpush1.bf16.msra.mxu1 %v20584_v9  ;;  %v20665_v9 = vld [vmem:[#allocation5 + $0x35a8] ss:$16 sps:$4 sm:$0xff]  }
 0x6ed   : > { %14941 = vmatpush1.bf16.msra.mxu0 %v20587_v2  ;;  %11508 = vmatprep.subr.bf16.mxu1 %v20592_v55  ;;  %v20670_v2 = vld [vmem:[#allocation5 + $0x19cc] ss:$16 sps:$4 sm:$0xff]  }
 0x6ee   : > { %14942 = vmatprep.subr.bf16.mxu0 %v20595_v57  ;;  %11538 = vmatprep.mubr.bf16.mxu1 %v21645_v19  ;;  %v20608_v19 = vld [vmem:[#allocation5 + $0x1888] ss:$16 sps:$4 sm:$0xff]   ;;  %v20673_v55 = vld [vmem:[#allocation5 + $0x35cc] ss:$16 sps:$4 sm:$0xff]  }
 0x6ef   : > { %14972 = vmatprep.mubr.bf16.mxu0 %v21724_v27  ;;  %v20668_v57 = vld [vmem:[#allocation5 + $0x19c8] ss:$16 sps:$4 sm:$0xff]  }
 0x6f0   : > { %11509 = vmatpush1.bf16.msra.mxu1 %v20590_v26  ;;  %v20671_v26 = vld [vmem:[#allocation5 + $0x35c8] ss:$16 sps:$4 sm:$0xff]  }
 0x6f1   : > { %14943 = vmatpush1.bf16.msra.mxu0 %v20593_v1  ;;  %11510 = vmatprep.subr.bf16.mxu1 %v20598_v62  ;;  %v20676_v1 = vld [vmem:[#allocation5 + $0x19ec] ss:$16 sps:$4 sm:$0xff]  }
 0x6f2   : > { %14944 = vmatprep.subr.bf16.mxu0 %v20601_v17  ;;  %v20679_v62 = vld [vmem:[#allocation5 + $0x35ec] ss:$16 sps:$4 sm:$0xff]   ;;  %v21728_v17 = vld [vmem:[#allocation3] sm:$0xe0] }
 0x6f4   : > { %11511 = vmatpush1.bf16.msra.mxu1 %v20596_v43  ;;  %v20674_v43 = vld [vmem:[#allocation5 + $0x19e8] ss:$16 sps:$4 sm:$0xff]  }
 0x6f5   : > { %14945 = vmatpush1.bf16.msra.mxu0 %v20599_v32  ;;  %11512 = vmatprep.subr.bf16.mxu1 %v20604_v22  ;;  %v20677_v32 = vld [vmem:[#allocation5 + $0x35e8] ss:$16 sps:$4 sm:$0xff]   ;;  %v11672_v22 = vrot.slane %v21728_v17, 5 }
 0x6f6   : > { %14946 = vmatprep.subr.bf16.mxu0 %v20607_v8  ;;  %v20981_v8 = vld [vmem:[#allocation3 + $0x20] sm:$0x1f] }
 0x6f8   : > { %11513 = vmatpush1.bf16.msra.mxu1 %v20602_v34  ;;  %v11673_v34 = vrot.slane %v20981_v8, 5  ;;  %v20746_v8 = vld [vmem:[#allocation5 + $0x1b68] ss:$16 sps:$4 sm:$0xff]  }
 0x6f9   : > { %14947 = vmatpush1.bf16.msra.mxu0 %v20605_v33  ;;  %11514 = vmatprep.subr.bf16.mxu1 %v20610_v38  ;;  %v21731_v33 = vld [vmem:[#allocation3 + $0x18] sm:$0xe0] }
 0x6fa   : > { %14948 = vmatprep.subr.bf16.mxu0 %v20613_v42  ;;  %v20682_v38 = vld [vmem:[#allocation5 + $0x1a0c] ss:$16 sps:$4 sm:$0xff]  }
 0x6fb   : > { %v20685_v42 = vld [vmem:[#allocation5 + $0x360c] ss:$16 sps:$4 sm:$0xff]  }
 0x6fc   : > { %11515 = vmatpush1.bf16.msra.mxu1 %v20608_v19  ;;  %v11681_v19 = vrot.slane %v21731_v33, 5 }
 0x6fd   : > { %14949 = vmatpush1.bf16.msra.mxu0 %v20611_v47  ;;  %11516 = vmatprep.subr.bf16.mxu1 %v20616_v44  ;;  %v20982_v47 = vld [vmem:[#allocation3 + $0x38] sm:$0x1f] }
 0x6fe   : > { %14950 = vmatprep.subr.bf16.mxu0 %v20619_v7  ;;  %v11682_v44 = vrot.slane %v20982_v47, 5  ;;  %v20680_v7 = vld [vmem:[#allocation5 + $0x1a08] ss:$16 sps:$4 sm:$0xff]  }
 0x6ff   : > { %v20755_v47 = vld [vmem:[#allocation5 + $0x3788] ss:$16 sps:$4 sm:$0xff]  }
 0x700   : > { %11517 = vmatpush1.bf16.msra.mxu1 %v20614_v50  ;;  %v20683_v50 = vld [vmem:[#allocation5 + $0x3608] ss:$16 sps:$4 sm:$0xff]  }
 0x701   : > { %14951 = vmatpush1.bf16.msra.mxu0 %v20617_v30  ;;  %11518 = vmatprep.subr.bf16.mxu1 %v20622_v51  ;;  %v21735_v30 = vsel %vm4086_vm5, %v11672_v22, %v11673_v34  ;;  %v20688_v51 = vld [vmem:[#allocation5 + $0x1a2c] ss:$16 sps:$4 sm:$0xff]   ;;  %v20749_v34 = vld [vmem:[#allocation5 + $0x3768] ss:$16 sps:$4 sm:$0xff]  }
 0x702   : > { %14952 = vmatprep.subr.bf16.mxu0 %v20625_v52  ;;  %v20691_v52 = vld [vmem:[#allocation5 + $0x362c] ss:$16 sps:$4 sm:$0xff]  }
 0x703   : > { %v20751_v22 = vld [vmem:[#allocation5 + $0x376c] ss:$16 sps:$4 sm:$0xff]  }
 0x704   : > { %11519 = vmatpush1.bf16.msra.mxu1 %v20620_v14  ;;  %v21740_v14 = vsel %vm4086_vm5, %v11681_v19, %v11682_v44  ;;  %v20752_v19 = vld [vmem:[#allocation5 + $0x1b88] ss:$16 sps:$4 sm:$0xff]   ;;  %v20760_v44 = vld [vmem:[#allocation5 + $0x1bac] ss:$16 sps:$4 sm:$0xff]  }
 0x705   : > { %14953 = vmatpush1.bf16.msra.mxu0 %v20623_v15  ;;  %11520 = vmatprep.subr.bf16.mxu1 %v20628_v21  ;;  %v20686_v15 = vld [vmem:[#allocation5 + $0x1a28] ss:$16 sps:$4 sm:$0xff]  }
 0x706   : > { %14954 = vmatprep.subr.bf16.mxu0 %v20631_v37  ;;  %v20689_v21 = vld [vmem:[#allocation5 + $0x3628] ss:$16 sps:$4 sm:$0xff]   ;;  %v20694_v37 = vld [vmem:[#allocation5 + $0x1a4c] ss:$16 sps:$4 sm:$0xff]  }
 0x708   : > { %11521 = vmatpush1.bf16.msra.mxu1 %v20626_v46  ;;  %v20697_v46 = vld [vmem:[#allocation5 + $0x364c] ss:$16 sps:$4 sm:$0xff]  }
 0x709   : > { %14955 = vmatpush1.bf16.msra.mxu0 %v20629_v41  ;;  %11522 = vmatprep.subr.bf16.mxu1 %v20634_v54  ;;  %v20695_v41 = vld [vmem:[#allocation5 + $0x3648] ss:$16 sps:$4 sm:$0xff]   ;;  %v20700_v54 = vld [vmem:[#allocation5 + $0x1a6c] ss:$16 sps:$4 sm:$0xff]  }
 0x70a   : > { %14956 = vmatprep.subr.bf16.mxu0 %v20637_v58  ;;  %v20703_v58 = vld [vmem:[#allocation5 + $0x366c] ss:$16 sps:$4 sm:$0xff]  }
 0x70c   : > { %11523 = vmatpush1.bf16.msra.mxu1 %v20632_v63  ;;  %v20698_v63 = vld [vmem:[#allocation5 + $0x1a68] ss:$16 sps:$4 sm:$0xff]  }
 0x70d   : > { %14957 = vmatpush1.bf16.msra.mxu0 %v20635_v4  ;;  %11524 = vmatprep.subr.bf16.mxu1 %v20640_v49  ;;  %v20701_v4 = vld [vmem:[#allocation5 + $0x3668] ss:$16 sps:$4 sm:$0xff]   ;;  %v20706_v49 = vld [vmem:[#allocation5 + $0x1a8c] ss:$16 sps:$4 sm:$0xff]  }
 0x70e   : > { %14958 = vmatprep.subr.bf16.mxu0 %v20643_v59  ;;  %v20709_v59 = vld [vmem:[#allocation5 + $0x368c] ss:$16 sps:$4 sm:$0xff]  }
 0x710   : > { %11525 = vmatpush1.bf16.msra.mxu1 %v20638_v3  ;;  %v20707_v3 = vld [vmem:[#allocation5 + $0x3688] ss:$16 sps:$4 sm:$0xff]  }
 0x711   : > { %14959 = vmatpush1.bf16.msra.mxu0 %v20641_v18  ;;  %11526 = vmatprep.subr.bf16.mxu1 %v20646_v61  ;;  %v20712_v18 = vld [vmem:[#allocation5 + $0x1aac] ss:$16 sps:$4 sm:$0xff]  }
 0x712   : > { %14960 = vmatprep.subr.bf16.mxu0 %v20649_v6  ;;  %v20715_v61 = vld [vmem:[#allocation5 + $0x36ac] ss:$16 sps:$4 sm:$0xff]   ;;  %v20710_v6 = vld [vmem:[#allocation5 + $0x1aa8] ss:$16 sps:$4 sm:$0xff]  }
 0x714   : > { %11527 = vmatpush1.bf16.msra.mxu1 %v20644_v53  ;;  %v20713_v53 = vld [vmem:[#allocation5 + $0x36a8] ss:$16 sps:$4 sm:$0xff]  }
 0x715   : > { %14961 = vmatpush1.bf16.msra.mxu0 %v20647_v20  ;;  %11528 = vmatprep.subr.bf16.mxu1 %v20652_v36  ;;  %v20718_v20 = vld [vmem:[#allocation5 + $0x1acc] ss:$16 sps:$4 sm:$0xff]  }
 0x716   : > { %14962 = vmatprep.subr.bf16.mxu0 %v20655_v13  ;;  %v20721_v36 = vld [vmem:[#allocation5 + $0x36cc] ss:$16 sps:$4 sm:$0xff]   ;;  %v20716_v13 = vld [vmem:[#allocation5 + $0x1ac8] ss:$16 sps:$4 sm:$0xff]  }
 0x718   : > { %11529 = vmatpush1.bf16.msra.mxu1 %v20650_v10  ;;  %v20719_v10 = vld [vmem:[#allocation5 + $0x36c8] ss:$16 sps:$4 sm:$0xff]  }
 0x719   : > { %14963 = vmatpush1.bf16.msra.mxu0 %v20653_v28  ;;  %11530 = vmatprep.subr.bf16.mxu1 %v20658_v0  ;;  %v20724_v28 = vld [vmem:[#allocation5 + $0x1aec] ss:$16 sps:$4 sm:$0xff]  }
 0x71a   : > { %14964 = vmatprep.subr.bf16.mxu0 %v20661_v31  ;;  %v20727_v0 = vld [vmem:[#allocation5 + $0x36ec] ss:$16 sps:$4 sm:$0xff]   ;;  %v20722_v31 = vld [vmem:[#allocation5 + $0x1ae8] ss:$16 sps:$4 sm:$0xff]  }
 0x71c   : > { %11531 = vmatpush1.bf16.msra.mxu1 %v20656_v60  ;;  %v20725_v60 = vld [vmem:[#allocation5 + $0x36e8] ss:$16 sps:$4 sm:$0xff]  }
 0x71d   : > { %14965 = vmatpush1.bf16.msra.mxu0 %v20659_v40  ;;  %11532 = vmatprep.subr.bf16.mxu1 %v20664_v23  ;;  %v20730_v40 = vld [vmem:[#allocation5 + $0x1b0c] ss:$16 sps:$4 sm:$0xff]  }
 0x71e   : > { %14966 = vmatprep.subr.bf16.mxu0 %v20667_v11  ;;  %v20733_v23 = vld [vmem:[#allocation5 + $0x370c] ss:$16 sps:$4 sm:$0xff]   ;;  %v20728_v11 = vld [vmem:[#allocation5 + $0x1b08] ss:$16 sps:$4 sm:$0xff]  }
 0x720   : > { %11533 = vmatpush1.bf16.msra.mxu1 %v20662_v5  ;;  %v20731_v5 = vld [vmem:[#allocation5 + $0x3708] ss:$16 sps:$4 sm:$0xff]  }
 0x721   : > { %14967 = vmatpush1.bf16.msra.mxu0 %v20665_v9  ;;  %11534 = vmatprep.subr.bf16.mxu1 %v20670_v2  ;;  %v20736_v9 = vld [vmem:[#allocation5 + $0x1b2c] ss:$16 sps:$4 sm:$0xff]  }
 0x722   : > { %14968 = vmatprep.subr.bf16.mxu0 %v20673_v55  ;;  %v20739_v2 = vld [vmem:[#allocation5 + $0x372c] ss:$16 sps:$4 sm:$0xff]   ;;  %v20734_v55 = vld [vmem:[#allocation5 + $0x1b28] ss:$16 sps:$4 sm:$0xff]  }
 0x724   : > { %11535 = vmatpush1.bf16.msra.mxu1 %v20668_v57  ;;  %v20737_v57 = vld [vmem:[#allocation5 + $0x3728] ss:$16 sps:$4 sm:$0xff]  }
 0x725   : > { %14969 = vmatpush1.bf16.msra.mxu0 %v20671_v26  ;;  %11536 = vmatprep.subr.bf16.mxu1 %v20676_v1  ;;  %v20742_v26 = vld [vmem:[#allocation5 + $0x1b4c] ss:$16 sps:$4 sm:$0xff]  }
 0x726   : > { %14970 = vmatprep.subr.bf16.mxu0 %v20679_v62  ;;  %v20745_v1 = vld [vmem:[#allocation5 + $0x374c] ss:$16 sps:$4 sm:$0xff]   ;;  %v20740_v62 = vld [vmem:[#allocation5 + $0x1b48] ss:$16 sps:$4 sm:$0xff]  }
 0x728   : > { %11537 = vmatpush1.bf16.msra.mxu1 %v20674_v43  ;;  %v20743_v43 = vld [vmem:[#allocation5 + $0x3748] ss:$16 sps:$4 sm:$0xff]  }
 0x729   : > { %14971 = vmatpush1.bf16.msra.mxu0 %v20677_v32  ;;  %11549 = vmatprep.subr.bf16.mxu1 %v20682_v38  ;;  %v20748_v32 = vld [vmem:[#allocation5 + $0x1b6c] ss:$16 sps:$4 sm:$0xff]  }
 0x72a   : > { %14983 = vmatprep.subr.bf16.mxu0 %v20685_v42  ;;  %v20754_v38 = vld [vmem:[#allocation5 + $0x1b8c] ss:$16 sps:$4 sm:$0xff]  }
 0x72b   : > { %11539 = vmatmul.mubr.bf16.vlgmr.msra.gmra.mrb[12].mxu1 %v21654_v24  ;;  %v20692_v24 = vld [vmem:[#allocation5 + $0x1a48] ss:$16 sps:$4 sm:$0xff]   ;;  %v20757_v42 = vld [vmem:[#allocation5 + $0x378c] ss:$16 sps:$4 sm:$0xff]  }
 0x72c   : > { %14973 = vmatmul.mubr.bf16.vlgmr.msra.gmra.mrb[8].mxu0 %v21735_v30  ;;  %11550 = vmatpush1.bf16.msra.mxu1 %v20680_v7  ;;  %v20763_v7 = vld [vmem:[#allocation5 + $0x37ac] ss:$16 sps:$4 sm:$0xff]  }
 0x72d   : > { %14984 = vmatpush1.bf16.msra.mxu0 %v20683_v50  ;;  %11551 = vmatprep.subr.bf16.mxu1 %v20688_v51  ;;  %v20758_v50 = vld [vmem:[#allocation5 + $0x1ba8] ss:$16 sps:$4 sm:$0xff]  }
 0x72e   : > { %14985 = vmatprep.subr.bf16.mxu0 %v20691_v52  ;;  %11581 = vmatprep.mubr.bf16.mxu1 %v21659_v25  ;;  %v20704_v25 = vld [vmem:[#allocation5 + $0x1a88] ss:$16 sps:$4 sm:$0xff]  }
 0x72f   : > { %15015 = vmatprep.mubr.bf16.mxu0 %v21740_v14  ;;  %v20761_v51 = vld [vmem:[#allocation5 + $0x37a8] ss:$16 sps:$4 sm:$0xff]  }
 0x730   : > { %11552 = vmatpush1.bf16.msra.mxu1 %v20686_v15  ;;  %v15031_v52 = vld [vmem:[#allocation3 + $0x28] sm:$0x3f] }
 0x731   : > { %14986 = vmatpush1.bf16.msra.mxu0 %v20689_v21  ;;  %11553 = vmatprep.subr.bf16.mxu1 %v20694_v37  ;;  %v20766_v15 = vld [vmem:[#allocation5 + $0x1bcc] ss:$16 sps:$4 sm:$0xff]   ;;  %v15116_v37 = vshrl.u32 %v21718_v35, 16 }
 0x732   : > { %14987 = vmatprep.subr.bf16.mxu0 %v20697_v46  ;;  %v20769_v21 = vld [vmem:[#allocation5 + $0x37cc] ss:$16 sps:$4 sm:$0xff]   ;;  %v15119_v46 = vshll.u32 %v21718_v35, 16  ;;  %v20773_v35 = vld [vmem:[#allocation5 + $0x37e8] ss:$16 sps:$4 sm:$0xff]  }
 0x734   : > { %11554 = vmatpush1.bf16.msra.mxu1 %v20692_v24  ;;  %v15124_v24 = vshrl.u32 %v15031_v52, 16 }
 0x735   : > { %14988 = vmatpush1.bf16.msra.mxu0 %v20695_v41  ;;  %11555 = vmatprep.subr.bf16.mxu1 %v20700_v54  ;;  %v15127_v41 = vshll.u32 %v15031_v52, 16  ;;  %v20764_v54 = vld [vmem:[#allocation5 + $0x1bc8] ss:$16 sps:$4 sm:$0xff]   ;;  %v20823_v52 = vld [vmem:[#allocation5 + $0x38ec] ss:$16 sps:$4 sm:$0xff]  }
 0x736   : > { %14989 = vmatprep.subr.bf16.mxu0 %v20703_v58  ;;  %v20767_v58 = vld [vmem:[#allocation5 + $0x37c8] ss:$16 sps:$4 sm:$0xff]  }
 0x738   : > { %11556 = vmatpush1.bf16.msra.mxu1 %v20698_v63  ;;  %v20772_v63 = vld [vmem:[#allocation5 + $0x1bec] ss:$16 sps:$4 sm:$0xff]  }
 0x739   : > { %14990 = vmatpush1.bf16.msra.mxu0 %v20701_v4  ;;  %11557 = vmatprep.subr.bf16.mxu1 %v20706_v49  ;;  %v20775_v4 = vld [vmem:[#allocation5 + $0x37ec] ss:$16 sps:$4 sm:$0xff]   ;;  %v21746_v49 = vld [vmem:[#allocation3 + $0x10] sm:$0xe0] }
 0x73a   : > { %14991 = vmatprep.subr.bf16.mxu0 %v20709_v59  ;;  %v15118_v59 = vrot.slane %v15116_v37, 5  ;;  %v20826_v37 = vld [vmem:[#allocation5 + $0x1d0c] ss:$16 sps:$4 sm:$0xff]  }
 0x73c   : > { %11558 = vmatpush1.bf16.msra.mxu1 %v20704_v25  ;;  %v15121_v25 = vrot.slane %v15119_v46, 6  ;;  %v20829_v46 = vld [vmem:[#allocation5 + $0x390c] ss:$16 sps:$4 sm:$0xff]  }
 0x73d   : > { %14992 = vmatpush1.bf16.msra.mxu0 %v20707_v3  ;;  %11559 = vmatprep.subr.bf16.mxu1 %v20712_v18  ;;  %v15126_v3 = vrot.slane %v15124_v24, 5  ;;  %v15129_v18 = vrot.slane %v15127_v41, 6  ;;  %v20824_v24 = vld [vmem:[#allocation5 + $0x1d08] ss:$16 sps:$4 sm:$0xff]  }
 0x73e   : > { %14993 = vmatprep.subr.bf16.mxu0 %v20715_v61  ;;  %v20770_v61 = vld [vmem:[#allocation5 + $0x1be8] ss:$16 sps:$4 sm:$0xff]  }
 0x73f   : > { %v20827_v41 = vld [vmem:[#allocation5 + $0x3908] ss:$16 sps:$4 sm:$0xff]  }
 0x740   : > { %11560 = vmatpush1.bf16.msra.mxu1 %v20710_v6  ;;  %v11678_v6 = vrot.slane %v21746_v49, 5 }
 0x741   : > { %14994 = vmatpush1.bf16.msra.mxu0 %v20713_v53  ;;  %11561 = vmatprep.subr.bf16.mxu1 %v20718_v20  ;;  %v20983_v53 = vld [vmem:[#allocation3 + $0x30] sm:$0x1f] }
 0x742   : > { %14995 = vmatprep.subr.bf16.mxu0 %v20721_v36  ;;  %v11679_v20 = vrot.slane %v20983_v53, 5  ;;  %v20778_v36 = vld [vmem:[#allocation5 + $0x1c0c] ss:$16 sps:$4 sm:$0xff]   ;;  %v20845_v53 = vld [vmem:[#allocation5 + $0x3968] ss:$16 sps:$4 sm:$0xff]  }
 0x744   : > { %11562 = vmatpush1.bf16.msra.mxu1 %v20716_v13  ;;  %v20781_v13 = vld [vmem:[#allocation5 + $0x380c] ss:$16 sps:$4 sm:$0xff]  }
 0x745   : > { %14996 = vmatpush1.bf16.msra.mxu0 %v20719_v10  ;;  %11563 = vmatprep.subr.bf16.mxu1 %v20724_v28  ;;  %v15122_v10 = vor.u32 %v15121_v25, %v15118_v59  ;;  %v15130_v28 = vor.u32 %v15129_v18, %v15126_v3  ;;  %v20838_v59 = vld [vmem:[#allocation5 + $0x1d4c] ss:$16 sps:$4 sm:$0xff]   ;;  %v20836_v3 = vld [vmem:[#allocation5 + $0x1d48] ss:$16 sps:$4 sm:$0xff]  }
 0x746   : > { %14997 = vmatprep.subr.bf16.mxu0 %v20727_v0  ;;  %v20776_v0 = vld [vmem:[#allocation5 + $0x1c08] ss:$16 sps:$4 sm:$0xff]   ;;  %v20841_v25 = vld [vmem:[#allocation5 + $0x394c] ss:$16 sps:$4 sm:$0xff]  }
 0x747   : > { %v20839_v18 = vld [vmem:[#allocation5 + $0x3948] ss:$16 sps:$4 sm:$0xff]  }
 0x748   : > { %11564 = vmatpush1.bf16.msra.mxu1 %v20722_v31  ;;  %v20779_v31 = vld [vmem:[#allocation5 + $0x3808] ss:$16 sps:$4 sm:$0xff]  }
 0x749   : > { %14998 = vmatpush1.bf16.msra.mxu0 %v20725_v60  ;;  %11565 = vmatprep.subr.bf16.mxu1 %v20730_v40  ;;  %v21750_v60 = vsel %vm4086_vm5, %v11678_v6, %v11679_v20  ;;  %v20784_v40 = vld [vmem:[#allocation5 + $0x1c2c] ss:$16 sps:$4 sm:$0xff]   ;;  %v20842_v6 = vld [vmem:[#allocation5 + $0x1d68] ss:$16 sps:$4 sm:$0xff]  }
 0x74a   : > { %14999 = vmatprep.subr.bf16.mxu0 %v20733_v23  ;;  %v20787_v23 = vld [vmem:[#allocation5 + $0x382c] ss:$16 sps:$4 sm:$0xff]  }
 0x74b   : > { %v20850_v20 = vld [vmem:[#allocation5 + $0x1d8c] ss:$16 sps:$4 sm:$0xff]  }
 0x74c   : > { %11566 = vmatpush1.bf16.msra.mxu1 %v20728_v11  ;;  %v15131_v11 = vsel %vm7522_vm6, %v15122_v10, %v15130_v28  ;;  %v20851_v10 = vld [vmem:[#allocation5 + $0x3988] ss:$16 sps:$4 sm:$0xff]   ;;  %v20856_v28 = vld [vmem:[#allocation5 + $0x1dac] ss:$16 sps:$4 sm:$0xff]  }
 0x74d   : > { %15000 = vmatpush1.bf16.msra.mxu0 %v20731_v5  ;;  %11567 = vmatprep.subr.bf16.mxu1 %v20736_v9  ;;  %v20782_v5 = vld [vmem:[#allocation5 + $0x1c28] ss:$16 sps:$4 sm:$0xff]  }
 0x74e   : > { %15001 = vmatprep.subr.bf16.mxu0 %v20739_v2  ;;  %v20785_v9 = vld [vmem:[#allocation5 + $0x3828] ss:$16 sps:$4 sm:$0xff]   ;;  %v20790_v2 = vld [vmem:[#allocation5 + $0x1c4c] ss:$16 sps:$4 sm:$0xff]  }
 0x750   : > { %11568 = vmatpush1.bf16.msra.mxu1 %v20734_v55  ;;  %v20793_v55 = vld [vmem:[#allocation5 + $0x384c] ss:$16 sps:$4 sm:$0xff]  }
 0x751   : > { %15002 = vmatpush1.bf16.msra.mxu0 %v20737_v57  ;;  %11569 = vmatprep.subr.bf16.mxu1 %v20742_v26  ;;  %v20788_v57 = vld [vmem:[#allocation5 + $0x1c48] ss:$16 sps:$4 sm:$0xff]  }
 0x752   : > { %15003 = vmatprep.subr.bf16.mxu0 %v20745_v1  ;;  %v20791_v26 = vld [vmem:[#allocation5 + $0x3848] ss:$16 sps:$4 sm:$0xff]   ;;  %v20799_v1 = vld [vmem:[#allocation5 + $0x386c] ss:$16 sps:$4 sm:$0xff]  }
 0x754   : > { %11570 = vmatpush1.bf16.msra.mxu1 %v20740_v62  ;;  %v20794_v62 = vld [vmem:[#allocation5 + $0x1c68] ss:$16 sps:$4 sm:$0xff]  }
 0x755   : > { %15004 = vmatpush1.bf16.msra.mxu0 %v20743_v43  ;;  %11571 = vmatprep.subr.bf16.mxu1 %v20748_v32  ;;  %v20797_v43 = vld [vmem:[#allocation5 + $0x3868] ss:$16 sps:$4 sm:$0xff]   ;;  %v20802_v32 = vld [vmem:[#allocation5 + $0x1c8c] ss:$16 sps:$4 sm:$0xff]  }
 0x756   : > { %15005 = vmatprep.subr.bf16.mxu0 %v20751_v22  ;;  %v20805_v22 = vld [vmem:[#allocation5 + $0x388c] ss:$16 sps:$4 sm:$0xff]  }
 0x758   : > { %11572 = vmatpush1.bf16.msra.mxu1 %v20746_v8  ;;  %v20803_v8 = vld [vmem:[#allocation5 + $0x3888] ss:$16 sps:$4 sm:$0xff]  }
 0x759   : > { %15006 = vmatpush1.bf16.msra.mxu0 %v20749_v34  ;;  %11573 = vmatprep.subr.bf16.mxu1 %v20754_v38  ;;  %v20808_v34 = vld [vmem:[#allocation5 + $0x1cac] ss:$16 sps:$4 sm:$0xff]  }
 0x75a   : > { %15007 = vmatprep.subr.bf16.mxu0 %v20757_v42  ;;  %v20811_v38 = vld [vmem:[#allocation5 + $0x38ac] ss:$16 sps:$4 sm:$0xff]   ;;  %v20806_v42 = vld [vmem:[#allocation5 + $0x1ca8] ss:$16 sps:$4 sm:$0xff]  }
 0x75c   : > { %11574 = vmatpush1.bf16.msra.mxu1 %v20752_v19  ;;  %v20809_v19 = vld [vmem:[#allocation5 + $0x38a8] ss:$16 sps:$4 sm:$0xff]  }
 0x75d   : > { %15008 = vmatpush1.bf16.msra.mxu0 %v20755_v47  ;;  %11575 = vmatprep.subr.bf16.mxu1 %v20760_v44  ;;  %v20814_v47 = vld [vmem:[#allocation5 + $0x1ccc] ss:$16 sps:$4 sm:$0xff]  }
 0x75e   : > { %15009 = vmatprep.subr.bf16.mxu0 %v20763_v7  ;;  %v20817_v44 = vld [vmem:[#allocation5 + $0x38cc] ss:$16 sps:$4 sm:$0xff]   ;;  %v20812_v7 = vld [vmem:[#allocation5 + $0x1cc8] ss:$16 sps:$4 sm:$0xff]  }
 0x760   : > { %11576 = vmatpush1.bf16.msra.mxu1 %v20758_v50  ;;  %v20815_v50 = vld [vmem:[#allocation5 + $0x38c8] ss:$16 sps:$4 sm:$0xff]  }
 0x761   : > { %15010 = vmatpush1.bf16.msra.mxu0 %v20761_v51  ;;  %11577 = vmatprep.subr.bf16.mxu1 %v20766_v15  ;;  %v20820_v51 = vld [vmem:[#allocation5 + $0x1cec] ss:$16 sps:$4 sm:$0xff]   ;;  %v20818_v15 = vld [vmem:[#allocation5 + $0x1ce8] ss:$16 sps:$4 sm:$0xff]  }
 0x762   : > { %15011 = vmatprep.subr.bf16.mxu0 %v20769_v21  ;;  %v20821_v21 = vld [vmem:[#allocation5 + $0x38e8] ss:$16 sps:$4 sm:$0xff]  }
 0x764   : > { %11578 = vmatpush1.bf16.msra.mxu1 %v20764_v54  ;;  %v20832_v54 = vld [vmem:[#allocation5 + $0x1d2c] ss:$16 sps:$4 sm:$0xff]  }
 0x765   : > { %15012 = vmatpush1.bf16.msra.mxu0 %v20767_v58  ;;  %11579 = vmatprep.subr.bf16.mxu1 %v20772_v63  ;;  %v20835_v58 = vld [vmem:[#allocation5 + $0x392c] ss:$16 sps:$4 sm:$0xff]   ;;  %v20830_v63 = vld [vmem:[#allocation5 + $0x1d28] ss:$16 sps:$4 sm:$0xff]  }
 0x766   : > { %15013 = vmatprep.subr.bf16.mxu0 %v20775_v4  ;;  %v20833_v4 = vld [vmem:[#allocation5 + $0x3928] ss:$16 sps:$4 sm:$0xff]  }
 0x768   : > { %11580 = vmatpush1.bf16.msra.mxu1 %v20770_v61  ;;  %v20844_v61 = vld [vmem:[#allocation5 + $0x1d6c] ss:$16 sps:$4 sm:$0xff]  }
 0x769   : > { %15014 = vmatpush1.bf16.msra.mxu0 %v20773_v35  ;;  %12008 = vmatprep.subr.bf16.mxu1 %v20778_v36  ;;  %v20847_v35 = vld [vmem:[#allocation5 + $0x396c] ss:$16 sps:$4 sm:$0xff]  }
 0x76a   : > { %15490 = vmatprep.subr.bf16.mxu0 %v20781_v13  ;;  %v20853_v36 = vld [vmem:[#allocation5 + $0x398c] ss:$16 sps:$4 sm:$0xff]   ;;  %v20848_v13 = vld [vmem:[#allocation5 + $0x1d88] ss:$16 sps:$4 sm:$0xff]  }
 0x76b   : > { %11582 = vmatmul.mubr.bf16.vlgmr.msra.gmra.mrb[12].mxu1 %v21684_v39  ;;  %v20796_v39 = vld [vmem:[#allocation5 + $0x1c6c] ss:$16 sps:$4 sm:$0xff]  }
 0x76c   : > { %15016 = vmatmul.mubr.bf16.vlgmr.msra.gmra.mrb[8].mxu0 %v21750_v60  ;;  %12009 = vmatpush1.bf16.msra.mxu1 %v20776_v0  ;;  %v20859_v0 = vld [vmem:[#allocation5 + $0x39ac] ss:$16 sps:$4 sm:$0xff]  }
 0x76d   : > { %15491 = vmatpush1.bf16.msra.mxu0 %v20779_v31  ;;  %12010 = vmatprep.subr.bf16.mxu1 %v20784_v40  ;;  %v15030_v31 = vld [vmem:[#allocation3 + $0x20] sm:$0x3f]  ;;  %v20854_v40 = vld [vmem:[#allocation5 + $0x1da8] ss:$16 sps:$4 sm:$0xff]  }
 0x76e   : > { %15492 = vmatprep.subr.bf16.mxu0 %v20787_v23  ;;  %12040 = vmatprep.mubr.bf16.mxu1 %v21724_v27  ;;  %v20800_v27 = vld [vmem:[#allocation5 + $0x1c88] ss:$16 sps:$4 sm:$0xff]  }
 0x76f   : > { %15522 = vmatprep.mubr.bf16.mxu0 %v15131_v11  ;;  %v20857_v23 = vld [vmem:[#allocation5 + $0x39a8] ss:$16 sps:$4 sm:$0xff]   ;;  %v15099_v11 = vshrl.u32 %v21728_v17, 16 }
 0x770   : > { %12011 = vmatpush1.bf16.msra.mxu1 %v20782_v5  ;;  %v15102_v5 = vshll.u32 %v21728_v17, 16 }
 0x771   : > { %15493 = vmatpush1.bf16.msra.mxu0 %v20785_v9  ;;  %12012 = vmatprep.subr.bf16.mxu1 %v20790_v2  ;;  %v15107_v9 = vshrl.u32 %v15030_v31, 16  ;;  %v15110_v2 = vshll.u32 %v15030_v31, 16  ;;  %v20902_v31 = vld [vmem:[#allocation5 + $0x1ea8] ss:$16 sps:$4 sm:$0xff]  }
 0x772   : > { %15494 = vmatprep.subr.bf16.mxu0 %v20793_v55  ;;  %v15033_v55 = vld [vmem:[#allocation3 + $0x38] sm:$0x3f] }
 0x773   : > { %v15109_v17 = vrot.slane %v15107_v9, 5  ;;  %v20911_v9 = vld [vmem:[#allocation5 + $0x3ac8] ss:$16 sps:$4 sm:$0xff]  }
 0x774   : > { %12013 = vmatpush1.bf16.msra.mxu1 %v20788_v57  ;;  %v20862_v57 = vld [vmem:[#allocation5 + $0x1dcc] ss:$16 sps:$4 sm:$0xff]  }
 0x775   : > { %15495 = vmatpush1.bf16.msra.mxu0 %v20791_v26  ;;  %12014 = vmatprep.subr.bf16.mxu1 %v20796_v39  ;;  %v20865_v26 = vld [vmem:[#allocation5 + $0x39cc] ss:$16 sps:$4 sm:$0xff]   ;;  %v20860_v39 = vld [vmem:[#allocation5 + $0x1dc8] ss:$16 sps:$4 sm:$0xff]  }
 0x776   : > { %15496 = vmatprep.subr.bf16.mxu0 %v20799_v1  ;;  %v15150_v1 = vshrl.u32 %v21731_v33, 16 }
 0x778   : > { %12015 = vmatpush1.bf16.msra.mxu1 %v20794_v62  ;;  %v15153_v62 = vshll.u32 %v21731_v33, 16  ;;  %v20866_v33 = vld [vmem:[#allocation5 + $0x1de8] ss:$16 sps:$4 sm:$0xff]  }
 0x779   : > { %15497 = vmatpush1.bf16.msra.mxu0 %v20797_v43  ;;  %12016 = vmatprep.subr.bf16.mxu1 %v20802_v32  ;;  %v15158_v43 = vshrl.u32 %v15033_v55, 16  ;;  %v15161_v32 = vshll.u32 %v15033_v55, 16  ;;  %v20919_v55 = vld [vmem:[#allocation5 + $0x3aec] ss:$16 sps:$4 sm:$0xff]  }
 0x77a   : > { %15498 = vmatprep.subr.bf16.mxu0 %v20805_v22  ;;  %v20863_v22 = vld [vmem:[#allocation5 + $0x39c8] ss:$16 sps:$4 sm:$0xff]  }
 0x77c   : > { %12017 = vmatpush1.bf16.msra.mxu1 %v20800_v27  ;;  %v15101_v27 = vrot.slane %v15099_v11, 5  ;;  %v20913_v11 = vld [vmem:[#allocation5 + $0x3acc] ss:$16 sps:$4 sm:$0xff]  }
 0x77d   : > { %15499 = vmatpush1.bf16.msra.mxu0 %v20803_v8  ;;  %12018 = vmatprep.subr.bf16.mxu1 %v20808_v34  ;;  %v15104_v8 = vrot.slane %v15102_v5, 6  ;;  %v15112_v34 = vrot.slane %v15110_v2, 6  ;;  %v20908_v5 = vld [vmem:[#allocation5 + $0x1ec8] ss:$16 sps:$4 sm:$0xff]   ;;  %v20916_v2 = vld [vmem:[#allocation5 + $0x1eec] ss:$16 sps:$4 sm:$0xff]  }
 0x77e   : > { %15500 = vmatprep.subr.bf16.mxu0 %v20811_v38  ;;  %v20868_v38 = vld [vmem:[#allocation5 + $0x1dec] ss:$16 sps:$4 sm:$0xff]  }
 0x780   : > { %12019 = vmatpush1.bf16.msra.mxu1 %v20806_v42  ;;  %v20871_v42 = vld [vmem:[#allocation5 + $0x39ec] ss:$16 sps:$4 sm:$0xff]  }
 0x781   : > { %15501 = vmatpush1.bf16.msra.mxu0 %v20809_v19  ;;  %12020 = vmatprep.subr.bf16.mxu1 %v20814_v47  ;;  %v15152_v19 = vrot.slane %v15150_v1, 5  ;;  %v15155_v47 = vrot.slane %v15153_v62, 6  ;;  %v20925_v1 = vld [vmem:[#allocation5 + $0x3b0c] ss:$16 sps:$4 sm:$0xff]   ;;  %v20920_v62 = vld [vmem:[#allocation5 + $0x1f08] ss:$16 sps:$4 sm:$0xff]  }
 0x782   : > { %15502 = vmatprep.subr.bf16.mxu0 %v20817_v44  ;;  %v15160_v44 = vrot.slane %v15158_v43, 5  ;;  %v20923_v43 = vld [vmem:[#allocation5 + $0x3b08] ss:$16 sps:$4 sm:$0xff]  }
 0x784   : > { %12021 = vmatpush1.bf16.msra.mxu1 %v20812_v7  ;;  %v15163_v7 = vrot.slane %v15161_v32, 6  ;;  %v20928_v32 = vld [vmem:[#allocation5 + $0x1f2c] ss:$16 sps:$4 sm:$0xff]  }
 0x785   : > { %15503 = vmatpush1.bf16.msra.mxu0 %v20815_v50  ;;  %12022 = vmatprep.subr.bf16.mxu1 %v20820_v51  ;;  %v20869_v50 = vld [vmem:[#allocation5 + $0x39e8] ss:$16 sps:$4 sm:$0xff]   ;;  %v15105_v51 = vor.u32 %v15104_v8, %v15101_v27 }
 0x786   : > { %15504 = vmatprep.subr.bf16.mxu0 %v20823_v52  ;;  %v15113_v52 = vor.u32 %v15112_v34, %v15109_v17  ;;  %v20926_v27 = vld [vmem:[#allocation5 + $0x1f28] ss:$16 sps:$4 sm:$0xff]   ;;  %v20934_v17 = vld [vmem:[#allocation5 + $0x1f4c] ss:$16 sps:$4 sm:$0xff]  }
 0x787   : > { %v20929_v8 = vld [vmem:[#allocation5 + $0x3b28] ss:$16 sps:$4 sm:$0xff]   ;;  %v20937_v34 = vld [vmem:[#allocation5 + $0x3b4c] ss:$16 sps:$4 sm:$0xff]  }
 0x788   : > { %12023 = vmatpush1.bf16.msra.mxu1 %v20818_v15  ;;  %v20874_v15 = vld [vmem:[#allocation5 + $0x1e0c] ss:$16 sps:$4 sm:$0xff]  }
 0x789   : > { %15505 = vmatpush1.bf16.msra.mxu0 %v20821_v21  ;;  %12024 = vmatprep.subr.bf16.mxu1 %v20826_v37  ;;  %v20877_v21 = vld [vmem:[#allocation5 + $0x3a0c] ss:$16 sps:$4 sm:$0xff]   ;;  %v15156_v37 = vor.u32 %v15155_v47, %v15152_v19 }
 0x78a   : > { %15506 = vmatprep.subr.bf16.mxu0 %v20829_v46  ;;  %v15164_v46 = vor.u32 %v15163_v7, %v15160_v44  ;;  %v20940_v19 = vld [vmem:[#allocation5 + $0x1f6c] ss:$16 sps:$4 sm:$0xff]   ;;  %v20938_v44 = vld [vmem:[#allocation5 + $0x1f68] ss:$16 sps:$4 sm:$0xff]  }
 0x78b   : > { %v20943_v47 = vld [vmem:[#allocation5 + $0x3b6c] ss:$16 sps:$4 sm:$0xff]   ;;  %v20941_v7 = vld [vmem:[#allocation5 + $0x3b68] ss:$16 sps:$4 sm:$0xff]  }
 0x78c   : > { %12025 = vmatpush1.bf16.msra.mxu1 %v20824_v24  ;;  %v20872_v24 = vld [vmem:[#allocation5 + $0x1e08] ss:$16 sps:$4 sm:$0xff]  }
 0x78d   : > { %15507 = vmatpush1.bf16.msra.mxu0 %v20827_v41  ;;  %12026 = vmatprep.subr.bf16.mxu1 %v20832_v54  ;;  %v20875_v41 = vld [vmem:[#allocation5 + $0x3a08] ss:$16 sps:$4 sm:$0xff]   ;;  %v15114_v54 = vsel %vm7522_vm6, %v15105_v51, %v15113_v52 }
 0x78e   : > { %15508 = vmatprep.subr.bf16.mxu0 %v20835_v58  ;;  %v20880_v58 = vld [vmem:[#allocation5 + $0x1e2c] ss:$16 sps:$4 sm:$0xff]   ;;  %v20944_v51 = vld [vmem:[#allocation5 + $0x1f88] ss:$16 sps:$4 sm:$0xff]  }
 0x78f   : > { %v20947_v52 = vld [vmem:[#allocation5 + $0x3b88] ss:$16 sps:$4 sm:$0xff]  }
 0x790   : > { %12027 = vmatpush1.bf16.msra.mxu1 %v20830_v63  ;;  %v20883_v63 = vld [vmem:[#allocation5 + $0x3a2c] ss:$16 sps:$4 sm:$0xff]  }
 0x791   : > { %15509 = vmatpush1.bf16.msra.mxu0 %v20833_v4  ;;  %12028 = vmatprep.subr.bf16.mxu1 %v20838_v59  ;;  %v15165_v4 = vsel %vm7522_vm6, %v15156_v37, %v15164_v46  ;;  %v20878_v59 = vld [vmem:[#allocation5 + $0x1e28] ss:$16 sps:$4 sm:$0xff]   ;;  %v15032_v37 = vld [vmem:[#allocation3 + $0x30] sm:$0x3f] }
 0x792   : > { %15510 = vmatprep.subr.bf16.mxu0 %v20841_v25  ;;  %v20881_v25 = vld [vmem:[#allocation5 + $0x3a28] ss:$16 sps:$4 sm:$0xff]  }
 0x793   : > { %v20950_v46 = vld [vmem:[#allocation5 + $0x1fa8] ss:$16 sps:$4 sm:$0xff]  }
 0x794   : > { %12029 = vmatpush1.bf16.msra.mxu1 %v20836_v3  ;;  %v20886_v3 = vld [vmem:[#allocation5 + $0x1e4c] ss:$16 sps:$4 sm:$0xff]  }
 0x795   : > { %15511 = vmatpush1.bf16.msra.mxu0 %v20839_v18  ;;  %12030 = vmatprep.subr.bf16.mxu1 %v20844_v61  ;;  %v20889_v18 = vld [vmem:[#allocation5 + $0x3a4c] ss:$16 sps:$4 sm:$0xff]   ;;  %v20884_v61 = vld [vmem:[#allocation5 + $0x1e48] ss:$16 sps:$4 sm:$0xff]  }
 0x796   : > { %15512 = vmatprep.subr.bf16.mxu0 %v20847_v35  ;;  %v20887_v35 = vld [vmem:[#allocation5 + $0x3a48] ss:$16 sps:$4 sm:$0xff]  }
 0x798   : > { %12031 = vmatpush1.bf16.msra.mxu1 %v20842_v6  ;;  %v20895_v6 = vld [vmem:[#allocation5 + $0x3a6c] ss:$16 sps:$4 sm:$0xff]  }
 0x799   : > { %15513 = vmatpush1.bf16.msra.mxu0 %v20845_v53  ;;  %12032 = vmatprep.subr.bf16.mxu1 %v20850_v20  ;;  %v20890_v53 = vld [vmem:[#allocation5 + $0x1e68] ss:$16 sps:$4 sm:$0xff]  }
 0x79a   : > { %15514 = vmatprep.subr.bf16.mxu0 %v20853_v36  ;;  %v20893_v20 = vld [vmem:[#allocation5 + $0x3a68] ss:$16 sps:$4 sm:$0xff]   ;;  %v20898_v36 = vld [vmem:[#allocation5 + $0x1e8c] ss:$16 sps:$4 sm:$0xff]  }
 0x79c   : > { %12033 = vmatpush1.bf16.msra.mxu1 %v20848_v13  ;;  %v20901_v13 = vld [vmem:[#allocation5 + $0x3a8c] ss:$16 sps:$4 sm:$0xff]  }
 0x79d   : > { %15515 = vmatpush1.bf16.msra.mxu0 %v20851_v10  ;;  %12034 = vmatprep.subr.bf16.mxu1 %v20856_v28  ;;  %v20899_v10 = vld [vmem:[#allocation5 + $0x3a88] ss:$16 sps:$4 sm:$0xff]   ;;  %v20904_v28 = vld [vmem:[#allocation5 + $0x1eac] ss:$16 sps:$4 sm:$0xff]  }
 0x79e   : > { %15516 = vmatprep.subr.bf16.mxu0 %v20859_v0  ;;  %v20907_v0 = vld [vmem:[#allocation5 + $0x3aac] ss:$16 sps:$4 sm:$0xff]  }
 0x7a0   : > { %12035 = vmatpush1.bf16.msra.mxu1 %v20854_v40  ;;  %v20905_v40 = vld [vmem:[#allocation5 + $0x3aa8] ss:$16 sps:$4 sm:$0xff]  }
 0x7a1   : > { %15517 = vmatpush1.bf16.msra.mxu0 %v20857_v23  ;;  %12036 = vmatprep.subr.bf16.mxu1 %v20862_v57  ;;  %v20910_v23 = vld [vmem:[#allocation5 + $0x1ecc] ss:$16 sps:$4 sm:$0xff]   ;;  %v20914_v57 = vld [vmem:[#allocation5 + $0x1ee8] ss:$16 sps:$4 sm:$0xff]  }
 0x7a2   : > { %15518 = vmatprep.subr.bf16.mxu0 %v20865_v26  ;;  %v20917_v26 = vld [vmem:[#allocation5 + $0x3ae8] ss:$16 sps:$4 sm:$0xff]  }
 0x7a4   : > { %12037 = vmatpush1.bf16.msra.mxu1 %v20860_v39  ;;  %v20922_v39 = vld [vmem:[#allocation5 + $0x1f0c] ss:$16 sps:$4 sm:$0xff]  }
 0x7a5   : > { %15519 = vmatpush1.bf16.msra.mxu0 %v20863_v22  ;;  %12038 = vmatprep.subr.bf16.mxu1 %v20868_v38  ;;  %v20931_v22 = vld [vmem:[#allocation5 + $0x3b2c] ss:$16 sps:$4 sm:$0xff]   ;;  %v20932_v38 = vld [vmem:[#allocation5 + $0x1f48] ss:$16 sps:$4 sm:$0xff]  }
 0x7a6   : > { %15520 = vmatprep.subr.bf16.mxu0 %v20871_v42  ;;  %v20935_v42 = vld [vmem:[#allocation5 + $0x3b48] ss:$16 sps:$4 sm:$0xff]  }
 0x7a8   : > { %12039 = vmatpush1.bf16.msra.mxu1 %v20866_v33  ;;  %v20946_v33 = vld [vmem:[#allocation5 + $0x1f8c] ss:$16 sps:$4 sm:$0xff]  }
 0x7a9   : > { %15521 = vmatpush1.bf16.msra.mxu0 %v20869_v50  ;;  %12051 = vmatprep.subr.bf16.mxu1 %v20874_v15  ;;  %v20949_v50 = vld [vmem:[#allocation5 + $0x3b8c] ss:$16 sps:$4 sm:$0xff]  }
 0x7aa   : > { %15533 = vmatprep.subr.bf16.mxu0 %v20877_v21  ;;  %v20952_v15 = vld [vmem:[#allocation5 + $0x1fac] ss:$16 sps:$4 sm:$0xff]  }
 0x7ab   : > { %12041 = vmatmul.mubr.bf16.vlgmr.msra.gmra.mrb[12].mxu1 %v21735_v30  ;;  %v20892_v30 = vld [vmem:[#allocation5 + $0x1e6c] ss:$16 sps:$4 sm:$0xff]  }
 0x7ac   : > { %15523 = vmatmul.mubr.bf16.vlgmr.msra.gmra.mrb[8].mxu0 %v15114_v54  ;;  %12052 = vmatpush1.bf16.msra.mxu1 %v20872_v24  ;;  %v20955_v21 = vld [vmem:[#allocation5 + $0x3bac] ss:$16 sps:$4 sm:$0xff]   ;;  %v20953_v24 = vld [vmem:[#allocation5 + $0x3ba8] ss:$16 sps:$4 sm:$0xff]   ;;  %v15136_v54 = vshll.u32 %v21746_v49, 16 }
 0x7ad   : > { %15534 = vmatpush1.bf16.msra.mxu0 %v20875_v41  ;;  %12053 = vmatprep.subr.bf16.mxu1 %v20880_v58  ;;  %v15133_v41 = vshrl.u32 %v21746_v49, 16  ;;  %v15141_v58 = vshrl.u32 %v15032_v37, 16  ;;  %v20962_v49 = vld [vmem:[#allocation5 + $0x1fe8] ss:$16 sps:$4 sm:$0xff]  }
 0x7ae   : > { %15535 = vmatprep.subr.bf16.mxu0 %v20883_v63  ;;  %12083 = vmatprep.mubr.bf16.mxu1 %v21740_v14  ;;  %v20896_v14 = vld [vmem:[#allocation5 + $0x1e88] ss:$16 sps:$4 sm:$0xff]   ;;  %v15144_v63 = vshll.u32 %v15032_v37, 16 }
 0x7af   : > { %15565 = vmatprep.mubr.bf16.mxu0 %v15165_v4  ;;  %v20958_v4 = vld [vmem:[#allocation5 + $0x1fcc] ss:$16 sps:$4 sm:$0xff]  }
 0x7b0   : > { %12054 = vmatpush1.bf16.msra.mxu1 %v20878_v59  ;;  %v20961_v59 = vld [vmem:[#allocation5 + $0x3bcc] ss:$16 sps:$4 sm:$0xff]  }
 0x7b1   : > { %15536 = vmatpush1.bf16.msra.mxu0 %v20881_v25  ;;  %12055 = vmatprep.subr.bf16.mxu1 %v20886_v3  ;;  %v20956_v25 = vld [vmem:[#allocation5 + $0x1fc8] ss:$16 sps:$4 sm:$0xff]  }
 0x7b2   : > { %15537 = vmatprep.subr.bf16.mxu0 %v20889_v18  ;;  %v20959_v3 = vld [vmem:[#allocation5 + $0x3bc8] ss:$16 sps:$4 sm:$0xff]   ;;  %v15135_v18 = vrot.slane %v15133_v41, 5 }
 0x7b4   : > { %12056 = vmatpush1.bf16.msra.mxu1 %v20884_v61  ;;  %v15138_v61 = vrot.slane %v15136_v54, 6 }
 0x7b5   : > { %15538 = vmatpush1.bf16.msra.mxu0 %v20887_v35  ;;  %12057 = vmatprep.subr.bf16.mxu1 %v20892_v30  ;;  %v15143_v35 = vrot.slane %v15141_v58, 5  ;;  %v15146_v30 = vrot.slane %v15144_v63, 6 }
 0x7b6   : > { %15539 = vmatprep.subr.bf16.mxu0 %v20895_v6  ;;  %v20964_v6 = vld [vmem:[#allocation5 + $0x1fec] ss:$16 sps:$4 sm:$0xff]  }
 0x7b8   : > { %12058 = vmatpush1.bf16.msra.mxu1 %v20890_v53  ;;  %v20967_v53 = vld [vmem:[#allocation5 + $0x3bec] ss:$16 sps:$4 sm:$0xff]  }
 0x7b9   : > { %15540 = vmatpush1.bf16.msra.mxu0 %v20893_v20  ;;  %12059 = vmatprep.subr.bf16.mxu1 %v20898_v36  ;;  %v20965_v20 = vld [vmem:[#allocation5 + $0x3be8] ss:$16 sps:$4 sm:$0xff]   ;;  %v15139_v36 = vor.u32 %v15138_v61, %v15135_v18 }
 0x7ba   : > { %15541 = vmatprep.subr.bf16.mxu0 %v20901_v13  ;;  %v15147_v13 = vor.u32 %v15146_v30, %v15143_v35 }
 0x7bc   : > { %12060 = vmatpush1.bf16.msra.mxu1 %v20896_v14  ;;  %v15148_v14 = vsel %vm7522_vm6, %v15139_v36, %v15147_v13 }
 0x7bd   : > { %15542 = vmatpush1.bf16.msra.mxu0 %v20899_v10  ;;  %12061 = vmatprep.subr.bf16.mxu1 %v20904_v28  ;;  %v8030_v10 = vld [vmem:[#allocation2 + $0x30] sm:$0xff] }
 0x7be   : > { %15543 = vmatprep.subr.bf16.mxu0 %v20907_v0  ;;  %v8034_v28 = vld [vmem:[#allocation2 + $0x10] sm:$0x80]  ;;  %v8031_v0 = vld [vmem:[#allocation2 + $0x38] sm:$0xff] }
 0x7c0   : > { %12062 = vmatpush1.bf16.msra.mxu1 %v20902_v31  ;;  %v8035_v31 = vld [vmem:[#allocation2 + $0x18] sm:$0x80] }
 0x7c1   : > { %15544 = vmatpush1.bf16.msra.mxu0 %v20905_v40  ;;  %12063 = vmatprep.subr.bf16.mxu1 %v20910_v23  ;;  %v8036_v40 = vld [vmem:[#allocation2 + $0x50] sm:$0x7f]  ;;  %v8044_v23 = vrot.slane %v8034_v28, 7 }
 0x7c2   : > { %15545 = vmatprep.subr.bf16.mxu0 %v20913_v11  ;;  %v8045_v11 = vrot.slane %v8030_v10, 7 }
 0x7c4   : > { %12064 = vmatpush1.bf16.msra.mxu1 %v20908_v5  ;;  %v9660_v5 = vld [vmem:[#allocation8 + $0x2] sm:$0x3] }
 0x7c5   : > { %15546 = vmatpush1.bf16.msra.mxu0 %v20911_v9  ;;  %12065 = vmatprep.subr.bf16.mxu1 %v20916_v2  ;;  %v8037_v9 = vld [vmem:[#allocation2 + $0x58] sm:$0x7f]  ;;  %v8047_v2 = vrot.slane %v8035_v31, 7 }
 0x7c6   : > { %15547 = vmatprep.subr.bf16.mxu0 %v20919_v55  ;;  %v8048_v55 = vrot.slane %v8031_v0, 7 }
 0x7c8   : > { %12066 = vmatpush1.bf16.msra.mxu1 %v20914_v57  ;;  %v8050_v57 = vrot.slane %v8036_v40, 7 }
 0x7c9   : > { %15548 = vmatpush1.bf16.msra.mxu0 %v20917_v26  ;;  %12067 = vmatprep.subr.bf16.mxu1 %v20922_v39  ;;  %v9665_v26 = vrot.slane %v9660_v5, %v21582_v56  ;;  %v8052_v39 = vrot.slane %v8037_v9, 7 }
 0x7ca   : > { %15549 = vmatprep.subr.bf16.mxu0 %v20925_v1  ;;  %v8046_v1 = vsel %vm446_vm7, %v8044_v23, %v8045_v11 }
 0x7cc   : > { %12068 = vmatpush1.bf16.msra.mxu1 %v20920_v62  ;;  %v12098_v62 = vld [vmem:[#allocation8 + $0x6] sm:$0x3] }
 0x7cd   : > { %15550 = vmatpush1.bf16.msra.mxu0 %v20923_v43  ;;  %12069 = vmatprep.subr.bf16.mxu1 %v20928_v32  ;;  %v8049_v43 = vsel %vm446_vm7, %v8047_v2, %v8048_v55  ;;  %v8032_v32 = vld [vmem:[#allocation2 + $0x50] sm:$0xff] }
 0x7ce   : > { %15551 = vmatprep.subr.bf16.mxu0 %v20931_v22  ;;  %v8051_v22 = vsel %vm446_vm7, %v8045_v11, %v8050_v57 }
 0x7d0   : > { %12070 = vmatpush1.bf16.msra.mxu1 %v20926_v27  ;;  %v15580_v27 = vld [vmem:[#allocation8 + $0xa] sm:$0x3] }
 0x7d1   : > { %15552 = vmatpush1.bf16.msra.mxu0 %v20929_v8  ;;  %12071 = vmatprep.subr.bf16.mxu1 %v20934_v17  ;;  %v8058_v8 = vmax.f32 %v8030_v10, %v8046_v1  ;;  %v9672_v17 = vadd.f32 %v9665_v26, %v21702_v12 }
 0x7d2   : > { %15553 = vmatprep.subr.bf16.mxu0 %v20937_v34  ;;  %v8033_v34 = vld [vmem:[#allocation2 + $0x58] sm:$0xff] }
 0x7d3   : > { %v9676_v37 = vmax.f32 %v8058_v8, %v9672_v17 }
 0x7d4   : > { %12072 = vmatpush1.bf16.msra.mxu1 %v20932_v38  ;;  %v8053_v38 = vsel %vm446_vm7, %v8048_v55, %v8052_v39 }
 0x7d5   : > { %15554 = vmatpush1.bf16.msra.mxu0 %v20935_v42  ;;  %12073 = vmatprep.subr.bf16.mxu1 %v20940_v19  ;;  %v12103_v42 = vrot.slane %v12098_v62, %v21582_v56  ;;  %v8059_v19 = vmax.f32 %v8031_v0, %v8049_v43 }
 0x7d6   : > { %15555 = vmatprep.subr.bf16.mxu0 %v20943_v47 }
 0x7d8   : > { %12074 = vmatpush1.bf16.msra.mxu1 %v20938_v44  ;;  %v12107_v44 = vrot.slane %v12098_v62, %v21584_v48 }
 0x7d9   : > { %15556 = vmatpush1.bf16.msra.mxu0 %v20941_v7  ;;  %12075 = vmatprep.subr.bf16.mxu1 %v20946_v33  ;;  %v8060_v7 = vmax.f32 %v8032_v32, %v8051_v22  ;;  %v9674_v33 = vadd.f32 %v9665_v26, %v21706_v16 }
 0x7da   : > { %15557 = vmatprep.subr.bf16.mxu0 %v20949_v50  ;;  %v15585_v50 = vrot.slane %v15580_v27, %v21582_v56 }
 0x7dc   : > { %12076 = vmatpush1.bf16.msra.mxu1 %v20944_v51  ;;  %v8061_v51 = vmax.f32 %v8033_v34, %v8053_v38 }
 0x7dd   : > { %15558 = vmatpush1.bf16.msra.mxu0 %v20947_v52  ;;  %12077 = vmatprep.subr.bf16.mxu1 %v20952_v15 }
 0x7de   : > { %15559 = vmatprep.subr.bf16.mxu0 %v20955_v21  ;;  %v15589_v21 = vrot.slane %v15580_v27, %v21584_v48 }
 0x7e0   : > { %12078 = vmatpush1.bf16.msra.mxu1 %v20950_v46 }
 0x7e1   : > { %15560 = vmatpush1.bf16.msra.mxu0 %v20953_v24  ;;  %12079 = vmatprep.subr.bf16.mxu1 %v20958_v4  ;;  %v9678_v4 = vmax.f32 %v8060_v7, %v9674_v33 }
 0x7e2   : > { %15561 = vmatprep.subr.bf16.mxu0 %v20961_v59 }
 0x7e4   : > { %12080 = vmatpush1.bf16.msra.mxu1 %v20956_v25 }
 0x7e5   : > { %15562 = vmatpush1.bf16.msra.mxu0 %v20959_v3  ;;  %12081 = vmatprep.subr.bf16.mxu1 %v20964_v6 }
 0x7e6   : > { %15563 = vmatprep.subr.bf16.mxu0 %v20967_v53 }
 0x7e8   : > { %12082 = vmatpush1.bf16.msra.mxu1 %v20962_v49 }
 0x7e9   : > { %15564 = vmatpush1.bf16.msra.mxu0 %v20965_v20 }
 0x7eb   : > { %12084 = vmatmul.mubr.bf16.vlgmr.msra.gmra.mrb[12].mxu1 %v21750_v60  ;;  %v9669_v60 = vrot.slane %v9660_v5, %v21584_v48 }
 0x7ec   : > { %15566 = vmatmul.mubr.bf16.vlgmr.msra.gmra.mrb[8].mxu0 %v15148_v14 }
 0x7ed   : > { %v9673_v47 = vadd.f32 %v9669_v60, %v21704_v45  ;;  %v9675_v52 = vadd.f32 %v9669_v60, %v21708_v29 }
 0x7ef   : > { %v9677_v54 = vmax.f32 %v8059_v19, %v9673_v47  ;;  %v9679_v3 = vmax.f32 %v8061_v51, %v9675_v52 }
 0x8be   : > { %v12085_v15 = vpop.f32.mrb[12].mxu1 }
 0x8bf   : > { %v15567_v12 = vpop.f32.mrb[8].mxu0  ;;  %v12110_v46 = vadd.f32 %v12103_v42, %v12085_v15  ;;  %v12087_v24 = vpop.f32.mrb[13].mxu1 }
 0x8c0   : > { %v15569_v41 = vpop.f32.mrb[9].mxu0  ;;  %v12111_v45 = vadd.f32 %v12107_v44, %v12087_v24  ;;  %v12089_v58 = vpop.f32.mrb[14].mxu1  ;;  %v15592_v56 = vadd.f32 %v15585_v50, %v15567_v12 }
 0x8c1   : > { %v15571_v63 = vpop.f32.mrb[10].mxu0  ;;  %v12114_v16 = vmax.f32 %v9676_v37, %v12110_v46  ;;  %v12112_v59 = vadd.f32 %v12103_v42, %v12089_v58  ;;  %v12091_v29 = vpop.f32.mrb[15].mxu1  ;;  %v15593_v18 = vadd.f32 %v15589_v21, %v15569_v41 }
 0x8c2   : > { %v15573_v25 = vpop.f32.mrb[11].mxu0  ;;  %v12115_v48 = vmax.f32 %v9677_v54, %v12111_v45  ;;  %v12113_v61 = vadd.f32 %v12107_v44, %v12091_v29  ;;  %v15594_v6 = vadd.f32 %v15585_v50, %v15571_v63 }
 0x8c3   : > { %v15596_v35 = vmax.f32 %v12114_v16, %v15592_v56  ;;  %v12116_v30 = vmax.f32 %v9678_v4, %v12112_v59  ;;  %v15595_v20 = vadd.f32 %v15589_v21, %v15573_v25 }
 0x8c4   : > { %v15597_v53 = vmax.f32 %v12115_v48, %v15593_v18  ;;  %v12117_v49 = vmax.f32 %v9679_v3, %v12113_v61 }
 0x8c5   : > { %15600 = vst [vmem:[%s21330_s6 + $0x10] sm:$0xff] %v15596_v35  ;;  %v15598_v36 = vmax.f32 %v12116_v30, %v15594_v6 }
 0x8c6   : > { %15601 = vst [vmem:[%s21330_s6 + $0x18] sm:$0xff] %v15597_v53  ;;  %v15599_v13 = vmax.f32 %v12117_v49, %v15595_v20 }
 0x8c7   : > { %15602 = vst [vmem:[%s21330_s6 + $0x30] sm:$0xff] %v15598_v36 }
 0x8c8   : > { %15603 = vst [vmem:[%s21330_s6 + $0x38] sm:$0xff] %v15599_v13 }
 0x8c9   : > { %21077 = shalt.err (!%p21074_p2)
}
 0x8ca   : > { %s21078_s30 = scalar_lea.hbm %s21789_s9, 1024  ;;  %s21082_s19 = scalar_lea.hbm %s21847_s3, 2048 }
 0x8cb   : > { %p21079_p3 = scmp.ne.s32.totalorder %s21789_s9, %s21078_s30  ;;  %p21083_p7 = scmp.lt.u32.totalorder %s21789_s9, %s21847_s3 }
 0x8cc   : > { %p21084_p9 = scmp.lt.u32.totalorder %s21082_s19, %s21078_s30  ;;  %p21086_p0 = scmp.lt.u32.totalorder %s21078_s30, %s21789_s9 }
 0x8cd   : > { %p21080_p5 = pnand %p21079_p3, %p21860_p1 }
 0x8ce   : > { %p21085_p12 = por %p21084_p9, %p21083_p7 }
 0x8cf   : > { %p21081_p6 = pneg %p21080_p5 }
 0x8d0   : > { %p21087_p13 = por %p21086_p0, %p21085_p12 }
 0x8d2   : > { %p21088_p4 = pnand %p21087_p13, %p21081_p6 }
 0x8d4   : > { %21091 = shalt.err (!%p21088_p4)
}
 0x8d5   : > { %s21163_s28 = smov 512   ;;  %s21164_s4 = smov 32  }
 0x8d6   : > { %18012 = dma.vmem_to_hbm [thread:$0]  (%p21860_p1), %s21792_s26, 1024, %s21789_s9, %s21798_s10, %s21163_s28, %s21163_s28, %s21164_s4  }
 0x8d7 PF: > { %p18029_p8 = scmp.ge.s32.totalorder %s21152_s17, 2  ;;  %s15637_s6 = sand.u32 1, %s21132_s12  }
 0x8d8   : > { %p21861_p10 = scmp.ne.s32.totalorder %s21853_s24, 0  ;;  %s15638_s7 = scalar_lea.sflag [#allocation7], %s15637_s6 }
 0x8da   : > { %p18022_p11 = pnand %p18029_p8, %p21861_p10 }
 0x8dc   : > { %21127 = dma.done.wait (!%p18022_p11), %s15638_s7, 1024  }
 0x8dd   : > { %21129 = vsyncadd (!%p18022_p11), %s15638_s7, 4294966272  ;;  %s18_s17 = sadd.s32 1, %s21152_s17   ;;  %s21862_s12 = smov %s21136_s13 }
 0x8de   : > { %p15_p2 = scmp.ge.s32.totalorder %s18_s17, 4   ;;  %s21863_s13 = smov %s21140_s14 }
 0x8df   : > { %s21864_s14 = smov %s21238_s25  ;;  %s21865_s15 = smov %s21148_s16 }
 0x8e0   : > { %s21866_s16 = smov %s21868_s20  ;;  %17 = sbr.rel (!%p15_p2) target bundleno = 6 (0x6), region = 172 }
 0x8e7   :  { %15643 = vsyncpa [#allocation6], 1 }
 0x8e8   :  { %15645 = vsyncpa [#allocation6 + $0x1], 1 }
 0x8e9   :  { %15646 = vsyncpa [#allocation9], 1 }
 0x8ea   :  { %15647 = vsyncpa [#allocation7], 1 }
 0x8eb   :  { %15649 = vsyncpa [#allocation7 + $0x1], 1 }
 0x8ec   :  { %15650 = vsyncmov [#allocation4] }
 0x8ef   :  { %s15651_s22 = vpop.sfrf %15650 }
 0x8f0   :  { %p17772_p1 = scmp.ne.s32.totalorder %s15651_s22, 0 }
 0x8f2   :  { %15655 = shalt.err (%p17772_p1)  }
 0x8f3   :  { %15657 = vsyncmov [#allocation4 + $0x1] }
 0x8f6   :  { %s15658_s24 = vpop.sfrf %15657 }
 0x8f7   :  { %p17773_p3 = scmp.ne.s32.totalorder %s15658_s24, 0 }
 0x8f9   :  { %15662 = shalt.err (%p17773_p3)  }
 0x8fa   :  { %15664 = vsyncmov [#allocation4 + $0x2] }
 0x8fd   :  { %s15665_s25 = vpop.sfrf %15664 }
 0x8fe   :  { %p17774_p5 = scmp.ne.s32.totalorder %s15665_s25, 0 }
 0x900   :  { %15669 = shalt.err (%p17774_p5)  }
 0x901   :  { %15671 = vsyncmov [#allocation4 + $0x3] }
 0x904   :  { %s15672_s17 = vpop.sfrf %15671 }
 0x905   :  { %p17775_p6 = scmp.ne.s32.totalorder %s15672_s17, 0 }
 0x907   :  { %15676 = shalt.err (%p17775_p6)  }
 0x908   :  { %15678 = vsyncmov [#allocation4 + $0x4] }
 0x90b   :  { %s15679_s0 = vpop.sfrf %15678 }
 0x90c   :  { %p17776_p7 = scmp.ne.s32.totalorder %s15679_s0, 0 }
 0x90e   :  { %15683 = shalt.err (%p17776_p7)  }
 0x90f   :  { %15685 = vsyncmov [#allocation4 + $0x5] }
 0x912   :  { %s15686_s1 = vpop.sfrf %15685 }
 0x913   :  { %p17777_p9 = scmp.ne.s32.totalorder %s15686_s1, 0 }
 0x915   :  { %15690 = shalt.err (%p17777_p9)  }

</bundles_post_ra>
